<compile_context>
chip_gen: v7x
topology: tpu7x:2x2x1
jax: 0.10.0
libtpu: 0.0.40
codegen_flags: <defaults>
</compile_context>

<pallas_src>
import functools

import jax
import jax.numpy as jnp
from jax.experimental import pallas as pl
from jax.experimental.pallas import tpu as pltpu


def _round_up(x, m):
    return ((x + m - 1) // m) * m


def basic_block_kernel(x_ref, w1c_ref, w2_ref, b1_ref, b2_ref, o_ref, buf_ref,
                       *, H, W, Wp_pad, NQ, Cp):
    """One batch element per grid step.

    x_ref  : (1, H, W, Cp)  bf16  channel-padded input (dense, no spatial halo)
    w1c_ref: (9*Cp, 2*Cp)   bf16  stacked per-tap conv1 weights (BN1 scale folded) with
                                  the 1x1 shortcut (+ its BN scale) folded into the
                                  center tap of the upper Cp output columns
    w2_ref : (9*Cp, Cp)     bf16  stacked per-tap conv2 weights (BN2 scale folded)
    b1_ref : (1, Cp)        f32   bn1 bias
    b2_ref : (1, Cp)        f32   bn2 bias + shortcut-BN bias
    o_ref  : (1, H*W, Cp)   bf16  lane-dense output
    buf_ref: (R, Cp)        bf16  flat zero-halo scratch; holds the padded input for
                                  conv1, then is overwritten with the padded conv1
                                  output for conv2.  Pixel (h, w) lives at flat row
                                  BASE + h*Wp_pad + w (BASE and Wp_pad multiples of 8).
    """
    R = buf_ref.shape[0]
    BASE = Wp_pad + 8          # 8-aligned interior start; rows [0, BASE) are top halo

    def conv_3x3(w_ref):
        # out[q] = sum_{kh,kw} buf[q + BASE + (kh-1)*Wp_pad + (kw-1)] @ w[tap],
        # for flat output rows q in [0, NQ); constant-offset slices, no im2col slab.
        acc = None
        for kh in range(3):
            for kw in range(3):
                t = kh * 3 + kw
                off = BASE - Wp_pad - 1 + kh * Wp_pad + kw    # static, >= 7
                part = jnp.dot(buf_ref[off:off + NQ, :],
                               w_ref[t * Cp:(t + 1) * Cp, :],
                               preferred_element_type=jnp.float32)
                acc = part if acc is None else acc + part
        return acc

    # ---- in-kernel spatial zero-padding: stage input into the zero-halo buffer ----
    buf_ref[...] = jnp.zeros((R, Cp), buf_ref.dtype)
    for h in range(H):
        row = BASE + h * Wp_pad                               # multiple of 8
        buf_ref[row:row + W, :] = x_ref[0, h, :, :]

    # ---- conv1 (3x3, pad=1) + folded 1x1 projection shortcut -----------------------
    acc1 = conv_3x3(w1c_ref)                                  # (NQ, 2*Cp) f32
    out1 = jnp.maximum(acc1[:, :Cp] + b1_ref[...], 0.0)       # bn1 bias + relu
    sc = acc1[:, Cp:]                                         # shortcut conv (scaled)

    # Zero the rows that fall in the width padding so they cannot leak into the halo
    # of the conv2 input, then overwrite the scratch with the padded conv1 output.
    q = jax.lax.broadcasted_iota(jnp.int32, (NQ, 1), 0)
    out1 = jnp.where((q % Wp_pad) < W, out1, 0.0)
    buf_ref[BASE:BASE + NQ, :] = out1.astype(buf_ref.dtype)

    # ---- conv2 (3x3, pad=1) + bn2 bias + shortcut residual + relu ------------------
    acc2 = conv_3x3(w2_ref)                                   # (NQ, Cp) f32
    y = jnp.maximum(acc2 + sc + b2_ref[...], 0.0).astype(o_ref.dtype)

    # ---- lane-dense bf16 store of the valid output rows ----------------------------
    for h in range(H):
        o_ref[0, h * W:(h + 1) * W, :] = y[h * Wp_pad:h * Wp_pad + W, :]


def basic_block(x, w1, s1, b1, w2, s2, b2, ws, ss, bs):
    """x: (N, H, W, Cin) f32; stride-1 BasicBlock with a 1x1-conv projection shortcut."""
    N, H, W, Cin = x.shape
    Cout = w1.shape[-1]
    Cp = _round_up(max(Cin, Cout), 128)          # MXU / lane width
    Wp_pad = _round_up(W + 2, 8)                 # sublane-aligned padded row stride
    NQ = (H - 1) * Wp_pad + _round_up(W, 8)      # flat conv-output rows (<= H*Wp_pad)
    R = 2 * Wp_pad + NQ + 16                     # scratch rows (covers all halo reads)

    # Channel pad to the lane width + bf16 cast; spatial halo padding happens in-kernel.
    xw = jnp.pad(x, ((0, 0), (0, 0), (0, 0), (0, Cp - Cin))).astype(jnp.bfloat16)

    # Fold the inference-mode BN scales into the conv weight output columns and lay the
    # weights out as 9 stacked (Cp, n_out) tap blocks (row = tap*Cp + cin).  The 1x1
    # projection shortcut becomes the center tap of Cp extra conv1 output columns.
    w1f = jnp.zeros((3, 3, Cp, Cp), jnp.float32).at[:, :, :Cin, :Cout].set(w1 * s1)
    wsf = jnp.zeros((3, 3, Cp, Cp), jnp.float32).at[1, 1, :Cin, :Cout].set(ws * ss)
    w1c = jnp.concatenate([w1f, wsf], axis=-1).reshape(9 * Cp, 2 * Cp).astype(jnp.bfloat16)
    w2f = (jnp.zeros((3, 3, Cp, Cp), jnp.float32).at[:, :, :Cout, :Cout].set(w2 * s2)
           .reshape(9 * Cp, Cp).astype(jnp.bfloat16))

    def vecp(v):
        # zero-padded lanes keep padded output channels exactly 0 through both convs
        return jnp.pad(v, (0, Cp - Cout)).reshape(1, Cp).astype(jnp.float32)

    bias1 = vecp(b1)
    bias2 = vecp(b2 + bs)      # bn2 bias and shortcut-BN bias are always summed

    kernel = functools.partial(basic_block_kernel,
                               H=H, W=W, Wp_pad=Wp_pad, NQ=NQ, Cp=Cp)
    vec_spec = pl.BlockSpec((1, Cp), lambda n: (0, 0))

    out = pl.pallas_call(
        kernel,
        out_shape=jax.ShapeDtypeStruct((N, H * W, Cp), jnp.bfloat16),
        grid_spec=pltpu.PrefetchScalarGridSpec(
            num_scalar_prefetch=0,
            grid=(N,),                     # batch (even) -> splits over v7x's two TCs
            in_specs=[
                pl.BlockSpec((1, H, W, Cp), lambda n: (n, 0, 0, 0)),
                pl.BlockSpec((9 * Cp, 2 * Cp), lambda n: (0, 0)),
                pl.BlockSpec((9 * Cp, Cp), lambda n: (0, 0)),
                vec_spec, vec_spec,        # bn1 bias, (bn2 + shortcut-bn) bias
            ],
            out_specs=pl.BlockSpec((1, H * W, Cp), lambda n: (n, 0, 0)),
            scratch_shapes=[pltpu.VMEM((R, Cp), jnp.bfloat16)],
        ),
        compiler_params=pltpu.CompilerParams(
            dimension_semantics=("parallel",),
            vmem_limit_bytes=32 * 1024 * 1024,
        ),
    )(xw, w1c, w2f, bias1, bias2)

    # Strip channel padding, restore NHWC.
    return out[:, :, :Cout].reshape(N, H, W, Cout).astype(x.dtype)


def _fold_bn(gamma, beta, mean, var, eps=1e-5):
    scale = gamma / jnp.sqrt(var + eps)
    bias = beta - mean * scale
    return scale, bias


def _ref_forward(x, w1, s1, b1, w2, s2, b2, ws, ss, bs):
    """Plain-JAX f32 reference (same math as the PyTorch module in eval mode)."""
    conv = functools.partial(
        jax.lax.conv_general_dilated,
        window_strides=(1, 1), padding='SAME',
        dimension_numbers=('NHWC', 'HWIO', 'NHWC'))
    out = jnp.maximum(conv(x, w1) * s1 + b1, 0.0)
    out = conv(out, w2) * s2 + b2
    sc = conv(x, ws.reshape(1, 1, *ws.shape)) * ss + bs
    return jnp.maximum(out + sc, 0.0)


if __name__ == "__main__":
    # Config consistent with BasicBlock(in_planes=4, planes=8, stride=1)
    N, H, W = 2, 16, 16
    in_planes, planes = 4, 8

    key = jax.random.PRNGKey(0)
    keys = jax.random.split(key, 8)

    x = jax.random.normal(keys[0], (N, H, W, in_planes), jnp.float32)

    # conv weights (HWIO), no bias
    w1 = 0.1 * jax.random.normal(keys[1], (3, 3, in_planes, planes), jnp.float32)
    w2 = 0.1 * jax.random.normal(keys[2], (3, 3, planes, planes), jnp.float32)
    ws = 0.1 * jax.random.normal(keys[3], (in_planes, planes), jnp.float32)  # 1x1 shortcut

    # BatchNorm parameters (inference mode), deterministic
    def bn_params(k):
        k1, k2, k3, k4 = jax.random.split(k, 4)
        gamma = jax.random.uniform(k1, (planes,), jnp.float32, 0.5, 1.5)
        beta = 0.1 * jax.random.normal(k2, (planes,), jnp.float32)
        mean = 0.1 * jax.random.normal(k3, (planes,), jnp.float32)
        var = jax.random.uniform(k4, (planes,), jnp.float32, 0.5, 1.5)
        return _fold_bn(gamma, beta, mean, var)

    s1, b1 = bn_params(keys[4])
    s2, b2 = bn_params(keys[5])
    ss, bs = bn_params(keys[6])

    out = basic_block(x, w1, s1, b1, w2, s2, b2, ws, ss, bs)
    out = jax.block_until_ready(out)

    ref = _ref_forward(x, w1, s1, b1, w2, s2, b2, ws, ss, bs)
    err = float(jnp.max(jnp.abs(out - ref)))
    assert out.shape == (N, H, W, planes)
    # Tolerance reflects intentional bf16 MXU operands / bf16 output (f32 accumulation)
    # vs the f32 reference.
    assert jnp.allclose(out, ref, atol=5e-2, rtol=5e-2), err

    print("KERNEL_OK")
</pallas_src>

<mosaic_0001>
module attributes {stable_mosaic.version = 11 : i64} {
  func.func @basic_block_kernel(%arg0: i32, %arg1: memref<1x16x16x128xbf16, #tpu.memory_space<vmem>>, %arg2: memref<1152x256xbf16, #tpu.memory_space<vmem>>, %arg3: memref<1152x128xbf16, #tpu.memory_space<vmem>>, %arg4: memref<1x128xf32, #tpu.memory_space<vmem>>, %arg5: memref<1x128xf32, #tpu.memory_space<vmem>>, %arg6: memref<1x256x128xbf16, #tpu.memory_space<vmem>>, %arg7: memref<440x128xbf16, #tpu.memory_space<vmem>>) attributes {dimension_semantics = [#tpu.dimension_semantics<parallel>], iteration_bounds = array<i64: 2>, scalar_prefetch = 0 : i64, scratch_operands = 1 : i64, tpu.core_type = #tpu.core_type<tc>, window_params = [{transform_indices = @transform_0, window_bounds = array<i64: 1, 16, 16, 128>}, {pipeline_mode = #tpu.pipeline_mode<synchronous>, transform_indices = @transform_1, window_bounds = array<i64: 1152, 256>}, {pipeline_mode = #tpu.pipeline_mode<synchronous>, transform_indices = @transform_2, window_bounds = array<i64: 1152, 128>}, {pipeline_mode = #tpu.pipeline_mode<synchronous>, transform_indices = @transform_3, window_bounds = array<i64: 1, 128>}, {pipeline_mode = #tpu.pipeline_mode<synchronous>, transform_indices = @transform_4, window_bounds = array<i64: 1, 128>}, {transform_indices = @transform_5, window_bounds = array<i64: 1, 256, 128>}]} {
    %cst = arith.constant 0.000000e+00 : bf16
    %0 = vector.broadcast %cst : bf16 to vector<440x128xbf16>
    %c0 = arith.constant 0 : index
    %c0_0 = arith.constant 0 : index
    %1 = vector.load %arg7[%c0, %c0_0] : memref<440x128xbf16, #tpu.memory_space<vmem>>, vector<440x128xbf16>
    tpu.vector_store %arg7[%c0, %c0_0], %0 {strides = array<i32>} : memref<440x128xbf16, #tpu.memory_space<vmem>>, vector<440x128xbf16>,
    %c0_1 = arith.constant 0 : index
    %c0_2 = arith.constant 0 : index
    %c0_3 = arith.constant 0 : index
    %c0_4 = arith.constant 0 : index
    %2 = vector.load %arg1[%c0_1, %c0_2, %c0_3, %c0_4] : memref<1x16x16x128xbf16, #tpu.memory_space<vmem>>, vector<1x1x16x128xbf16>
    %3 = vector.shape_cast %2 : vector<1x1x16x128xbf16> to vector<16x128xbf16>
    %c32 = arith.constant 32 : index
    %c0_5 = arith.constant 0 : index
    %4 = vector.load %arg7[%c32, %c0_5] : memref<440x128xbf16, #tpu.memory_space<vmem>>, vector<16x128xbf16>
    tpu.vector_store %arg7[%c32, %c0_5], %3 {strides = array<i32>} : memref<440x128xbf16, #tpu.memory_space<vmem>>, vector<16x128xbf16>,
    %c0_6 = arith.constant 0 : index
    %c1 = arith.constant 1 : index
    %c0_7 = arith.constant 0 : index
    %c0_8 = arith.constant 0 : index
    %5 = vector.load %arg1[%c0_6, %c1, %c0_7, %c0_8] : memref<1x16x16x128xbf16, #tpu.memory_space<vmem>>, vector<1x1x16x128xbf16>
    %6 = vector.shape_cast %5 : vector<1x1x16x128xbf16> to vector<16x128xbf16>
    %c56 = arith.constant 56 : index
    %c0_9 = arith.constant 0 : index
    %7 = vector.load %arg7[%c56, %c0_9] : memref<440x128xbf16, #tpu.memory_space<vmem>>, vector<16x128xbf16>
    tpu.vector_store %arg7[%c56, %c0_9], %6 {strides = array<i32>} : memref<440x128xbf16, #tpu.memory_space<vmem>>, vector<16x128xbf16>,
    %c0_10 = arith.constant 0 : index
    %c2 = arith.constant 2 : index
    %c0_11 = arith.constant 0 : index
    %c0_12 = arith.constant 0 : index
    %8 = vector.load %arg1[%c0_10, %c2, %c0_11, %c0_12] : memref<1x16x16x128xbf16, #tpu.memory_space<vmem>>, vector<1x1x16x128xbf16>
    %9 = vector.shape_cast %8 : vector<1x1x16x128xbf16> to vector<16x128xbf16>
    %c80 = arith.constant 80 : index
    %c0_13 = arith.constant 0 : index
    %10 = vector.load %arg7[%c80, %c0_13] : memref<440x128xbf16, #tpu.memory_space<vmem>>, vector<16x128xbf16>
    tpu.vector_store %arg7[%c80, %c0_13], %9 {strides = array<i32>} : memref<440x128xbf16, #tpu.memory_space<vmem>>, vector<16x128xbf16>,
    %c0_14 = arith.constant 0 : index
    %c3 = arith.constant 3 : index
    %c0_15 = arith.constant 0 : index
    %c0_16 = arith.constant 0 : index
    %11 = vector.load %arg1[%c0_14, %c3, %c0_15, %c0_16] : memref<1x16x16x128xbf16, #tpu.memory_space<vmem>>, vector<1x1x16x128xbf16>
    %12 = vector.shape_cast %11 : vector<1x1x16x128xbf16> to vector<16x128xbf16>
    %c104 = arith.constant 104 : index
    %c0_17 = arith.constant 0 : index
    %13 = vector.load %arg7[%c104, %c0_17] : memref<440x128xbf16, #tpu.memory_space<vmem>>, vector<16x128xbf16>
    tpu.vector_store %arg7[%c104, %c0_17], %12 {strides = array<i32>} : memref<440x128xbf16, #tpu.memory_space<vmem>>, vector<16x128xbf16>,
    %c0_18 = arith.constant 0 : index
    %c4 = arith.constant 4 : index
    %c0_19 = arith.constant 0 : index
    %c0_20 = arith.constant 0 : index
    %14 = vector.load %arg1[%c0_18, %c4, %c0_19, %c0_20] : memref<1x16x16x128xbf16, #tpu.memory_space<vmem>>, vector<1x1x16x128xbf16>
    %15 = vector.shape_cast %14 : vector<1x1x16x128xbf16> to vector<16x128xbf16>
    %c128 = arith.constant 128 : index
    %c0_21 = arith.constant 0 : index
    %16 = vector.load %arg7[%c128, %c0_21] : memref<440x128xbf16, #tpu.memory_space<vmem>>, vector<16x128xbf16>
    tpu.vector_store %arg7[%c128, %c0_21], %15 {strides = array<i32>} : memref<440x128xbf16, #tpu.memory_space<vmem>>, vector<16x128xbf16>,
    %c0_22 = arith.constant 0 : index
    %c5 = arith.constant 5 : index
    %c0_23 = arith.constant 0 : index
    %c0_24 = arith.constant 0 : index
    %17 = vector.load %arg1[%c0_22, %c5, %c0_23, %c0_24] : memref<1x16x16x128xbf16, #tpu.memory_space<vmem>>, vector<1x1x16x128xbf16>
    %18 = vector.shape_cast %17 : vector<1x1x16x128xbf16> to vector<16x128xbf16>
    %c152 = arith.constant 152 : index
    %c0_25 = arith.constant 0 : index
    %19 = vector.load %arg7[%c152, %c0_25] : memref<440x128xbf16, #tpu.memory_space<vmem>>, vector<16x128xbf16>
    tpu.vector_store %arg7[%c152, %c0_25], %18 {strides = array<i32>} : memref<440x128xbf16, #tpu.memory_space<vmem>>, vector<16x128xbf16>,
    %c0_26 = arith.constant 0 : index
    %c6 = arith.constant 6 : index
    %c0_27 = arith.constant 0 : index
    %c0_28 = arith.constant 0 : index
    %20 = vector.load %arg1[%c0_26, %c6, %c0_27, %c0_28] : memref<1x16x16x128xbf16, #tpu.memory_space<vmem>>, vector<1x1x16x128xbf16>
    %21 = vector.shape_cast %20 : vector<1x1x16x128xbf16> to vector<16x128xbf16>
    %c176 = arith.constant 176 : index
    %c0_29 = arith.constant 0 : index
    %22 = vector.load %arg7[%c176, %c0_29] : memref<440x128xbf16, #tpu.memory_space<vmem>>, vector<16x128xbf16>
    tpu.vector_store %arg7[%c176, %c0_29], %21 {strides = array<i32>} : memref<440x128xbf16, #tpu.memory_space<vmem>>, vector<16x128xbf16>,
    %c0_30 = arith.constant 0 : index
    %c7 = arith.constant 7 : index
    %c0_31 = arith.constant 0 : index
    %c0_32 = arith.constant 0 : index
    %23 = vector.load %arg1[%c0_30, %c7, %c0_31, %c0_32] : memref<1x16x16x128xbf16, #tpu.memory_space<vmem>>, vector<1x1x16x128xbf16>
    %24 = vector.shape_cast %23 : vector<1x1x16x128xbf16> to vector<16x128xbf16>
    %c200 = arith.constant 200 : index
    %c0_33 = arith.constant 0 : index
    %25 = vector.load %arg7[%c200, %c0_33] : memref<440x128xbf16, #tpu.memory_space<vmem>>, vector<16x128xbf16>
    tpu.vector_store %arg7[%c200, %c0_33], %24 {strides = array<i32>} : memref<440x128xbf16, #tpu.memory_space<vmem>>, vector<16x128xbf16>,
    %c0_34 = arith.constant 0 : index
    %c8 = arith.constant 8 : index
    %c0_35 = arith.constant 0 : index
    %c0_36 = arith.constant 0 : index
    %26 = vector.load %arg1[%c0_34, %c8, %c0_35, %c0_36] : memref<1x16x16x128xbf16, #tpu.memory_space<vmem>>, vector<1x1x16x128xbf16>
    %27 = vector.shape_cast %26 : vector<1x1x16x128xbf16> to vector<16x128xbf16>
    %c224 = arith.constant 224 : index
    %c0_37 = arith.constant 0 : index
    %28 = vector.load %arg7[%c224, %c0_37] : memref<440x128xbf16, #tpu.memory_space<vmem>>, vector<16x128xbf16>
    tpu.vector_store %arg7[%c224, %c0_37], %27 {strides = array<i32>} : memref<440x128xbf16, #tpu.memory_space<vmem>>, vector<16x128xbf16>,
    %c0_38 = arith.constant 0 : index
    %c9 = arith.constant 9 : index
    %c0_39 = arith.constant 0 : index
    %c0_40 = arith.constant 0 : index
    %29 = vector.load %arg1[%c0_38, %c9, %c0_39, %c0_40] : memref<1x16x16x128xbf16, #tpu.memory_space<vmem>>, vector<1x1x16x128xbf16>
    %30 = vector.shape_cast %29 : vector<1x1x16x128xbf16> to vector<16x128xbf16>
    %c248 = arith.constant 248 : index
    %c0_41 = arith.constant 0 : index
    %31 = vector.load %arg7[%c248, %c0_41] : memref<440x128xbf16, #tpu.memory_space<vmem>>, vector<16x128xbf16>
    tpu.vector_store %arg7[%c248, %c0_41], %30 {strides = array<i32>} : memref<440x128xbf16, #tpu.memory_space<vmem>>, vector<16x128xbf16>,
    %c0_42 = arith.constant 0 : index
    %c10 = arith.constant 10 : index
    %c0_43 = arith.constant 0 : index
    %c0_44 = arith.constant 0 : index
    %32 = vector.load %arg1[%c0_42, %c10, %c0_43, %c0_44] : memref<1x16x16x128xbf16, #tpu.memory_space<vmem>>, vector<1x1x16x128xbf16>
    %33 = vector.shape_cast %32 : vector<1x1x16x128xbf16> to vector<16x128xbf16>
    %c272 = arith.constant 272 : index
    %c0_45 = arith.constant 0 : index
    %34 = vector.load %arg7[%c272, %c0_45] : memref<440x128xbf16, #tpu.memory_space<vmem>>, vector<16x128xbf16>
    tpu.vector_store %arg7[%c272, %c0_45], %33 {strides = array<i32>} : memref<440x128xbf16, #tpu.memory_space<vmem>>, vector<16x128xbf16>,
    %c0_46 = arith.constant 0 : index
    %c11 = arith.constant 11 : index
    %c0_47 = arith.constant 0 : index
    %c0_48 = arith.constant 0 : index
    %35 = vector.load %arg1[%c0_46, %c11, %c0_47, %c0_48] : memref<1x16x16x128xbf16, #tpu.memory_space<vmem>>, vector<1x1x16x128xbf16>
    %36 = vector.shape_cast %35 : vector<1x1x16x128xbf16> to vector<16x128xbf16>
    %c296 = arith.constant 296 : index
    %c0_49 = arith.constant 0 : index
    %37 = vector.load %arg7[%c296, %c0_49] : memref<440x128xbf16, #tpu.memory_space<vmem>>, vector<16x128xbf16>
    tpu.vector_store %arg7[%c296, %c0_49], %36 {strides = array<i32>} : memref<440x128xbf16, #tpu.memory_space<vmem>>, vector<16x128xbf16>,
    %c0_50 = arith.constant 0 : index
    %c12 = arith.constant 12 : index
    %c0_51 = arith.constant 0 : index
    %c0_52 = arith.constant 0 : index
    %38 = vector.load %arg1[%c0_50, %c12, %c0_51, %c0_52] : memref<1x16x16x128xbf16, #tpu.memory_space<vmem>>, vector<1x1x16x128xbf16>
    %39 = vector.shape_cast %38 : vector<1x1x16x128xbf16> to vector<16x128xbf16>
    %c320 = arith.constant 320 : index
    %c0_53 = arith.constant 0 : index
    %40 = vector.load %arg7[%c320, %c0_53] : memref<440x128xbf16, #tpu.memory_space<vmem>>, vector<16x128xbf16>
    tpu.vector_store %arg7[%c320, %c0_53], %39 {strides = array<i32>} : memref<440x128xbf16, #tpu.memory_space<vmem>>, vector<16x128xbf16>,
    %c0_54 = arith.constant 0 : index
    %c13 = arith.constant 13 : index
    %c0_55 = arith.constant 0 : index
    %c0_56 = arith.constant 0 : index
    %41 = vector.load %arg1[%c0_54, %c13, %c0_55, %c0_56] : memref<1x16x16x128xbf16, #tpu.memory_space<vmem>>, vector<1x1x16x128xbf16>
    %42 = vector.shape_cast %41 : vector<1x1x16x128xbf16> to vector<16x128xbf16>
    %c344 = arith.constant 344 : index
    %c0_57 = arith.constant 0 : index
    %43 = vector.load %arg7[%c344, %c0_57] : memref<440x128xbf16, #tpu.memory_space<vmem>>, vector<16x128xbf16>
    tpu.vector_store %arg7[%c344, %c0_57], %42 {strides = array<i32>} : memref<440x128xbf16, #tpu.memory_space<vmem>>, vector<16x128xbf16>,
    %c0_58 = arith.constant 0 : index
    %c14 = arith.constant 14 : index
    %c0_59 = arith.constant 0 : index
    %c0_60 = arith.constant 0 : index
    %44 = vector.load %arg1[%c0_58, %c14, %c0_59, %c0_60] : memref<1x16x16x128xbf16, #tpu.memory_space<vmem>>, vector<1x1x16x128xbf16>
    %45 = vector.shape_cast %44 : vector<1x1x16x128xbf16> to vector<16x128xbf16>
    %c368 = arith.constant 368 : index
    %c0_61 = arith.constant 0 : index
    %46 = vector.load %arg7[%c368, %c0_61] : memref<440x128xbf16, #tpu.memory_space<vmem>>, vector<16x128xbf16>
    tpu.vector_store %arg7[%c368, %c0_61], %45 {strides = array<i32>} : memref<440x128xbf16, #tpu.memory_space<vmem>>, vector<16x128xbf16>,
    %c0_62 = arith.constant 0 : index
    %c15 = arith.constant 15 : index
    %c0_63 = arith.constant 0 : index
    %c0_64 = arith.constant 0 : index
    %47 = vector.load %arg1[%c0_62, %c15, %c0_63, %c0_64] : memref<1x16x16x128xbf16, #tpu.memory_space<vmem>>, vector<1x1x16x128xbf16>
    %48 = vector.shape_cast %47 : vector<1x1x16x128xbf16> to vector<16x128xbf16>
    %c392 = arith.constant 392 : index
    %c0_65 = arith.constant 0 : index
    %49 = vector.load %arg7[%c392, %c0_65] : memref<440x128xbf16, #tpu.memory_space<vmem>>, vector<16x128xbf16>
    tpu.vector_store %arg7[%c392, %c0_65], %48 {strides = array<i32>} : memref<440x128xbf16, #tpu.memory_space<vmem>>, vector<16x128xbf16>,
    %c7_66 = arith.constant 7 : index
    %c0_67 = arith.constant 0 : index
    %50 = vector.load %arg7[%c7_66, %c0_67] : memref<440x128xbf16, #tpu.memory_space<vmem>>, vector<376x128xbf16>
    %c0_68 = arith.constant 0 : index
    %c0_69 = arith.constant 0 : index
    %51 = vector.load %arg2[%c0_68, %c0_69] : memref<1152x256xbf16, #tpu.memory_space<vmem>>, vector<128x256xbf16>
    %cst_70 = arith.constant dense<0.000000e+00> : vector<376x256xf32>
    %52 = tpu.matmul %50, %51, %cst_70 {dimension_numbers = #tpu.dot_dimension_numbers<[1], [0], [0], [1], [0, 0, 1, 1], [], []>} : vector<376x128xbf16>, vector<128x256xbf16>, vector<376x256xf32> -> vector<376x256xf32>
    %c8_71 = arith.constant 8 : index
    %c0_72 = arith.constant 0 : index
    %53 = vector.load %arg7[%c8_71, %c0_72] : memref<440x128xbf16, #tpu.memory_space<vmem>>, vector<376x128xbf16>
    %c128_73 = arith.constant 128 : index
    %c0_74 = arith.constant 0 : index
    %54 = vector.load %arg2[%c128_73, %c0_74] : memref<1152x256xbf16, #tpu.memory_space<vmem>>, vector<128x256xbf16>
    %cst_75 = arith.constant dense<0.000000e+00> : vector<376x256xf32>
    %55 = tpu.matmul %53, %54, %cst_75 {dimension_numbers = #tpu.dot_dimension_numbers<[1], [0], [0], [1], [0, 0, 1, 1], [], []>} : vector<376x128xbf16>, vector<128x256xbf16>, vector<376x256xf32> -> vector<376x256xf32>
    %56 = arith.addf %52, %55 : vector<376x256xf32>
    %c9_76 = arith.constant 9 : index
    %c0_77 = arith.constant 0 : index
    %57 = vector.load %arg7[%c9_76, %c0_77] : memref<440x128xbf16, #tpu.memory_space<vmem>>, vector<376x128xbf16>
    %c256 = arith.constant 256 : index
    %c0_78 = arith.constant 0 : index
    %58 = vector.load %arg2[%c256, %c0_78] : memref<1152x256xbf16, #tpu.memory_space<vmem>>, vector<128x256xbf16>
    %cst_79 = arith.constant dense<0.000000e+00> : vector<376x256xf32>
    %59 = tpu.matmul %57, %58, %cst_79 {dimension_numbers = #tpu.dot_dimension_numbers<[1], [0], [0], [1], [0, 0, 1, 1], [], []>} : vector<376x128xbf16>, vector<128x256xbf16>, vector<376x256xf32> -> vector<376x256xf32>
    %60 = arith.addf %56, %59 : vector<376x256xf32>
    %c31 = arith.constant 31 : index
    %c0_80 = arith.constant 0 : index
    %61 = vector.load %arg7[%c31, %c0_80] : memref<440x128xbf16, #tpu.memory_space<vmem>>, vector<376x128xbf16>
    %c384 = arith.constant 384 : index
    %c0_81 = arith.constant 0 : index
    %62 = vector.load %arg2[%c384, %c0_81] : memref<1152x256xbf16, #tpu.memory_space<vmem>>, vector<128x256xbf16>
    %cst_82 = arith.constant dense<0.000000e+00> : vector<376x256xf32>
    %63 = tpu.matmul %61, %62, %cst_82 {dimension_numbers = #tpu.dot_dimension_numbers<[1], [0], [0], [1], [0, 0, 1, 1], [], []>} : vector<376x128xbf16>, vector<128x256xbf16>, vector<376x256xf32> -> vector<376x256xf32>
    %64 = arith.addf %60, %63 : vector<376x256xf32>
    %c32_83 = arith.constant 32 : index
    %c0_84 = arith.constant 0 : index
    %65 = vector.load %arg7[%c32_83, %c0_84] : memref<440x128xbf16, #tpu.memory_space<vmem>>, vector<376x128xbf16>
    %c512 = arith.constant 512 : index
    %c0_85 = arith.constant 0 : index
    %66 = vector.load %arg2[%c512, %c0_85] : memref<1152x256xbf16, #tpu.memory_space<vmem>>, vector<128x256xbf16>
    %cst_86 = arith.constant dense<0.000000e+00> : vector<376x256xf32>
    %67 = tpu.matmul %65, %66, %cst_86 {dimension_numbers = #tpu.dot_dimension_numbers<[1], [0], [0], [1], [0, 0, 1, 1], [], []>} : vector<376x128xbf16>, vector<128x256xbf16>, vector<376x256xf32> -> vector<376x256xf32>
    %68 = arith.addf %64, %67 : vector<376x256xf32>
    %c33 = arith.constant 33 : index
    %c0_87 = arith.constant 0 : index
    %69 = vector.load %arg7[%c33, %c0_87] : memref<440x128xbf16, #tpu.memory_space<vmem>>, vector<376x128xbf16>
    %c640 = arith.constant 640 : index
    %c0_88 = arith.constant 0 : index
    %70 = vector.load %arg2[%c640, %c0_88] : memref<1152x256xbf16, #tpu.memory_space<vmem>>, vector<128x256xbf16>
    %cst_89 = arith.constant dense<0.000000e+00> : vector<376x256xf32>
    %71 = tpu.matmul %69, %70, %cst_89 {dimension_numbers = #tpu.dot_dimension_numbers<[1], [0], [0], [1], [0, 0, 1, 1], [], []>} : vector<376x128xbf16>, vector<128x256xbf16>, vector<376x256xf32> -> vector<376x256xf32>
    %72 = arith.addf %68, %71 : vector<376x256xf32>
    %c55 = arith.constant 55 : index
    %c0_90 = arith.constant 0 : index
    %73 = vector.load %arg7[%c55, %c0_90] : memref<440x128xbf16, #tpu.memory_space<vmem>>, vector<376x128xbf16>
    %c768 = arith.constant 768 : index
    %c0_91 = arith.constant 0 : index
    %74 = vector.load %arg2[%c768, %c0_91] : memref<1152x256xbf16, #tpu.memory_space<vmem>>, vector<128x256xbf16>
    %cst_92 = arith.constant dense<0.000000e+00> : vector<376x256xf32>
    %75 = tpu.matmul %73, %74, %cst_92 {dimension_numbers = #tpu.dot_dimension_numbers<[1], [0], [0], [1], [0, 0, 1, 1], [], []>} : vector<376x128xbf16>, vector<128x256xbf16>, vector<376x256xf32> -> vector<376x256xf32>
    %76 = arith.addf %72, %75 : vector<376x256xf32>
    %c56_93 = arith.constant 56 : index
    %c0_94 = arith.constant 0 : index
    %77 = vector.load %arg7[%c56_93, %c0_94] : memref<440x128xbf16, #tpu.memory_space<vmem>>, vector<376x128xbf16>
    %c896 = arith.constant 896 : index
    %c0_95 = arith.constant 0 : index
    %78 = vector.load %arg2[%c896, %c0_95] : memref<1152x256xbf16, #tpu.memory_space<vmem>>, vector<128x256xbf16>
    %cst_96 = arith.constant dense<0.000000e+00> : vector<376x256xf32>
    %79 = tpu.matmul %77, %78, %cst_96 {dimension_numbers = #tpu.dot_dimension_numbers<[1], [0], [0], [1], [0, 0, 1, 1], [], []>} : vector<376x128xbf16>, vector<128x256xbf16>, vector<376x256xf32> -> vector<376x256xf32>
    %80 = arith.addf %76, %79 : vector<376x256xf32>
    %c57 = arith.constant 57 : index
    %c0_97 = arith.constant 0 : index
    %81 = vector.load %arg7[%c57, %c0_97] : memref<440x128xbf16, #tpu.memory_space<vmem>>, vector<376x128xbf16>
    %c1024 = arith.constant 1024 : index
    %c0_98 = arith.constant 0 : index
    %82 = vector.load %arg2[%c1024, %c0_98] : memref<1152x256xbf16, #tpu.memory_space<vmem>>, vector<128x256xbf16>
    %cst_99 = arith.constant dense<0.000000e+00> : vector<376x256xf32>
    %83 = tpu.matmul %81, %82, %cst_99 {dimension_numbers = #tpu.dot_dimension_numbers<[1], [0], [0], [1], [0, 0, 1, 1], [], []>} : vector<376x128xbf16>, vector<128x256xbf16>, vector<376x256xf32> -> vector<376x256xf32>
    %84 = arith.addf %80, %83 : vector<376x256xf32>
    %85 = vector.extract_strided_slice %84 {offsets = [0, 0], sizes = [376, 128], strides = [1, 1]} : vector<376x256xf32> to vector<376x128xf32>
    %c0_100 = arith.constant 0 : index
    %c0_101 = arith.constant 0 : index
    %86 = vector.load %arg4[%c0_100, %c0_101] : memref<1x128xf32, #tpu.memory_space<vmem>>, vector<1x128xf32>
    %87 = vector.broadcast %86 : vector<1x128xf32> to vector<376x128xf32>
    %88 = arith.addf %85, %87 : vector<376x128xf32>
    %cst_102 = arith.constant 0.000000e+00 : f32
    %89 = vector.broadcast %cst_102 : f32 to vector<376x128xf32>
    %90 = arith.maximumf %88, %89 : vector<376x128xf32>
    %91 = vector.extract_strided_slice %84 {offsets = [0, 128], sizes = [376, 128], strides = [1, 1]} : vector<376x256xf32> to vector<376x128xf32>
    %92 = tpu.iota {dimensions = array<i32: 0>} : vector<376x1xi32>
    %c24_i32 = arith.constant 24 : i32
    %c0_i32 = arith.constant 0 : i32
    %93 = arith.cmpi eq, %c24_i32, %c0_i32 : i32
    %c1_i32 = arith.constant 1 : i32
    %94 = arith.select %93, %c1_i32, %c24_i32 : i32
    %95 = vector.broadcast %94 : i32 to vector<376x1xi32>
    %96 = arith.remsi %92, %95 : vector<376x1xi32>
    %c0_i32_103 = arith.constant 0 : i32
    %97 = vector.broadcast %c0_i32_103 : i32 to vector<376x1xi32>
    %98 = arith.cmpi ne, %96, %97 : vector<376x1xi32>
    %c0_i32_104 = arith.constant 0 : i32
    %99 = vector.broadcast %c0_i32_104 : i32 to vector<376x1xi32>
    %100 = arith.cmpi slt, %96, %99 : vector<376x1xi32>
    %c0_i32_105 = arith.constant 0 : i32
    %101 = arith.cmpi slt, %94, %c0_i32_105 : i32
    %102 = vector.broadcast %101 : i1 to vector<376x1xi1>
    %103 = vector.broadcast %102 : vector<376x1xi1> to vector<376x1xi1>
    %104 = arith.xori %100, %103 : vector<376x1xi1>
    %105 = arith.andi %104, %98 : vector<376x1xi1>
    %106 = vector.broadcast %94 : i32 to vector<376x1xi32>
    %107 = arith.addi %96, %106 : vector<376x1xi32>
    %108 = arith.select %105, %107, %96 : vector<376x1xi1>, vector<376x1xi32>
    %c16_i32 = arith.constant 16 : i32
    %109 = vector.broadcast %c16_i32 : i32 to vector<376x1xi32>
    %110 = arith.cmpi slt, %108, %109 : vector<376x1xi32>
    %cst_106 = arith.constant 0.000000e+00 : f32
    %111 = vector.shape_cast %110 : vector<376x1xi1> to vector<376x1xi1>
    %112 = vector.broadcast %111 : vector<376x1xi1> to vector<376x128xi1>
    %113 = vector.broadcast %cst_106 : f32 to vector<376x128xf32>
    %114 = arith.select %112, %90, %113 : vector<376x128xi1>, vector<376x128xf32>
    %115 = arith.truncf %114 : vector<376x128xf32> to vector<376x128xbf16>
    %c32_107 = arith.constant 32 : index
    %c0_108 = arith.constant 0 : index
    %116 = vector.load %arg7[%c32_107, %c0_108] : memref<440x128xbf16, #tpu.memory_space<vmem>>, vector<376x128xbf16>
    tpu.vector_store %arg7[%c32_107, %c0_108], %115 {strides = array<i32>} : memref<440x128xbf16, #tpu.memory_space<vmem>>, vector<376x128xbf16>,
    %c7_109 = arith.constant 7 : index
    %c0_110 = arith.constant 0 : index
    %117 = vector.load %arg7[%c7_109, %c0_110] : memref<440x128xbf16, #tpu.memory_space<vmem>>, vector<376x128xbf16>
    %c0_111 = arith.constant 0 : index
    %c0_112 = arith.constant 0 : index
    %118 = vector.load %arg3[%c0_111, %c0_112] : memref<1152x128xbf16, #tpu.memory_space<vmem>>, vector<128x128xbf16>
    %cst_113 = arith.constant dense<0.000000e+00> : vector<376x128xf32>
    %119 = tpu.matmul %117, %118, %cst_113 {dimension_numbers = #tpu.dot_dimension_numbers<[1], [0], [0], [1], [0, 0, 1, 1], [], []>} : vector<376x128xbf16>, vector<128x128xbf16>, vector<376x128xf32> -> vector<376x128xf32>
    %c8_114 = arith.constant 8 : index
    %c0_115 = arith.constant 0 : index
    %120 = vector.load %arg7[%c8_114, %c0_115] : memref<440x128xbf16, #tpu.memory_space<vmem>>, vector<376x128xbf16>
    %c128_116 = arith.constant 128 : index
    %c0_117 = arith.constant 0 : index
    %121 = vector.load %arg3[%c128_116, %c0_117] : memref<1152x128xbf16, #tpu.memory_space<vmem>>, vector<128x128xbf16>
    %cst_118 = arith.constant dense<0.000000e+00> : vector<376x128xf32>
    %122 = tpu.matmul %120, %121, %cst_118 {dimension_numbers = #tpu.dot_dimension_numbers<[1], [0], [0], [1], [0, 0, 1, 1], [], []>} : vector<376x128xbf16>, vector<128x128xbf16>, vector<376x128xf32> -> vector<376x128xf32>
    %123 = arith.addf %119, %122 : vector<376x128xf32>
    %c9_119 = arith.constant 9 : index
    %c0_120 = arith.constant 0 : index
    %124 = vector.load %arg7[%c9_119, %c0_120] : memref<440x128xbf16, #tpu.memory_space<vmem>>, vector<376x128xbf16>
    %c256_121 = arith.constant 256 : index
    %c0_122 = arith.constant 0 : index
    %125 = vector.load %arg3[%c256_121, %c0_122] : memref<1152x128xbf16, #tpu.memory_space<vmem>>, vector<128x128xbf16>
    %cst_123 = arith.constant dense<0.000000e+00> : vector<376x128xf32>
    %126 = tpu.matmul %124, %125, %cst_123 {dimension_numbers = #tpu.dot_dimension_numbers<[1], [0], [0], [1], [0, 0, 1, 1], [], []>} : vector<376x128xbf16>, vector<128x128xbf16>, vector<376x128xf32> -> vector<376x128xf32>
    %127 = arith.addf %123, %126 : vector<376x128xf32>
    %c31_124 = arith.constant 31 : index
    %c0_125 = arith.constant 0 : index
    %128 = vector.load %arg7[%c31_124, %c0_125] : memref<440x128xbf16, #tpu.memory_space<vmem>>, vector<376x128xbf16>
    %c384_126 = arith.constant 384 : index
    %c0_127 = arith.constant 0 : index
    %129 = vector.load %arg3[%c384_126, %c0_127] : memref<1152x128xbf16, #tpu.memory_space<vmem>>, vector<128x128xbf16>
    %cst_128 = arith.constant dense<0.000000e+00> : vector<376x128xf32>
    %130 = tpu.matmul %128, %129, %cst_128 {dimension_numbers = #tpu.dot_dimension_numbers<[1], [0], [0], [1], [0, 0, 1, 1], [], []>} : vector<376x128xbf16>, vector<128x128xbf16>, vector<376x128xf32> -> vector<376x128xf32>
    %131 = arith.addf %127, %130 : vector<376x128xf32>
    %c32_129 = arith.constant 32 : index
    %c0_130 = arith.constant 0 : index
    %132 = vector.load %arg7[%c32_129, %c0_130] : memref<440x128xbf16, #tpu.memory_space<vmem>>, vector<376x128xbf16>
    %c512_131 = arith.constant 512 : index
    %c0_132 = arith.constant 0 : index
    %133 = vector.load %arg3[%c512_131, %c0_132] : memref<1152x128xbf16, #tpu.memory_space<vmem>>, vector<128x128xbf16>
    %cst_133 = arith.constant dense<0.000000e+00> : vector<376x128xf32>
    %134 = tpu.matmul %132, %133, %cst_133 {dimension_numbers = #tpu.dot_dimension_numbers<[1], [0], [0], [1], [0, 0, 1, 1], [], []>} : vector<376x128xbf16>, vector<128x128xbf16>, vector<376x128xf32> -> vector<376x128xf32>
    %135 = arith.addf %131, %134 : vector<376x128xf32>
    %c33_134 = arith.constant 33 : index
    %c0_135 = arith.constant 0 : index
    %136 = vector.load %arg7[%c33_134, %c0_135] : memref<440x128xbf16, #tpu.memory_space<vmem>>, vector<376x128xbf16>
    %c640_136 = arith.constant 640 : index
    %c0_137 = arith.constant 0 : index
    %137 = vector.load %arg3[%c640_136, %c0_137] : memref<1152x128xbf16, #tpu.memory_space<vmem>>, vector<128x128xbf16>
    %cst_138 = arith.constant dense<0.000000e+00> : vector<376x128xf32>
    %138 = tpu.matmul %136, %137, %cst_138 {dimension_numbers = #tpu.dot_dimension_numbers<[1], [0], [0], [1], [0, 0, 1, 1], [], []>} : vector<376x128xbf16>, vector<128x128xbf16>, vector<376x128xf32> -> vector<376x128xf32>
    %139 = arith.addf %135, %138 : vector<376x128xf32>
    %c55_139 = arith.constant 55 : index
    %c0_140 = arith.constant 0 : index
    %140 = vector.load %arg7[%c55_139, %c0_140] : memref<440x128xbf16, #tpu.memory_space<vmem>>, vector<376x128xbf16>
    %c768_141 = arith.constant 768 : index
    %c0_142 = arith.constant 0 : index
    %141 = vector.load %arg3[%c768_141, %c0_142] : memref<1152x128xbf16, #tpu.memory_space<vmem>>, vector<128x128xbf16>
    %cst_143 = arith.constant dense<0.000000e+00> : vector<376x128xf32>
    %142 = tpu.matmul %140, %141, %cst_143 {dimension_numbers = #tpu.dot_dimension_numbers<[1], [0], [0], [1], [0, 0, 1, 1], [], []>} : vector<376x128xbf16>, vector<128x128xbf16>, vector<376x128xf32> -> vector<376x128xf32>
    %143 = arith.addf %139, %142 : vector<376x128xf32>
    %c56_144 = arith.constant 56 : index
    %c0_145 = arith.constant 0 : index
    %144 = vector.load %arg7[%c56_144, %c0_145] : memref<440x128xbf16, #tpu.memory_space<vmem>>, vector<376x128xbf16>
    %c896_146 = arith.constant 896 : index
    %c0_147 = arith.constant 0 : index
    %145 = vector.load %arg3[%c896_146, %c0_147] : memref<1152x128xbf16, #tpu.memory_space<vmem>>, vector<128x128xbf16>
    %cst_148 = arith.constant dense<0.000000e+00> : vector<376x128xf32>
    %146 = tpu.matmul %144, %145, %cst_148 {dimension_numbers = #tpu.dot_dimension_numbers<[1], [0], [0], [1], [0, 0, 1, 1], [], []>} : vector<376x128xbf16>, vector<128x128xbf16>, vector<376x128xf32> -> vector<376x128xf32>
    %147 = arith.addf %143, %146 : vector<376x128xf32>
    %c57_149 = arith.constant 57 : index
    %c0_150 = arith.constant 0 : index
    %148 = vector.load %arg7[%c57_149, %c0_150] : memref<440x128xbf16, #tpu.memory_space<vmem>>, vector<376x128xbf16>
    %c1024_151 = arith.constant 1024 : index
    %c0_152 = arith.constant 0 : index
    %149 = vector.load %arg3[%c1024_151, %c0_152] : memref<1152x128xbf16, #tpu.memory_space<vmem>>, vector<128x128xbf16>
    %cst_153 = arith.constant dense<0.000000e+00> : vector<376x128xf32>
    %150 = tpu.matmul %148, %149, %cst_153 {dimension_numbers = #tpu.dot_dimension_numbers<[1], [0], [0], [1], [0, 0, 1, 1], [], []>} : vector<376x128xbf16>, vector<128x128xbf16>, vector<376x128xf32> -> vector<376x128xf32>
    %151 = arith.addf %147, %150 : vector<376x128xf32>
    %152 = arith.addf %151, %91 : vector<376x128xf32>
    %c0_154 = arith.constant 0 : index
    %c0_155 = arith.constant 0 : index
    %153 = vector.load %arg5[%c0_154, %c0_155] : memref<1x128xf32, #tpu.memory_space<vmem>>, vector<1x128xf32>
    %154 = vector.broadcast %153 : vector<1x128xf32> to vector<376x128xf32>
    %155 = arith.addf %152, %154 : vector<376x128xf32>
    %cst_156 = arith.constant 0.000000e+00 : f32
    %156 = vector.broadcast %cst_156 : f32 to vector<376x128xf32>
    %157 = arith.maximumf %155, %156 : vector<376x128xf32>
    %158 = arith.truncf %157 : vector<376x128xf32> to vector<376x128xbf16>
    %159 = vector.extract_strided_slice %158 {offsets = [0, 0], sizes = [16, 128], strides = [1, 1]} : vector<376x128xbf16> to vector<16x128xbf16>
    %c0_157 = arith.constant 0 : index
    %c0_158 = arith.constant 0 : index
    %c0_159 = arith.constant 0 : index
    %160 = vector.load %arg6[%c0_157, %c0_158, %c0_159] : memref<1x256x128xbf16, #tpu.memory_space<vmem>>, vector<1x16x128xbf16>
    %161 = vector.shape_cast %160 : vector<1x16x128xbf16> to vector<16x128xbf16>
    %162 = vector.shape_cast %159 : vector<16x128xbf16> to vector<1x16x128xbf16>
    tpu.vector_store %arg6[%c0_157, %c0_158, %c0_159], %162 {strides = array<i32>} : memref<1x256x128xbf16, #tpu.memory_space<vmem>>, vector<1x16x128xbf16>,
    %163 = vector.extract_strided_slice %158 {offsets = [24, 0], sizes = [16, 128], strides = [1, 1]} : vector<376x128xbf16> to vector<16x128xbf16>
    %c0_160 = arith.constant 0 : index
    %c16 = arith.constant 16 : index
    %c0_161 = arith.constant 0 : index
    %164 = vector.load %arg6[%c0_160, %c16, %c0_161] : memref<1x256x128xbf16, #tpu.memory_space<vmem>>, vector<1x16x128xbf16>
    %165 = vector.shape_cast %164 : vector<1x16x128xbf16> to vector<16x128xbf16>
    %166 = vector.shape_cast %163 : vector<16x128xbf16> to vector<1x16x128xbf16>
    tpu.vector_store %arg6[%c0_160, %c16, %c0_161], %166 {strides = array<i32>} : memref<1x256x128xbf16, #tpu.memory_space<vmem>>, vector<1x16x128xbf16>,
    %167 = vector.extract_strided_slice %158 {offsets = [48, 0], sizes = [16, 128], strides = [1, 1]} : vector<376x128xbf16> to vector<16x128xbf16>
    %c0_162 = arith.constant 0 : index
    %c32_163 = arith.constant 32 : index
    %c0_164 = arith.constant 0 : index
    %168 = vector.load %arg6[%c0_162, %c32_163, %c0_164] : memref<1x256x128xbf16, #tpu.memory_space<vmem>>, vector<1x16x128xbf16>
    %169 = vector.shape_cast %168 : vector<1x16x128xbf16> to vector<16x128xbf16>
    %170 = vector.shape_cast %167 : vector<16x128xbf16> to vector<1x16x128xbf16>
    tpu.vector_store %arg6[%c0_162, %c32_163, %c0_164], %170 {strides = array<i32>} : memref<1x256x128xbf16, #tpu.memory_space<vmem>>, vector<1x16x128xbf16>,
    %171 = vector.extract_strided_slice %158 {offsets = [72, 0], sizes = [16, 128], strides = [1, 1]} : vector<376x128xbf16> to vector<16x128xbf16>
    %c0_165 = arith.constant 0 : index
    %c48 = arith.constant 48 : index
    %c0_166 = arith.constant 0 : index
    %172 = vector.load %arg6[%c0_165, %c48, %c0_166] : memref<1x256x128xbf16, #tpu.memory_space<vmem>>, vector<1x16x128xbf16>
    %173 = vector.shape_cast %172 : vector<1x16x128xbf16> to vector<16x128xbf16>
    %174 = vector.shape_cast %171 : vector<16x128xbf16> to vector<1x16x128xbf16>
    tpu.vector_store %arg6[%c0_165, %c48, %c0_166], %174 {strides = array<i32>} : memref<1x256x128xbf16, #tpu.memory_space<vmem>>, vector<1x16x128xbf16>,
    %175 = vector.extract_strided_slice %158 {offsets = [96, 0], sizes = [16, 128], strides = [1, 1]} : vector<376x128xbf16> to vector<16x128xbf16>
    %c0_167 = arith.constant 0 : index
    %c64 = arith.constant 64 : index
    %c0_168 = arith.constant 0 : index
    %176 = vector.load %arg6[%c0_167, %c64, %c0_168] : memref<1x256x128xbf16, #tpu.memory_space<vmem>>, vector<1x16x128xbf16>
    %177 = vector.shape_cast %176 : vector<1x16x128xbf16> to vector<16x128xbf16>
    %178 = vector.shape_cast %175 : vector<16x128xbf16> to vector<1x16x128xbf16>
    tpu.vector_store %arg6[%c0_167, %c64, %c0_168], %178 {strides = array<i32>} : memref<1x256x128xbf16, #tpu.memory_space<vmem>>, vector<1x16x128xbf16>,
    %179 = vector.extract_strided_slice %158 {offsets = [120, 0], sizes = [16, 128], strides = [1, 1]} : vector<376x128xbf16> to vector<16x128xbf16>
    %c0_169 = arith.constant 0 : index
    %c80_170 = arith.constant 80 : index
    %c0_171 = arith.constant 0 : index
    %180 = vector.load %arg6[%c0_169, %c80_170, %c0_171] : memref<1x256x128xbf16, #tpu.memory_space<vmem>>, vector<1x16x128xbf16>
    %181 = vector.shape_cast %180 : vector<1x16x128xbf16> to vector<16x128xbf16>
    %182 = vector.shape_cast %179 : vector<16x128xbf16> to vector<1x16x128xbf16>
    tpu.vector_store %arg6[%c0_169, %c80_170, %c0_171], %182 {strides = array<i32>} : memref<1x256x128xbf16, #tpu.memory_space<vmem>>, vector<1x16x128xbf16>,
    %183 = vector.extract_strided_slice %158 {offsets = [144, 0], sizes = [16, 128], strides = [1, 1]} : vector<376x128xbf16> to vector<16x128xbf16>
    %c0_172 = arith.constant 0 : index
    %c96 = arith.constant 96 : index
    %c0_173 = arith.constant 0 : index
    %184 = vector.load %arg6[%c0_172, %c96, %c0_173] : memref<1x256x128xbf16, #tpu.memory_space<vmem>>, vector<1x16x128xbf16>
    %185 = vector.shape_cast %184 : vector<1x16x128xbf16> to vector<16x128xbf16>
    %186 = vector.shape_cast %183 : vector<16x128xbf16> to vector<1x16x128xbf16>
    tpu.vector_store %arg6[%c0_172, %c96, %c0_173], %186 {strides = array<i32>} : memref<1x256x128xbf16, #tpu.memory_space<vmem>>, vector<1x16x128xbf16>,
    %187 = vector.extract_strided_slice %158 {offsets = [168, 0], sizes = [16, 128], strides = [1, 1]} : vector<376x128xbf16> to vector<16x128xbf16>
    %c0_174 = arith.constant 0 : index
    %c112 = arith.constant 112 : index
    %c0_175 = arith.constant 0 : index
    %188 = vector.load %arg6[%c0_174, %c112, %c0_175] : memref<1x256x128xbf16, #tpu.memory_space<vmem>>, vector<1x16x128xbf16>
    %189 = vector.shape_cast %188 : vector<1x16x128xbf16> to vector<16x128xbf16>
    %190 = vector.shape_cast %187 : vector<16x128xbf16> to vector<1x16x128xbf16>
    tpu.vector_store %arg6[%c0_174, %c112, %c0_175], %190 {strides = array<i32>} : memref<1x256x128xbf16, #tpu.memory_space<vmem>>, vector<1x16x128xbf16>,
    %191 = vector.extract_strided_slice %158 {offsets = [192, 0], sizes = [16, 128], strides = [1, 1]} : vector<376x128xbf16> to vector<16x128xbf16>
    %c0_176 = arith.constant 0 : index
    %c128_177 = arith.constant 128 : index
    %c0_178 = arith.constant 0 : index
    %192 = vector.load %arg6[%c0_176, %c128_177, %c0_178] : memref<1x256x128xbf16, #tpu.memory_space<vmem>>, vector<1x16x128xbf16>
    %193 = vector.shape_cast %192 : vector<1x16x128xbf16> to vector<16x128xbf16>
    %194 = vector.shape_cast %191 : vector<16x128xbf16> to vector<1x16x128xbf16>
    tpu.vector_store %arg6[%c0_176, %c128_177, %c0_178], %194 {strides = array<i32>} : memref<1x256x128xbf16, #tpu.memory_space<vmem>>, vector<1x16x128xbf16>,
    %195 = vector.extract_strided_slice %158 {offsets = [216, 0], sizes = [16, 128], strides = [1, 1]} : vector<376x128xbf16> to vector<16x128xbf16>
    %c0_179 = arith.constant 0 : index
    %c144 = arith.constant 144 : index
    %c0_180 = arith.constant 0 : index
    %196 = vector.load %arg6[%c0_179, %c144, %c0_180] : memref<1x256x128xbf16, #tpu.memory_space<vmem>>, vector<1x16x128xbf16>
    %197 = vector.shape_cast %196 : vector<1x16x128xbf16> to vector<16x128xbf16>
    %198 = vector.shape_cast %195 : vector<16x128xbf16> to vector<1x16x128xbf16>
    tpu.vector_store %arg6[%c0_179, %c144, %c0_180], %198 {strides = array<i32>} : memref<1x256x128xbf16, #tpu.memory_space<vmem>>, vector<1x16x128xbf16>,
    %199 = vector.extract_strided_slice %158 {offsets = [240, 0], sizes = [16, 128], strides = [1, 1]} : vector<376x128xbf16> to vector<16x128xbf16>
    %c0_181 = arith.constant 0 : index
    %c160 = arith.constant 160 : index
    %c0_182 = arith.constant 0 : index
    %200 = vector.load %arg6[%c0_181, %c160, %c0_182] : memref<1x256x128xbf16, #tpu.memory_space<vmem>>, vector<1x16x128xbf16>
    %201 = vector.shape_cast %200 : vector<1x16x128xbf16> to vector<16x128xbf16>
    %202 = vector.shape_cast %199 : vector<16x128xbf16> to vector<1x16x128xbf16>
    tpu.vector_store %arg6[%c0_181, %c160, %c0_182], %202 {strides = array<i32>} : memref<1x256x128xbf16, #tpu.memory_space<vmem>>, vector<1x16x128xbf16>,
    %203 = vector.extract_strided_slice %158 {offsets = [264, 0], sizes = [16, 128], strides = [1, 1]} : vector<376x128xbf16> to vector<16x128xbf16>
    %c0_183 = arith.constant 0 : index
    %c176_184 = arith.constant 176 : index
    %c0_185 = arith.constant 0 : index
    %204 = vector.load %arg6[%c0_183, %c176_184, %c0_185] : memref<1x256x128xbf16, #tpu.memory_space<vmem>>, vector<1x16x128xbf16>
    %205 = vector.shape_cast %204 : vector<1x16x128xbf16> to vector<16x128xbf16>
    %206 = vector.shape_cast %203 : vector<16x128xbf16> to vector<1x16x128xbf16>
    tpu.vector_store %arg6[%c0_183, %c176_184, %c0_185], %206 {strides = array<i32>} : memref<1x256x128xbf16, #tpu.memory_space<vmem>>, vector<1x16x128xbf16>,
    %207 = vector.extract_strided_slice %158 {offsets = [288, 0], sizes = [16, 128], strides = [1, 1]} : vector<376x128xbf16> to vector<16x128xbf16>
    %c0_186 = arith.constant 0 : index
    %c192 = arith.constant 192 : index
    %c0_187 = arith.constant 0 : index
    %208 = vector.load %arg6[%c0_186, %c192, %c0_187] : memref<1x256x128xbf16, #tpu.memory_space<vmem>>, vector<1x16x128xbf16>
    %209 = vector.shape_cast %208 : vector<1x16x128xbf16> to vector<16x128xbf16>
    %210 = vector.shape_cast %207 : vector<16x128xbf16> to vector<1x16x128xbf16>
    tpu.vector_store %arg6[%c0_186, %c192, %c0_187], %210 {strides = array<i32>} : memref<1x256x128xbf16, #tpu.memory_space<vmem>>, vector<1x16x128xbf16>,
    %211 = vector.extract_strided_slice %158 {offsets = [312, 0], sizes = [16, 128], strides = [1, 1]} : vector<376x128xbf16> to vector<16x128xbf16>
    %c0_188 = arith.constant 0 : index
    %c208 = arith.constant 208 : index
    %c0_189 = arith.constant 0 : index
    %212 = vector.load %arg6[%c0_188, %c208, %c0_189] : memref<1x256x128xbf16, #tpu.memory_space<vmem>>, vector<1x16x128xbf16>
    %213 = vector.shape_cast %212 : vector<1x16x128xbf16> to vector<16x128xbf16>
    %214 = vector.shape_cast %211 : vector<16x128xbf16> to vector<1x16x128xbf16>
    tpu.vector_store %arg6[%c0_188, %c208, %c0_189], %214 {strides = array<i32>} : memref<1x256x128xbf16, #tpu.memory_space<vmem>>, vector<1x16x128xbf16>,
    %215 = vector.extract_strided_slice %158 {offsets = [336, 0], sizes = [16, 128], strides = [1, 1]} : vector<376x128xbf16> to vector<16x128xbf16>
    %c0_190 = arith.constant 0 : index
    %c224_191 = arith.constant 224 : index
    %c0_192 = arith.constant 0 : index
    %216 = vector.load %arg6[%c0_190, %c224_191, %c0_192] : memref<1x256x128xbf16, #tpu.memory_space<vmem>>, vector<1x16x128xbf16>
    %217 = vector.shape_cast %216 : vector<1x16x128xbf16> to vector<16x128xbf16>
    %218 = vector.shape_cast %215 : vector<16x128xbf16> to vector<1x16x128xbf16>
    tpu.vector_store %arg6[%c0_190, %c224_191, %c0_192], %218 {strides = array<i32>} : memref<1x256x128xbf16, #tpu.memory_space<vmem>>, vector<1x16x128xbf16>,
    %219 = vector.extract_strided_slice %158 {offsets = [360, 0], sizes = [16, 128], strides = [1, 1]} : vector<376x128xbf16> to vector<16x128xbf16>
    %c0_193 = arith.constant 0 : index
    %c240 = arith.constant 240 : index
    %c0_194 = arith.constant 0 : index
    %220 = vector.load %arg6[%c0_193, %c240, %c0_194] : memref<1x256x128xbf16, #tpu.memory_space<vmem>>, vector<1x16x128xbf16>
    %221 = vector.shape_cast %220 : vector<1x16x128xbf16> to vector<16x128xbf16>
    %222 = vector.shape_cast %219 : vector<16x128xbf16> to vector<1x16x128xbf16>
    tpu.vector_store %arg6[%c0_193, %c240, %c0_194], %222 {strides = array<i32>} : memref<1x256x128xbf16, #tpu.memory_space<vmem>>, vector<1x16x128xbf16>,
    return
  }
  func.func @transform_0(%arg0: i32) -> (i32, i32, i32, i32) {
    %c0_i32 = arith.constant 0 : i32
    %c0_i32_0 = arith.constant 0 : i32
    %c0_i32_1 = arith.constant 0 : i32
    %c0_i32_2 = arith.constant 0 : i32
    return %arg0, %c0_i32, %c0_i32_0, %c0_i32_1 : i32, i32, i32, i32
  }
  func.func @transform_1(%arg0: i32) -> (i32, i32) {
    %c0_i32 = arith.constant 0 : i32
    %c0_i32_0 = arith.constant 0 : i32
    %c0_i32_1 = arith.constant 0 : i32
    return %c0_i32, %c0_i32_0 : i32, i32
  }
  func.func @transform_2(%arg0: i32) -> (i32, i32) {
    %c0_i32 = arith.constant 0 : i32
    %c0_i32_0 = arith.constant 0 : i32
    %c0_i32_1 = arith.constant 0 : i32
    return %c0_i32, %c0_i32_0 : i32, i32
  }
  func.func @transform_3(%arg0: i32) -> (i32, i32) {
    %c0_i32 = arith.constant 0 : i32
    %c0_i32_0 = arith.constant 0 : i32
    %c0_i32_1 = arith.constant 0 : i32
    return %c0_i32, %c0_i32_0 : i32, i32
  }
  func.func @transform_4(%arg0: i32) -> (i32, i32) {
    %c0_i32 = arith.constant 0 : i32
    %c0_i32_0 = arith.constant 0 : i32
    %c0_i32_1 = arith.constant 0 : i32
    return %c0_i32, %c0_i32_0 : i32, i32
  }
  func.func @transform_5(%arg0: i32) -> (i32, i32, i32) {
    %c0_i32 = arith.constant 0 : i32
    %c0_i32_0 = arith.constant 0 : i32
    %c0_i32_1 = arith.constant 0 : i32
    return %arg0, %c0_i32, %c0_i32_0 : i32, i32, i32
  }
}

</mosaic_0001>

<bundles_post_ra>
// kernel: tpu_custom_call.1
= control target key start
LH: loop header
LB: loop body
LE: loop exit
PB: predicated region body
PF: predicated region fallthrough
CT: control target
= control target key end

     0   :  { %10 = vsyncpa [#allocation4], 0  ;;  %s22691_s0 = inlined_call_operand.hbm [shape: bf16[2,16,16,128], index: 0, kind: input, shape index: {}]   ;;  %s22692_s1 = inlined_call_operand.hbm [shape: bf16[1152,256], index: 1, kind: input, shape index: {}]   ;;  %s22693_s2 = inlined_call_operand.hbm [shape: bf16[1152,128], index: 2, kind: input, shape index: {}]   ;;  %s22694_s3 = inlined_call_operand.vmem [shape: f32[1,128], index: 3, kind: input, shape index: {}]   ;;  %s22695_s4 = inlined_call_operand.vmem [shape: f32[1,128], index: 4, kind: input, shape index: {}]   ;;  %s22696_s5 = inlined_call_operand.hbm [shape: bf16[2,256,128], index: 5, kind: output, shape index: {}]  }
   0x1   :  { %12 = vsyncpa [#allocation4 + $0x1], 0 }
   0x2   :  { %13 = vsyncpa [#allocation7], 0 }
   0x3   :  { %14 = vsyncpa [#allocation5], 0 }
   0x4   :  { %16 = vsyncpa [#allocation5 + $0x1], 0  ;;  %s17903_s18 = smov 0   ;;  %s17905_s19 = smov 0  }
   0x5   :  { %s17907_s20 = smov 0   ;;  %s17909_s21 = smov 0  }
   0x6 LB: > { %s17924_s22 = sadd.s32 4294967295, %s17860_s21   ;;  %s14074_s23 = sadd.s32 4294967294, %s17860_s21   ;;  %s17860_s21 = sphi %s17909_s21, %s23816_s21   ;;  %s17856_s20 = sphi %s17907_s20, %s23815_s20   ;;  %s17852_s19 = sphi %s17905_s19, %s23814_s19   ;;  %s17848_s18 = sphi %s17903_s18, %s23813_s18  }
   0x7   : > { %p42_p0 = scmp.ne.s32.totalorder %s17852_s19, %s17848_s18  ;;  %p22697_p1 = scmp.eq.s32.totalorder %s17924_s22, 0 }
   0x8   : > { %p156_p3 = scmp.eq.s32.totalorder %s14074_s23, 1  ;;  %p14075_p5 = scmp.ge.s32.totalorder %s17860_s21, 1 }
   0x9   : > { %p17933_p4 = por %p22697_p1, %p42_p0  ;;  %p163_p7 = scmp.lt.s32.totalorder %s17860_s21, 3 }
   0xa   : > { %p17938_p6 = por %p156_p3, %p42_p0  ;;  %s17862_s27 = smov [#allocation6]  }
   0xb   : > { %s22815_s24 = scalar_select %p17933_p4, 1, 0 }
   0xc   : > { %s22816_s25 = scalar_select %p17938_p6, 1, 0 }
   0xd   : > { %p17943_p8 = pnand %p14075_p5, %p163_p7  ;;  %s175_s28 = sshll.u32 %s17862_s27, 4  ;;  %s17947_s28 = int_to_ptr.vmem [resolvable:$true] %s175_s28 }
   0xe   : > { %s17863_s30 = smov [#allocation8]   ;;  %s17704_s9 = scalar_lea.hbm %s22692_s1, 18432 }
   0xf   : > { %p16791_p9 = pneg %p17943_p8  ;;  %s188_s6 = sshll.u32 %s17863_s30, 4  ;;  %s17958_s6 = int_to_ptr.vmem [resolvable:$true] %s188_s6 }
  0x10   : > { %p17705_p12 = scmp.ne.s32.totalorder %s22692_s1, %s17704_s9  ;;  %p17711_p5 = scmp.lt.u32.totalorder %s17704_s9, %s22692_s1 }
  0x11   : > { %p17954_p11 = pnand %p16791_p9, %p22697_p1 }
  0x13   : > { %p17706_p13 = pneg %p17954_p11 }
  0x15   : > { %p17707_p0 = pnand %p17706_p13, %p17705_p12 }
  0x17   : > { %p17708_p3 = pneg %p17707_p0 }
  0x19   : > { %p17713_p7 = pnand %p17711_p5, %p17708_p3 }
  0x1b   : > { %17716 = shalt.err (!%p17713_p7)
}
  0x1c   : > { %s17717_s14 = scalar_lea.vmem %s17947_s28, 18432  ;;  %p17725_p2 = scmp.lt.s32.totalorder %s17947_s28, %s17947_s28 }
  0x1d   : > { %p17718_p9 = scmp.ne.s32.totalorder %s17947_s28, %s17717_s14  ;;  %p17726_p12 = scmp.lt.s32.totalorder %s17717_s14, %s17717_s14 }
  0x1f   : > { %p17720_p10 = pnand %p17718_p9, %p17706_p13  ;;  %p17727_p0 = por %p17726_p12, %p17725_p2 }
  0x21   : > { %p17721_p1 = pneg %p17720_p10 }
  0x23   : > { %p17728_p6 = pnand %p17727_p0, %p17721_p1 }
  0x25   : > { %17731 = shalt.err (!%p17728_p6)
}
  0x26   : > { %s17864_s15 = smov 128   ;;  %s17865_s16 = smov 8  }
  0x27   : > { %16794 = dma.hbm_to_vmem [thread:$0]  (!%p17954_p11), %s22692_s1, 18432, %s17947_s28, [#allocation7], %s17864_s15, %s17864_s15, %s17865_s16  }
  0x28   : > { %s17732_s7 = scalar_lea.hbm %s22693_s2, 9216 }
  0x29   : > { %p17733_p2 = scmp.ne.s32.totalorder %s22693_s2, %s17732_s7  ;;  %p17739_p10 = scmp.lt.u32.totalorder %s17732_s7, %s22693_s2 }
  0x2b   : > { %p17735_p1 = pnand %p17733_p2, %p17706_p13 }
  0x2d   : > { %p17736_p6 = pneg %p17735_p1 }
  0x2f   : > { %p17741_p3 = pnand %p17739_p10, %p17736_p6 }
  0x31   : > { %17744 = shalt.err (!%p17741_p3)
}
  0x32   : > { %s17745_s28 = scalar_lea.vmem %s17958_s6, 9216  ;;  %p17753_p12 = scmp.lt.s32.totalorder %s17958_s6, %s17958_s6 }
  0x33   : > { %p17746_p5 = scmp.ne.s32.totalorder %s17958_s6, %s17745_s28  ;;  %p17754_p0 = scmp.lt.s32.totalorder %s17745_s28, %s17745_s28 }
  0x35   : > { %p17748_p7 = pnand %p17746_p5, %p17706_p13  ;;  %p17755_p2 = por %p17754_p0, %p17753_p12 }
  0x37   : > { %p17749_p9 = pneg %p17748_p7 }
  0x39   : > { %p17756_p1 = pnand %p17755_p2, %p17749_p9 }
  0x3b   : > { %17759 = shalt.err (!%p17756_p1)
}
  0x3c   : > { %s17866_s12 = smov 64   ;;  %s17867_s13 = smov 4  }
  0x3d   : > { %16797 = dma.hbm_to_vmem [thread:$0]  (!%p17954_p11), %s22693_s2, 9216, %s17958_s6, [#allocation7], %s17866_s12, %s17866_s12, %s17867_s13  }
  0x3e   : > { %s18016_s16 = sadd.s32 1, %s17860_s21   ;;  %s29_s23 = sadd.s32 1, %s17856_s20 }
  0x3f   : > { %s26_s17 = ssub.s32 %s17860_s21, %s18016_s16  ;;  %p36_p6 = scmp.ne.s32.totalorder %s17856_s20, %s17852_s19 }
  0x40   : > { %p27_p13 = scmp.eq.s32.totalorder %s26_s17, 0  ;;  %p37_p10 = scmp.eq.s32.totalorder %s17860_s21, 0 }
  0x41   : > { %p22819_p5 = scmp.eq.s32.totalorder %s17924_s22, 1  ;;  %p16808_p9 = scmp.lt.s32.totalorder %s17860_s21, 2 }
  0x42   : > { %s18025_s27 = scalar_select %p27_p13, %s17856_s20, %s29_s23  }
  0x43   : > { %p38_p3 = por %p37_p10, %p36_p6  ;;  %p18029_p7 = por %p22819_p5, %p36_p6 }
  0x44   : > { %s208_s30 = sand.u32 1, %s17856_s20   ;;  %s14851_s6 = sshll.u32 %s17860_s21, 11 }
  0x45   : > { %s22820_s29 = scalar_select %p18029_p7, 1, 0 }
  0x46   : > { %s14079_s7 = sshll.u32 %s208_s30, 7  ;;  %s18039_s10 = scalar_lea.hbm %s22691_s0, %s14851_s6 }
  0x47   : > { %s212_s11 = scalar_lea.vmem [#allocation3], %s14079_s7  ;;  %p18043_p11 = pnand %p16808_p9, %p38_p3 }
  0x48   : > { %s219_s28 = sshll.u32 %s212_s11, 4  ;;  %s18047_s15 = scalar_lea.sflag [#allocation4], %s208_s30  ;;  %s18041_s28 = int_to_ptr.vmem [resolvable:$true] %s219_s28 }
  0x49   : > { %s17760_s17 = scalar_lea.hbm %s18039_s10, 2048  ;;  %p17762_p0 = pneg %p18043_p11 }
  0x4a   : > { %p17761_p12 = scmp.ne.s32.totalorder %s18039_s10, %s17760_s17  ;;  %s17765_s6 = scalar_lea.hbm %s22691_s0, 4096 }
  0x4b   : > { %p17766_p13 = scmp.lt.u32.totalorder %s18039_s10, %s22691_s0  ;;  %p17767_p6 = scmp.lt.u32.totalorder %s17765_s6, %s17760_s17 }
  0x4c   : > { %p17763_p2 = pnand %p17762_p0, %p17761_p12  ;;  %p17769_p3 = scmp.lt.u32.totalorder %s17760_s17, %s18039_s10 }
  0x4d   : > { %p17768_p10 = por %p17767_p6, %p17766_p13 }
  0x4e   : > { %p17764_p1 = pneg %p17763_p2 }
  0x4f   : > { %p17770_p5 = por %p17769_p3, %p17768_p10 }
  0x51   : > { %p17771_p9 = pnand %p17770_p5, %p17764_p1 }
  0x53   : > { %17774 = shalt.err (!%p17771_p9)
}
  0x54   : > { %s17775_s30 = scalar_lea.vmem %s18041_s28, 2048  ;;  %s17868_s11 = smov [#allocation3]  }
  0x55   : > { %p17776_p12 = scmp.ne.s32.totalorder %s18041_s28, %s17775_s30  ;;  %s17780_s23 = sshll.u32 %s17868_s11, 4  ;;  %s17781_s23 = int_to_ptr.vmem [resolvable:$false] %s17780_s23 }
  0x56   : > { %s17782_s7 = scalar_lea.vmem %s17781_s23, 4096  ;;  %p17783_p4 = scmp.lt.s32.totalorder %s18041_s28, %s17781_s23 }
  0x57   : > { %p17778_p2 = pnand %p17776_p12, %p17762_p0  ;;  %p17784_p13 = scmp.lt.s32.totalorder %s17782_s7, %s17775_s30 }
  0x59   : > { %p17779_p7 = pneg %p17778_p2  ;;  %p17785_p6 = por %p17784_p13, %p17783_p4 }
  0x5b   : > { %p17786_p10 = pnand %p17785_p6, %p17779_p7 }
  0x5d   : > { %17789 = shalt.err (!%p17786_p10)
}
  0x5e   : > { %16801 = dma.hbm_to_vmem [thread:$0]  (!%p18043_p11), %s18039_s10, 2048, %s18041_s28, %s18047_s15, %s17866_s12, %s17866_s12, %s17867_s13  }
  0x5f   : > { %231 = sbr.rel (%p17943_p8) target bundleno = 2680 (0xa78), region = 40 }
  0x66   : > { %s18081_s17 = sand.u32 1, %s17852_s19   ;;  %p22822_p4 = scmp.ne.s32.totalorder %s22815_s24, 0 }
  0x67   : > { %s14083_s6 = sshll.u32 %s18081_s17, 7  ;;  %s234_s8 = scalar_lea.sflag [#allocation4], %s18081_s17 }
  0x68   : > { %s18087_s14 = scalar_lea.vmem [#allocation3], %s14083_s6 }
  0x69   : > { %17835 = dma.done.wait (%p22822_p4), %s234_s8, 2048  }
  0x6a   : > { %17837 = vsyncadd (%p22822_p4), %s234_s8, 4294965248  ;;  %p22823_p7 = scmp.eq.s32.totalorder %s17924_s22, 0 }
  0x6c   : > { %17839 = dma.done.wait (%p22823_p7), [#allocation7], 27648   ;;  %p22824_p8 = pmov %p22823_p7 }
  0x6d   : > { %v22700_v0 = vmov 0   ;;  %v16853_v1 = vld [vmem:[#allocation6 + $0x84] ss:$8 sps:$4 sm:$0xff]   ;;  %v16857_v3 = vld [vmem:[#allocation6 + $0x80] ss:$8 sps:$4 sm:$0xff]   ;;  %v14089_v44 = vld [vmem:[%s18087_s14 + $0x10] sm:$0xff]  }
  0x6e   : > { %17841 = vsyncadd (%p22824_p8), [#allocation7], 4294939648  ;;  %741 = vmatprep.mubr.bf16.mxu1 %v22700_v0  ;;  %273 = vst [vmem:[#allocation2] sm:$0xf] %v22700_v0  ;;  %2109 = vmatprep.mubr.bf16.mxu0 %v22700_v0  ;;  %v18154_v2 = vld [vmem:[#allocation6 + $0x104] ss:$8 sps:$4 sm:$0xff]  }
  0x6f   : > { %274 = vst [vmem:[#allocation2 + $0x4] sm:$0xf] %v22700_v0  ;;  %275 = vst [vmem:[#allocation2 + $0x8] sm:$0xf] %v22700_v0  ;;  %709 = vmatprep.subr.bf16.mxu1 %v16853_v1  ;;  %v16858_v4 = vld [vmem:[#allocation6 + $0x100] ss:$8 sps:$4 sm:$0xff]   ;;  %2077 = vmatprep.subr.bf16.mxu0 %v18154_v2 }
  0x70   : > { %276 = vst [vmem:[#allocation2 + $0xc] sm:$0xf] %v22700_v0  ;;  %277 = vst [vmem:[#allocation2 + $0x10] sm:$0xf] %v22700_v0  ;;  %v16859_v5 = vld [vmem:[#allocation6 + $0x94] ss:$8 sps:$4 sm:$0xff]   ;;  %710 = vmatpush1.bf16.msra.mxu1 %v16857_v3  ;;  %2078 = vmatpush1.bf16.msra.mxu0 %v16858_v4 }
  0x71   : > { %278 = vst [vmem:[#allocation2 + $0x14] sm:$0xf] %v22700_v0  ;;  %279 = vst [vmem:[#allocation2 + $0x18] sm:$0xf] %v22700_v0  ;;  %v16861_v6 = vld [vmem:[#allocation6 + $0x114] ss:$8 sps:$4 sm:$0xff]   ;;  %711 = vmatprep.subr.bf16.mxu1 %v16859_v5 }
  0x72   : > { %280 = vst [vmem:[#allocation2 + $0x1c] sm:$0xf] %v22700_v0  ;;  %281 = vst [vmem:[#allocation2 + $0x20] sm:$0xf] %v22700_v0  ;;  %v16863_v7 = vld [vmem:[#allocation6 + $0x90] ss:$8 sps:$4 sm:$0xff]   ;;  %2079 = vmatprep.subr.bf16.mxu0 %v16861_v6 }
  0x73   : > { %282 = vst [vmem:[#allocation2 + $0x24] sm:$0xf] %v22700_v0  ;;  %283 = vst [vmem:[#allocation2 + $0x28] sm:$0xf] %v22700_v0  ;;  %v16864_v8 = vld [vmem:[#allocation6 + $0x110] ss:$8 sps:$4 sm:$0xff]  }
  0x74   : > { %284 = vst [vmem:[#allocation2 + $0x2c] sm:$0xf] %v22700_v0  ;;  %285 = vst [vmem:[#allocation2 + $0x30] sm:$0xf] %v22700_v0  ;;  %v16865_v9 = vld [vmem:[#allocation6 + $0xa4] ss:$8 sps:$4 sm:$0xff]   ;;  %712 = vmatpush1.bf16.msra.mxu1 %v16863_v7  ;;  %2080 = vmatpush1.bf16.msra.mxu0 %v16864_v8 }
  0x75   : > { %286 = vst [vmem:[#allocation2 + $0x34] sm:$0xf] %v22700_v0  ;;  %287 = vst [vmem:[#allocation2 + $0x38] sm:$0xf] %v22700_v0  ;;  %v16867_v10 = vld [vmem:[#allocation6 + $0x124] ss:$8 sps:$4 sm:$0xff]   ;;  %713 = vmatprep.subr.bf16.mxu1 %v16865_v9 }
  0x76   : > { %288 = vst [vmem:[#allocation2 + $0x3c] sm:$0xf] %v22700_v0  ;;  %289 = vst [vmem:[#allocation2 + $0x40] sm:$0xf] %v22700_v0  ;;  %v16869_v11 = vld [vmem:[#allocation6 + $0xa0] ss:$8 sps:$4 sm:$0xff]   ;;  %2081 = vmatprep.subr.bf16.mxu0 %v16867_v10 }
  0x77   : > { %290 = vst [vmem:[#allocation2 + $0x44] sm:$0xf] %v22700_v0  ;;  %291 = vst [vmem:[#allocation2 + $0x48] sm:$0xf] %v22700_v0  ;;  %v16870_v12 = vld [vmem:[#allocation6 + $0x120] ss:$8 sps:$4 sm:$0xff]  }
  0x78   : > { %292 = vst [vmem:[#allocation2 + $0x4c] sm:$0xf] %v22700_v0  ;;  %293 = vst [vmem:[#allocation2 + $0x50] sm:$0xf] %v22700_v0  ;;  %v16871_v13 = vld [vmem:[#allocation6 + $0xb4] ss:$8 sps:$4 sm:$0xff]   ;;  %714 = vmatpush1.bf16.msra.mxu1 %v16869_v11  ;;  %2082 = vmatpush1.bf16.msra.mxu0 %v16870_v12 }
  0x79   : > { %294 = vst [vmem:[#allocation2 + $0x54] sm:$0xf] %v22700_v0  ;;  %295 = vst [vmem:[#allocation2 + $0x58] sm:$0xf] %v22700_v0  ;;  %v16873_v14 = vld [vmem:[#allocation6 + $0x134] ss:$8 sps:$4 sm:$0xff]   ;;  %715 = vmatprep.subr.bf16.mxu1 %v16871_v13 }
  0x7a   : > { %296 = vst [vmem:[#allocation2 + $0x5c] sm:$0xf] %v22700_v0  ;;  %297 = vst [vmem:[#allocation2 + $0x60] sm:$0xf] %v22700_v0  ;;  %v16875_v15 = vld [vmem:[#allocation6 + $0xb0] ss:$8 sps:$4 sm:$0xff]   ;;  %2083 = vmatprep.subr.bf16.mxu0 %v16873_v14 }
  0x7b   : > { %298 = vst [vmem:[#allocation2 + $0x64] sm:$0xf] %v22700_v0  ;;  %299 = vst [vmem:[#allocation2 + $0x68] sm:$0xf] %v22700_v0  ;;  %v16876_v16 = vld [vmem:[#allocation6 + $0x130] ss:$8 sps:$4 sm:$0xff]  }
  0x7c   : > { %300 = vst [vmem:[#allocation2 + $0x6c] sm:$0xf] %v22700_v0  ;;  %301 = vst [vmem:[#allocation2 + $0x70] sm:$0xf] %v22700_v0  ;;  %v16877_v17 = vld [vmem:[#allocation6 + $0xc4] ss:$8 sps:$4 sm:$0xff]   ;;  %716 = vmatpush1.bf16.msra.mxu1 %v16875_v15  ;;  %2084 = vmatpush1.bf16.msra.mxu0 %v16876_v16 }
  0x7d   : > { %302 = vst [vmem:[#allocation2 + $0x74] sm:$0xf] %v22700_v0  ;;  %303 = vst [vmem:[#allocation2 + $0x78] sm:$0xf] %v22700_v0  ;;  %v16879_v18 = vld [vmem:[#allocation6 + $0x144] ss:$8 sps:$4 sm:$0xff]   ;;  %717 = vmatprep.subr.bf16.mxu1 %v16877_v17 }
  0x7e   : > { %304 = vst [vmem:[#allocation2 + $0x7c] sm:$0xf] %v22700_v0  ;;  %305 = vst [vmem:[#allocation2 + $0x80] sm:$0xf] %v22700_v0  ;;  %v16881_v19 = vld [vmem:[#allocation6 + $0xc0] ss:$8 sps:$4 sm:$0xff]   ;;  %2085 = vmatprep.subr.bf16.mxu0 %v16879_v18 }
  0x7f   : > { %306 = vst [vmem:[#allocation2 + $0x84] sm:$0xf] %v22700_v0  ;;  %307 = vst [vmem:[#allocation2 + $0x88] sm:$0xf] %v22700_v0  ;;  %v16882_v20 = vld [vmem:[#allocation6 + $0x140] ss:$8 sps:$4 sm:$0xff]  }
  0x80   : > { %308 = vst [vmem:[#allocation2 + $0x8c] sm:$0xf] %v22700_v0  ;;  %309 = vst [vmem:[#allocation2 + $0x90] sm:$0xf] %v22700_v0  ;;  %v16883_v21 = vld [vmem:[#allocation6 + $0xd4] ss:$8 sps:$4 sm:$0xff]   ;;  %718 = vmatpush1.bf16.msra.mxu1 %v16881_v19  ;;  %2086 = vmatpush1.bf16.msra.mxu0 %v16882_v20 }
  0x81   : > { %310 = vst [vmem:[#allocation2 + $0x94] sm:$0xf] %v22700_v0  ;;  %311 = vst [vmem:[#allocation2 + $0x98] sm:$0xf] %v22700_v0  ;;  %v16885_v22 = vld [vmem:[#allocation6 + $0x154] ss:$8 sps:$4 sm:$0xff]   ;;  %719 = vmatprep.subr.bf16.mxu1 %v16883_v21 }
  0x82   : > { %312 = vst [vmem:[#allocation2 + $0x9c] sm:$0xf] %v22700_v0  ;;  %313 = vst [vmem:[#allocation2 + $0xa0] sm:$0xf] %v22700_v0  ;;  %v16887_v23 = vld [vmem:[#allocation6 + $0xd0] ss:$8 sps:$4 sm:$0xff]   ;;  %2087 = vmatprep.subr.bf16.mxu0 %v16885_v22 }
  0x83   : > { %314 = vst [vmem:[#allocation2 + $0xa4] sm:$0xf] %v22700_v0  ;;  %315 = vst [vmem:[#allocation2 + $0xa8] sm:$0xf] %v22700_v0  ;;  %v16888_v24 = vld [vmem:[#allocation6 + $0x150] ss:$8 sps:$4 sm:$0xff]  }
  0x84   : > { %316 = vst [vmem:[#allocation2 + $0xac] sm:$0xf] %v22700_v0  ;;  %317 = vst [vmem:[#allocation2 + $0xb0] sm:$0xf] %v22700_v0  ;;  %v16889_v25 = vld [vmem:[#allocation6 + $0xe4] ss:$8 sps:$4 sm:$0xff]   ;;  %720 = vmatpush1.bf16.msra.mxu1 %v16887_v23  ;;  %2088 = vmatpush1.bf16.msra.mxu0 %v16888_v24 }
  0x85   : > { %318 = vst [vmem:[#allocation2 + $0xb4] sm:$0xf] %v22700_v0  ;;  %319 = vst [vmem:[#allocation2 + $0xb8] sm:$0xf] %v22700_v0  ;;  %v16891_v26 = vld [vmem:[#allocation6 + $0x164] ss:$8 sps:$4 sm:$0xff]   ;;  %721 = vmatprep.subr.bf16.mxu1 %v16889_v25 }
  0x86   : > { %320 = vst [vmem:[#allocation2 + $0xbc] sm:$0xf] %v22700_v0  ;;  %321 = vst [vmem:[#allocation2 + $0xc0] sm:$0xf] %v22700_v0  ;;  %v16893_v27 = vld [vmem:[#allocation6 + $0xe0] ss:$8 sps:$4 sm:$0xff]   ;;  %2089 = vmatprep.subr.bf16.mxu0 %v16891_v26 }
  0x87   : > { %322 = vst [vmem:[#allocation2 + $0xc4] sm:$0xf] %v22700_v0  ;;  %323 = vst [vmem:[#allocation2 + $0xc8] sm:$0xf] %v22700_v0  ;;  %v16894_v28 = vld [vmem:[#allocation6 + $0x160] ss:$8 sps:$4 sm:$0xff]  }
  0x88   : > { %324 = vst [vmem:[#allocation2 + $0xcc] sm:$0xf] %v22700_v0  ;;  %325 = vst [vmem:[#allocation2 + $0xd0] sm:$0xf] %v22700_v0  ;;  %v328_v29 = vld [vmem:[%s18087_s14] sm:$0xff]   ;;  %v16903_v31 = vld [vmem:[#allocation2 + $0x4] sm:$0xff]   ;;  %722 = vmatpush1.bf16.msra.mxu1 %v16893_v27  ;;  %2090 = vmatpush1.bf16.msra.mxu0 %v16894_v28 }
  0x89   : > { %326 = vst [vmem:[#allocation2 + $0xd4] sm:$0xf] %v22700_v0  ;;  %327 = vst [vmem:[#allocation2 + $0xd8] sm:$0xf] %v22700_v0  ;;  %v16895_v30 = vld [vmem:[#allocation6 + $0xf4] ss:$8 sps:$4 sm:$0xff]  }
  0x8a   : > { %330 = vst [vmem:[#allocation2 + $0x10] sm:$0xff] %v328_v29   ;;  %v16897_v32 = vld [vmem:[#allocation6 + $0x174] ss:$8 sps:$4 sm:$0xff]   ;;  %v409_v33 = vld [vmem:[#allocation2 + $0x8] sm:$0xf]  ;;  %v1785_v34 = vshll.u32 %v16903_v31, 16  ;;  %723 = vmatprep.subr.bf16.mxu1 %v16895_v30 }
  0x8b   : > { %v410_v35 = vld [vmem:[#allocation2 + $0xc] sm:$0xf]  ;;  %v14087_v38 = vld [vmem:[%s18087_s14 + $0x8] sm:$0xff]   ;;  %v1783_v41 = vshrl.u32 %v16903_v31, 16  ;;  %2091 = vmatprep.subr.bf16.mxu0 %v16897_v32  ;;  %340 = vst [vmem:[#allocation2 + $0x28] sm:$0xff] %v14089_v44   ;;  %v14091_v54 = vld [vmem:[%s18087_s14 + $0x18] sm:$0xff]  }
  0x8c   : > { %v16899_v36 = vld [vmem:[#allocation6 + $0xf0] ss:$8 sps:$4 sm:$0xff]   ;;  %v18158_v37 = vcombine.low %v409_v33, %v410_v35  ;;  %v18161_v40 = vld [vmem:[#allocation2 + $0x4] sm:$0xf]  ;;  %v1787_v42 = vrot.slane %v1785_v34, 1  ;;  %335 = vst [vmem:[#allocation2 + $0x1c] sm:$0xff] %v14087_v38  }
  0x8d   : > { %v16900_v39 = vld [vmem:[#allocation6 + $0x170] ss:$8 sps:$4 sm:$0xff]   ;;  %v16907_v43 = vld [vmem:[#allocation6 + $0x184] ss:$8 sps:$4 sm:$0xff]   ;;  %v14117_v46 = vcombine.low %v18161_v40, %v409_v33  ;;  %724 = vmatpush1.bf16.msra.mxu1 %v16899_v36  ;;  %vm22746_vm0 = vsmask.f32 7424 }
  0x8e   : > { %2092 = vmatpush1.bf16.msra.mxu0 %v16900_v39  ;;  %v1788_v48 = vor.u32 %v1787_v42, %v1783_v41  ;;  %v16905_v50 = vld [vmem:[#allocation6 + $0x180] ss:$8 sps:$4 sm:$0xff]   ;;  %v16915_v56 = vld [vmem:[#allocation6 + $0x194] ss:$8 sps:$4 sm:$0xff]   ;;  %345 = vst [vmem:[#allocation2 + $0x34] sm:$0xff] %v14091_v54   ;;  %s22568_s30 = scalar_lea.vmem [#allocation9], %s14083_s6 }
  0x8f   : > { %2945 = vmatprep.subr.bf16.mxu0 %v16907_v43  ;;  %v14093_v55 = vld [vmem:[%s18087_s14 + $0x20] sm:$0xff]   ;;  %v16913_v59 = vld [vmem:[#allocation6 + $0x190] ss:$8 sps:$4 sm:$0xff]   ;;  %v14095_v3 = vld [vmem:[%s18087_s14 + $0x28] sm:$0xff]   ;;  %vm22747_vm1 = vsmask.f32 4352 }
  0x90   : > { %742 = vmatmul.mubr.bf16.vlgmr.msra.gmra.mrb[0].mxu1 %v14117_v46  ;;  %350 = vst [vmem:[#allocation2 + $0x40] sm:$0xff] %v14093_v55   ;;  %v16923_v63 = vld [vmem:[#allocation6 + $0x1a4] ss:$8 sps:$4 sm:$0xff]   ;;  %355 = vst [vmem:[#allocation2 + $0x4c] sm:$0xff] %v14095_v3   ;;  %v16921_v4 = vld [vmem:[#allocation6 + $0x1a0] ss:$8 sps:$4 sm:$0xff]  }
  0x91   : > { %v16904_v45 = vld [vmem:[#allocation2 + $0xc] sm:$0xff]   ;;  %v16910_v47 = vld [vmem:[#allocation2 + $0x14] sm:$0xff]   ;;  %751 = vmatprep.mubr.bf16.mxu1 %v22700_v0  ;;  %v16938_v20 = vld [vmem:[#allocation6 + $0x1c0] ss:$8 sps:$4 sm:$0xff]   ;;  %s14931_s11 = sshll.u32 %s17924_s22, 11  ;;  %s13982_s23 = sshll.u32 %s22568_s30, 4  ;;  %s22646_s23 = int_to_ptr.vmem [resolvable:$true] %s13982_s23 }
  0x92   : > { %v1790_v49 = vshll.u32 %v16904_v45, 16  ;;  %v1794_v52 = vshrl.u32 %v16904_v45, 16  ;;  %v1798_v53 = vshll.u32 %v16910_v47, 16  ;;  %v411_v58 = vld [vmem:[#allocation2 + $0x10] sm:$0xf]  ;;  %v1802_v7 = vshrl.u32 %v16910_v47, 16  ;;  %s22644_s8 = scalar_lea.hbm %s22696_s5, %s14931_s11 }
  0x93   : > { %v16912_v62 = vld [vmem:[#allocation2 + $0x1c] sm:$0xff]   ;;  %v14118_v1 = vcombine.low %v410_v35, %v411_v58  ;;  %v14097_v5 = vld [vmem:[%s18087_s14 + $0x30] sm:$0xff]   ;;  %v412_v10 = vld [vmem:[#allocation2 + $0x14] sm:$0xf]  ;;  %s17790_s24 = scalar_lea.vmem %s22646_s23, 2048  ;;  %p23810_p0 = scmp.ne.s32.totalorder %s22820_s29, 0 }
  0x94   : > { %v1792_v51 = vrot.slane %v1790_v49, 1  ;;  %v1800_v61 = vrot.slane %v1798_v53, 1  ;;  %v1806_v8 = vshll.u32 %v16912_v62, 16  ;;  %360 = vst [vmem:[#allocation2 + $0x58] sm:$0xff] %v14097_v5   ;;  %v16930_v9 = vld [vmem:[#allocation6 + $0x1b4] ss:$8 sps:$4 sm:$0xff]   ;;  %p17791_p11 = scmp.ne.s32.totalorder %s22646_s23, %s17790_s24 }
  0x95   : > { %v413_v11 = vld [vmem:[#allocation2 + $0x18] sm:$0xf]  ;;  %v16917_v12 = vld [vmem:[#allocation2 + $0x24] sm:$0xff]   ;;  %v16928_v15 = vld [vmem:[#allocation6 + $0x1b0] ss:$8 sps:$4 sm:$0xff]   ;;  %v1810_v18 = vshrl.u32 %v16912_v62, 16 }
  0x96   : > { %v1793_v57 = vsel %vm22746_vm0, %v1788_v48, %v1792_v51  ;;  %v1796_v60 = vor.u32 %v1794_v52, %v1792_v51  ;;  %v1804_v13 = vor.u32 %v1802_v7, %v1800_v61  ;;  %v1808_v14 = vrot.slane %v1806_v8, 1  ;;  %v16940_v21 = vld [vmem:[#allocation6 + $0x1c4] ss:$8 sps:$4 sm:$0xff]   ;;  %v414_v22 = vld [vmem:[#allocation2 + $0x1c] sm:$0xf]  ;;  %v14099_v24 = vld [vmem:[%s18087_s14 + $0x38] sm:$0xff]   ;;  %p17792_p1 = pnand %p17791_p11, %p23810_p0 }
  0x97   : > { %2110 = vmatmul.mubr.bf16.vlgmr.msra.gmra.mrb[0].mxu0 %v1793_v57  ;;  %v14119_v16 = vcombine.low %v412_v10, %v413_v11  ;;  %v1814_v19 = vshll.u32 %v16917_v12, 16  ;;  %v415_v23 = vld [vmem:[#allocation2 + $0x20] sm:$0xf]  ;;  %v16920_v25 = vld [vmem:[#allocation2 + $0x2c] sm:$0xff]   ;;  %365 = vst [vmem:[#allocation2 + $0x64] sm:$0xff] %v14099_v24   ;;  %v1818_v35 = vshrl.u32 %v16917_v12, 16 }
  0x98   : > { %2946 = vmatpush1.bf16.msra.mxu0 %v16905_v50  ;;  %2119 = vmatprep.mubr.bf16.mxu0 %v22700_v0  ;;  %v1801_v6 = vsel %vm22746_vm0, %v1796_v60, %v1800_v61  ;;  %v1809_v17 = vsel %vm22746_vm0, %v1804_v13, %v1808_v14  ;;  %v1812_v26 = vor.u32 %v1810_v18, %v1808_v14  ;;  %v16946_v28 = vld [vmem:[#allocation6 + $0x1d0] ss:$8 sps:$4 sm:$0xff]   ;;  %v16948_v30 = vld [vmem:[#allocation6 + $0x1d4] ss:$8 sps:$4 sm:$0xff]   ;;  %v14101_v31 = vld [vmem:[%s18087_s14 + $0x40] sm:$0xff]   ;;  %v1822_v36 = vshll.u32 %v16920_v25, 16  ;;  %p17793_p3 = pneg %p17792_p1 }
  0x99   : > { %2947 = vmatprep.subr.bf16.mxu0 %v16915_v56  ;;  %752 = vmatmul.mubr.bf16.gmra.mrb[4].mxu1 %v14118_v1  ;;  %v1816_v27 = vrot.slane %v1814_v19, 1  ;;  %v14120_v29 = vcombine.low %v414_v22, %v415_v23  ;;  %370 = vst [vmem:[#allocation2 + $0x70] sm:$0xff] %v14101_v31   ;;  %v16956_v32 = vld [vmem:[#allocation6 + $0x1e4] ss:$8 sps:$4 sm:$0xff]   ;;  %v416_v34 = vld [vmem:[#allocation2 + $0x24] sm:$0xf] }
  0x9a   : > { %761 = vmatprep.mubr.bf16.mxu1 %v22700_v0  ;;  %v16954_v38 = vld [vmem:[#allocation6 + $0x1e0] ss:$8 sps:$4 sm:$0xff]   ;;  %v14105_v41 = vld [vmem:[%s18087_s14 + $0x50] sm:$0xff]   ;;  %v417_v42 = vld [vmem:[#allocation2 + $0x28] sm:$0xf]  ;;  %v1824_v44 = vrot.slane %v1822_v36, 1 }
  0x9b   : > { %v1817_v33 = vsel %vm22746_vm0, %v1812_v26, %v1816_v27  ;;  %v14103_v39 = vld [vmem:[%s18087_s14 + $0x48] sm:$0xff]   ;;  %380 = vst [vmem:[#allocation2 + $0x88] sm:$0xff] %v14105_v41   ;;  %v1820_v43 = vor.u32 %v1818_v35, %v1816_v27  ;;  %v16925_v45 = vld [vmem:[#allocation2 + $0x34] sm:$0xff]   ;;  %v14121_v48 = vcombine.low %v416_v34, %v417_v42  ;;  %v1826_v50 = vshrl.u32 %v16920_v25, 16  ;;  %v418_v52 = vld [vmem:[#allocation2 + $0x2c] sm:$0xf] }
  0x9c   : > { %2948 = vmatpush1.bf16.msra.mxu0 %v16913_v59  ;;  %375 = vst [vmem:[#allocation2 + $0x7c] sm:$0xff] %v14103_v39   ;;  %v16961_v46 = vld [vmem:[#allocation6 + $0x1f0] ss:$8 sps:$4 sm:$0xff]   ;;  %v16963_v47 = vld [vmem:[#allocation6 + $0x1f4] ss:$8 sps:$4 sm:$0xff]   ;;  %v1830_v51 = vshll.u32 %v16925_v45, 16 }
  0x9d   : > { %2949 = vmatprep.subr.bf16.mxu0 %v16923_v63  ;;  %v1825_v49 = vsel %vm22746_vm0, %v1820_v43, %v1824_v44  ;;  %v419_v53 = vld [vmem:[#allocation2 + $0x30] sm:$0xf]  ;;  %v14107_v54 = vld [vmem:[%s18087_s14 + $0x58] sm:$0xff]   ;;  %v1828_v55 = vor.u32 %v1826_v50, %v1824_v44  ;;  %v16927_v57 = vld [vmem:[#allocation2 + $0x3c] sm:$0xff]   ;;  %v1834_v61 = vshrl.u32 %v16925_v45, 16  ;;  %v1016_v26 = vshrl.u32 %v18158_v37, 16 }
  0x9e   : > { %v1832_v56 = vrot.slane %v1830_v51, 1  ;;  %385 = vst [vmem:[#allocation2 + $0x94] sm:$0xff] %v14107_v54   ;;  %v14122_v58 = vcombine.low %v418_v52, %v419_v53  ;;  %v16974_v59 = vld [vmem:[#allocation6 + $0x204] ss:$8 sps:$4 sm:$0xff]   ;;  %v1838_v62 = vshll.u32 %v16927_v57, 16  ;;  %v1842_v14 = vshrl.u32 %v16927_v57, 16 }
  0x9f   : > { %2120 = vmatmul.mubr.bf16.gmra.mrb[4].mxu0 %v1801_v6  ;;  %v14109_v63 = vld [vmem:[%s18087_s14 + $0x60] sm:$0xff]   ;;  %v420_v1 = vld [vmem:[#allocation2 + $0x34] sm:$0xf]  ;;  %v421_v3 = vld [vmem:[#allocation2 + $0x38] sm:$0xf]  ;;  %v1019_v27 = vshll.u32 %v18158_v37, 16 }
  0xa0   : > { %2129 = vmatprep.mubr.bf16.mxu0 %v22700_v0  ;;  %2950 = vmatpush1.bf16.msra.mxu0 %v16921_v4  ;;  %v1833_v60 = vsel %vm22746_vm0, %v1828_v55, %v1832_v56  ;;  %390 = vst [vmem:[#allocation2 + $0xa0] sm:$0xff] %v14109_v63   ;;  %v407_v4 = vld [vmem:[#allocation2] sm:$0x8]  ;;  %v1836_v5 = vor.u32 %v1834_v61, %v1832_v56  ;;  %v1840_v6 = vrot.slane %v1838_v62, 1  ;;  %v16933_v7 = vld [vmem:[#allocation2 + $0x44] sm:$0xff]   ;;  %v16937_v45 = vld [vmem:[#allocation2 + $0x54] sm:$0xff]  }
  0xa1   : > { %2951 = vmatprep.subr.bf16.mxu0 %v16930_v9  ;;  %762 = vmatmul.mubr.bf16.gmra.mrb[8].mxu1 %v14119_v16  ;;  %v16979_v8 = vld [vmem:[#allocation6] ss:$8 sps:$4 sm:$0xff]   ;;  %v14123_v9 = vcombine.low %v420_v1, %v421_v3  ;;  %v16981_v10 = vld [vmem:[#allocation6 + $0x4] ss:$8 sps:$4 sm:$0xff]   ;;  %v14157_v11 = vcombine.low %v407_v4, %v18161_v40  ;;  %v16985_v12 = vld [vmem:[#allocation6 + $0x14] ss:$8 sps:$4 sm:$0xff]  }
  0xa2   : > { %771 = vmatprep.mubr.bf16.mxu1 %v22700_v0  ;;  %1326 = vmatprep.subr.bf16.mxu1 %v16981_v10  ;;  %v1841_v13 = vsel %vm22746_vm0, %v1836_v5, %v1840_v6  ;;  %v16983_v16 = vld [vmem:[#allocation6 + $0x10] ss:$8 sps:$4 sm:$0xff]   ;;  %v422_v18 = vld [vmem:[#allocation2 + $0x3c] sm:$0xf]  ;;  %v423_v19 = vld [vmem:[#allocation2 + $0x40] sm:$0xf]  ;;  %v1844_v23 = vor.u32 %v1842_v14, %v1840_v6 }
  0xa3   : > { %1327 = vmatpush1.bf16.msra.mxu1 %v16979_v8  ;;  %v16935_v40 = vld [vmem:[#allocation2 + $0x4c] sm:$0xff]   ;;  %v1011_v22 = vshll.u32 %v14157_v11, 16  ;;  %v16987_v25 = vld [vmem:[#allocation6 + $0x20] ss:$8 sps:$4 sm:$0xff]   ;;  %v1850_v34 = vshrl.u32 %v16933_v7, 16  ;;  %v1021_v39 = vrot.slane %v1019_v27, 4 }
  0xa4   : > { %2952 = vmatpush1.bf16.msra.mxu0 %v16928_v15  ;;  %v1846_v15 = vshll.u32 %v16933_v7, 16  ;;  %1328 = vmatprep.subr.bf16.mxu1 %v16985_v12  ;;  %v1854_v35 = vshll.u32 %v16935_v40, 16  ;;  %v16994_v36 = vld [vmem:[#allocation6 + $0x30] ss:$8 sps:$4 sm:$0xff]   ;;  %v17001_v41 = vld [vmem:[#allocation6 + $0x44] ss:$8 sps:$4 sm:$0xff]  }
  0xa5   : > { %2953 = vmatprep.subr.bf16.mxu0 %v16940_v21  ;;  %v1008_v21 = vshrl.u32 %v14157_v11, 16  ;;  %v424_v37 = vld [vmem:[#allocation2 + $0x44] sm:$0xf]  ;;  %v425_v42 = vld [vmem:[#allocation2 + $0x48] sm:$0xf]  ;;  %v1858_v53 = vshrl.u32 %v16935_v40, 16 }
  0xa6   : > { %v1848_v24 = vrot.slane %v1846_v15, 1  ;;  %v1856_v44 = vrot.slane %v1854_v35, 1  ;;  %v1862_v54 = vshll.u32 %v16937_v45, 16  ;;  %v17003_v55 = vld [vmem:[#allocation6 + $0x50] ss:$8 sps:$4 sm:$0xff]   ;;  %v1866_v4 = vshrl.u32 %v16937_v45, 16 }
  0xa7   : > { %2130 = vmatmul.mubr.bf16.gmra.mrb[8].mxu0 %v1809_v17  ;;  %v14111_v17 = vld [vmem:[%s18087_s14 + $0x68] sm:$0xff]   ;;  %1329 = vmatpush1.bf16.msra.mxu1 %v16983_v16  ;;  %v1010_v31 = vrot.slane %v1008_v21, 3  ;;  %v426_v56 = vld [vmem:[#allocation2 + $0x4c] sm:$0xf]  ;;  %v427_v57 = vld [vmem:[#allocation2 + $0x50] sm:$0xf] }
  0xa8   : > { %2139 = vmatprep.mubr.bf16.mxu0 %v22700_v0  ;;  %2954 = vmatpush1.bf16.msra.mxu0 %v16938_v20  ;;  %395 = vst [vmem:[#allocation2 + $0xac] sm:$0xff] %v14111_v17   ;;  %v16989_v20 = vld [vmem:[#allocation6 + $0x24] ss:$8 sps:$4 sm:$0xff]   ;;  %v1852_v43 = vor.u32 %v1850_v34, %v1848_v24  ;;  %v1860_v61 = vor.u32 %v1858_v53, %v1856_v44  ;;  %v1864_v62 = vrot.slane %v1862_v54, 1  ;;  %v17013_v63 = vld [vmem:[#allocation6 + $0x74] ss:$8 sps:$4 sm:$0xff]  }
  0xa9   : > { %2955 = vmatprep.subr.bf16.mxu0 %v16948_v30  ;;  %772 = vmatmul.mubr.bf16.gmra.mrb[12].mxu1 %v14120_v29  ;;  %v16996_v29 = vld [vmem:[#allocation6 + $0x34] ss:$8 sps:$4 sm:$0xff]   ;;  %v14126_v1 = vcombine.low %v426_v56, %v427_v57  ;;  %v17011_v3 = vld [vmem:[#allocation6 + $0x70] ss:$8 sps:$4 sm:$0xff]   ;;  %v16945_v11 = vld [vmem:[#allocation2 + $0x64] sm:$0xff]   ;;  %s17870_s22 = smov [#allocation9]  }
  0xaa   : > { %781 = vmatprep.mubr.bf16.mxu1 %v22700_v0  ;;  %1330 = vmatprep.subr.bf16.mxu1 %v16989_v20  ;;  %v14113_v30 = vld [vmem:[%s18087_s14 + $0x70] sm:$0xff]   ;;  %v1857_v52 = vsel %vm22746_vm0, %v1852_v43, %v1856_v44  ;;  %v1865_v5 = vsel %vm22746_vm0, %v1860_v61, %v1864_v62  ;;  %v428_v7 = vld [vmem:[#allocation2 + $0x54] sm:$0xf]  ;;  %v429_v8 = vld [vmem:[#allocation2 + $0x58] sm:$0xf]  ;;  %v1878_v16 = vshll.u32 %v16945_v11, 16 }
  0xab   : > { %400 = vst [vmem:[#allocation2 + $0xb8] sm:$0xff] %v14113_v30   ;;  %1331 = vmatpush1.bf16.msra.mxu1 %v16987_v25  ;;  %v14127_v12 = vcombine.low %v428_v7, %v429_v8  ;;  %v430_v14 = vld [vmem:[#allocation2 + $0x5c] sm:$0xf]  ;;  %v431_v17 = vld [vmem:[#allocation2 + $0x60] sm:$0xf]  ;;  %v1882_v40 = vshrl.u32 %v16945_v11, 16 }
  0xac   : > { %2956 = vmatpush1.bf16.msra.mxu0 %v16946_v28  ;;  %v14124_v28 = vcombine.low %v422_v18, %v423_v19  ;;  %1332 = vmatprep.subr.bf16.mxu1 %v16996_v29  ;;  %v16950_v18 = vld [vmem:[#allocation2 + $0x6c] sm:$0xff]   ;;  %v1880_v20 = vrot.slane %v1878_v16, 1  ;;  %v14128_v21 = vcombine.low %v430_v14, %v431_v17  ;;  %v16953_v25 = vld [vmem:[#allocation2 + $0x74] sm:$0xff]   ;;  %v439_v54 = vld [vmem:[#allocation2 + $0x80] sm:$0xf]  ;;  %s17794_s26 = sshll.u32 %s17870_s22, 4  ;;  %s17795_s26 = int_to_ptr.vmem [resolvable:$false] %s17794_s26 }
  0xad   : > { %2957 = vmatprep.subr.bf16.mxu0 %v16956_v32  ;;  %v1013_v32 = vrot.slane %v1011_v22, 4  ;;  %v1886_v22 = vshll.u32 %v16950_v18, 16  ;;  %v1890_v29 = vshrl.u32 %v16950_v18, 16  ;;  %v1894_v30 = vshll.u32 %v16953_v25, 16  ;;  %v437_v43 = vld [vmem:[#allocation2 + $0x78] sm:$0xf]  ;;  %p17797_p5 = scmp.lt.s32.totalorder %s22646_s23, %s17795_s26 }
  0xae   : > { %v2442_v56 = vld [vmem:[#allocation2 + $0xc] sm:$0x8]  ;;  %v441_v7 = vld [vmem:[#allocation2 + $0x88] sm:$0xf]  ;;  %v2447_v18 = vld [vmem:[#allocation2 + $0x20] sm:$0xf] }
  0xaf   : > { %2140 = vmatmul.mubr.bf16.gmra.mrb[12].mxu0 %v1817_v33  ;;  %v1849_v33 = vsel %vm22746_vm0, %v1844_v23, %v1848_v24  ;;  %1333 = vmatpush1.bf16.msra.mxu1 %v16994_v36  ;;  %v432_v23 = vld [vmem:[#allocation2 + $0x64] sm:$0xf]  ;;  %v433_v24 = vld [vmem:[#allocation2 + $0x68] sm:$0xf]  ;;  %v1888_v27 = vrot.slane %v1886_v22, 1  ;;  %v1896_v35 = vrot.slane %v1894_v30, 1 }
  0xb0   : > { %2149 = vmatprep.mubr.bf16.mxu0 %v22700_v0  ;;  %2958 = vmatpush1.bf16.msra.mxu0 %v16954_v38  ;;  %v1018_v38 = vrot.slane %v1016_v26, 3  ;;  %v1884_v26 = vor.u32 %v1882_v40, %v1880_v20  ;;  %v16958_v36 = vld [vmem:[#allocation2 + $0x7c] sm:$0xff]   ;;  %s17796_s12 = scalar_lea.vmem %s17795_s26, 4096 }
  0xb1   : > { %2959 = vmatprep.subr.bf16.mxu0 %v16963_v47  ;;  %782 = vmatmul.mubr.bf16.gmra.mrb[16].mxu1 %v14121_v48  ;;  %v1014_v47 = vor.u32 %v1013_v32, %v1010_v31  ;;  %v14125_v48 = vcombine.low %v424_v37, %v425_v42  ;;  %v434_v32 = vld [vmem:[#allocation2 + $0x6c] sm:$0xf]  ;;  %v1892_v34 = vor.u32 %v1890_v29, %v1888_v27  ;;  %v1902_v37 = vshll.u32 %v16958_v36, 16  ;;  %v436_v42 = vld [vmem:[#allocation2 + $0x74] sm:$0xf]  ;;  %p17798_p9 = scmp.lt.s32.totalorder %s17796_s12, %s17790_s24 }
  0xb2   : > { %791 = vmatprep.mubr.bf16.mxu1 %v22700_v0  ;;  %1334 = vmatprep.subr.bf16.mxu1 %v17001_v41  ;;  %v18204_v50 = vor.u32 %v1021_v39, %v1018_v38  ;;  %v1889_v31 = vsel %vm22746_vm0, %v1884_v26, %v1888_v27  ;;  %v1898_v39 = vshrl.u32 %v16953_v25, 16  ;;  %v2448_v25 = vld [vmem:[#allocation2 + $0x24] sm:$0xf]  ;;  %v2449_v26 = vld [vmem:[#allocation2 + $0x28] sm:$0xf] }
  0xb3   : > { %v1897_v41 = vsel %vm22746_vm0, %v1892_v34, %v1896_v35  ;;  %v1904_v45 = vrot.slane %v1902_v37, 1  ;;  %v2451_v29 = vld [vmem:[#allocation2 + $0x30] sm:$0xf]  ;;  %p17799_p12 = por %p17798_p9, %p17797_p5 }
  0xb4   : > { %2960 = vmatpush1.bf16.msra.mxu0 %v16961_v46  ;;  %v16999_v46 = vld [vmem:[#allocation6 + $0x40] ss:$8 sps:$4 sm:$0xff]   ;;  %v18208_v51 = vsel %vm22747_vm1, %v1014_v47, %v18204_v50  ;;  %v1900_v44 = vor.u32 %v1898_v39, %v1896_v35  ;;  %v14131_v47 = vcombine.low %v436_v42, %v437_v43  ;;  %v444_v39 = vld [vmem:[#allocation2 + $0x94] sm:$0xf] }
  0xb5   : > { %3454 = vmatprep.subr.bf16.mxu0 %v16974_v59  ;;  %1335 = vmatpush1.bf16.msra.mxu1 %v16999_v46  ;;  %v16943_v59 = vld [vmem:[#allocation2 + $0x5c] sm:$0xff]   ;;  %v16960_v46 = vld [vmem:[#allocation2 + $0x84] sm:$0xff]   ;;  %p17800_p2 = pnand %p17799_p12, %p17793_p3 }
  0xb6   : > { %v1870_v6 = vshll.u32 %v16943_v59, 16  ;;  %v1874_v15 = vshrl.u32 %v16943_v59, 16  ;;  %v1910_v53 = vshll.u32 %v16960_v46, 16  ;;  %v2443_v59 = vld [vmem:[#allocation2 + $0x10] sm:$0xf] }
  0xb7   : > { %2150 = vmatmul.mubr.bf16.gmra.mrb[16].mxu0 %v1825_v49  ;;  %v17005_v49 = vld [vmem:[#allocation6 + $0x54] ss:$8 sps:$4 sm:$0xff]  }
  0xb8   : > { %2159 = vmatprep.mubr.bf16.mxu0 %v22700_v0  ;;  %1336 = vmatprep.subr.bf16.mxu1 %v17005_v49  ;;  %v1872_v10 = vrot.slane %v1870_v6, 1  ;;  %v438_v49 = vld [vmem:[#allocation2 + $0x7c] sm:$0xf]  ;;  %v14237_v6 = vcombine.low %v2442_v56, %v2443_v59 }
  0xb9   : > { %792 = vmatmul.mubr.bf16.gmra.mrb[20].mxu1 %v14122_v58  ;;  %v17009_v58 = vld [vmem:[#allocation6 + $0x64] ss:$8 sps:$4 sm:$0xff]   ;;  %v446_v56 = vld [vmem:[#allocation2 + $0x9c] sm:$0xf] }
  0xba   : > { %801 = vmatprep.mubr.bf16.mxu1 %v22700_v0  ;;  %1337 = vmatpush1.bf16.msra.mxu1 %v17003_v55  ;;  %v1876_v19 = vor.u32 %v1874_v15, %v1872_v10  ;;  %v16966_v55 = vld [vmem:[#allocation2 + $0x8c] sm:$0xff]   ;;  %v2446_v15 = vld [vmem:[#allocation2 + $0x1c] sm:$0xf] }
  0xbb   : > { %1338 = vmatprep.subr.bf16.mxu1 %v17009_v58  ;;  %v1912_v58 = vrot.slane %v1910_v53, 1  ;;  %v1918_v61 = vshll.u32 %v16966_v55, 16  ;;  %v1922_v16 = vshrl.u32 %v16966_v55, 16  ;;  %v2452_v53 = vld [vmem:[#allocation2 + $0x34] sm:$0xf] }
  0xbd   : > { %v1920_v8 = vrot.slane %v1918_v61, 1  ;;  %v16991_v61 = vld [vmem:[#allocation6 + $0x210] ss:$8 sps:$4 sm:$0xff]  }
  0xbf   : > { %2160 = vmatmul.mubr.bf16.gmra.mrb[20].mxu0 %v1833_v60  ;;  %v17007_v60 = vld [vmem:[#allocation6 + $0x60] ss:$8 sps:$4 sm:$0xff]   ;;  %v1924_v27 = vor.u32 %v1922_v16, %v1920_v8  ;;  %v17021_v16 = vld [vmem:[#allocation6 + $0x230] ss:$8 sps:$4 sm:$0xff]  }
  0xc0   : > { %2169 = vmatprep.mubr.bf16.mxu0 %v22700_v0  ;;  %1339 = vmatpush1.bf16.msra.mxu1 %v17007_v60  ;;  %v14132_v60 = vcombine.low %v438_v49, %v439_v54  ;;  %v2453_v54 = vld [vmem:[#allocation2 + $0x38] sm:$0xf] }
  0xc1   : > { %802 = vmatmul.mubr.bf16.gmra.mrb[24].mxu1 %v14123_v9  ;;  %1340 = vmatprep.subr.bf16.mxu1 %v17013_v63  ;;  %v1868_v9 = vor.u32 %v1866_v4, %v1864_v62  ;;  %v2444_v62 = vld [vmem:[#allocation2 + $0x14] sm:$0xf]  ;;  %v2445_v63 = vld [vmem:[#allocation2 + $0x18] sm:$0xf]  ;;  %v440_v4 = vld [vmem:[#allocation2 + $0x84] sm:$0xf] }
  0xc2   : > { %811 = vmatprep.mubr.bf16.mxu1 %v22700_v0  ;;  %v14133_v14 = vcombine.low %v440_v4, %v441_v7  ;;  %v17017_v4 = vld [vmem:[#allocation6 + $0x224] ss:$8 sps:$4 sm:$0xff]  }
  0xc4   : > { %1341 = vmatpush1.bf16.msra.mxu1 %v17011_v3 }
  0xc5   : > { %16029 = vmatprep.subr.bf16.mxu1 %v18154_v2  ;;  %v1881_v2 = vsel %vm22746_vm0, %v1876_v19, %v1880_v20  ;;  %v442_v20 = vld [vmem:[#allocation2 + $0x8c] sm:$0xf] }
  0xc7   : > { %2170 = vmatmul.mubr.bf16.gmra.mrb[24].mxu0 %v1841_v13  ;;  %v1873_v13 = vsel %vm22746_vm0, %v1868_v9, %v1872_v10  ;;  %v14238_v9 = vcombine.low %v2444_v62, %v2445_v63  ;;  %v14242_v62 = vcombine.low %v2452_v53, %v2453_v54 }
  0xc8   : > { %2179 = vmatprep.mubr.bf16.mxu0 %v22700_v0 }
  0xc9   : > { %812 = vmatmul.mubr.bf16.gmra.mrb[28].mxu1 %v14124_v28  ;;  %v14129_v28 = vcombine.low %v432_v23, %v433_v24  ;;  %v2635_v17 = vshrl.u32 %v14238_v9, 16  ;;  %v2638_v23 = vshll.u32 %v14238_v9, 16  ;;  %v14239_v24 = vcombine.low %v2446_v15, %v2447_v18 }
  0xca   : > { %821 = vmatprep.mubr.bf16.mxu1 %v22700_v0  ;;  %v2674_v7 = vshll.u32 %v14242_v62, 16 }
  0xcb   : > { %v2647_v34 = vshll.u32 %v14239_v24, 16 }
  0xcf   : > { %2180 = vmatmul.mubr.bf16.gmra.mrb[28].mxu0 %v1849_v33  ;;  %v435_v33 = vld [vmem:[#allocation2 + $0x70] sm:$0xf] }
  0xd0   : > { %2189 = vmatprep.mubr.bf16.mxu0 %v22700_v0  ;;  %v14130_v38 = vcombine.low %v434_v32, %v435_v33  ;;  %v2640_v32 = vrot.slane %v2638_v23, 4  ;;  %v2644_v33 = vshrl.u32 %v14239_v24, 16  ;;  %v450_v23 = vld [vmem:[#allocation2 + $0xac] sm:$0xf]  ;;  %v451_v24 = vld [vmem:[#allocation2 + $0xb0] sm:$0xf] }
  0xd1   : > { %822 = vmatmul.mubr.bf16.gmra.mrb[32].mxu1 %v14125_v48  ;;  %v1905_v48 = vsel %vm22746_vm0, %v1900_v44, %v1904_v45  ;;  %v2649_v44 = vrot.slane %v2647_v34, 4  ;;  %v2458_v34 = vld [vmem:[#allocation2 + $0x4c] sm:$0xf] }
  0xd2   : > { %831 = vmatprep.mubr.bf16.mxu1 %v22700_v0  ;;  %v2646_v43 = vrot.slane %v2644_v33, 3  ;;  %v14138_v33 = vcombine.low %v450_v23, %v451_v24  ;;  %v17047_v23 = vld [vmem:[#allocation6 + $0x274] ss:$8 sps:$4 sm:$0xff]  }
  0xd4   : > { %v2650_v63 = vor.u32 %v2649_v44, %v2646_v43  ;;  %v17558_v43 = vld [vmem:[#allocation2 + $0x14] sm:$0xf] }
  0xd7   : > { %2190 = vmatmul.mubr.bf16.gmra.mrb[32].mxu0 %v1857_v52  ;;  %v1906_v52 = vshrl.u32 %v16958_v36, 16  ;;  %v14240_v36 = vcombine.low %v2448_v25, %v2449_v26 }
  0xd8   : > { %2199 = vmatprep.mubr.bf16.mxu0 %v22700_v0 }
  0xd9   : > { %832 = vmatmul.mubr.bf16.gmra.mrb[36].mxu1 %v14126_v1  ;;  %v1908_v57 = vor.u32 %v1906_v52, %v1904_v45  ;;  %v16968_v1 = vld [vmem:[#allocation2 + $0x94] sm:$0xff]   ;;  %v2653_v45 = vshrl.u32 %v14240_v36, 16  ;;  %v16972_v52 = vld [vmem:[#allocation6 + $0x200] ss:$8 sps:$4 sm:$0xff]  }
  0xda   : > { %841 = vmatprep.mubr.bf16.mxu1 %v22700_v0  ;;  %v1926_v11 = vshll.u32 %v16968_v1, 16 }
  0xdb   : > { %v1913_v3 = vsel %vm22746_vm0, %v1908_v57, %v1912_v58  ;;  %v447_v57 = vld [vmem:[#allocation2 + $0xa0] sm:$0xf] }
  0xdc   : > { %v18236_v40 = vrot.slane %v1926_v11, 1  ;;  %v449_v11 = vld [vmem:[#allocation2 + $0xa8] sm:$0xf] }
  0xde   : > { %v1929_v35 = vsel %vm22746_vm0, %v1924_v27, %v18236_v40  ;;  %v17035_v27 = vld [vmem:[#allocation6 + $0x254] ss:$8 sps:$4 sm:$0xff]  }
  0xdf   : > { %2200 = vmatmul.mubr.bf16.gmra.mrb[36].mxu0 %v1865_v5  ;;  %v1914_v5 = vshrl.u32 %v16960_v46, 16  ;;  %v2656_v46 = vshll.u32 %v14240_v36, 16  ;;  %v17039_v36 = vld [vmem:[#allocation6 + $0x260] ss:$8 sps:$4 sm:$0xff]  }
  0xe0   : > { %2209 = vmatprep.mubr.bf16.mxu0 %v22700_v0 }
  0xe1   : > { %842 = vmatmul.mubr.bf16.gmra.mrb[40].mxu1 %v14127_v12  ;;  %v1916_v10 = vor.u32 %v1914_v5, %v1912_v58  ;;  %v2627_v12 = vshrl.u32 %v14237_v6, 16  ;;  %v2655_v58 = vrot.slane %v2653_v45, 3  ;;  %v2658_v59 = vrot.slane %v2656_v46, 4 }
  0xe2   : > { %851 = vmatprep.mubr.bf16.mxu1 %v22700_v0  ;;  %v14136_v5 = vcombine.low %v446_v56, %v447_v57  ;;  %v17559_v57 = vld [vmem:[#allocation2 + $0x18] sm:$0xf] }
  0xe3   : > { %v1921_v19 = vsel %vm22746_vm0, %v1916_v10, %v1920_v8  ;;  %v2629_v22 = vrot.slane %v2627_v12, 3  ;;  %v17015_v8 = vld [vmem:[#allocation6 + $0x220] ss:$8 sps:$4 sm:$0xff]   ;;  %v2659_v15 = vor.u32 %v2658_v59, %v2655_v58 }
  0xe4   : > { %v448_v10 = vld [vmem:[#allocation2 + $0xa4] sm:$0xf]  ;;  %v2454_v12 = vld [vmem:[#allocation2 + $0x3c] sm:$0xf] }
  0xe5   : > { %v14137_v18 = vcombine.low %v448_v10, %v449_v11  ;;  %v17560_v58 = vld [vmem:[#allocation2 + $0x1c] sm:$0xf] }
  0xe6   : > { %v14160_v59 = vcombine.low %v17559_v57, %v17560_v58  ;;  %v17571_v58 = vld [vmem:[#allocation6 + $0x130] ss:$8 sps:$4 sm:$0xff]  }
  0xe7   : > { %2210 = vmatmul.mubr.bf16.gmra.mrb[40].mxu0 %v1873_v13  ;;  %v2630_v13 = vshll.u32 %v14237_v6, 16  ;;  %v2671_v6 = vshrl.u32 %v14242_v62, 16 }
  0xe8   : > { %2219 = vmatprep.mubr.bf16.mxu0 %v22700_v0 }
  0xe9   : > { %852 = vmatmul.mubr.bf16.gmra.mrb[44].mxu1 %v14128_v21  ;;  %v443_v21 = vld [vmem:[#allocation2 + $0x90] sm:$0xf] }
  0xea   : > { %861 = vmatprep.mubr.bf16.mxu1 %v22700_v0  ;;  %v14134_v30 = vcombine.low %v442_v20, %v443_v21  ;;  %v2673_v20 = vrot.slane %v2671_v6, 3  ;;  %v2676_v21 = vrot.slane %v2674_v7, 4  ;;  %v1034_v7 = vshrl.u32 %v14160_v59, 16 }
  0xec   : > { %v2677_v46 = vor.u32 %v2676_v21, %v2673_v20  ;;  %v17561_v20 = vld [vmem:[#allocation2 + $0x20] sm:$0xf]  ;;  %v17562_v21 = vld [vmem:[#allocation2 + $0x24] sm:$0xf] }
  0xef   : > { %2220 = vmatmul.mubr.bf16.gmra.mrb[44].mxu0 %v1881_v2  ;;  %v2632_v2 = vrot.slane %v2630_v13, 4  ;;  %v2455_v13 = vld [vmem:[#allocation2 + $0x40] sm:$0xf] }
  0xf0   : > { %2229 = vmatprep.mubr.bf16.mxu0 %v22700_v0 }
  0xf1   : > { %862 = vmatmul.mubr.bf16.gmra.mrb[48].mxu1 %v14129_v28  ;;  %v2450_v28 = vld [vmem:[#allocation2 + $0x2c] sm:$0xf]  ;;  %v2633_v37 = vor.u32 %v2632_v2, %v2629_v22  ;;  %v17027_v22 = vld [vmem:[#allocation6 + $0x240] ss:$8 sps:$4 sm:$0xff]   ;;  %v2660_v2 = vsel %vm22747_vm1, %v2650_v63, %v2659_v15 }
  0xf2   : > { %871 = vmatprep.mubr.bf16.mxu1 %v22700_v0 }
  0xf7   : > { %2230 = vmatmul.mubr.bf16.gmra.mrb[48].mxu0 %v1889_v31  ;;  %v2637_v31 = vrot.slane %v2635_v17, 3  ;;  %v17029_v17 = vld [vmem:[#allocation6 + $0x244] ss:$8 sps:$4 sm:$0xff]  }
  0xf8   : > { %2239 = vmatprep.mubr.bf16.mxu0 %v22700_v0 }
  0xf9   : > { %872 = vmatmul.mubr.bf16.gmra.mrb[52].mxu1 %v14130_v38  ;;  %v14241_v38 = vcombine.low %v2450_v28, %v2451_v29  ;;  %v2641_v42 = vor.u32 %v2640_v32, %v2637_v31  ;;  %v2456_v28 = vld [vmem:[#allocation2 + $0x44] sm:$0xf]  ;;  %v2457_v29 = vld [vmem:[#allocation2 + $0x48] sm:$0xf]  ;;  %v17033_v31 = vld [vmem:[#allocation6 + $0x250] ss:$8 sps:$4 sm:$0xff]  }
  0xfa   : > { %881 = vmatprep.mubr.bf16.mxu1 %v22700_v0  ;;  %v17041_v32 = vld [vmem:[#allocation6 + $0x264] ss:$8 sps:$4 sm:$0xff]  }
  0xfb   : > { %v2642_v55 = vsel %vm22747_vm1, %v2633_v37, %v2641_v42  ;;  %v2651_v9 = vsel %vm22747_vm1, %v2641_v42, %v2650_v63  ;;  %v453_v37 = vld [vmem:[#allocation2 + $0xb8] sm:$0xf]  ;;  %v17557_v42 = vld [vmem:[#allocation2 + $0x10] sm:$0xf]  ;;  %v2460_v63 = vld [vmem:[#allocation2 + $0x54] sm:$0xf] }
  0xfc   : > { %v14159_v44 = vcombine.low %v17557_v42, %v17558_v43  ;;  %v17565_v43 = vld [vmem:[#allocation6 + $0x110] ss:$8 sps:$4 sm:$0xff]  }
  0xfe   : > { %v1025_v54 = vshrl.u32 %v14159_v44, 16 }
  0xff   : > { %2240 = vmatmul.mubr.bf16.gmra.mrb[52].mxu0 %v1897_v41  ;;  %v445_v41 = vld [vmem:[#allocation2 + $0x98] sm:$0xf] }
 0x100   : > { %2249 = vmatprep.mubr.bf16.mxu0 %v22700_v0  ;;  %v14135_v49 = vcombine.low %v444_v39, %v445_v41  ;;  %v14244_v39 = vcombine.low %v2456_v28, %v2457_v29  ;;  %v452_v41 = vld [vmem:[#allocation2 + $0xb4] sm:$0xf]  ;;  %v1027_v11 = vrot.slane %v1025_v54, 3 }
 0x101   : > { %882 = vmatmul.mubr.bf16.gmra.mrb[56].mxu1 %v14131_v47  ;;  %v2662_v47 = vshrl.u32 %v14241_v38, 16 }
 0x102   : > { %891 = vmatprep.mubr.bf16.mxu1 %v22700_v0  ;;  %v2692_v53 = vshll.u32 %v14244_v39, 16 }
 0x103   : > { %v2664_v1 = vrot.slane %v2662_v47, 3 }
 0x104   : > { %v2694_v6 = vrot.slane %v2692_v53, 4  ;;  %v17570_v53 = vld [vmem:[#allocation2 + $0x2c] sm:$0xf] }
 0x107   : > { %2250 = vmatmul.mubr.bf16.gmra.mrb[56].mxu0 %v1905_v48  ;;  %v2665_v48 = vshll.u32 %v14241_v38, 16 }
 0x108   : > { %2259 = vmatprep.mubr.bf16.mxu0 %v22700_v0 }
 0x109   : > { %892 = vmatmul.mubr.bf16.gmra.mrb[60].mxu1 %v14132_v60  ;;  %v16993_v60 = vld [vmem:[#allocation6 + $0x214] ss:$8 sps:$4 sm:$0xff]  }
 0x10a   : > { %901 = vmatprep.mubr.bf16.mxu1 %v22700_v0 }
 0x10f   : > { %2260 = vmatmul.mubr.bf16.gmra.mrb[60].mxu0 %v1913_v3  ;;  %v2667_v3 = vrot.slane %v2665_v48, 4 }
 0x110   : > { %2269 = vmatprep.mubr.bf16.mxu0 %v22700_v0 }
 0x111   : > { %902 = vmatmul.mubr.bf16.gmra.mrb[64].mxu1 %v14133_v14  ;;  %v17023_v14 = vld [vmem:[#allocation6 + $0x234] ss:$8 sps:$4 sm:$0xff]  }
 0x112   : > { %911 = vmatprep.mubr.bf16.mxu1 %v22700_v0 }
 0x117   : > { %2270 = vmatmul.mubr.bf16.gmra.mrb[64].mxu0 %v1921_v19  ;;  %v14243_v19 = vcombine.low %v2454_v12, %v2455_v13 }
 0x118   : > { %2279 = vmatprep.mubr.bf16.mxu0 %v22700_v0 }
 0x119   : > { %912 = vmatmul.mubr.bf16.gmra.mrb[68].mxu1 %v14134_v30  ;;  %v2680_v25 = vshrl.u32 %v14243_v19, 16  ;;  %v2683_v26 = vshll.u32 %v14243_v19, 16  ;;  %v2668_v30 = vor.u32 %v2667_v3, %v2664_v1  ;;  %v2461_v1 = vld [vmem:[#allocation2 + $0x58] sm:$0xf] }
 0x11a   : > { %921 = vmatprep.mubr.bf16.mxu1 %v22700_v0  ;;  %v14115_v3 = vld [vmem:[%s18087_s14 + $0x78] sm:$0xff]   ;;  %v14246_v10 = vcombine.low %v2460_v63, %v2461_v1  ;;  %s13969_s14 = scalar_lea.sflag [#allocation5], %s18081_s17 }
 0x11b   : > { %v2669_v38 = vsel %vm22747_vm1, %v2659_v15, %v2668_v30  ;;  %v2682_v47 = vrot.slane %v2680_v25, 3  ;;  %v2685_v48 = vrot.slane %v2683_v26, 4  ;;  %405 = vst [vmem:[#allocation2 + $0xc4] sm:$0xff] %v14115_v3   ;;  %v2462_v25 = vld [vmem:[#allocation2 + $0x5c] sm:$0xf] }
 0x11c   : > { %v2710_v19 = vshll.u32 %v14246_v10, 16  ;;  %v2463_v26 = vld [vmem:[#allocation2 + $0x60] sm:$0xf]  ;;  %v17573_v3 = vld [vmem:[#allocation6 + $0x140] ss:$8 sps:$4 sm:$0xff]  }
 0x11e   : > { %v2712_v28 = vrot.slane %v2710_v19, 4 }
 0x11f   : > { %2280 = vmatmul.mubr.bf16.gmra.mrb[68].mxu0 %v1929_v35  ;;  %v2459_v35 = vld [vmem:[#allocation2 + $0x50] sm:$0xf] }
 0x120   : > { %2977 = vmatprep.mubr.bf16.mxu0 %v22700_v0  ;;  %v14245_v45 = vcombine.low %v2458_v34, %v2459_v35  ;;  %v17563_v34 = vld [vmem:[#allocation6 + $0x100] ss:$8 sps:$4 sm:$0xff]   ;;  %v17564_v35 = vld [vmem:[#allocation6 + $0x114] ss:$8 sps:$4 sm:$0xff]  }
 0x121   : > { %922 = vmatmul.mubr.bf16.gmra.mrb[72].mxu1 %v14135_v49  ;;  %v2689_v49 = vshrl.u32 %v14244_v39, 16 }
 0x122   : > { %931 = vmatprep.mubr.bf16.mxu1 %v22700_v0  ;;  %v2698_v56 = vshrl.u32 %v14245_v45, 16  ;;  %v2701_v62 = vshll.u32 %v14245_v45, 16 }
 0x124   : > { %v2700_v13 = vrot.slane %v2698_v56, 3 }
 0x127   : > { %2978 = vmatmul.mubr.bf16.vlgmr.msra.gmra.mrb[0].mxu0 %v2642_v55  ;;  %v1028_v55 = vshll.u32 %v14159_v44, 16 }
 0x128   : > { %3455 = vmatpush1.bf16.msra.mxu0 %v16972_v52  ;;  %2987 = vmatprep.mubr.bf16.mxu0 %v22700_v0  ;;  %v14139_v52 = vcombine.low %v452_v41, %v453_v37 }
 0x129   : > { %3456 = vmatprep.subr.bf16.mxu0 %v16993_v60  ;;  %932 = vmatmul.mubr.bf16.gmra.mrb[76].mxu1 %v14136_v5  ;;  %v2678_v60 = vsel %vm22747_vm1, %v2668_v30, %v2677_v46  ;;  %v2691_v5 = vrot.slane %v2689_v49, 3  ;;  %v1030_v12 = vrot.slane %v1028_v55, 4  ;;  %v2465_v49 = vld [vmem:[#allocation2 + $0x68] sm:$0xf] }
 0x12a   : > { %941 = vmatprep.mubr.bf16.mxu1 %v22700_v0 }
 0x12b   : > { %v2695_v24 = vor.u32 %v2694_v6, %v2691_v5  ;;  %v17574_v5 = vld [vmem:[#allocation6 + $0x154] ss:$8 sps:$4 sm:$0xff]  }
 0x12c   : > { %3457 = vmatpush1.bf16.msra.mxu0 %v16991_v61  ;;  %v454_v61 = vld [vmem:[#allocation2 + $0xbc] sm:$0xf] }
 0x12d   : > { %3458 = vmatprep.subr.bf16.mxu0 %v17017_v4  ;;  %v2686_v4 = vor.u32 %v2685_v48, %v2682_v47  ;;  %v2464_v47 = vld [vmem:[#allocation2 + $0x64] sm:$0xf]  ;;  %v17568_v48 = vld [vmem:[#allocation6 + $0x134] ss:$8 sps:$4 sm:$0xff]  }
 0x12f   : > { %2988 = vmatmul.mubr.bf16.gmra.mrb[72].mxu0 %v2651_v9  ;;  %v14140_v9 = vcombine.low %v454_v61, %v454_v61  ;;  %v2687_v15 = vsel %vm22747_vm1, %v2677_v46, %v2686_v4  ;;  %v17567_v46 = vld [vmem:[#allocation6 + $0x120] ss:$8 sps:$4 sm:$0xff]   ;;  %v14248_v61 = vcombine.low %v2464_v47, %v2465_v49 }
 0x130   : > { %2997 = vmatprep.mubr.bf16.mxu0 %v22700_v0  ;;  %3459 = vmatpush1.bf16.msra.mxu0 %v17015_v8  ;;  %v1037_v8 = vshll.u32 %v14160_v59, 16  ;;  %v17572_v59 = vld [vmem:[#allocation6 + $0x144] ss:$8 sps:$4 sm:$0xff]  }
 0x131   : > { %3460 = vmatprep.subr.bf16.mxu0 %v17023_v14  ;;  %942 = vmatmul.mubr.bf16.gmra.mrb[80].mxu1 %v14137_v18  ;;  %v2703_v14 = vrot.slane %v2701_v62, 4  ;;  %v2707_v18 = vshrl.u32 %v14246_v10, 16  ;;  %v2467_v10 = vld [vmem:[#allocation2 + $0x70] sm:$0xf] }
 0x132   : > { %951 = vmatprep.mubr.bf16.mxu1 %v22700_v0 }
 0x134   : > { %3461 = vmatpush1.bf16.msra.mxu0 %v17021_v16  ;;  %v1036_v16 = vrot.slane %v1034_v7, 3  ;;  %v2725_v7 = vshrl.u32 %v14248_v61, 16 }
 0x135   : > { %3462 = vmatprep.subr.bf16.mxu0 %v17029_v17  ;;  %v1039_v17 = vrot.slane %v1037_v8, 4  ;;  %v2728_v8 = vshll.u32 %v14248_v61, 16 }
 0x137   : > { %2998 = vmatmul.mubr.bf16.gmra.mrb[76].mxu0 %v2660_v2  ;;  %v17045_v2 = vld [vmem:[#allocation6 + $0x270] ss:$8 sps:$4 sm:$0xff]   ;;  %v1040_v45 = vor.u32 %v1039_v17, %v1036_v16 }
 0x138   : > { %3007 = vmatprep.mubr.bf16.mxu0 %v22700_v0  ;;  %3463 = vmatpush1.bf16.msra.mxu0 %v17027_v22  ;;  %v14161_v22 = vcombine.low %v17561_v20, %v17562_v21  ;;  %v17577_v17 = vld [vmem:[#allocation6 + $0x150] ss:$8 sps:$4 sm:$0xff]   ;;  %v2727_v20 = vrot.slane %v2725_v7, 3  ;;  %v2730_v21 = vrot.slane %v2728_v8, 4 }
 0x139   : > { %3464 = vmatprep.subr.bf16.mxu0 %v17035_v27  ;;  %952 = vmatmul.mubr.bf16.gmra.mrb[84].mxu1 %v14138_v33  ;;  %v2709_v27 = vrot.slane %v2707_v18, 3  ;;  %v1031_v33 = vor.u32 %v1030_v12, %v1027_v11  ;;  %v17575_v11 = vld [vmem:[#allocation2 + $0x30] sm:$0xf]  ;;  %v17576_v12 = vld [vmem:[#allocation2 + $0x34] sm:$0xf] }
 0x13a   : > { %961 = vmatprep.mubr.bf16.mxu1 %v22700_v0  ;;  %v1043_v29 = vshrl.u32 %v14161_v22, 16  ;;  %v1046_v30 = vshll.u32 %v14161_v22, 16  ;;  %v17578_v18 = vld [vmem:[#allocation6 + $0x164] ss:$8 sps:$4 sm:$0xff]  }
 0x13b   : > { %v1032_v41 = vsel %vm22747_vm1, %v18204_v50, %v1031_v33  ;;  %v2713_v50 = vor.u32 %v2712_v28, %v2709_v27  ;;  %v1041_v55 = vsel %vm22747_vm1, %v1031_v33, %v1040_v45  ;;  %v2731_v27 = vor.u32 %v2730_v21, %v2727_v20 }
 0x13c   : > { %3465 = vmatpush1.bf16.msra.mxu0 %v17033_v31  ;;  %v2696_v31 = vsel %vm22747_vm1, %v2686_v4, %v2695_v24  ;;  %v1045_v37 = vrot.slane %v1043_v29, 3  ;;  %v1048_v42 = vrot.slane %v1046_v30, 4  ;;  %v17052_v4 = vld [vmem:[#allocation6 + $0x284] ss:$8 sps:$4 sm:$0xff]  }
 0x13d   : > { %3466 = vmatprep.subr.bf16.mxu0 %v17041_v32  ;;  %v14247_v32 = vcombine.low %v2462_v25, %v2463_v26  ;;  %v17579_v25 = vld [vmem:[#allocation6 + $0x160] ss:$8 sps:$4 sm:$0xff]   ;;  %v17580_v26 = vld [vmem:[#allocation6 + $0x174] ss:$8 sps:$4 sm:$0xff]  }
 0x13e   : > { %v1049_v62 = vor.u32 %v1048_v42, %v1045_v37 }
 0x13f   : > { %3008 = vmatmul.mubr.bf16.gmra.mrb[12].mxu0 %v2669_v38  ;;  %v2716_v38 = vshrl.u32 %v14247_v32, 16  ;;  %v2719_v39 = vshll.u32 %v14247_v32, 16  ;;  %v2469_v32 = vld [vmem:[#allocation2 + $0x78] sm:$0xf] }
 0x140   : > { %3017 = vmatprep.mubr.bf16.mxu0 %v22700_v0  ;;  %3467 = vmatpush1.bf16.msra.mxu0 %v17039_v36  ;;  %v2704_v36 = vor.u32 %v2703_v14, %v2700_v13  ;;  %v14163_v13 = vcombine.low %v17575_v11, %v17576_v12  ;;  %v1050_v14 = vsel %vm22747_vm1, %v1040_v45, %v1049_v62 }
 0x141   : > { %962 = vmatmul.mubr.bf16.gmra.mrb[88].mxu1 %v14139_v52  ;;  %3468 = vmatprep.subr.bf16.mxu0 %v17047_v23  ;;  %v17569_v52 = vld [vmem:[#allocation2 + $0x28] sm:$0xf]  ;;  %v2718_v56 = vrot.slane %v2716_v38, 3  ;;  %v2721_v57 = vrot.slane %v2719_v39, 4 }
 0x142   : > { %971 = vmatprep.mubr.bf16.mxu1 %v22700_v0  ;;  %v2705_v44 = vsel %vm22747_vm1, %v2695_v24, %v2704_v36  ;;  %v14162_v54 = vcombine.low %v17569_v52, %v17570_v53  ;;  %v1061_v23 = vshrl.u32 %v14163_v13, 16  ;;  %v1064_v24 = vshll.u32 %v14163_v13, 16 }
 0x143   : > { %v2722_v6 = vor.u32 %v2721_v57, %v2718_v56 }
 0x144   : > { %3469 = vmatpush1.bf16.msra.mxu0 %v17045_v2  ;;  %v1052_v63 = vshrl.u32 %v14162_v54, 16  ;;  %v1055_v1 = vshll.u32 %v14162_v54, 16  ;;  %v1066_v37 = vrot.slane %v1064_v24, 4  ;;  %v17587_v24 = vld [vmem:[#allocation2 + $0x4c] sm:$0xf] }
 0x145   : > { %4298 = vmatprep.subr.bf16.mxu0 %v17052_v4  ;;  %v2723_v19 = vsel %vm22747_vm1, %v2713_v50, %v2722_v6 }
 0x146   : > { %v1057_v16 = vrot.slane %v1055_v1, 4 }
 0x147   : > { %3018 = vmatmul.mubr.bf16.gmra.mrb[80].mxu0 %v2678_v60  ;;  %v2714_v60 = vsel %vm22747_vm1, %v2704_v36, %v2713_v50 }
 0x148   : > { %3027 = vmatprep.mubr.bf16.mxu0 %v22700_v0 }
 0x149   : > { %972 = vmatmul.mubr.bf16.gmra.mrb[92].mxu1 %v14140_v9  ;;  %v2466_v9 = vld [vmem:[#allocation2 + $0x6c] sm:$0xf] }
 0x14a   : > { %1358 = vmatprep.mubr.bf16.mxu1 %v22700_v0  ;;  %v14249_v22 = vcombine.low %v2466_v9, %v2467_v10 }
 0x14c   : > { %v2734_v28 = vshrl.u32 %v14249_v22, 16  ;;  %v2737_v29 = vshll.u32 %v14249_v22, 16  ;;  %v2472_v22 = vld [vmem:[#allocation2 + $0x84] sm:$0xf] }
 0x14e   : > { %v2736_v47 = vrot.slane %v2734_v28, 3 }
 0x14f   : > { %3028 = vmatmul.mubr.bf16.gmra.mrb[84].mxu0 %v2687_v15  ;;  %v1054_v15 = vrot.slane %v1052_v63, 3  ;;  %v17585_v63 = vld [vmem:[#allocation2 + $0x44] sm:$0xf] }
 0x150   : > { %3037 = vmatprep.mubr.bf16.mxu0 %v22700_v0 }
 0x151   : > { %1359 = vmatmul.mubr.bf16.vlgmr.msra.gmra.mrb[0].mxu1 %v18208_v51  ;;  %v17566_v51 = vld [vmem:[#allocation6 + $0x124] ss:$8 sps:$4 sm:$0xff]   ;;  %v1058_v2 = vor.u32 %v1057_v16, %v1054_v15 }
 0x152   : > { %1368 = vmatprep.mubr.bf16.mxu1 %v22700_v0  ;;  %16037 = vmatpush1.bf16.msra.mxu1 %v17563_v34  ;;  %v17581_v34 = vld [vmem:[#allocation2 + $0x38] sm:$0xf] }
 0x153   : > { %16030 = vmatprep.subr.bf16.mxu1 %v17564_v35  ;;  %v17582_v35 = vld [vmem:[#allocation2 + $0x3c] sm:$0xf]  ;;  %v1059_v39 = vsel %vm22747_vm1, %v1049_v62, %v1058_v2  ;;  %v17584_v62 = vld [vmem:[#allocation2 + $0x40] sm:$0xf] }
 0x154   : > { %v14164_v36 = vcombine.low %v17581_v34, %v17582_v35  ;;  %v14165_v1 = vcombine.low %v17584_v62, %v17585_v63 }
 0x156   : > { %16038 = vmatpush1.bf16.msra.mxu1 %v17565_v43  ;;  %v17583_v43 = vld [vmem:[#allocation6 + $0x170] ss:$8 sps:$4 sm:$0xff]   ;;  %v1070_v53 = vshrl.u32 %v14164_v36, 16  ;;  %v1073_v54 = vshll.u32 %v14164_v36, 16 }
 0x157   : > { %3038 = vmatmul.mubr.bf16.gmra.mrb[24].mxu0 %v2696_v31  ;;  %16031 = vmatprep.subr.bf16.mxu1 %v17566_v51  ;;  %v2468_v31 = vld [vmem:[#allocation2 + $0x74] sm:$0xf] }
 0x158   : > { %3047 = vmatprep.mubr.bf16.mxu0 %v22700_v0  ;;  %v14250_v50 = vcombine.low %v2468_v31, %v2469_v32 }
 0x159   : > { %1369 = vmatmul.mubr.bf16.gmra.mrb[96].mxu1 %v1032_v41  ;;  %v1063_v41 = vrot.slane %v1061_v23, 3  ;;  %v17586_v23 = vld [vmem:[#allocation2 + $0x48] sm:$0xf] }
 0x15a   : > { %1378 = vmatprep.mubr.bf16.mxu1 %v22700_v0  ;;  %16039 = vmatpush1.bf16.msra.mxu1 %v17567_v46  ;;  %v2732_v46 = vsel %vm22747_vm1, %v2722_v6, %v2731_v27  ;;  %v2743_v56 = vshrl.u32 %v14250_v50, 16  ;;  %v2746_v57 = vshll.u32 %v14250_v50, 16  ;;  %v1075_v6 = vrot.slane %v1073_v54, 4  ;;  %v17589_v50 = vld [vmem:[#allocation2 + $0x54] sm:$0xf] }
 0x15b   : > { %16032 = vmatprep.subr.bf16.mxu1 %v17568_v48  ;;  %v2739_v48 = vrot.slane %v2737_v29, 4  ;;  %v1067_v52 = vor.u32 %v1066_v37, %v1063_v41 }
 0x15c   : > { %v2745_v12 = vrot.slane %v2743_v56, 3  ;;  %v2748_v13 = vrot.slane %v2746_v57, 4 }
 0x15d   : > { %v1068_v4 = vsel %vm22747_vm1, %v1058_v2, %v1067_v52  ;;  %v2473_v2 = vld [vmem:[#allocation2 + $0x88] sm:$0xf] }
 0x15e   : > { %16040 = vmatpush1.bf16.msra.mxu1 %v17571_v58 }
 0x15f   : > { %3048 = vmatmul.mubr.bf16.gmra.mrb[88].mxu0 %v2705_v44  ;;  %16033 = vmatprep.subr.bf16.mxu1 %v17572_v59  ;;  %v2470_v59 = vld [vmem:[#allocation2 + $0x7c] sm:$0xf] }
 0x160   : > { %3057 = vmatprep.mubr.bf16.mxu0 %v22700_v0 }
 0x161   : > { %1379 = vmatmul.mubr.bf16.gmra.mrb[100].mxu1 %v1041_v55  ;;  %v2740_v55 = vor.u32 %v2739_v48, %v2736_v47  ;;  %v17588_v48 = vld [vmem:[#allocation2 + $0x50] sm:$0xf] }
 0x162   : > { %1388 = vmatprep.mubr.bf16.mxu1 %v22700_v0  ;;  %16041 = vmatpush1.bf16.msra.mxu1 %v17573_v3 }
 0x163   : > { %16034 = vmatprep.subr.bf16.mxu1 %v17574_v5  ;;  %v1072_v5 = vrot.slane %v1070_v53, 3  ;;  %v2741_v11 = vsel %vm22747_vm1, %v2731_v27, %v2740_v55 }
 0x165   : > { %v1076_v16 = vor.u32 %v1075_v6, %v1072_v5 }
 0x166   : > { %16042 = vmatpush1.bf16.msra.mxu1 %v17577_v17  ;;  %v1079_v17 = vshrl.u32 %v14165_v1, 16 }
 0x167   : > { %3058 = vmatmul.mubr.bf16.gmra.mrb[92].mxu0 %v2714_v60  ;;  %16035 = vmatprep.subr.bf16.mxu1 %v17578_v18  ;;  %v2471_v60 = vld [vmem:[#allocation2 + $0x80] sm:$0xf]  ;;  %v1082_v18 = vshll.u32 %v14165_v1, 16 }
 0x168   : > { %3067 = vmatprep.mubr.bf16.mxu0 %v22700_v0  ;;  %v1081_v27 = vrot.slane %v1079_v17, 3  ;;  %v2476_v17 = vld [vmem:[#allocation2 + $0x94] sm:$0xf] }
 0x169   : > { %1389 = vmatmul.mubr.bf16.gmra.mrb[12].mxu1 %v1050_v14  ;;  %v14251_v14 = vcombine.low %v2470_v59, %v2471_v60  ;;  %v1084_v28 = vrot.slane %v1082_v18, 4  ;;  %v2477_v18 = vld [vmem:[#allocation2 + $0x98] sm:$0xf] }
 0x16a   : > { %1398 = vmatprep.mubr.bf16.mxu1 %v22700_v0  ;;  %16043 = vmatpush1.bf16.msra.mxu1 %v17579_v25  ;;  %v14166_v25 = vcombine.low %v17586_v23, %v17587_v24 }
 0x16b   : > { %16036 = vmatprep.subr.bf16.mxu1 %v17580_v26  ;;  %v2752_v20 = vshrl.u32 %v14251_v14, 16  ;;  %v2755_v21 = vshll.u32 %v14251_v14, 16  ;;  %v1077_v26 = vsel %vm22747_vm1, %v1067_v52, %v1076_v16  ;;  %v1085_v34 = vor.u32 %v1084_v28, %v1081_v27 }
 0x16c   : > { %v18280_v30 = vpop.f32.mrb[4].mxu1  ;;  %v1088_v35 = vshrl.u32 %v14166_v25, 16  ;;  %v1091_v36 = vshll.u32 %v14166_v25, 16  ;;  %v14167_v52 = vcombine.low %v17588_v48, %v17589_v50  ;;  %v2478_v48 = vld [vmem:[#allocation2 + $0x9c] sm:$0xf] }
 0x16d   : > { %v755_v33 = vpop.f32.mrb[5].mxu1  ;;  %v2754_v31 = vrot.slane %v2752_v20, 3  ;;  %v2757_v32 = vrot.slane %v2755_v21, 4  ;;  %v1086_v54 = vsel %vm22747_vm1, %v1076_v16, %v1085_v34  ;;  %v17590_v20 = vld [vmem:[#allocation2 + $0x58] sm:$0xf] }
 0x16e   : > { %v18285_v42 = vpop.f32.mrb[6].mxu1  ;;  %16044 = vmatpush1.bf16.msra.mxu1 %v17583_v43  ;;  %v14252_v33 = vcombine.low %v2472_v22, %v2473_v2  ;;  %v1093_v56 = vrot.slane %v1091_v36, 4  ;;  %v17591_v21 = vld [vmem:[#allocation2 + $0x5c] sm:$0xf]  ;;  %v2479_v50 = vld [vmem:[#allocation2 + $0xa0] sm:$0xf] }
 0x16f   : > { %3068 = vmatmul.mubr.bf16.gmra.mrb[36].mxu0 %v2723_v19  ;;  %v18287_v44 = vpop.f32.mrb[7].mxu1  ;;  %v2749_v19 = vor.u32 %v2748_v13, %v2745_v12  ;;  %v1100_v12 = vshll.u32 %v14167_v52, 16  ;;  %v14168_v22 = vcombine.low %v17590_v20, %v17591_v21  ;;  %v2480_v20 = vld [vmem:[#allocation2 + $0xa4] sm:$0xf]  ;;  %v2481_v21 = vld [vmem:[#allocation2 + $0xa8] sm:$0xf] }
 0x170   : > { %3077 = vmatprep.mubr.bf16.mxu0 %v22700_v0  ;;  %v2761_v41 = vshrl.u32 %v14252_v33, 16  ;;  %v2764_v37 = vshll.u32 %v14252_v33, 16 }
 0x171   : > { %1399 = vmatmul.mubr.bf16.gmra.mrb[104].mxu1 %v1059_v39  ;;  %v2750_v29 = vsel %vm22747_vm1, %v2740_v55, %v2749_v19  ;;  %v2758_v39 = vor.u32 %v2757_v32, %v2754_v31  ;;  %v1090_v55 = vrot.slane %v1088_v35, 3  ;;  %v1102_v25 = vrot.slane %v1100_v12, 4 }
 0x172   : > { %v18282_v38 = vpop.f32.mrb[4].mxu0  ;;  %1408 = vmatprep.mubr.bf16.mxu1 %v22700_v0  ;;  %v2763_v1 = vrot.slane %v2761_v41, 3  ;;  %v14254_v35 = vcombine.low %v2476_v17, %v2477_v18 }
 0x173   : > { %v2123_v51 = vpop.f32.mrb[5].mxu0  ;;  %v2759_v63 = vsel %vm22747_vm1, %v2749_v19, %v2758_v39 }
 0x174   : > { %v18289_v45 = vpop.f32.mrb[6].mxu0  ;;  %v18296_v58 = vpop.f32.mrb[8].mxu1  ;;  %v2474_v51 = vld [vmem:[#allocation2 + $0x8c] sm:$0xf] }
 0x175   : > { %v18292_v49 = vpop.f32.mrb[7].mxu0  ;;  %v18298_v61 = vpop.f32.mrb[9].mxu1 }
 0x176   : > { %v18303_v7 = vpop.f32.mrb[10].mxu1 }
 0x177   : > { %3078 = vmatmul.mubr.bf16.gmra.mrb[96].mxu0 %v2732_v46  ;;  %v769_v9 = vpop.f32.mrb[11].mxu1  ;;  %v2475_v46 = vld [vmem:[#allocation2 + $0x90] sm:$0xf] }
 0x178   : > { %3087 = vmatprep.mubr.bf16.mxu0 %v22700_v0  ;;  %v14253_v5 = vcombine.low %v2474_v51, %v2475_v46  ;;  %v1094_v9 = vor.u32 %v1093_v56, %v1090_v55  ;;  %v2779_v46 = vshrl.u32 %v14254_v35, 16 }
 0x179   : > { %1409 = vmatmul.mubr.bf16.gmra.mrb[108].mxu1 %v1068_v4  ;;  %v2766_v4 = vrot.slane %v2764_v37, 4  ;;  %v1109_v37 = vshll.u32 %v14168_v22, 16 }
 0x17a   : > { %v18300_v3 = vpop.f32.mrb[8].mxu0  ;;  %1418 = vmatprep.mubr.bf16.mxu1 %v22700_v0  ;;  %v2770_v14 = vshrl.u32 %v14253_v5, 16  ;;  %v1095_v23 = vsel %vm22747_vm1, %v1085_v34, %v1094_v9  ;;  %v1106_v34 = vshrl.u32 %v14168_v22, 16  ;;  %v17594_v22 = vld [vmem:[#allocation2 + $0x68] sm:$0xf] }
 0x17b   : > { %v18305_v8 = vpop.f32.mrb[9].mxu0  ;;  %v2767_v13 = vor.u32 %v2766_v4, %v2763_v1  ;;  %v2781_v1 = vrot.slane %v2779_v46, 3 }
 0x17c   : > { %v18307_v10 = vpop.f32.mrb[10].mxu0  ;;  %v2772_v32 = vrot.slane %v2770_v14, 3  ;;  %v1108_v56 = vrot.slane %v1106_v34, 3 }
 0x17d   : > { %v2137_v15 = vpop.f32.mrb[11].mxu0  ;;  %v2768_v31 = vsel %vm22747_vm1, %v2758_v39, %v2767_v13  ;;  %v17593_v39 = vld [vmem:[#allocation2 + $0x64] sm:$0xf] }
 0x17e   : > { %v2773_v15 = vshll.u32 %v14253_v5, 16  ;;  %v14255_v5 = vcombine.low %v2478_v48, %v2479_v50  ;;  %v14256_v48 = vcombine.low %v2480_v20, %v2481_v21 }
 0x17f   : > { %3088 = vmatmul.mubr.bf16.gmra.mrb[100].mxu0 %v2741_v11  ;;  %v1097_v11 = vshrl.u32 %v14167_v52, 16  ;;  %v17592_v52 = vld [vmem:[#allocation2 + $0x60] sm:$0xf] }
 0x180   : > { %3097 = vmatprep.mubr.bf16.mxu0 %v22700_v0  ;;  %v2775_v33 = vrot.slane %v2773_v15, 4  ;;  %v2788_v17 = vshrl.u32 %v14255_v5, 16  ;;  %v2791_v18 = vshll.u32 %v14255_v5, 16  ;;  %v17597_v5 = vld [vmem:[#allocation2 + $0x74] sm:$0xf] }
 0x181   : > { %1419 = vmatmul.mubr.bf16.gmra.mrb[24].mxu1 %v1077_v26  ;;  %v1099_v24 = vrot.slane %v1097_v11, 3 }
 0x182   : > { %1428 = vmatprep.mubr.bf16.mxu1 %v22700_v0  ;;  %v2776_v51 = vor.u32 %v2775_v33, %v2772_v32  ;;  %v2790_v46 = vrot.slane %v2788_v17, 3 }
 0x183   : > { %v1103_v41 = vor.u32 %v1102_v25, %v1099_v24 }
 0x184   : > { %v18316_v43 = vpop.f32.mrb[16].mxu1 }
 0x185   : > { %v785_v47 = vpop.f32.mrb[17].mxu1  ;;  %v1104_v55 = vsel %vm22747_vm1, %v1094_v9, %v1103_v41 }
 0x186   : > { %v18321_v57 = vpop.f32.mrb[18].mxu1  ;;  %v2782_v47 = vshll.u32 %v14254_v35, 16 }
 0x187   : > { %3098 = vmatmul.mubr.bf16.gmra.mrb[48].mxu0 %v2750_v29  ;;  %v18323_v60 = vpop.f32.mrb[19].mxu1 }
 0x188   : > { %3107 = vmatprep.mubr.bf16.mxu0 %v22700_v0  ;;  %v2784_v4 = vrot.slane %v2782_v47, 4  ;;  %v2793_v47 = vrot.slane %v2791_v18, 4 }
 0x189   : > { %1429 = vmatmul.mubr.bf16.gmra.mrb[112].mxu1 %v1086_v54  ;;  %v14169_v54 = vcombine.low %v17592_v52, %v17593_v39 }
 0x18a   : > { %v18318_v53 = vpop.f32.mrb[16].mxu0  ;;  %1438 = vmatprep.mubr.bf16.mxu1 %v22700_v0  ;;  %v2785_v15 = vor.u32 %v2784_v4, %v2781_v1  ;;  %v17596_v4 = vld [vmem:[#allocation2 + $0x70] sm:$0xf] }
 0x18b   : > { %v2153_v59 = vpop.f32.mrb[17].mxu0  ;;  %v1115_v12 = vshrl.u32 %v14169_v54, 16  ;;  %v1118_v14 = vshll.u32 %v14169_v54, 16  ;;  %v2794_v54 = vor.u32 %v2793_v47, %v2790_v46 }
 0x18c   : > { %v18325_v62 = vpop.f32.mrb[18].mxu0  ;;  %v18332_v16 = vpop.f32.mrb[20].mxu1  ;;  %v1111_v59 = vrot.slane %v1109_v37, 4  ;;  %v2786_v37 = vsel %vm22747_vm1, %v2776_v51, %v2785_v15 }
 0x18d   : > { %v18328_v6 = vpop.f32.mrb[19].mxu0  ;;  %v18334_v19 = vpop.f32.mrb[21].mxu1  ;;  %v1120_v32 = vrot.slane %v1118_v14, 4 }
 0x18e   : > { %v18339_v26 = vpop.f32.mrb[22].mxu1  ;;  %v1112_v11 = vor.u32 %v1111_v59, %v1108_v56  ;;  %v2800_v56 = vshll.u32 %v14256_v48, 16 }
 0x18f   : > { %3108 = vmatmul.mubr.bf16.gmra.mrb[104].mxu0 %v2759_v63  ;;  %v799_v28 = vpop.f32.mrb[23].mxu1  ;;  %v2777_v63 = vsel %vm22747_vm1, %v2767_v13, %v2776_v51  ;;  %v18370_v51 = vld [vmem:[#allocation2 + $0xac] sm:$0xf] }
 0x190   : > { %3117 = vmatprep.mubr.bf16.mxu0 %v22700_v0  ;;  %v1113_v28 = vsel %vm22747_vm1, %v1103_v41, %v1112_v11  ;;  %22825 = vst [vmem:[#allocation13_spill] sm:$0xff] %v18370_v51 }
 0x191   : > { %1439 = vmatmul.mubr.bf16.gmra.mrb[116].mxu1 %v1095_v23  ;;  %v17595_v23 = vld [vmem:[#allocation2 + $0x6c] sm:$0xf] }
 0x192   : > { %v18336_v2 = vpop.f32.mrb[20].mxu0  ;;  %1448 = vmatprep.mubr.bf16.mxu1 %v22700_v0  ;;  %v14170_v24 = vcombine.low %v17594_v22, %v17595_v23 }
 0x193   : > { %v18341_v27 = vpop.f32.mrb[21].mxu0 }
 0x194   : > { %v18343_v29 = vpop.f32.mrb[22].mxu0  ;;  %v1124_v52 = vshrl.u32 %v14170_v24, 16  ;;  %v1127_v39 = vshll.u32 %v14170_v24, 16  ;;  %v2795_v24 = vsel %vm22747_vm1, %v2785_v15, %v2794_v54  ;;  %v18389_v15 = vld [vmem:[#allocation2 + $0xb8] sm:$0xf] }
 0x195   : > { %v2167_v36 = vpop.f32.mrb[23].mxu0  ;;  %22830 = vst [vmem:[#allocation18_spill] sm:$0xff] %v18389_v15 }
 0x196   : > { %v1126_v18 = vrot.slane %v1124_v52, 3  ;;  %v1129_v20 = vrot.slane %v1127_v39, 4  ;;  %v18387_v39 = vld [vmem:[#allocation2 + $0xb4] sm:$0xf] }
 0x197   : > { %3118 = vmatmul.mubr.bf16.gmra.mrb[108].mxu0 %v2768_v31  ;;  %v1117_v31 = vrot.slane %v1115_v12, 3  ;;  %v14171_v12 = vcombine.low %v17596_v4, %v17597_v5  ;;  %22829 = vst [vmem:[#allocation17_spill] sm:$0xff] %v18387_v39 }
 0x198   : > { %3127 = vmatprep.mubr.bf16.mxu0 %v22700_v0 }
 0x199   : > { %1449 = vmatmul.mubr.bf16.gmra.mrb[36].mxu1 %v1104_v55  ;;  %v1121_v41 = vor.u32 %v1120_v32, %v1117_v31  ;;  %v2797_v55 = vshrl.u32 %v14256_v48, 16  ;;  %v2802_v31 = vrot.slane %v2800_v56, 4  ;;  %v1136_v46 = vshll.u32 %v14171_v12, 16  ;;  %v17599_v56 = vld [vmem:[#allocation2 + $0x7c] sm:$0xf] }
 0x19a   : > { %1458 = vmatprep.mubr.bf16.mxu1 %v22700_v0 }
 0x19b   : > { %v1122_v17 = vsel %vm22747_vm1, %v1112_v11, %v1121_v41  ;;  %v1130_v11 = vor.u32 %v1129_v20, %v1126_v18 }
 0x19c   : > { %v18352_v9 = vpop.f32.mrb[28].mxu1 }
 0x19d   : > { %v815_v13 = vpop.f32.mrb[29].mxu1  ;;  %v1131_v4 = vsel %vm22747_vm1, %v1121_v41, %v1130_v11 }
 0x19e   : > { %v18357_v33 = vpop.f32.mrb[30].mxu1 }
 0x19f   : > { %3128 = vmatmul.mubr.bf16.gmra.mrb[60].mxu0 %v2777_v63  ;;  %v18359_v36 = vpop.f32.mrb[31].mxu1  ;;  %v2483_v63 = vld [vmem:[#allocation2 + $0xb0] sm:$0xf] }
 0x1a0   : > { %3137 = vmatprep.mubr.bf16.mxu0 %v22700_v0  ;;  %v14257_v32 = vcombine.low %v18370_v51, %v2483_v63 }
 0x1a1   : > { %1459 = vmatmul.mubr.bf16.gmra.mrb[120].mxu1 %v1113_v28  ;;  %v2799_v28 = vrot.slane %v2797_v55, 3  ;;  %v17598_v55 = vld [vmem:[#allocation2 + $0x78] sm:$0xf] }
 0x1a2   : > { %v18354_v25 = vpop.f32.mrb[28].mxu0  ;;  %1468 = vmatprep.mubr.bf16.mxu1 %v22700_v0  ;;  %v2806_v48 = vshrl.u32 %v14257_v32, 16  ;;  %v2809_v52 = vshll.u32 %v14257_v32, 16  ;;  %v14172_v63 = vcombine.low %v17598_v55, %v17599_v56  ;;  %v17601_v55 = vld [vmem:[#allocation2 + $0x84] sm:$0xf] }
 0x1a3   : > { %v2183_v35 = vpop.f32.mrb[29].mxu0  ;;  %v2803_v47 = vor.u32 %v2802_v31, %v2799_v28 }
 0x1a4   : > { %v18361_v34 = vpop.f32.mrb[30].mxu0  ;;  %v18368_v59 = vpop.f32.mrb[32].mxu1  ;;  %v2811_v20 = vrot.slane %v2809_v52, 4  ;;  %v1142_v28 = vshrl.u32 %v14172_v63, 16  ;;  %v1145_v31 = vshll.u32 %v14172_v63, 16 }
 0x1a5   : > { %v18364_v50 = vpop.f32.mrb[31].mxu0  ;;  %v18372_v1 = vpop.f32.mrb[33].mxu1  ;;  %v2804_v18 = vsel %vm22747_vm1, %v2794_v54, %v2803_v47  ;;  %v18399_v54 = vld [vmem:[#allocation2 + $0xbc] sm:$0xf]  ;;  %v17600_v52 = vld [vmem:[#allocation2 + $0x80] sm:$0xf] }
 0x1a6   : > { %v18377_v21 = vpop.f32.mrb[34].mxu1  ;;  %22832 = vst [vmem:[#allocation20_spill] sm:$0xff] %v18399_v54  ;;  %v14173_v56 = vcombine.low %v17600_v52, %v17601_v55 }
 0x1a7   : > { %3138 = vmatmul.mubr.bf16.gmra.mrb[112].mxu0 %v2786_v37  ;;  %22826 = vst [vmem:[#allocation14_spill] sm:$0xff] %v18377_v21  ;;  %v829_v22 = vpop.f32.mrb[35].mxu1  ;;  %v1133_v37 = vshrl.u32 %v14171_v12, 16  ;;  %v2808_v12 = vrot.slane %v2806_v48, 3 }
 0x1a8   : > { %3147 = vmatprep.mubr.bf16.mxu0 %v22700_v0  ;;  %v14258_v22 = vcombine.low %v18387_v39, %v18389_v15  ;;  %v1154_v39 = vshll.u32 %v14173_v56, 16 }
 0x1a9   : > { %1469 = vmatmul.mubr.bf16.gmra.mrb[124].mxu1 %v1122_v17  ;;  %v1135_v5 = vrot.slane %v1133_v37, 3  ;;  %v1138_v17 = vrot.slane %v1136_v46, 4  ;;  %v2812_v32 = vor.u32 %v2811_v20, %v2808_v12  ;;  %v18401_v46 = vld [vmem:[#allocation2 + $0xc0] sm:$0xf] }
 0x1aa   : > { %v18374_v14 = vpop.f32.mrb[32].mxu0  ;;  %1478 = vmatprep.mubr.bf16.mxu1 %v22700_v0  ;;  %v2815_v41 = vshrl.u32 %v14258_v22, 16  ;;  %22833 = vst [vmem:[#allocation21_spill] sm:$0xff] %v18401_v46  ;;  %v14259_v52 = vcombine.low %v18399_v54, %v18401_v46  ;;  %v17603_v54 = vld [vmem:[#allocation2 + $0x8c] sm:$0xf] }
 0x1ab   : > { %v18379_v13 = vpop.f32.mrb[33].mxu0 }
 0x1ac   : > { %22827 = vst [vmem:[#allocation15_spill] sm:$0xff] %v18379_v13  ;;  %v18381_v23 = vpop.f32.mrb[34].mxu0  ;;  %v2817_v15 = vrot.slane %v2815_v41, 3  ;;  %v18421_v41 = vld [vmem:[#allocation2 + $0xc4] sm:$0xf] }
 0x1ad   : > { %22828 = vst [vmem:[#allocation16_spill] sm:$0xff] %v18381_v23  ;;  %v2197_v35 = vpop.f32.mrb[35].mxu0  ;;  %22841 = vst [vmem:[#allocation28_spill] sm:$0xff] %v18421_v41  ;;  %v17075_v23 = vld [vmem:[#allocation2 + $0xbc] sm:$0x1f]  }
 0x1ae   : > { %v2818_v35 = vshll.u32 %v14258_v22, 16  ;;  %v17636_v13 = vld [vmem:[#allocation2 + $0x5c] sm:$0xf] }
 0x1af   : > { %3148 = vmatmul.mubr.bf16.gmra.mrb[116].mxu0 %v2795_v24  ;;  %v1139_v24 = vor.u32 %v1138_v17, %v1135_v5  ;;  %v1144_v5 = vrot.slane %v1142_v28, 3  ;;  %v1147_v17 = vrot.slane %v1145_v31, 4  ;;  %v1151_v31 = vshrl.u32 %v14173_v56, 16 }
 0x1b0   : > { %3157 = vmatprep.mubr.bf16.mxu0 %v22700_v0 }
 0x1b1   : > { %1479 = vmatmul.mubr.bf16.gmra.mrb[48].mxu1 %v1131_v4  ;;  %v1140_v63 = vsel %vm22747_vm1, %v1130_v11, %v1139_v24  ;;  %v22839_v11 = vmov 0   ;;  %v1148_v28 = vor.u32 %v1147_v17, %v1144_v5  ;;  %v1153_v56 = vrot.slane %v1151_v31, 3 }
 0x1b2   : > { %1488 = vmatprep.mubr.bf16.mxu1 %v22700_v0  ;;  %v1156_v17 = vrot.slane %v1154_v39, 4 }
 0x1b4   : > { %v18397_v37 = vpop.f32.mrb[40].mxu1 }
 0x1b5   : > { %22831 = vst [vmem:[#allocation19_spill] sm:$0xff] %v18397_v37  ;;  %v845_v48 = vpop.f32.mrb[41].mxu1 }
 0x1b6   : > { %v2820_v48 = vrot.slane %v2818_v35, 4  ;;  %v18423_v35 = vld [vmem:[#allocation2 + $0xc8] sm:$0xf] }
 0x1b7   : > { %3158 = vmatmul.mubr.bf16.gmra.mrb[120].mxu0 %v2804_v18  ;;  %v18406_v18 = vpop.f32.mrb[42].mxu1  ;;  %22842 = vst [vmem:[#allocation29_spill] sm:$0xff] %v18423_v35 }
 0x1b8   : > { %3167 = vmatprep.mubr.bf16.mxu0 %v22700_v0  ;;  %22835 = vst [vmem:[#allocation23_spill] sm:$0xff] %v18406_v18  ;;  %v18408_v20 = vpop.f32.mrb[43].mxu1  ;;  %v2813_v0 = vsel %vm22747_vm1, %v2803_v47, %v2812_v32 }
 0x1b9   : > { %22836 = vst [vmem:[#allocation24_spill] sm:$0xff] %v18408_v20  ;;  %1489 = vmatmul.mubr.bf16.gmra.mrb[128].mxu1 %v1140_v63  ;;  %v2827_v20 = vshll.u32 %v14259_v52, 16  ;;  %v17602_v63 = vld [vmem:[#allocation2 + $0x88] sm:$0xf] }
 0x1ba   : > { %v18403_v4 = vpop.f32.mrb[40].mxu0  ;;  %1498 = vmatprep.mubr.bf16.mxu1 %v22839_v11 }
 0x1bb   : > { %22834 = vst [vmem:[#allocation22_spill] sm:$0xff] %v18403_v4  ;;  %v2213_v12 = vpop.f32.mrb[41].mxu0  ;;  %v17633_v4 = vld [vmem:[#allocation2 + $0x50] sm:$0xf] }
 0x1bc   : > { %v18410_v22 = vpop.f32.mrb[42].mxu0  ;;  %v2821_v12 = vor.u32 %v2820_v48, %v2817_v15  ;;  %v18419_v47 = vpop.f32.mrb[44].mxu1 }
 0x1bd   : > { %22837 = vst [vmem:[#allocation25_spill] sm:$0xff] %v18410_v22  ;;  %v18415_v55 = vpop.f32.mrb[43].mxu0  ;;  %v2824_v22 = vshrl.u32 %v14259_v52, 16  ;;  %22840 = vst [vmem:[#allocation27_spill] sm:$0xff] %v18419_v47  ;;  %v18425_v46 = vpop.f32.mrb[45].mxu1 }
 0x1be   : > { %22838 = vst [vmem:[#allocation26_spill] sm:$0xff] %v18415_v55  ;;  %22843 = vst [vmem:[#allocation30_spill] sm:$0xff] %v18425_v46  ;;  %v14174_v55 = vcombine.low %v17602_v63, %v17603_v54  ;;  %v18430_v15 = vpop.f32.mrb[46].mxu1  ;;  %v2822_v51 = vsel %vm22747_vm1, %v2812_v32, %v2821_v12  ;;  %v2829_v46 = vrot.slane %v2827_v20, 4  ;;  %v14260_v54 = vcombine.low %v18421_v41, %v18423_v35  ;;  %v17605_v32 = vld [vmem:[#allocation2 + $0x94] sm:$0xf] }
 0x1bf   : > { %3168 = vmatmul.mubr.bf16.gmra.mrb[124].mxu0 %v2813_v0  ;;  %v1149_v0 = vsel %vm22747_vm1, %v1139_v24, %v1148_v28  ;;  %22845 = vst [vmem:[#allocation32_spill] sm:$0xff] %v18430_v15  ;;  %v859_v52 = vpop.f32.mrb[47].mxu1  ;;  %v2826_v18 = vrot.slane %v2824_v22, 3  ;;  %v1157_v24 = vor.u32 %v1156_v17, %v1153_v56  ;;  %v17604_v15 = vld [vmem:[#allocation2 + $0x90] sm:$0xf] }
 0x1c0   : > { %3177 = vmatprep.mubr.bf16.mxu0 %v22839_v11  ;;  %v1160_v39 = vshrl.u32 %v14174_v55, 16  ;;  %v1163_v31 = vshll.u32 %v14174_v55, 16  ;;  %v14175_v22 = vcombine.low %v17604_v15, %v17605_v32  ;;  %v17607_v15 = vld [vmem:[#allocation2 + $0x9c] sm:$0xf] }
 0x1c1   : > { %1499 = vmatmul.mubr.bf16.gmra.mrb[132].mxu1 %v1149_v0  ;;  %v2830_v52 = vor.u32 %v2829_v46, %v2826_v18  ;;  %v1158_v20 = vsel %vm22747_vm1, %v1148_v28, %v1157_v24  ;;  %v17606_v28 = vld [vmem:[#allocation2 + $0x98] sm:$0xf] }
 0x1c2   : > { %v18427_v5 = vpop.f32.mrb[44].mxu0  ;;  %1508 = vmatprep.mubr.bf16.mxu1 %v22839_v11  ;;  %v1165_v35 = vrot.slane %v1163_v31, 4  ;;  %v1169_v55 = vshrl.u32 %v14175_v22, 16  ;;  %v1172_v56 = vshll.u32 %v14175_v22, 16 }
 0x1c3   : > { %22844 = vst [vmem:[#allocation31_spill] sm:$0xff] %v18427_v5  ;;  %v18432_v48 = vpop.f32.mrb[45].mxu0  ;;  %v1162_v5 = vrot.slane %v1160_v39, 3  ;;  %v2831_v0 = vsel %vm22747_vm1, %v2821_v12, %v2830_v52 }
 0x1c4   : > { %22846 = vst [vmem:[#allocation33_spill] sm:$0xff] %v18432_v48  ;;  %v18434_v47 = vpop.f32.mrb[46].mxu0  ;;  %v2833_v48 = vshrl.u32 %v14260_v54, 16 }
 0x1c5   : > { %22847 = vst [vmem:[#allocation34_spill] sm:$0xff] %v18434_v47  ;;  %v2227_v63 = vpop.f32.mrb[47].mxu0  ;;  %v2836_v47 = vshll.u32 %v14260_v54, 16  ;;  %v14176_v54 = vcombine.low %v17606_v28, %v17607_v15 }
 0x1c6   : > { %v2835_v63 = vrot.slane %v2833_v48, 3  ;;  %v1174_v48 = vrot.slane %v1172_v56, 4  ;;  %v17608_v56 = vld [vmem:[#allocation2 + $0xa0] sm:$0xf] }
 0x1c7   : > { %3178 = vmatmul.mubr.bf16.gmra.mrb[128].mxu0 %v2822_v51  ;;  %v2838_v41 = vrot.slane %v2836_v47, 4  ;;  %v1166_v51 = vor.u32 %v1165_v35, %v1162_v5  ;;  %v1171_v47 = vrot.slane %v1169_v55, 3 }
 0x1c8   : > { %3187 = vmatprep.mubr.bf16.mxu0 %v22839_v11 }
 0x1c9   : > { %1509 = vmatmul.mubr.bf16.gmra.mrb[60].mxu1 %v1158_v20  ;;  %v2839_v46 = vor.u32 %v2838_v41, %v2835_v63  ;;  %v1167_v12 = vsel %vm22747_vm1, %v1157_v24, %v1166_v51  ;;  %v1175_v20 = vor.u32 %v1174_v48, %v1171_v47  ;;  %v1181_v63 = vshll.u32 %v14176_v54, 16 }
 0x1ca   : > { %1518 = vmatprep.mubr.bf16.mxu1 %v22839_v11 }
 0x1cb   : > { %v2840_v41 = vsel %vm22747_vm1, %v2830_v52, %v2839_v46  ;;  %v1176_v52 = vsel %vm22747_vm1, %v1166_v51, %v1175_v20  ;;  %v17610_v51 = vld [vmem:[#allocation2 + $0xa8] sm:$0xf] }
 0x1cc   : > { %v18445_v18 = vpop.f32.mrb[52].mxu1 }
 0x1cd   : > { %22848 = vst [vmem:[#allocation35_spill] sm:$0xff] %v18445_v18  ;;  %v875_v17 = vpop.f32.mrb[53].mxu1 }
 0x1ce   : > { %v18450_v31 = vpop.f32.mrb[54].mxu1  ;;  %v17609_v17 = vld [vmem:[#allocation2 + $0xa4] sm:$0xf] }
 0x1cf   : > { %3188 = vmatmul.mubr.bf16.gmra.mrb[132].mxu0 %v2831_v0  ;;  %22850 = vst [vmem:[#allocation37_spill] sm:$0xff] %v18450_v31  ;;  %v18452_v5 = vpop.f32.mrb[55].mxu1  ;;  %v1178_v0 = vshrl.u32 %v14176_v54, 16  ;;  %v14177_v28 = vcombine.low %v17608_v56, %v17609_v17 }
 0x1d0   : > { %3197 = vmatprep.mubr.bf16.mxu0 %v22839_v11  ;;  %22851 = vst [vmem:[#allocation38_spill] sm:$0xff] %v18452_v5 }
 0x1d1   : > { %1519 = vmatmul.mubr.bf16.gmra.mrb[136].mxu1 %v1167_v12  ;;  %v1180_v12 = vrot.slane %v1178_v0, 3  ;;  %v1190_v56 = vshll.u32 %v14177_v28, 16  ;;  %v17611_v0 = vld [vmem:[#allocation2 + $0xac] sm:$0xf] }
 0x1d2   : > { %v18447_v39 = vpop.f32.mrb[52].mxu0  ;;  %1528 = vmatprep.mubr.bf16.mxu1 %v22839_v11 }
 0x1d3   : > { %22849 = vst [vmem:[#allocation36_spill] sm:$0xff] %v18447_v39  ;;  %v2243_v35 = vpop.f32.mrb[53].mxu0 }
 0x1d4   : > { %v18454_v32 = vpop.f32.mrb[54].mxu0  ;;  %v18461_v24 = vpop.f32.mrb[56].mxu1  ;;  %v1183_v35 = vrot.slane %v1181_v63, 4  ;;  %v14178_v63 = vcombine.low %v17610_v51, %v17611_v0 }
 0x1d5   : > { %22852 = vst [vmem:[#allocation39_spill] sm:$0xff] %v18454_v32  ;;  %v18457_v22 = vpop.f32.mrb[55].mxu0  ;;  %22854 = vst [vmem:[#allocation41_spill] sm:$0xff] %v18461_v24  ;;  %v18463_v55 = vpop.f32.mrb[57].mxu1  ;;  %v1187_v24 = vshrl.u32 %v14177_v28, 16 }
 0x1d6   : > { %22853 = vst [vmem:[#allocation40_spill] sm:$0xff] %v18457_v22  ;;  %22855 = vst [vmem:[#allocation42_spill] sm:$0xff] %v18463_v55  ;;  %v18468_v22 = vpop.f32.mrb[58].mxu1  ;;  %v1184_v55 = vor.u32 %v1183_v35, %v1180_v12  ;;  %v1196_v28 = vshrl.u32 %v14178_v63, 16  ;;  %v17056_v35 = vld [vmem:[#allocation6 + $0x290] ss:$8 sps:$4 sm:$0xff]  }
 0x1d7   : > { %3198 = vmatmul.mubr.bf16.gmra.mrb[136].mxu0 %v2840_v41  ;;  %22857 = vst [vmem:[#allocation44_spill] sm:$0xff] %v18468_v22  ;;  %v889_v54 = vpop.f32.mrb[59].mxu1  ;;  %v1189_v22 = vrot.slane %v1187_v24, 3  ;;  %v17065_v24 = vld [vmem:[#allocation6 + $0x2a4] ss:$8 sps:$4 sm:$0xff]  }
 0x1d8   : > { %3207 = vmatprep.mubr.bf16.mxu0 %v22839_v11  ;;  %v1185_v17 = vsel %vm22747_vm1, %v1175_v20, %v1184_v55  ;;  %v17612_v54 = vld [vmem:[#allocation2 + $0x10] sm:$0xf]  ;;  %v17617_v32 = vld [vmem:[#allocation2 + $0x1c] sm:$0xf] }
 0x1d9   : > { %1529 = vmatmul.mubr.bf16.gmra.mrb[140].mxu1 %v1176_v52  ;;  %v17058_v52 = vld [vmem:[#allocation6 + $0x294] ss:$8 sps:$4 sm:$0xff]  }
 0x1da   : > { %v18465_v15 = vpop.f32.mrb[56].mxu0  ;;  %1538 = vmatprep.mubr.bf16.mxu1 %v22839_v11 }
 0x1db   : > { %22856 = vst [vmem:[#allocation43_spill] sm:$0xff] %v18465_v15  ;;  %v18470_v47 = vpop.f32.mrb[57].mxu0  ;;  %v17613_v15 = vld [vmem:[#allocation2 + $0x14] sm:$0xf] }
 0x1dc   : > { %22858 = vst [vmem:[#allocation45_spill] sm:$0xff] %v18470_v47  ;;  %v18472_v48 = vpop.f32.mrb[58].mxu0  ;;  %v1192_v47 = vrot.slane %v1190_v56, 4  ;;  %v17614_v56 = vld [vmem:[#allocation2 + $0xb0] sm:$0xf] }
 0x1dd   : > { %22859 = vst [vmem:[#allocation46_spill] sm:$0xff] %v18472_v48  ;;  %v2257_v41 = vpop.f32.mrb[59].mxu0  ;;  %v14277_v48 = vcombine.low %v17612_v54, %v17613_v15  ;;  %v17615_v15 = vld [vmem:[#allocation2 + $0xb4] sm:$0xf] }
 0x1de   : > { %v17050_v41 = vld [vmem:[#allocation6 + $0x280] ss:$8 sps:$4 sm:$0xff]   ;;  %v1193_v12 = vor.u32 %v1192_v47, %v1189_v22  ;;  %v14179_v0 = vcombine.low %v17614_v56, %v17615_v15  ;;  %v1198_v22 = vrot.slane %v1196_v28, 3  ;;  %v17074_v56 = vld [vmem:[#allocation6 + $0x2b4] ss:$8 sps:$4 sm:$0xff]  }
 0x1df   : > { %3208 = vmatmul.mubr.bf16.gmra.mrb[140].mxu0 %v2839_v46  ;;  %v1199_v46 = vshll.u32 %v14178_v63, 16  ;;  %v17072_v15 = vld [vmem:[#allocation6 + $0x2b0] ss:$8 sps:$4 sm:$0xff]  }
 0x1e0   : > { %3486 = vmatprep.mubr.bf16.mxu0 %v22839_v11  ;;  %v1194_v54 = vsel %vm22747_vm1, %v1184_v55, %v1193_v12  ;;  %v1205_v28 = vshrl.u32 %v14179_v0, 16 }
 0x1e1   : > { %1539 = vmatmul.mubr.bf16.gmra.mrb[72].mxu1 %v1185_v17  ;;  %v1201_v47 = vrot.slane %v1199_v46, 4  ;;  %v1208_v46 = vshll.u32 %v14179_v0, 16 }
 0x1e2   : > { %1548 = vmatprep.mubr.bf16.mxu1 %v22839_v11 }
 0x1e3   : > { %v1202_v55 = vor.u32 %v1201_v47, %v1198_v22  ;;  %v1207_v47 = vrot.slane %v1205_v28, 3  ;;  %v1210_v0 = vrot.slane %v1208_v46, 4 }
 0x1e4   : > { %v18479_v51 = vpop.f32.mrb[64].mxu1 }
 0x1e5   : > { %22860 = vst [vmem:[#allocation47_spill] sm:$0xff] %v18479_v51  ;;  %v905_v20 = vpop.f32.mrb[65].mxu1  ;;  %v1203_v22 = vsel %vm22747_vm1, %v1193_v12, %v1202_v55  ;;  %v1211_v12 = vor.u32 %v1210_v0, %v1207_v47 }
 0x1e6   : > { %v18484_v63 = vpop.f32.mrb[66].mxu1  ;;  %v17063_v20 = vld [vmem:[#allocation6 + $0x2a0] ss:$8 sps:$4 sm:$0xff]  }
 0x1e7   : > { %3487 = vmatmul.mubr.bf16.vlgmr.msra.gmra.mrb[0].mxu0 %v14277_v48  ;;  %22862 = vst [vmem:[#allocation49_spill] sm:$0xff] %v18484_v63  ;;  %v18486_v31 = vpop.f32.mrb[67].mxu1 }
 0x1e8   : > { %4299 = vmatpush1.bf16.msra.mxu0 %v17050_v41  ;;  %3496 = vmatprep.mubr.bf16.mxu0 %v22839_v11  ;;  %v17616_v41 = vld [vmem:[#allocation2 + $0x18] sm:$0xf]  ;;  %22863 = vst [vmem:[#allocation50_spill] sm:$0xff] %v18486_v31 }
 0x1e9   : > { %4300 = vmatprep.subr.bf16.mxu0 %v17058_v52  ;;  %v14278_v5 = vcombine.low %v17616_v41, %v17617_v32  ;;  %1549 = vmatmul.mubr.bf16.gmra.mrb[144].mxu1 %v1194_v54  ;;  %v17618_v41 = vld [vmem:[#allocation2 + $0xb8] sm:$0xf]  ;;  %v17619_v54 = vld [vmem:[#allocation2 + $0xbc] sm:$0xf] }
 0x1ea   : > { %v18481_v17 = vpop.f32.mrb[64].mxu0  ;;  %1558 = vmatprep.mubr.bf16.mxu1 %v22839_v11 }
 0x1eb   : > { %22861 = vst [vmem:[#allocation48_spill] sm:$0xff] %v18481_v17  ;;  %v2273_v48 = vpop.f32.mrb[65].mxu0 }
 0x1ec   : > { %v18488_v52 = vpop.f32.mrb[66].mxu0  ;;  %4301 = vmatpush1.bf16.msra.mxu0 %v17056_v35  ;;  %v18494_v32 = vpop.f32.mrb[68].mxu1  ;;  %v17081_v35 = vld [vmem:[#allocation6 + $0x2c4] ss:$8 sps:$4 sm:$0xff]  }
 0x1ed   : > { %22864 = vst [vmem:[#allocation51_spill] sm:$0xff] %v18488_v52  ;;  %v18490_v51 = vpop.f32.mrb[67].mxu0  ;;  %4302 = vmatprep.subr.bf16.mxu0 %v17065_v24  ;;  %22866 = vst [vmem:[#allocation53_spill] sm:$0xff] %v18494_v32  ;;  %v18496_v48 = vpop.f32.mrb[69].mxu1  ;;  %v14180_v24 = vcombine.low %v17618_v41, %v17619_v54  ;;  %v17621_v32 = vld [vmem:[#allocation2 + $0x24] sm:$0xf] }
 0x1ee   : > { %22865 = vst [vmem:[#allocation52_spill] sm:$0xff] %v18490_v51  ;;  %22867 = vst [vmem:[#allocation54_spill] sm:$0xff] %v18496_v48  ;;  %v17087_v41 = vld [vmem:[#allocation6 + $0x2d4] ss:$8 sps:$4 sm:$0xff]   ;;  %v17085_v54 = vld [vmem:[#allocation6 + $0x2d0] ss:$8 sps:$4 sm:$0xff]  }
 0x1ef   : > { %3497 = vmatmul.mubr.bf16.gmra.mrb[144].mxu0 %v14278_v5  ;;  %v18501_v5 = vpop.f32.mrb[70].mxu1  ;;  %v1214_v28 = vshrl.u32 %v14180_v24, 16  ;;  %v1217_v46 = vshll.u32 %v14180_v24, 16 }
 0x1f0   : > { %3506 = vmatprep.mubr.bf16.mxu0 %v22839_v11  ;;  %4303 = vmatpush1.bf16.msra.mxu0 %v17063_v20  ;;  %22869 = vst [vmem:[#allocation56_spill] sm:$0xff] %v18501_v5  ;;  %v17620_v20 = vld [vmem:[#allocation2 + $0x20] sm:$0xf]  ;;  %v919_v63 = vpop.f32.mrb[71].mxu1  ;;  %v17099_v5 = vld [vmem:[#allocation6 + $0x2f4] ss:$8 sps:$4 sm:$0xff]  }
 0x1f1   : > { %4304 = vmatprep.subr.bf16.mxu0 %v17074_v56  ;;  %v14279_v31 = vcombine.low %v17620_v20, %v17621_v32  ;;  %v17079_v56 = vld [vmem:[#allocation6 + $0x2c0] ss:$8 sps:$4 sm:$0xff]   ;;  %1559 = vmatmul.mubr.bf16.gmra.mrb[148].mxu1 %v1203_v22  ;;  %v17093_v63 = vld [vmem:[#allocation6 + $0x2e4] ss:$8 sps:$4 sm:$0xff]   ;;  %v1212_v32 = vsel %vm22747_vm1, %v1202_v55, %v1211_v12  ;;  %v1219_v20 = vrot.slane %v1217_v46, 4 }
 0x1f2   : > { %v18498_v51 = vpop.f32.mrb[68].mxu0  ;;  %1568 = vmatprep.mubr.bf16.mxu1 %v22839_v11  ;;  %v17623_v22 = vld [vmem:[#allocation2 + $0x2c] sm:$0xf]  ;;  %v17625_v46 = vld [vmem:[#allocation2 + $0x34] sm:$0xf] }
 0x1f3   : > { %22868 = vst [vmem:[#allocation55_spill] sm:$0xff] %v18498_v51  ;;  %v18503_v52 = vpop.f32.mrb[69].mxu0 }
 0x1f4   : > { %22870 = vst [vmem:[#allocation57_spill] sm:$0xff] %v18503_v52  ;;  %v18505_v48 = vpop.f32.mrb[70].mxu0  ;;  %4305 = vmatpush1.bf16.msra.mxu0 %v17072_v15  ;;  %v1216_v15 = vrot.slane %v1214_v28, 3  ;;  %v17624_v28 = vld [vmem:[#allocation2 + $0x30] sm:$0xf] }
 0x1f5   : > { %22871 = vst [vmem:[#allocation58_spill] sm:$0xff] %v18505_v48  ;;  %v2287_v17 = vpop.f32.mrb[71].mxu0  ;;  %4306 = vmatprep.subr.bf16.mxu0 %v17081_v35  ;;  %v17091_v48 = vld [vmem:[#allocation6 + $0x2e0] ss:$8 sps:$4 sm:$0xff]   ;;  %v17097_v52 = vld [vmem:[#allocation6 + $0x2f0] ss:$8 sps:$4 sm:$0xff]  }
 0x1f6   : > { %v17622_v17 = vld [vmem:[#allocation2 + $0x28] sm:$0xf] }
 0x1f7   : > { %3507 = vmatmul.mubr.bf16.gmra.mrb[148].mxu0 %v14279_v31  ;;  %v14280_v35 = vcombine.low %v17622_v17, %v17623_v22  ;;  %v1220_v31 = vor.u32 %v1219_v20, %v1216_v15  ;;  %v17626_v17 = vld [vmem:[#allocation2 + $0x94] sm:$0xff]  }
 0x1f8   : > { %3516 = vmatprep.mubr.bf16.mxu0 %v22839_v11  ;;  %4307 = vmatpush1.bf16.msra.mxu0 %v17079_v56  ;;  %v1930_v22 = vshrl.u32 %v17626_v17, 16 }
 0x1f9   : > { %4308 = vmatprep.subr.bf16.mxu0 %v17087_v41  ;;  %1569 = vmatmul.mubr.bf16.gmra.mrb[84].mxu1 %v1212_v32  ;;  %v1221_v0 = vsel %vm22747_vm1, %v1211_v12, %v1220_v31 }
 0x1fa   : > { %1578 = vmatprep.mubr.bf16.mxu1 %v22839_v11 }
 0x1fc   : > { %4309 = vmatpush1.bf16.msra.mxu0 %v17085_v54  ;;  %v18512_v24 = vpop.f32.mrb[76].mxu1  ;;  %v14281_v54 = vcombine.low %v17624_v28, %v17625_v46  ;;  %v17628_v46 = vld [vmem:[#allocation2 + $0x3c] sm:$0xf] }
 0x1fd   : > { %4310 = vmatprep.subr.bf16.mxu0 %v17093_v63  ;;  %22872 = vst [vmem:[#allocation59_spill] sm:$0xff] %v18512_v24  ;;  %v935_v47 = vpop.f32.mrb[77].mxu1 }
 0x1fe   : > { %v18517_v56 = vpop.f32.mrb[78].mxu1 }
 0x1ff   : > { %3517 = vmatmul.mubr.bf16.gmra.mrb[12].mxu0 %v14280_v35  ;;  %22873 = vst [vmem:[#allocation60_spill] sm:$0xff] %v18517_v56  ;;  %v18519_v63 = vpop.f32.mrb[79].mxu1 }
 0x200   : > { %3526 = vmatprep.mubr.bf16.mxu0 %v22839_v11  ;;  %4311 = vmatpush1.bf16.msra.mxu0 %v17091_v48  ;;  %22874 = vst [vmem:[#allocation61_spill] sm:$0xff] %v18519_v63  ;;  %v17061_v48 = vld [vmem:[#allocation2 + $0x9c] sm:$0xff]  }
 0x201   : > { %1579 = vmatmul.mubr.bf16.gmra.mrb[152].mxu1 %v1221_v0  ;;  %v1934_v47 = vshll.u32 %v17061_v48, 16  ;;  %v17627_v0 = vld [vmem:[#allocation2 + $0x38] sm:$0xf]  ;;  %4312 = vmatprep.subr.bf16.mxu0 %v17099_v5 }
 0x202   : > { %v18514_v55 = vpop.f32.mrb[72].mxu0  ;;  %1588 = vmatprep.mubr.bf16.mxu1 %v22839_v11  ;;  %v14282_v63 = vcombine.low %v17627_v0, %v17628_v46  ;;  %v1938_v0 = vshrl.u32 %v17061_v48, 16  ;;  %v17629_v46 = vld [vmem:[#allocation2 + $0x40] sm:$0xf] }
 0x203   : > { %v2991_v41 = vpop.f32.mrb[73].mxu0  ;;  %v1936_v17 = vrot.slane %v1934_v47, 1  ;;  %v17068_v47 = vld [vmem:[#allocation2 + $0xac] sm:$0xff]  }
 0x204   : > { %v18521_v32 = vpop.f32.mrb[74].mxu0  ;;  %v18527_v12 = vpop.f32.mrb[80].mxu1  ;;  %4313 = vmatpush1.bf16.msra.mxu0 %v17097_v52 }
 0x205   : > { %v18523_v15 = vpop.f32.mrb[75].mxu0  ;;  %22875 = vst [vmem:[#allocation62_spill] sm:$0xff] %v18527_v12  ;;  %v18529_v20 = vpop.f32.mrb[81].mxu1  ;;  %v1932_v12 = vor.u32 %v1930_v22, %v18236_v40  ;;  %v1940_v40 = vor.u32 %v1938_v0, %v1936_v17 }
 0x206   : > { %22876 = vst [vmem:[#allocation63_spill] sm:$0xff] %v18529_v20  ;;  %v18533_v41 = vpop.f32.mrb[82].mxu1  ;;  %v17066_v20 = vld [vmem:[#allocation2 + $0xa4] sm:$0xff]  }
 0x207   : > { %3527 = vmatmul.mubr.bf16.gmra.mrb[152].mxu0 %v14281_v54  ;;  %22877 = vst [vmem:[#allocation64_spill] sm:$0xff] %v18533_v41  ;;  %v949_v56 = vpop.f32.mrb[83].mxu1  ;;  %v1937_v41 = vsel %vm22746_vm0, %v1932_v12, %v1936_v17  ;;  %v1946_v52 = vshrl.u32 %v17066_v20, 16  ;;  %v1950_v12 = vshll.u32 %v17068_v47, 16 }
 0x208   : > { %3536 = vmatprep.mubr.bf16.mxu0 %v22839_v11  ;;  %v1942_v56 = vshll.u32 %v17066_v20, 16 }
 0x209   : > { %1589 = vmatmul.mubr.bf16.gmra.mrb[156].mxu1 %v1220_v31 }
 0x20a   : > { %v18531_v35 = vpop.f32.mrb[76].mxu0  ;;  %2289 = vmatprep.mubr.bf16.mxu1 %v22839_v11  ;;  %v1944_v22 = vrot.slane %v1942_v56, 1 }
 0x20b   : > { %v18535_v28 = vpop.f32.mrb[77].mxu0 }
 0x20c   : > { %v18537_v54 = vpop.f32.mrb[78].mxu0  ;;  %v1945_v48 = vsel %vm22746_vm0, %v1940_v40, %v1944_v22  ;;  %v17070_v40 = vld [vmem:[#allocation2 + $0xb4] sm:$0xff]  }
 0x20d   : > { %v3005_v24 = vpop.f32.mrb[79].mxu0  ;;  %v1958_v18 = vshll.u32 %v17070_v40, 16 }
 0x20e   : > { %v17630_v24 = vld [vmem:[#allocation2 + $0x44] sm:$0xf] }
 0x20f   : > { %3537 = vmatmul.mubr.bf16.gmra.mrb[156].mxu0 %v14282_v63  ;;  %v14283_v31 = vcombine.low %v17629_v46, %v17630_v24  ;;  %v17631_v46 = vld [vmem:[#allocation2 + $0x48] sm:$0xf]  ;;  %v17632_v24 = vld [vmem:[#allocation2 + $0x4c] sm:$0xf] }
 0x210   : > { %3546 = vmatprep.mubr.bf16.mxu0 %v22839_v11  ;;  %v14284_v17 = vcombine.low %v17631_v46, %v17632_v24 }
 0x211   : > { %2290 = vmatmul.mubr.bf16.vlgmr.msra.gmra.mrb[72].mxu1 %v1937_v41 }
 0x212   : > { %2299 = vmatprep.mubr.bf16.mxu1 %v22839_v11 }
 0x214   : > { %v18545_v63 = vpop.f32.mrb[88].mxu1 }
 0x215   : > { %22878 = vst [vmem:[#allocation65_spill] sm:$0xff] %v18545_v63  ;;  %v965_v5 = vpop.f32.mrb[89].mxu1  ;;  %v1952_v63 = vrot.slane %v1950_v12, 1 }
 0x216   : > { %v18550_v39 = vpop.f32.mrb[90].mxu1  ;;  %v1948_v5 = vor.u32 %v1946_v52, %v1944_v22  ;;  %v17634_v22 = vld [vmem:[#allocation2 + $0x54] sm:$0xf] }
 0x217   : > { %3547 = vmatmul.mubr.bf16.gmra.mrb[24].mxu0 %v14283_v31  ;;  %22879 = vst [vmem:[#allocation66_spill] sm:$0xff] %v18550_v39  ;;  %v18552_v0 = vpop.f32.mrb[91].mxu1  ;;  %v1954_v39 = vshrl.u32 %v17068_v47, 16  ;;  %v14285_v52 = vcombine.low %v17633_v4, %v17634_v22 }
 0x218   : > { %3556 = vmatprep.mubr.bf16.mxu0 %v22839_v11  ;;  %22880 = vst [vmem:[#allocation67_spill] sm:$0xff] %v18552_v0  ;;  %v1953_v24 = vsel %vm22746_vm0, %v1948_v5, %v1952_v63  ;;  %v17105_v5 = vld [vmem:[#allocation6 + $0x304] ss:$8 sps:$4 sm:$0xff]  }
 0x219   : > { %2300 = vmatmul.mubr.bf16.gmra.mrb[160].mxu1 %v1945_v48  ;;  %5166 = vmatprep.subr.bf16.mxu0 %v17105_v5 }
 0x21a   : > { %v18547_v51 = vpop.f32.mrb[80].mxu0  ;;  %2309 = vmatprep.mubr.bf16.mxu1 %v22839_v11 }
 0x21b   : > { %v3021_v41 = vpop.f32.mrb[81].mxu0 }
 0x21c   : > { %v18554_v56 = vpop.f32.mrb[82].mxu0  ;;  %v18560_v20 = vpop.f32.mrb[92].mxu1 }
 0x21d   : > { %v18556_v31 = vpop.f32.mrb[83].mxu0  ;;  %22881 = vst [vmem:[#allocation68_spill] sm:$0xff] %v18560_v20  ;;  %v18562_v41 = vpop.f32.mrb[93].mxu1  ;;  %v1960_v20 = vrot.slane %v1958_v18, 1 }
 0x21e   : > { %22882 = vst [vmem:[#allocation69_spill] sm:$0xff] %v18562_v41  ;;  %v977_v0 = vpop.f32.mrb[94].mxu1  ;;  %v1956_v41 = vor.u32 %v1954_v39, %v1952_v63 }
 0x21f   : > { %3557 = vmatmul.mubr.bf16.gmra.mrb[160].mxu0 %v14284_v17  ;;  %v978_v12 = vpop.f32.mrb[95].mxu1 }
 0x220   : > { %3566 = vmatprep.mubr.bf16.mxu0 %v22839_v11  ;;  %v1961_v4 = vsel %vm22746_vm0, %v1956_v41, %v1960_v20  ;;  %v17635_v12 = vld [vmem:[#allocation2 + $0x58] sm:$0xf] }
 0x221   : > { %2310 = vmatmul.mubr.bf16.gmra.mrb[164].mxu1 %v1953_v24  ;;  %v1966_v24 = vshll.u32 %v17075_v23, 16  ;;  %v14286_v39 = vcombine.low %v17635_v12, %v17636_v13 }
 0x222   : > { %v18564_v46 = vpop.f32.mrb[84].mxu0  ;;  %2319 = vmatprep.mubr.bf16.mxu1 %v22839_v11 }
 0x223   : > { %v18567_v48 = vpop.f32.mrb[85].mxu0 }
 0x224   : > { %v18569_v17 = vpop.f32.mrb[86].mxu0  ;;  %v18572_v0 = vpop.f32.mrb[0].mxu1 }
 0x225   : > { %v3035_v37 = vpop.f32.mrb[87].mxu0  ;;  %22883 = vst [vmem:[#allocation70_spill] sm:$0xff] %v18572_v0  ;;  %v18575_v47 = vpop.f32.mrb[1].mxu1 }
 0x226   : > { %22884 = vst [vmem:[#allocation71_spill] sm:$0xff] %v18575_v47  ;;  %v18578_v22 = vpop.f32.mrb[2].mxu1  ;;  %v1962_v37 = vshrl.u32 %v17070_v40, 16 }
 0x227   : > { %3567 = vmatmul.mubr.bf16.gmra.mrb[164].mxu0 %v14285_v52  ;;  %22885 = vst [vmem:[#allocation72_spill] sm:$0xff] %v18578_v22  ;;  %v18580_v18 = vpop.f32.mrb[3].mxu1  ;;  %v1968_v52 = vrot.slane %v1966_v24, 1 }
 0x228   : > { %3576 = vmatprep.mubr.bf16.mxu0 %v22839_v11  ;;  %22886 = vst [vmem:[#allocation73_spill] sm:$0xff] %v18580_v18  ;;  %v1964_v63 = vor.u32 %v1962_v37, %v1960_v20  ;;  %v17637_v20 = vld [vmem:[#allocation2 + $0x60] sm:$0xf]  ;;  %v17638_v37 = vld [vmem:[#allocation2 + $0x64] sm:$0xf] }
 0x229   : > { %2320 = vmatmul.mubr.bf16.gmra.mrb[84].mxu1 %v1961_v4  ;;  %v14287_v24 = vcombine.low %v17637_v20, %v17638_v37 }
 0x22a   : > { %2329 = vmatprep.mubr.bf16.mxu1 %v22839_v11  ;;  %v1969_v47 = vsel %vm22746_vm0, %v1964_v63, %v1968_v52 }
 0x22c   : > { %v1370_v0 = vpop.f32.mrb[96].mxu1 }
 0x22d   : > { %v1371_v41 = vadd.f32 %v1370_v0, %v18280_v30  ;;  %v1372_v5 = vpop.f32.mrb[97].mxu1 }
 0x22e   : > { %v1374_v40 = vpop.f32.mrb[98].mxu1 }
 0x22f   : > { %3577 = vmatmul.mubr.bf16.gmra.mrb[36].mxu0 %v14286_v39  ;;  %v2352_v13 = vadd.f32 %v18282_v38, %v1371_v41  ;;  %v1375_v4 = vadd.f32 %v1374_v40, %v18285_v42  ;;  %v1376_v18 = vpop.f32.mrb[99].mxu1  ;;  %v1970_v38 = vshrl.u32 %v17075_v23, 16 }
 0x230   : > { %3586 = vmatprep.mubr.bf16.mxu0 %v22839_v11  ;;  %v1377_v21 = vadd.f32 %v1376_v18, %v18287_v44 }
 0x231   : > { %v18594_v30 = vadd.f32 %v18514_v55, %v2352_v13  ;;  %v2354_v0 = vadd.f32 %v18289_v45, %v1375_v4  ;;  %2330 = vmatmul.mubr.bf16.gmra.mrb[168].mxu1 %v1969_v47  ;;  %v1972_v18 = vor.u32 %v1970_v38, %v1968_v52  ;;  %v17640_v13 = vld [vmem:[#allocation2 + $0x6c] sm:$0xf]  ;;  %v17642_v38 = vld [vmem:[#allocation2 + $0x74] sm:$0xf] }
 0x232   : > { %v18585_v22 = vpop.f32.mrb[88].mxu0  ;;  %v2355_v63 = vadd.f32 %v18292_v49, %v1377_v21  ;;  %2339 = vmatprep.mubr.bf16.mxu1 %v22839_v11 }
 0x233   : > { %v3051_v12 = vpop.f32.mrb[89].mxu0  ;;  %v18602_v42 = vadd.f32 %v18521_v32, %v2354_v0 }
 0x234   : > { %v18590_v39 = vpop.f32.mrb[90].mxu0  ;;  %v18605_v41 = vadd.f32 %v18523_v15, %v2355_v63  ;;  %v1380_v44 = vpop.f32.mrb[100].mxu1  ;;  %v17639_v15 = vld [vmem:[#allocation2 + $0x68] sm:$0xf] }
 0x235   : > { %v18597_v5 = vpop.f32.mrb[91].mxu0  ;;  %v1381_v45 = vadd.f32 %v1380_v44, %v18296_v58  ;;  %v1382_v55 = vpop.f32.mrb[101].mxu1  ;;  %v14288_v12 = vcombine.low %v17639_v15, %v17640_v13  ;;  %v17644_v15 = vld [vmem:[#allocation2 + $0x7c] sm:$0xf] }
 0x236   : > { %v1383_v49 = vadd.f32 %v1382_v55, %v18298_v61  ;;  %v1384_v21 = vpop.f32.mrb[102].mxu1 }
 0x237   : > { %3587 = vmatmul.mubr.bf16.gmra.mrb[168].mxu0 %v14287_v24  ;;  %v2356_v23 = vadd.f32 %v18300_v3, %v1381_v45  ;;  %v1385_v40 = vadd.f32 %v1384_v21, %v18303_v7  ;;  %v1386_v4 = vpop.f32.mrb[103].mxu1 }
 0x238   : > { %3596 = vmatprep.mubr.bf16.mxu0 %v22839_v11  ;;  %v2357_v20 = vadd.f32 %v18305_v8, %v1383_v49 }
 0x239   : > { %v18620_v52 = vadd.f32 %v18531_v35, %v2356_v23  ;;  %v2358_v61 = vadd.f32 %v18307_v10, %v1385_v40  ;;  %2340 = vmatmul.mubr.bf16.gmra.mrb[172].mxu1 %v1972_v18  ;;  %v17641_v35 = vld [vmem:[#allocation2 + $0x70] sm:$0xf]  ;;  %v17643_v40 = vld [vmem:[#allocation2 + $0x78] sm:$0xf] }
 0x23a   : > { %v18609_v47 = vpop.f32.mrb[92].mxu0  ;;  %v18624_v3 = vadd.f32 %v18535_v28, %v2357_v20  ;;  %v14289_v10 = vcombine.low %v17641_v35, %v17642_v38  ;;  %v14290_v13 = vcombine.low %v17643_v40, %v17644_v15  ;;  %v17648_v15 = vld [vmem:[#allocation2 + $0x8c] sm:$0xf] }
 0x23b   : > { %v18613_v32 = vpop.f32.mrb[93].mxu0  ;;  %v18627_v7 = vadd.f32 %v18537_v54, %v2358_v61 }
 0x23c   : > { %v18617_v58 = vpop.f32.mrb[94].mxu0  ;;  %v18629_v24 = vpop.f32.mrb[12].mxu1 }
 0x23d   : > { %v3065_v37 = vpop.f32.mrb[95].mxu0  ;;  %22887 = vst [vmem:[#allocation74_spill] sm:$0xff] %v18629_v24  ;;  %v18632_v8 = vpop.f32.mrb[13].mxu1  ;;  %v22938_v24 = vld [vmem:[#allocation46_spill] sm:$0xff] }
 0x23e   : > { %22888 = vst [vmem:[#allocation75_spill] sm:$0xff] %v18632_v8  ;;  %v18634_v0 = vpop.f32.mrb[14].mxu1 }
 0x23f   : > { %3597 = vmatmul.mubr.bf16.gmra.mrb[172].mxu0 %v14288_v12  ;;  %22889 = vst [vmem:[#allocation76_spill] sm:$0xff] %v18634_v0  ;;  %v18636_v63 = vpop.f32.mrb[15].mxu1 }
 0x240   : > { %3606 = vmatprep.mubr.bf16.mxu0 %v22839_v11  ;;  %22890 = vst [vmem:[#allocation77_spill] sm:$0xff] %v18636_v63 }
 0x244   : > { %v1400_v28 = vpop.f32.mrb[104].mxu1 }
 0x245   : > { %v1401_v54 = vadd.f32 %v1400_v28, %v18316_v43  ;;  %v1402_v44 = vpop.f32.mrb[105].mxu1 }
 0x246   : > { %v1404_v55 = vpop.f32.mrb[106].mxu1 }
 0x247   : > { %3607 = vmatmul.mubr.bf16.gmra.mrb[48].mxu0 %v14289_v10  ;;  %v2364_v18 = vadd.f32 %v18318_v53, %v1401_v54  ;;  %v1405_v21 = vadd.f32 %v1404_v55, %v18321_v57  ;;  %v1406_v23 = vpop.f32.mrb[107].mxu1  ;;  %v17645_v54 = vld [vmem:[#allocation2 + $0x80] sm:$0xf] }
 0x248   : > { %3616 = vmatprep.mubr.bf16.mxu0 %v22839_v11  ;;  %v1407_v4 = vadd.f32 %v1406_v23, %v18323_v60 }
 0x249   : > { %v18648_v20 = vadd.f32 %v18547_v51, %v2364_v18  ;;  %v2366_v43 = vadd.f32 %v18325_v62, %v1405_v21 }
 0x24a   : > { %v18640_v45 = vpop.f32.mrb[96].mxu0  ;;  %v2367_v53 = vadd.f32 %v18328_v6, %v1407_v4 }
 0x24b   : > { %v3081_v49 = vpop.f32.mrb[97].mxu0  ;;  %v18655_v37 = vadd.f32 %v18554_v56, %v2366_v43 }
 0x24c   : > { %v18644_v12 = vpop.f32.mrb[98].mxu0  ;;  %v18658_v57 = vadd.f32 %v18556_v31, %v2367_v53  ;;  %v1410_v35 = vpop.f32.mrb[108].mxu1  ;;  %v17646_v31 = vld [vmem:[#allocation2 + $0x84] sm:$0xf] }
 0x24d   : > { %v18651_v61 = vpop.f32.mrb[99].mxu0  ;;  %v1411_v60 = vadd.f32 %v1410_v35, %v18332_v16  ;;  %v1412_v51 = vpop.f32.mrb[109].mxu1  ;;  %v14291_v44 = vcombine.low %v17645_v54, %v17646_v31 }
 0x24e   : > { %v1413_v62 = vadd.f32 %v1412_v51, %v18334_v19  ;;  %v1414_v10 = vpop.f32.mrb[110].mxu1 }
 0x24f   : > { %3617 = vmatmul.mubr.bf16.gmra.mrb[176].mxu0 %v14290_v13  ;;  %v2368_v6 = vadd.f32 %v18336_v2, %v1411_v60  ;;  %v1415_v56 = vadd.f32 %v1414_v10, %v18339_v26  ;;  %v1416_v55 = vpop.f32.mrb[111].mxu1  ;;  %v17649_v10 = vld [vmem:[#allocation2 + $0x90] sm:$0xf] }
 0x250   : > { %3626 = vmatprep.mubr.bf16.mxu0 %v22839_v11  ;;  %v2369_v18 = vadd.f32 %v18341_v27, %v1413_v62 }
 0x251   : > { %v18673_v16 = vadd.f32 %v18564_v46, %v2368_v6  ;;  %v2370_v19 = vadd.f32 %v18343_v29, %v1415_v56  ;;  %v17647_v46 = vld [vmem:[#allocation2 + $0x88] sm:$0xf]  ;;  %v17650_v6 = vld [vmem:[#allocation2 + $0x94] sm:$0xf] }
 0x252   : > { %v18662_v38 = vpop.f32.mrb[100].mxu0  ;;  %v18677_v2 = vadd.f32 %v18567_v48, %v2369_v18  ;;  %v14292_v13 = vcombine.low %v17647_v46, %v17648_v15  ;;  %v14293_v56 = vcombine.low %v17649_v10, %v17650_v6 }
 0x253   : > { %v18666_v28 = vpop.f32.mrb[101].mxu0  ;;  %v18680_v23 = vadd.f32 %v18569_v17, %v2370_v19 }
 0x254   : > { %v18670_v49 = vpop.f32.mrb[102].mxu0  ;;  %v18682_v26 = vpop.f32.mrb[24].mxu1 }
 0x255   : > { %v3095_v21 = vpop.f32.mrb[103].mxu0  ;;  %22891 = vst [vmem:[#allocation78_spill] sm:$0xff] %v18682_v26  ;;  %v18685_v27 = vpop.f32.mrb[25].mxu1 }
 0x256   : > { %22892 = vst [vmem:[#allocation79_spill] sm:$0xff] %v18685_v27  ;;  %v18687_v40 = vpop.f32.mrb[26].mxu1  ;;  %v22936_v27 = vld [vmem:[#allocation29_spill] sm:$0xff] }
 0x257   : > { %3627 = vmatmul.mubr.bf16.gmra.mrb[180].mxu0 %v14291_v44  ;;  %22893 = vst [vmem:[#allocation80_spill] sm:$0xff] %v18687_v40  ;;  %v18689_v29 = vpop.f32.mrb[27].mxu1  ;;  %v14300_v26 = vcombine.low %v22936_v27, %v22936_v27 }
 0x258   : > { %3636 = vmatprep.mubr.bf16.mxu0 %v22839_v11  ;;  %22894 = vst [vmem:[#allocation81_spill] sm:$0xff] %v18689_v29  ;;  %v22928_v29 = vld [vmem:[#allocation39_spill] sm:$0xff] }
 0x25c   : > { %v1430_v48 = vpop.f32.mrb[112].mxu1 }
 0x25d   : > { %v1431_v17 = vadd.f32 %v1430_v48, %v18352_v9  ;;  %v1432_v4 = vpop.f32.mrb[113].mxu1  ;;  %v17651_v48 = vld [vmem:[#allocation2 + $0x98] sm:$0xf] }
 0x25e   : > { %v1434_v53 = vpop.f32.mrb[114].mxu1 }
 0x25f   : > { %3637 = vmatmul.mubr.bf16.gmra.mrb[60].mxu0 %v14292_v13  ;;  %v2376_v35 = vadd.f32 %v18354_v25, %v1431_v17  ;;  %v1435_v51 = vadd.f32 %v1434_v53, %v18357_v33  ;;  %v1436_v62 = vpop.f32.mrb[115].mxu1  ;;  %v22896_v53 = vld [vmem:[#allocation15_spill] sm:$0xff] }
 0x260   : > { %3646 = vmatprep.mubr.bf16.mxu0 %v22839_v11  ;;  %v1437_v31 = vadd.f32 %v1436_v62, %v18359_v36 }
 0x261   : > { %v18701_v44 = vadd.f32 %v18585_v22, %v2376_v35  ;;  %v2378_v9 = vadd.f32 %v18361_v34, %v1435_v51  ;;  %v22897_v51 = vld [vmem:[#allocation16_spill] sm:$0xff] }
 0x262   : > { %v18693_v43 = vpop.f32.mrb[104].mxu0  ;;  %v2379_v25 = vadd.f32 %v18364_v50, %v1437_v31 }
 0x263   : > { %v3111_v60 = vpop.f32.mrb[105].mxu0  ;;  %v18708_v18 = vadd.f32 %v18590_v39, %v2378_v9  ;;  %v22895_v39 = vld [vmem:[#allocation14_spill] sm:$0xff] }
 0x264   : > { %v18697_v54 = vpop.f32.mrb[106].mxu0  ;;  %v18711_v33 = vadd.f32 %v18597_v5, %v2379_v25  ;;  %v1440_v19 = vpop.f32.mrb[116].mxu1  ;;  %v17652_v5 = vld [vmem:[#allocation2 + $0x9c] sm:$0xf]  ;;  %v17654_v9 = vld [vmem:[#allocation2 + $0xa4] sm:$0xf] }
 0x265   : > { %v18704_v55 = vpop.f32.mrb[107].mxu0  ;;  %v1441_v36 = vadd.f32 %v1440_v19, %v18368_v59  ;;  %v1442_v22 = vpop.f32.mrb[117].mxu1  ;;  %v14294_v17 = vcombine.low %v17651_v48, %v17652_v5  ;;  %v22904_v48 = vld [vmem:[#allocation23_spill] sm:$0xff] }
 0x266   : > { %v1443_v34 = vadd.f32 %v1442_v22, %v18372_v1  ;;  %v1444_v46 = vpop.f32.mrb[118].mxu1 }
 0x267   : > { %3647 = vmatmul.mubr.bf16.gmra.mrb[184].mxu0 %v14293_v56  ;;  %v2380_v50 = vadd.f32 %v18374_v14, %v1441_v36  ;;  %v1445_v13 = vadd.f32 %v1444_v46, %v22895_v39  ;;  %v1446_v4 = vpop.f32.mrb[119].mxu1 }
 0x268   : > { %3656 = vmatprep.mubr.bf16.mxu0 %v22839_v11  ;;  %v2381_v35 = vadd.f32 %v22896_v53, %v1443_v34  ;;  %v17655_v4 = vld [vmem:[#allocation2 + $0xa8] sm:$0xf]  ;;  %v22905_v53 = vld [vmem:[#allocation13_spill] sm:$0xff] }
 0x269   : > { %v18726_v59 = vadd.f32 %v18609_v47, %v2380_v50  ;;  %v2382_v1 = vadd.f32 %v22897_v51, %v1445_v13  ;;  %v17653_v47 = vld [vmem:[#allocation2 + $0xa0] sm:$0xf]  ;;  %v22903_v50 = vld [vmem:[#allocation22_spill] sm:$0xff] }
 0x26a   : > { %v18715_v21 = vpop.f32.mrb[108].mxu0  ;;  %v18730_v14 = vadd.f32 %v18613_v32, %v2381_v35  ;;  %v14295_v25 = vcombine.low %v17653_v47, %v17654_v9  ;;  %v14296_v35 = vcombine.low %v17655_v4, %v22905_v53  ;;  %v22907_v9 = vld [vmem:[#allocation25_spill] sm:$0xff]  ;;  %v22911_v53 = vld [vmem:[#allocation31_spill] sm:$0xff] }
 0x26b   : > { %v18719_v15 = vpop.f32.mrb[109].mxu0  ;;  %v18733_v10 = vadd.f32 %v18617_v58, %v2382_v1  ;;  %v22902_v58 = vld [vmem:[#allocation19_spill] sm:$0xff]  ;;  %v22906_v1 = vld [vmem:[#allocation24_spill] sm:$0xff] }
 0x26c   : > { %v18723_v60 = vpop.f32.mrb[110].mxu0  ;;  %v18735_v6 = vpop.f32.mrb[36].mxu1 }
 0x26d   : > { %v3125_v62 = vpop.f32.mrb[111].mxu0  ;;  %22898 = vst [vmem:[#allocation14_spill] sm:$0xff] %v18735_v6  ;;  %v18738_v56 = vpop.f32.mrb[37].mxu1  ;;  %v17101_v6 = vld [vmem:[#allocation2 + $0x10] sm:$0xff]  }
 0x26e   : > { %22899 = vst [vmem:[#allocation15_spill] sm:$0xff] %v18738_v56  ;;  %v18740_v31 = vpop.f32.mrb[38].mxu1 }
 0x26f   : > { %3657 = vmatmul.mubr.bf16.gmra.mrb[188].mxu0 %v14294_v17  ;;  %22900 = vst [vmem:[#allocation16_spill] sm:$0xff] %v18740_v31  ;;  %v18742_v19 = vpop.f32.mrb[39].mxu1 }
 0x270   : > { %3666 = vmatprep.mubr.bf16.mxu0 %v22839_v11  ;;  %22901 = vst [vmem:[#allocation82_spill] sm:$0xff] %v18742_v19 }
 0x274   : > { %v1460_v32 = vpop.f32.mrb[120].mxu1 }
 0x275   : > { %v1461_v36 = vadd.f32 %v1460_v32, %v22902_v58  ;;  %v1462_v22 = vpop.f32.mrb[121].mxu1  ;;  %v22908_v58 = vld [vmem:[#allocation26_spill] sm:$0xff] }
 0x276   : > { %v1464_v46 = vpop.f32.mrb[122].mxu1 }
 0x277   : > { %3667 = vmatmul.mubr.bf16.gmra.mrb[120].mxu0 %v14295_v25  ;;  %v2388_v39 = vadd.f32 %v22903_v50, %v1461_v36  ;;  %v1465_v5 = vadd.f32 %v1464_v46, %v22904_v48  ;;  %v1466_v17 = vpop.f32.mrb[123].mxu1 }
 0x278   : > { %3676 = vmatprep.mubr.bf16.mxu0 %v22839_v11  ;;  %v1467_v62 = vadd.f32 %v1466_v17, %v22906_v1 }
 0x279   : > { %v18755_v47 = vadd.f32 %v18640_v45, %v2388_v39  ;;  %v2390_v25 = vadd.f32 %v22907_v9, %v1465_v5  ;;  %v22910_v5 = vld [vmem:[#allocation30_spill] sm:$0xff]  ;;  %v17656_v9 = vld [vmem:[#allocation2 + $0xb0] sm:$0xf] }
 0x27a   : > { %v18746_v34 = vpop.f32.mrb[112].mxu0  ;;  %v2391_v36 = vadd.f32 %v22908_v58, %v1467_v62 }
 0x27b   : > { %v3141_v13 = vpop.f32.mrb[113].mxu0  ;;  %v18762_v22 = vadd.f32 %v18644_v12, %v2390_v25  ;;  %v22912_v12 = vld [vmem:[#allocation32_spill] sm:$0xff] }
 0x27c   : > { %v18751_v51 = vpop.f32.mrb[114].mxu0  ;;  %v18765_v46 = vadd.f32 %v18651_v61, %v2391_v36  ;;  %v1470_v50 = vpop.f32.mrb[124].mxu1  ;;  %v22909_v13 = vld [vmem:[#allocation27_spill] sm:$0xff]  ;;  %v22913_v61 = vld [vmem:[#allocation17_spill] sm:$0xff] }
 0x27d   : > { %v18758_v32 = vpop.f32.mrb[115].mxu0  ;;  %v1471_v48 = vadd.f32 %v1470_v50, %v22909_v13  ;;  %v1472_v45 = vpop.f32.mrb[125].mxu1  ;;  %v14297_v25 = vcombine.low %v17656_v9, %v22913_v61  ;;  %v22914_v36 = vld [vmem:[#allocation33_spill] sm:$0xff]  ;;  %v22915_v13 = vld [vmem:[#allocation34_spill] sm:$0xff] }
 0x27e   : > { %v1473_v17 = vadd.f32 %v1472_v45, %v22910_v5  ;;  %v1474_v4 = vpop.f32.mrb[126].mxu1 }
 0x27f   : > { %3677 = vmatmul.mubr.bf16.gmra.mrb[192].mxu0 %v14296_v35  ;;  %v2392_v1 = vadd.f32 %v22911_v53, %v1471_v48  ;;  %v1475_v35 = vadd.f32 %v1474_v4, %v22912_v12  ;;  %v1476_v58 = vpop.f32.mrb[127].mxu1 }
 0x280   : > { %3686 = vmatprep.mubr.bf16.mxu0 %v22839_v11  ;;  %v2393_v19 = vadd.f32 %v22914_v36, %v1473_v17  ;;  %v22923_v36 = vld [vmem:[#allocation36_spill] sm:$0xff] }
 0x281   : > { %v18781_v50 = vadd.f32 %v18662_v38, %v2392_v1  ;;  %v2394_v45 = vadd.f32 %v22915_v13, %v1475_v35  ;;  %v22919_v38 = vld [vmem:[#allocation20_spill] sm:$0xff]  ;;  %v22920_v1 = vld [vmem:[#allocation18_spill] sm:$0xff] }
 0x282   : > { %v18769_v39 = vpop.f32.mrb[116].mxu0  ;;  %v18785_v48 = vadd.f32 %v18666_v28, %v2393_v19  ;;  %v14298_v9 = vcombine.low %v22920_v1, %v22919_v38  ;;  %v22926_v38 = vld [vmem:[#allocation21_spill] sm:$0xff] }
 0x283   : > { %v18773_v62 = vpop.f32.mrb[117].mxu0  ;;  %v18788_v53 = vadd.f32 %v18670_v49, %v2394_v45  ;;  %v22922_v49 = vld [vmem:[#allocation35_spill] sm:$0xff] }
 0x284   : > { %v18778_v31 = vpop.f32.mrb[118].mxu0  ;;  %v18790_v4 = vpop.f32.mrb[48].mxu1 }
 0x285   : > { %v3155_v5 = vpop.f32.mrb[119].mxu0  ;;  %22916 = vst [vmem:[#allocation19_spill] sm:$0xff] %v18790_v4  ;;  %v18793_v17 = vpop.f32.mrb[49].mxu1  ;;  %v22925_v4 = vld [vmem:[#allocation28_spill] sm:$0xff] }
 0x286   : > { %22917 = vst [vmem:[#allocation22_spill] sm:$0xff] %v18793_v17  ;;  %v18795_v12 = vpop.f32.mrb[50].mxu1  ;;  %v22924_v5 = vld [vmem:[#allocation37_spill] sm:$0xff]  ;;  %v14299_v1 = vcombine.low %v22926_v38, %v22925_v4 }
 0x287   : > { %3687 = vmatmul.mubr.bf16.gmra.mrb[196].mxu0 %v14297_v25  ;;  %22918 = vst [vmem:[#allocation23_spill] sm:$0xff] %v18795_v12  ;;  %v18799_v35 = vpop.f32.mrb[51].mxu1  ;;  %v17102_v4 = vld [vmem:[#allocation2 + $0x18] sm:$0xff]  }
 0x288   : > { %3696 = vmatprep.mubr.bf16.mxu0 %v22839_v11  ;;  %22921 = vst [vmem:[#allocation13_spill] sm:$0xff] %v18799_v35  ;;  %v4011_v8 = vshll.u32 %v17102_v4, 16 }
 0x28c   : > { %v1490_v28 = vpop.f32.mrb[128].mxu1 }
 0x28d   : > { %v1491_v19 = vadd.f32 %v1490_v28, %v22922_v49  ;;  %v1492_v61 = vpop.f32.mrb[129].mxu1 }
 0x28e   : > { %v1494_v58 = vpop.f32.mrb[130].mxu1 }
 0x28f   : > { %3697 = vmatmul.mubr.bf16.gmra.mrb[132].mxu0 %v14298_v9  ;;  %v2400_v13 = vadd.f32 %v22923_v36, %v1491_v19  ;;  %v1495_v12 = vadd.f32 %v1494_v58, %v22924_v5  ;;  %v1496_v17 = vpop.f32.mrb[131].mxu1  ;;  %v22927_v9 = vld [vmem:[#allocation38_spill] sm:$0xff]  ;;  %v22929_v19 = vld [vmem:[#allocation40_spill] sm:$0xff]  ;;  %v4006_v5 = vshll.u32 %v17101_v6, 16 }
 0x290   : > { %3706 = vmatprep.mubr.bf16.mxu0 %v22839_v11  ;;  %v1497_v56 = vadd.f32 %v1496_v17, %v22927_v9 }
 0x291   : > { %v2402_v28 = vadd.f32 %v22928_v29, %v1495_v12  ;;  %v18816_v61 = vadd.f32 %v18693_v43, %v2400_v13  ;;  %v22932_v29 = vld [vmem:[#allocation41_spill] sm:$0xff]  ;;  %v22933_v43 = vld [vmem:[#allocation42_spill] sm:$0xff] }
 0x292   : > { %v18803_v25 = vpop.f32.mrb[124].mxu0  ;;  %v2403_v36 = vadd.f32 %v22929_v19, %v1497_v56 }
 0x293   : > { %v3171_v45 = vpop.f32.mrb[125].mxu0  ;;  %v18820_v58 = vadd.f32 %v18697_v54, %v2402_v28  ;;  %v22935_v28 = vld [vmem:[#allocation44_spill] sm:$0xff] }
 0x294   : > { %v18809_v35 = vpop.f32.mrb[126].mxu0  ;;  %v1500_v45 = vpop.f32.mrb[132].mxu1  ;;  %v18824_v17 = vadd.f32 %v18704_v55, %v2403_v36  ;;  %v22937_v55 = vld [vmem:[#allocation45_spill] sm:$0xff] }
 0x295   : > { %v18813_v49 = vpop.f32.mrb[127].mxu0  ;;  %22930 = vst [vmem:[#allocation24_spill] sm:$0xff] %v18820_v58  ;;  %v1501_v12 = vadd.f32 %v1500_v45, %v22932_v29  ;;  %v1502_v38 = vpop.f32.mrb[133].mxu1  ;;  %v4004_v45 = vshrl.u32 %v17101_v6, 16  ;;  %v4008_v29 = vrot.slane %v4006_v5, 1  ;;  %v4013_v5 = vrot.slane %v4011_v8, 1 }
 0x296   : > { %22931 = vst [vmem:[#allocation25_spill] sm:$0xff] %v18824_v17  ;;  %v1503_v13 = vadd.f32 %v1502_v38, %v22933_v43  ;;  %v1504_v56 = vpop.f32.mrb[134].mxu1  ;;  %v22960_v58 = vld [vmem:[#allocation58_spill] sm:$0xff] }
 0x297   : > { %3707 = vmatmul.mubr.bf16.gmra.mrb[200].mxu0 %v14299_v1  ;;  %v22934_v1 = vld [vmem:[#allocation43_spill] sm:$0xff]  ;;  %v1505_v40 = vadd.f32 %v1504_v56, %v22935_v28  ;;  %v1506_v63 = vpop.f32.mrb[135].mxu1  ;;  %v4009_v6 = vor.u32 %v4008_v29, %v4004_v45 }
 0x298   : > { %3716 = vmatprep.mubr.bf16.mxu0 %v22839_v11  ;;  %v2404_v19 = vadd.f32 %v22934_v1, %v1501_v12  ;;  %v2405_v36 = vadd.f32 %v22937_v55, %v1503_v13  ;;  %v17106_v13 = vld [vmem:[#allocation2 + $0x20] sm:$0xff]   ;;  %v17109_v45 = vld [vmem:[#allocation6 + $0x310] ss:$8 sps:$4 sm:$0xff]  }
 0x299   : > { %v2406_v38 = vadd.f32 %v22938_v24, %v1505_v40  ;;  %v22946_v29 = vld [vmem:[#allocation47_spill] sm:$0xff] }
 0x29a   : > { %v18827_v9 = vpop.f32.mrb[128].mxu0  ;;  %v18841_v12 = vadd.f32 %v18715_v21, %v2404_v19  ;;  %v18844_v1 = vadd.f32 %v18719_v15, %v2405_v36  ;;  %v4014_v21 = vsel %vm22746_vm0, %v4009_v6, %v4013_v5  ;;  %v17103_v15 = vld [vmem:[#allocation6 + $0x300] ss:$8 sps:$4 sm:$0xff]   ;;  %v4019_v19 = vshll.u32 %v17106_v13, 16  ;;  %v18860_v36 = vld [vmem:[#allocation2 + $0x28] sm:$0xff]  }
 0x29b   : > { %v18831_v54 = vpop.f32.mrb[129].mxu0  ;;  %v18847_v27 = vadd.f32 %v18723_v60, %v2406_v38  ;;  %v17111_v60 = vld [vmem:[#allocation6 + $0x314] ss:$8 sps:$4 sm:$0xff]  }
 0x29c   : > { %v18837_v0 = vpop.f32.mrb[130].mxu0  ;;  %22939 = vst [vmem:[#allocation26_spill] sm:$0xff] %v18841_v12  ;;  %22940 = vst [vmem:[#allocation27_spill] sm:$0xff] %v18844_v1  ;;  %v18849_v63 = vpop.f32.mrb[60].mxu1  ;;  %v4021_v8 = vrot.slane %v4019_v19, 1  ;;  %v4023_v12 = vshrl.u32 %v17106_v13, 16 }
 0x29d   : > { %v3185_v43 = vpop.f32.mrb[131].mxu0  ;;  %22941 = vst [vmem:[#allocation30_spill] sm:$0xff] %v18847_v27  ;;  %22942 = vst [vmem:[#allocation31_spill] sm:$0xff] %v18849_v63  ;;  %v18852_v56 = vpop.f32.mrb[61].mxu1 }
 0x29e   : > { %22943 = vst [vmem:[#allocation32_spill] sm:$0xff] %v18852_v56  ;;  %v18854_v24 = vpop.f32.mrb[62].mxu1 }
 0x29f   : > { %3717 = vmatmul.mubr.bf16.gmra.mrb[204].mxu0 %v14300_v26  ;;  %22944 = vst [vmem:[#allocation17_spill] sm:$0xff] %v18854_v24  ;;  %v18856_v40 = vpop.f32.mrb[63].mxu1  ;;  %v4015_v26 = vshrl.u32 %v17102_v4, 16  ;;  %v22947_v24 = vld [vmem:[#allocation48_spill] sm:$0xff] }
 0x2a0   : > { %4330 = vmatprep.mubr.bf16.mxu0 %v22839_v11  ;;  %22945 = vst [vmem:[#allocation33_spill] sm:$0xff] %v18856_v40  ;;  %v17117_v40 = vld [vmem:[#allocation6 + $0x324] ss:$8 sps:$4 sm:$0xff]  }
 0x2a1   : > { %v4017_v55 = vor.u32 %v4015_v26, %v4013_v5  ;;  %v22949_v5 = vld [vmem:[#allocation50_spill] sm:$0xff] }
 0x2a3   : > { %v4022_v19 = vsel %vm22746_vm0, %v4017_v55, %v4021_v8  ;;  %v4025_v55 = vor.u32 %v4023_v12, %v4021_v8  ;;  %v22958_v8 = vld [vmem:[#allocation56_spill] sm:$0xff] }
 0x2a4   : > { %v1520_v28 = vpop.f32.mrb[136].mxu1 }
 0x2a5   : > { %v1521_v38 = vadd.f32 %v1520_v28, %v22946_v29  ;;  %v1522_v43 = vpop.f32.mrb[137].mxu1  ;;  %v4027_v28 = vshll.u32 %v18860_v36, 16  ;;  %v22950_v29 = vld [vmem:[#allocation51_spill] sm:$0xff] }
 0x2a6   : > { %v1524_v4 = vpop.f32.mrb[138].mxu1 }
 0x2a7   : > { %4331 = vmatmul.mubr.bf16.vlgmr.msra.gmra.mrb[0].mxu0 %v4014_v21  ;;  %v2412_v56 = vadd.f32 %v22947_v24, %v1521_v38  ;;  %v1526_v27 = vpop.f32.mrb[139].mxu1  ;;  %v17123_v24 = vld [vmem:[#allocation6 + $0x334] ss:$8 sps:$4 sm:$0xff]  }
 0x2a8   : > { %5167 = vmatpush1.bf16.msra.mxu0 %v17103_v15  ;;  %4340 = vmatprep.mubr.bf16.mxu0 %v22839_v11  ;;  %v22948_v15 = vld [vmem:[#allocation49_spill] sm:$0xff]  ;;  %v1527_v26 = vadd.f32 %v1526_v27, %v22949_v5 }
 0x2a9   : > { %5168 = vmatprep.subr.bf16.mxu0 %v17111_v60  ;;  %v1525_v63 = vadd.f32 %v1524_v4, %v22948_v15  ;;  %v17115_v60 = vld [vmem:[#allocation6 + $0x320] ss:$8 sps:$4 sm:$0xff]   ;;  %v18876_v38 = vadd.f32 %v18746_v34, %v2412_v56  ;;  %v22952_v4 = vld [vmem:[#allocation52_spill] sm:$0xff] }
 0x2aa   : > { %v18863_v6 = vpop.f32.mrb[136].mxu0  ;;  %v17108_v15 = vld [vmem:[#allocation2 + $0x30] sm:$0xff]   ;;  %v22955_v5 = vld [vmem:[#allocation53_spill] sm:$0xff] }
 0x2ab   : > { %v3201_v21 = vpop.f32.mrb[137].mxu0  ;;  %v2414_v43 = vadd.f32 %v22950_v29, %v1525_v63  ;;  %22951 = vst [vmem:[#allocation34_spill] sm:$0xff] %v18876_v38  ;;  %v17121_v63 = vld [vmem:[#allocation6 + $0x330] ss:$8 sps:$4 sm:$0xff]   ;;  %v22959_v38 = vld [vmem:[#allocation57_spill] sm:$0xff] }
 0x2ac   : > { %v18867_v1 = vpop.f32.mrb[138].mxu0  ;;  %5169 = vmatpush1.bf16.msra.mxu0 %v17109_v45  ;;  %v2415_v21 = vadd.f32 %v22952_v4, %v1527_v26  ;;  %v1530_v13 = vpop.f32.mrb[140].mxu1  ;;  %v4029_v45 = vrot.slane %v4027_v28, 1  ;;  %v17129_v26 = vld [vmem:[#allocation6 + $0x344] ss:$8 sps:$4 sm:$0xff]   ;;  %v22957_v4 = vld [vmem:[#allocation55_spill] sm:$0xff] }
 0x2ad   : > { %v18873_v17 = vpop.f32.mrb[139].mxu0  ;;  %5170 = vmatprep.subr.bf16.mxu0 %v17117_v40  ;;  %v18880_v27 = vadd.f32 %v18751_v51, %v2414_v43  ;;  %v1531_v34 = vadd.f32 %v1530_v13, %v22955_v5  ;;  %v1532_v56 = vpop.f32.mrb[141].mxu1  ;;  %v22956_v51 = vld [vmem:[#allocation54_spill] sm:$0xff]  ;;  %v4035_v5 = vshll.u32 %v17108_v15, 16 }
 0x2ae   : > { %v18884_v40 = vadd.f32 %v18758_v32, %v2415_v21  ;;  %v1533_v29 = vadd.f32 %v1532_v56, %v22956_v51  ;;  %v1534_v43 = vpop.f32.mrb[142].mxu1  ;;  %v4030_v13 = vsel %vm22746_vm0, %v4025_v55, %v4029_v45 }
 0x2af   : > { %4341 = vmatmul.mubr.bf16.gmra.mrb[208].mxu0 %v4022_v19  ;;  %22953 = vst [vmem:[#allocation20_spill] sm:$0xff] %v18880_v27  ;;  %v2416_v27 = vadd.f32 %v22957_v4, %v1531_v34  ;;  %v1535_v28 = vadd.f32 %v1534_v43, %v22958_v8  ;;  %v17135_v34 = vld [vmem:[#allocation6 + $0x354] ss:$8 sps:$4 sm:$0xff]   ;;  %v4037_v55 = vrot.slane %v4035_v5, 1 }
 0x2b0   : > { %4350 = vmatprep.mubr.bf16.mxu0 %v22839_v11  ;;  %5171 = vmatpush1.bf16.msra.mxu0 %v17115_v60  ;;  %22954 = vst [vmem:[#allocation18_spill] sm:$0xff] %v18884_v40  ;;  %v1536_v60 = vpop.f32.mrb[143].mxu1  ;;  %v2417_v32 = vadd.f32 %v22959_v38, %v1533_v29  ;;  %v17127_v40 = vld [vmem:[#allocation6 + $0x340] ss:$8 sps:$4 sm:$0xff]   ;;  %v22962_v5 = vld [vmem:[#allocation60_spill] sm:$0xff] }
 0x2b1   : > { %5172 = vmatprep.subr.bf16.mxu0 %v17123_v24  ;;  %v4031_v24 = vshrl.u32 %v18860_v36, 16  ;;  %v2418_v56 = vadd.f32 %v22960_v58, %v1535_v28  ;;  %v18899_v4 = vadd.f32 %v18769_v39, %v2416_v27  ;;  %v17133_v58 = vld [vmem:[#allocation6 + $0x350] ss:$8 sps:$4 sm:$0xff]   ;;  %v4039_v39 = vshrl.u32 %v17108_v15, 16  ;;  %v17113_v28 = vld [vmem:[#allocation2 + $0x40] sm:$0xff]  }
 0x2b2   : > { %v18887_v19 = vpop.f32.mrb[140].mxu0  ;;  %v18902_v43 = vadd.f32 %v18773_v62, %v2417_v32  ;;  %v17139_v62 = vld [vmem:[#allocation6 + $0x360] ss:$8 sps:$4 sm:$0xff]   ;;  %v22961_v60 = vld [vmem:[#allocation59_spill] sm:$0xff] }
 0x2b3   : > { %v18891_v12 = vpop.f32.mrb[141].mxu0  ;;  %v18905_v38 = vadd.f32 %v18778_v31, %v2418_v56  ;;  %v4033_v36 = vor.u32 %v4031_v24, %v4029_v45  ;;  %v4041_v31 = vor.u32 %v4039_v39, %v4037_v55 }
 0x2b4   : > { %v3213_v21 = vpop.f32.mrb[142].mxu0  ;;  %5173 = vmatpush1.bf16.msra.mxu0 %v17121_v63  ;;  %v17112_v63 = vld [vmem:[#allocation2 + $0x38] sm:$0xff]  }
 0x2b5   : > { %v3214_v51 = vpop.f32.mrb[143].mxu0  ;;  %5174 = vmatprep.subr.bf16.mxu0 %v17129_v26  ;;  %v17141_v26 = vld [vmem:[#allocation6 + $0x364] ss:$8 sps:$4 sm:$0xff]   ;;  %v4038_v29 = vsel %vm22746_vm0, %v4033_v36, %v4037_v55  ;;  %v4043_v27 = vshll.u32 %v17112_v63, 16  ;;  %v4047_v55 = vshrl.u32 %v17112_v63, 16 }
 0x2b7   : > { %4351 = vmatmul.mubr.bf16.gmra.mrb[212].mxu0 %v4030_v13  ;;  %v4045_v8 = vrot.slane %v4043_v27, 1 }
 0x2b8   : > { %4360 = vmatprep.mubr.bf16.mxu0 %v22839_v11  ;;  %5175 = vmatpush1.bf16.msra.mxu0 %v17127_v40 }
 0x2b9   : > { %5176 = vmatprep.subr.bf16.mxu0 %v17135_v34  ;;  %v4046_v36 = vsel %vm22746_vm0, %v4041_v31, %v4045_v8  ;;  %v22964_v31 = vld [vmem:[#allocation62_spill] sm:$0xff] }
 0x2bc   : > { %5177 = vmatpush1.bf16.msra.mxu0 %v17133_v58  ;;  %v1550_v45 = vpop.f32.mrb[144].mxu1  ;;  %v4051_v58 = vshll.u32 %v17113_v28, 16 }
 0x2bd   : > { %5178 = vmatprep.subr.bf16.mxu0 %v17141_v26  ;;  %v18911_v40 = vadd.f32 %v1550_v45, %v22961_v60  ;;  %v1552_v32 = vpop.f32.mrb[145].mxu1  ;;  %v22963_v26 = vld [vmem:[#allocation61_spill] sm:$0xff]  ;;  %v17114_v60 = vld [vmem:[#allocation2 + $0x48] sm:$0xff]  }
 0x2be   : > { %v1554_v13 = vpop.f32.mrb[146].mxu1  ;;  %v4053_v45 = vrot.slane %v4051_v58, 1 }
 0x2bf   : > { %4361 = vmatmul.mubr.bf16.gmra.mrb[12].mxu0 %v4038_v29  ;;  %v18917_v56 = vadd.f32 %v1554_v13, %v22962_v5  ;;  %v1556_v51 = vpop.f32.mrb[147].mxu1 }
 0x2c0   : > { %4370 = vmatprep.mubr.bf16.mxu0 %v22839_v11  ;;  %5179 = vmatpush1.bf16.msra.mxu0 %v17139_v62  ;;  %v18921_v29 = vadd.f32 %v1556_v51, %v22963_v26  ;;  %v4049_v62 = vor.u32 %v4047_v55, %v4045_v8 }
 0x2c2   : > { %v3498_v21 = vpop.f32.mrb[144].mxu0  ;;  %v4054_v26 = vsel %vm22746_vm0, %v4049_v62, %v4053_v45 }
 0x2c3   : > { %v18914_v15 = vadd.f32 %v3498_v21, %v18594_v30  ;;  %v3500_v24 = vpop.f32.mrb[145].mxu0 }
 0x2c4   : > { %v3502_v34 = vpop.f32.mrb[146].mxu0  ;;  %v1560_v32 = vpop.f32.mrb[148].mxu1  ;;  %v22965_v24 = vld [vmem:[#allocation63_spill] sm:$0xff] }
 0x2c5   : > { %v18924_v39 = vadd.f32 %v3502_v34, %v18602_v42  ;;  %v3504_v27 = vpop.f32.mrb[147].mxu0  ;;  %v18931_v63 = vadd.f32 %v1560_v32, %v22964_v31  ;;  %v1562_v21 = vpop.f32.mrb[149].mxu1  ;;  %v22967_v34 = vld [vmem:[#allocation64_spill] sm:$0xff]  ;;  %v4059_v32 = vshll.u32 %v17114_v60, 16 }
 0x2c6   : > { %v18927_v30 = vadd.f32 %v3504_v27, %v18605_v41  ;;  %v18934_v5 = vadd.f32 %v1562_v21, %v22965_v24  ;;  %v1564_v42 = vpop.f32.mrb[150].mxu1  ;;  %v4055_v27 = vshrl.u32 %v17113_v28, 16 }
 0x2c7   : > { %4371 = vmatmul.mubr.bf16.gmra.mrb[216].mxu0 %v4046_v36  ;;  %v18940_v36 = vadd.f32 %v1564_v42, %v22967_v34  ;;  %v1566_v8 = vpop.f32.mrb[151].mxu1  ;;  %v4061_v42 = vrot.slane %v4059_v32, 1  ;;  %v17118_v34 = vld [vmem:[#allocation2 + $0x50] sm:$0xff]  }
 0x2c8   : > { %4380 = vmatprep.mubr.bf16.mxu0 %v22839_v11  ;;  %v4057_v24 = vor.u32 %v4055_v27, %v4053_v45  ;;  %v4067_v62 = vshll.u32 %v17118_v34, 16 }
 0x2ca   : > { %v3508_v13 = vpop.f32.mrb[148].mxu0  ;;  %v4069_v28 = vrot.slane %v4067_v62, 1 }
 0x2cb   : > { %v18937_v51 = vadd.f32 %v3508_v13, %v18620_v52  ;;  %v3510_v41 = vpop.f32.mrb[149].mxu0  ;;  %v17145_v52 = vld [vmem:[#allocation6 + $0x370] ss:$8 sps:$4 sm:$0xff]   ;;  %v17147_v13 = vld [vmem:[#allocation6 + $0x374] ss:$8 sps:$4 sm:$0xff]  }
 0x2cc   : > { %v18943_v55 = vadd.f32 %v3510_v41, %v18624_v3  ;;  %v3512_v58 = vpop.f32.mrb[150].mxu0  ;;  %5180 = vmatprep.subr.bf16.mxu0 %v17147_v13  ;;  %v4062_v3 = vsel %vm22746_vm0, %v4057_v24, %v4061_v42  ;;  %v4063_v41 = vshrl.u32 %v17114_v60, 16  ;;  %v22972_v13 = vld [vmem:[#allocation66_spill] sm:$0xff] }
 0x2cd   : > { %22966 = vst [vmem:[#allocation35_spill] sm:$0xff] %v18937_v51  ;;  %v18947_v31 = vadd.f32 %v3512_v58, %v18627_v7  ;;  %v3514_v21 = vpop.f32.mrb[151].mxu0  ;;  %5181 = vmatpush1.bf16.msra.mxu0 %v17145_v52  ;;  %v17119_v58 = vld [vmem:[#allocation2 + $0x58] sm:$0xff]  }
 0x2ce   : > { %22968 = vst [vmem:[#allocation36_spill] sm:$0xff] %v18943_v55  ;;  %v4065_v7 = vor.u32 %v4063_v41, %v4061_v42  ;;  %v4071_v41 = vshrl.u32 %v17118_v34, 16  ;;  %v4075_v62 = vshll.u32 %v17119_v58, 16  ;;  %v22973_v55 = vld [vmem:[#allocation67_spill] sm:$0xff] }
 0x2cf   : > { %22969 = vst [vmem:[#allocation37_spill] sm:$0xff] %v18947_v31  ;;  %4381 = vmatmul.mubr.bf16.gmra.mrb[220].mxu0 %v4054_v26  ;;  %v22970_v26 = vld [vmem:[#allocation65_spill] sm:$0xff] }
 0x2d0   : > { %4390 = vmatprep.mubr.bf16.mxu0 %v22839_v11  ;;  %v4070_v42 = vsel %vm22746_vm0, %v4065_v7, %v4069_v28  ;;  %v22975_v7 = vld [vmem:[#allocation68_spill] sm:$0xff] }
 0x2d4   : > { %v1580_v8 = vpop.f32.mrb[152].mxu1 }
 0x2d5   : > { %v18953_v21 = vadd.f32 %v1580_v8, %v22970_v26  ;;  %v1582_v31 = vpop.f32.mrb[153].mxu1  ;;  %v4073_v26 = vor.u32 %v4071_v41, %v4069_v28 }
 0x2d6   : > { %v1584_v27 = vpop.f32.mrb[154].mxu1 }
 0x2d7   : > { %4391 = vmatmul.mubr.bf16.gmra.mrb[24].mxu0 %v4062_v3  ;;  %v18959_v60 = vadd.f32 %v1584_v27, %v22972_v13  ;;  %v1586_v24 = vpop.f32.mrb[155].mxu1 }
 0x2d8   : > { %4400 = vmatprep.mubr.bf16.mxu0 %v22839_v11  ;;  %v18963_v51 = vadd.f32 %v1586_v24, %v22973_v55  ;;  %v22976_v24 = vld [vmem:[#allocation69_spill] sm:$0xff] }
 0x2da   : > { %v3528_v45 = vpop.f32.mrb[152].mxu0 }
 0x2db   : > { %v18956_v32 = vadd.f32 %v3528_v45, %v18648_v20  ;;  %v3530_v52 = vpop.f32.mrb[153].mxu0  ;;  %v4077_v45 = vrot.slane %v4075_v62, 1  ;;  %v4079_v62 = vshrl.u32 %v17119_v58, 16 }
 0x2dc   : > { %v3532_v3 = vpop.f32.mrb[154].mxu0  ;;  %v1590_v27 = vpop.f32.mrb[156].mxu1  ;;  %v17120_v52 = vld [vmem:[#allocation2 + $0x60] sm:$0xff]  }
 0x2dd   : > { %22971 = vst [vmem:[#allocation28_spill] sm:$0xff] %v18956_v32  ;;  %v18966_v31 = vadd.f32 %v3532_v3, %v18655_v37  ;;  %v3534_v8 = vpop.f32.mrb[155].mxu0  ;;  %v18973_v34 = vadd.f32 %v1590_v27, %v22975_v7  ;;  %v1592_v13 = vpop.f32.mrb[157].mxu1  ;;  %v4078_v41 = vsel %vm22746_vm0, %v4073_v26, %v4077_v45  ;;  %v4083_v27 = vshll.u32 %v17120_v52, 16 }
 0x2de   : > { %v18969_v20 = vadd.f32 %v3534_v8, %v18658_v57  ;;  %v18976_v32 = vadd.f32 %v1592_v13, %v22976_v24  ;;  %v1594_v37 = vpop.f32.mrb[158].mxu1  ;;  %v17154_v13 = vld [vmem:[#allocation6 + $0x384] ss:$8 sps:$4 sm:$0xff]   ;;  %v4087_v26 = vshrl.u32 %v17120_v52, 16 }
 0x2df   : > { %4401 = vmatmul.mubr.bf16.gmra.mrb[224].mxu0 %v4070_v42  ;;  %v1595_v42 = vpop.f32.mrb[159].mxu1  ;;  %v17124_v37 = vld [vmem:[#allocation2 + $0x68] sm:$0xff]   ;;  %5675 = vmatprep.subr.bf16.mxu0 %v17154_v13 }
 0x2e0   : > { %22974 = vst [vmem:[#allocation21_spill] sm:$0xff] %v18969_v20  ;;  %4410 = vmatprep.mubr.bf16.mxu0 %v22839_v11  ;;  %v17125_v42 = vld [vmem:[#allocation2 + $0x70] sm:$0xff]  }
 0x2e2   : > { %v3538_v55 = vpop.f32.mrb[156].mxu0 }
 0x2e3   : > { %v18979_v3 = vadd.f32 %v3538_v55, %v18673_v16  ;;  %v3540_v57 = vpop.f32.mrb[157].mxu0  ;;  %v4081_v16 = vor.u32 %v4079_v62, %v4077_v45  ;;  %v4085_v55 = vrot.slane %v4083_v27, 1 }
 0x2e4   : > { %v18982_v8 = vadd.f32 %v3540_v57, %v18677_v2  ;;  %v3542_v28 = vpop.f32.mrb[158].mxu0  ;;  %v18988_v24 = vpop.f32.mrb[72].mxu1 }
 0x2e5   : > { %v18986_v7 = vadd.f32 %v3542_v28, %v18680_v23  ;;  %v3544_v20 = vpop.f32.mrb[159].mxu0  ;;  %22979 = vst [vmem:[#allocation40_spill] sm:$0xff] %v18988_v24  ;;  %v18991_v2 = vpop.f32.mrb[73].mxu1  ;;  %v4086_v23 = vsel %vm22746_vm0, %v4081_v16, %v4085_v55  ;;  %v4095_v24 = vshrl.u32 %v17124_v37, 16 }
 0x2e6   : > { %22977 = vst [vmem:[#allocation38_spill] sm:$0xff] %v18982_v8  ;;  %22980 = vst [vmem:[#allocation41_spill] sm:$0xff] %v18991_v2  ;;  %v18993_v57 = vpop.f32.mrb[74].mxu1  ;;  %v4091_v20 = vshll.u32 %v17124_v37, 16 }
 0x2e7   : > { %22978 = vst [vmem:[#allocation39_spill] sm:$0xff] %v18986_v7  ;;  %4411 = vmatmul.mubr.bf16.gmra.mrb[228].mxu0 %v4078_v41  ;;  %22981 = vst [vmem:[#allocation42_spill] sm:$0xff] %v18993_v57  ;;  %v18995_v58 = vpop.f32.mrb[75].mxu1  ;;  %v4089_v41 = vor.u32 %v4087_v26, %v4085_v55  ;;  %v4099_v7 = vshll.u32 %v17125_v42, 16 }
 0x2e8   : > { %4420 = vmatprep.mubr.bf16.mxu0 %v22839_v11  ;;  %22982 = vst [vmem:[#allocation43_spill] sm:$0xff] %v18995_v58  ;;  %v4093_v45 = vrot.slane %v4091_v20, 1 }
 0x2e9   : > { %v4101_v20 = vrot.slane %v4099_v7, 1 }
 0x2ec   : > { %v2301_v28 = vpop.f32.mrb[160].mxu1 }
 0x2ed   : > { %v2424_v62 = vadd.f32 %v2301_v28, %v18911_v40  ;;  %v2303_v27 = vpop.f32.mrb[161].mxu1  ;;  %v4094_v40 = vsel %vm22746_vm0, %v4089_v41, %v4093_v45 }
 0x2ee   : > { %v2305_v13 = vpop.f32.mrb[162].mxu1 }
 0x2ef   : > { %4421 = vmatmul.mubr.bf16.gmra.mrb[36].mxu0 %v4086_v23  ;;  %v19001_v57 = vadd.f32 %v18803_v25, %v2424_v62  ;;  %v2426_v23 = vadd.f32 %v2305_v13, %v18917_v56  ;;  %v2307_v58 = vpop.f32.mrb[163].mxu1  ;;  %v4097_v56 = vor.u32 %v4095_v24, %v4093_v45  ;;  %v4103_v13 = vshrl.u32 %v17125_v42, 16 }
 0x2f0   : > { %4430 = vmatprep.mubr.bf16.mxu0 %v22839_v11  ;;  %v2427_v55 = vadd.f32 %v2307_v58, %v18921_v29  ;;  %v17126_v29 = vld [vmem:[#allocation2 + $0x78] sm:$0xff]  }
 0x2f1   : > { %v19010_v26 = vadd.f32 %v18809_v35, %v2426_v23  ;;  %v4102_v24 = vsel %vm22746_vm0, %v4097_v56, %v4101_v20  ;;  %v4111_v56 = vshrl.u32 %v17126_v29, 16 }
 0x2f2   : > { %v3558_v2 = vpop.f32.mrb[160].mxu0 }
 0x2f3   : > { %v19004_v16 = vadd.f32 %v3558_v2, %v18701_v44  ;;  %v3560_v52 = vpop.f32.mrb[161].mxu0  ;;  %v19016_v44 = vadd.f32 %v18813_v49, %v2427_v55 }
 0x2f4   : > { %v3562_v8 = vpop.f32.mrb[162].mxu0  ;;  %v2311_v28 = vpop.f32.mrb[164].mxu1  ;;  %v4107_v52 = vshll.u32 %v17126_v29, 16 }
 0x2f5   : > { %v19013_v37 = vadd.f32 %v3562_v8, %v18708_v18  ;;  %v3564_v25 = vpop.f32.mrb[163].mxu0  ;;  %v2428_v35 = vadd.f32 %v2311_v28, %v18931_v63  ;;  %v2313_v58 = vpop.f32.mrb[165].mxu1  ;;  %v17131_v28 = vld [vmem:[#allocation2 + $0x88] sm:$0xff]  }
 0x2f6   : > { %v19019_v2 = vadd.f32 %v3564_v25, %v18711_v33  ;;  %v2429_v18 = vadd.f32 %v2313_v58, %v18934_v5  ;;  %v2315_v8 = vpop.f32.mrb[166].mxu1  ;;  %v4109_v55 = vrot.slane %v4107_v52, 1  ;;  %v4123_v52 = vshll.u32 %v17131_v28, 16 }
 0x2f7   : > { %4431 = vmatmul.mubr.bf16.gmra.mrb[232].mxu0 %v4094_v40  ;;  %v19025_v49 = vadd.f32 %v18827_v9, %v2428_v35  ;;  %v2430_v7 = vadd.f32 %v2315_v8, %v18940_v36  ;;  %v2317_v45 = vpop.f32.mrb[167].mxu1  ;;  %v17130_v40 = vld [vmem:[#allocation2 + $0x80] sm:$0xff]  }
 0x2f8   : > { %4440 = vmatprep.mubr.bf16.mxu0 %v22839_v11  ;;  %v19033_v27 = vadd.f32 %v18831_v54, %v2429_v18  ;;  %v4105_v54 = vor.u32 %v4103_v13, %v4101_v20  ;;  %v4113_v58 = vor.u32 %v4111_v56, %v4109_v55  ;;  %v4125_v56 = vrot.slane %v4123_v52, 1  ;;  %v17136_v52 = vld [vmem:[#allocation2 + $0x98] sm:$0xff]  }
 0x2f9   : > { %v19039_v9 = vadd.f32 %v18837_v0, %v2430_v7  ;;  %v4119_v7 = vshrl.u32 %v17130_v40, 16 }
 0x2fa   : > { %v3568_v41 = vpop.f32.mrb[164].mxu0  ;;  %v4110_v0 = vsel %vm22746_vm0, %v4105_v54, %v4109_v55 }
 0x2fb   : > { %v19028_v33 = vadd.f32 %v3568_v41, %v18726_v59  ;;  %v3570_v62 = vpop.f32.mrb[165].mxu0 }
 0x2fc   : > { %v19036_v63 = vadd.f32 %v3570_v62, %v18730_v14  ;;  %v3572_v5 = vpop.f32.mrb[166].mxu0  ;;  %v19044_v36 = vpop.f32.mrb[84].mxu1 }
 0x2fd   : > { %v19042_v59 = vadd.f32 %v3572_v5, %v18733_v10  ;;  %v3574_v23 = vpop.f32.mrb[167].mxu0  ;;  %22983 = vst [vmem:[#allocation44_spill] sm:$0xff] %v19044_v36  ;;  %v19047_v14 = vpop.f32.mrb[85].mxu1  ;;  %v4115_v10 = vshll.u32 %v17130_v40, 16 }
 0x2fe   : > { %22984 = vst [vmem:[#allocation29_spill] sm:$0xff] %v19047_v14  ;;  %v19049_v25 = vpop.f32.mrb[86].mxu1 }
 0x2ff   : > { %4441 = vmatmul.mubr.bf16.gmra.mrb[236].mxu0 %v4102_v24  ;;  %22985 = vst [vmem:[#allocation45_spill] sm:$0xff] %v19049_v25  ;;  %v19051_v42 = vpop.f32.mrb[87].mxu1  ;;  %v4117_v41 = vrot.slane %v4115_v10, 1 }
 0x300   : > { %4450 = vmatprep.mubr.bf16.mxu0 %v22839_v11  ;;  %22986 = vst [vmem:[#allocation46_spill] sm:$0xff] %v19051_v42 }
 0x304   : > { %v2331_v35 = vpop.f32.mrb[168].mxu1 }
 0x305   : > { %v2436_v20 = vadd.f32 %v2331_v35, %v18953_v21  ;;  %v2333_v18 = vpop.f32.mrb[169].mxu1  ;;  %v4118_v21 = vsel %vm22746_vm0, %v4113_v58, %v4117_v41 }
 0x306   : > { %v2335_v62 = vpop.f32.mrb[170].mxu1 }
 0x307   : > { %4451 = vmatmul.mubr.bf16.gmra.mrb[48].mxu0 %v4110_v0  ;;  %v19057_v24 = vadd.f32 %v18863_v6, %v2436_v20  ;;  %v2438_v5 = vadd.f32 %v2335_v62, %v18959_v60  ;;  %v2337_v13 = vpop.f32.mrb[171].mxu1  ;;  %v4121_v60 = vor.u32 %v4119_v7, %v4117_v41 }
 0x308   : > { %4460 = vmatprep.mubr.bf16.mxu0 %v22839_v11  ;;  %v2439_v54 = vadd.f32 %v2337_v13, %v18963_v51  ;;  %v17132_v51 = vld [vmem:[#allocation2 + $0x90] sm:$0xff]  }
 0x309   : > { %v19066_v55 = vadd.f32 %v18867_v1, %v2438_v5  ;;  %v4126_v41 = vsel %vm22746_vm0, %v4121_v60, %v4125_v56 }
 0x30a   : > { %v3588_v8 = vpop.f32.mrb[168].mxu0 }
 0x30b   : > { %v19060_v45 = vadd.f32 %v3588_v8, %v18755_v47  ;;  %v3590_v29 = vpop.f32.mrb[169].mxu0  ;;  %v19072_v47 = vadd.f32 %v18873_v17, %v2439_v54  ;;  %v4139_v54 = vshll.u32 %v17136_v52, 16 }
 0x30c   : > { %v3592_v23 = vpop.f32.mrb[170].mxu0  ;;  %v2341_v10 = vpop.f32.mrb[172].mxu1  ;;  %v4127_v29 = vshrl.u32 %v17131_v28, 16 }
 0x30d   : > { %v19069_v40 = vadd.f32 %v3592_v23, %v18762_v22  ;;  %v3594_v6 = vpop.f32.mrb[171].mxu0  ;;  %v2440_v1 = vadd.f32 %v2341_v10, %v18973_v34  ;;  %v2343_v35 = vpop.f32.mrb[173].mxu1  ;;  %v4141_v28 = vrot.slane %v4139_v54, 1 }
 0x30e   : > { %v19075_v0 = vadd.f32 %v3594_v6, %v18765_v46  ;;  %v2441_v22 = vadd.f32 %v2343_v35, %v18976_v32  ;;  %v2345_v20 = vpop.f32.mrb[174].mxu1  ;;  %v4131_v32 = vshll.u32 %v17132_v51, 16 }
 0x30f   : > { %4461 = vmatmul.mubr.bf16.gmra.mrb[240].mxu0 %v4118_v21  ;;  %v19081_v17 = vadd.f32 %v18887_v19, %v2440_v1  ;;  %v2346_v8 = vpop.f32.mrb[175].mxu1  ;;  %v17137_v21 = vld [vmem:[#allocation2 + $0xa0] sm:$0xff]   ;;  %v4143_v1 = vshrl.u32 %v17136_v52, 16 }
 0x310   : > { %4470 = vmatprep.mubr.bf16.mxu0 %v22839_v11  ;;  %v19088_v62 = vadd.f32 %v18891_v12, %v2441_v22  ;;  %v4133_v13 = vrot.slane %v4131_v32, 1  ;;  %v4135_v12 = vshrl.u32 %v17132_v51, 16  ;;  %v4147_v35 = vshll.u32 %v17137_v21, 16  ;;  %v22987_v22 = vld [vmem:[#allocation24_spill] sm:$0xff]  ;;  %v22988_v20 = vld [vmem:[#allocation25_spill] sm:$0xff]  ;;  %v22989_v32 = vld [vmem:[#allocation26_spill] sm:$0xff] }
 0x311   : > { %v4151_v52 = vshrl.u32 %v17137_v21, 16 }
 0x312   : > { %v3598_v58 = vpop.f32.mrb[172].mxu0  ;;  %v4149_v8 = vrot.slane %v4147_v35, 1 }
 0x313   : > { %v19084_v46 = vadd.f32 %v3598_v58, %v18781_v50  ;;  %v3600_v18 = vpop.f32.mrb[173].mxu0  ;;  %v4129_v50 = vor.u32 %v4127_v29, %v4125_v56 }
 0x314   : > { %v19091_v34 = vadd.f32 %v3600_v18, %v18785_v48  ;;  %v3602_v7 = vpop.f32.mrb[174].mxu0  ;;  %v4137_v48 = vor.u32 %v4135_v12, %v4133_v13  ;;  %v22990_v12 = vld [vmem:[#allocation27_spill] sm:$0xff] }
 0x315   : > { %v19094_v5 = vadd.f32 %v3602_v7, %v18788_v53  ;;  %v3604_v19 = vpop.f32.mrb[175].mxu0  ;;  %v4134_v23 = vsel %vm22746_vm0, %v4129_v50, %v4133_v13  ;;  %v17138_v7 = vld [vmem:[#allocation2 + $0xa8] sm:$0xff]  }
 0x316   : > { %v4142_v56 = vsel %vm22746_vm0, %v4137_v48, %v4141_v28  ;;  %v4159_v35 = vshrl.u32 %v17138_v7, 16 }
 0x317   : > { %4471 = vmatmul.mubr.bf16.gmra.mrb[244].mxu0 %v4126_v41  ;;  %v4145_v41 = vor.u32 %v4143_v1, %v4141_v28  ;;  %v4153_v28 = vor.u32 %v4151_v52, %v4149_v8 }
 0x318   : > { %4480 = vmatprep.mubr.bf16.mxu0 %v22839_v11 }
 0x319   : > { %v4150_v13 = vsel %vm22746_vm0, %v4145_v41, %v4149_v8 }
 0x31f   : > { %4481 = vmatmul.mubr.bf16.gmra.mrb[60].mxu0 %v4134_v23  ;;  %v4155_v23 = vshll.u32 %v17138_v7, 16 }
 0x320   : > { %4490 = vmatprep.mubr.bf16.mxu0 %v22839_v11 }
 0x322   : > { %v3618_v6 = vpop.f32.mrb[176].mxu0 }
 0x323   : > { %v3620_v53 = vpop.f32.mrb[177].mxu0  ;;  %v19100_v60 = vadd.f32 %v3618_v6, %v18816_v61  ;;  %v22991_v6 = vld [vmem:[#allocation30_spill] sm:$0xff] }
 0x324   : > { %v3622_v10 = vpop.f32.mrb[178].mxu0 }
 0x325   : > { %v3624_v58 = vpop.f32.mrb[179].mxu0  ;;  %v19104_v51 = vadd.f32 %v3622_v10, %v22987_v22  ;;  %v4157_v10 = vrot.slane %v4155_v23, 1 }
 0x326   : > { %v19107_v18 = vadd.f32 %v3624_v58, %v22988_v20  ;;  %v17143_v20 = vld [vmem:[#allocation2 + $0xb8] sm:$0xff]  }
 0x327   : > { %4491 = vmatmul.mubr.bf16.gmra.mrb[248].mxu0 %v4142_v56  ;;  %v17142_v56 = vld [vmem:[#allocation2 + $0xb0] sm:$0xff]   ;;  %v4158_v1 = vsel %vm22746_vm0, %v4153_v28, %v4157_v10  ;;  %v4161_v21 = vor.u32 %v4159_v35, %v4157_v10  ;;  %v4171_v52 = vshll.u32 %v17143_v20, 16 }
 0x328   : > { %4500 = vmatprep.mubr.bf16.mxu0 %v22839_v11  ;;  %v4163_v58 = vshll.u32 %v17142_v56, 16 }
 0x329   : > { %v4173_v10 = vrot.slane %v4171_v52, 1  ;;  %v17148_v52 = vld [vmem:[#allocation2 + $0xc8] sm:$0x1f]  }
 0x32a   : > { %v3628_v61 = vpop.f32.mrb[180].mxu0  ;;  %v4165_v22 = vrot.slane %v4163_v58, 1 }
 0x32b   : > { %v3630_v29 = vpop.f32.mrb[181].mxu0  ;;  %v19111_v19 = vadd.f32 %v3628_v61, %v22989_v32 }
 0x32c   : > { %v3632_v50 = vpop.f32.mrb[182].mxu0  ;;  %v19115_v54 = vadd.f32 %v3630_v29, %v22990_v12  ;;  %v22992_v29 = vld [vmem:[#allocation34_spill] sm:$0xff]  ;;  %v4166_v8 = vsel %vm22746_vm0, %v4161_v21, %v4165_v22  ;;  %v22993_v12 = vld [vmem:[#allocation20_spill] sm:$0xff] }
 0x32d   : > { %v3634_v48 = vpop.f32.mrb[183].mxu0  ;;  %v19118_v53 = vadd.f32 %v3632_v50, %v22991_v6 }
 0x32e   : > { %v22994_v48 = vld [vmem:[#allocation18_spill] sm:$0xff] }
 0x32f   : > { %4501 = vmatmul.mubr.bf16.gmra.mrb[252].mxu0 %v4150_v13  ;;  %v4167_v13 = vshrl.u32 %v17142_v56, 16 }
 0x330   : > { %4510 = vmatprep.mubr.bf16.mxu0 %v22839_v11 }
 0x331   : > { %v4169_v28 = vor.u32 %v4167_v13, %v4165_v22 }
 0x333   : > { %v4174_v21 = vsel %vm22746_vm0, %v4169_v28, %v4173_v10  ;;  %v4663_v28 = vld [vmem:[#allocation2 + $0x18] sm:$0x8] }
 0x337   : > { %4511 = vmatmul.mubr.bf16.gmra.mrb[120].mxu0 %v4158_v1  ;;  %v17144_v1 = vld [vmem:[#allocation2 + $0xc0] sm:$0xff]  }
 0x338   : > { %4520 = vmatprep.mubr.bf16.mxu0 %v22839_v11 }
 0x33a   : > { %v3648_v41 = vpop.f32.mrb[184].mxu0 }
 0x33b   : > { %v3650_v61 = vpop.f32.mrb[185].mxu0  ;;  %v19124_v32 = vadd.f32 %v3648_v41, %v22992_v29  ;;  %v4179_v29 = vshll.u32 %v17144_v1, 16 }
 0x33c   : > { %v3652_v50 = vpop.f32.mrb[186].mxu0  ;;  %v4175_v61 = vshrl.u32 %v17143_v20, 16 }
 0x33d   : > { %v3654_v23 = vpop.f32.mrb[187].mxu0  ;;  %v19128_v7 = vadd.f32 %v3652_v50, %v22993_v12  ;;  %v4181_v13 = vrot.slane %v4179_v29, 1  ;;  %v4183_v12 = vshrl.u32 %v17144_v1, 16 }
 0x33e   : > { %v19131_v6 = vadd.f32 %v3654_v23, %v22994_v48  ;;  %v4177_v22 = vor.u32 %v4175_v61, %v4173_v10  ;;  %v4187_v48 = vshll.u32 %v17148_v52, 16 }
 0x33f   : > { %4521 = vmatmul.mubr.bf16.gmra.mrb[4].mxu0 %v4166_v8  ;;  %v4185_v20 = vor.u32 %v4183_v12, %v4181_v13  ;;  %v4191_v12 = vshrl.u32 %v17148_v52, 16 }
 0x340   : > { %4530 = vmatprep.mubr.bf16.mxu0 %v22839_v11 }
 0x342   : > { %v3658_v35 = vpop.f32.mrb[188].mxu0 }
 0x343   : > { %v3660_v58 = vpop.f32.mrb[189].mxu0  ;;  %v19135_v41 = vadd.f32 %v3658_v35, %v18899_v4  ;;  %v4182_v4 = vsel %vm22746_vm0, %v4177_v22, %v4181_v13  ;;  %v19147_v35 = vld [vmem:[#allocation2 + $0x1c] sm:$0xf] }
 0x344   : > { %v3662_v56 = vpop.f32.mrb[190].mxu0  ;;  %v19139_v50 = vadd.f32 %v3660_v58, %v18902_v43  ;;  %v4189_v43 = vrot.slane %v4187_v48, 1  ;;  %v19151_v58 = vld [vmem:[#allocation2 + $0x24] sm:$0xf] }
 0x345   : > { %v3664_v23 = vpop.f32.mrb[191].mxu0  ;;  %v19142_v8 = vadd.f32 %v3662_v56, %v18905_v38  ;;  %v19149_v38 = vld [vmem:[#allocation2 + $0x20] sm:$0xf]  ;;  %22995 = vst [vmem:[#allocation47_spill] sm:$0xff] %v19151_v58 }
 0x346   : > { %v4190_v29 = vsel %vm22746_vm0, %v4185_v20, %v4189_v43  ;;  %v14358_v23 = vcombine.low %v19149_v38, %v19151_v58  ;;  %v19169_v20 = vld [vmem:[#allocation2 + $0x2c] sm:$0xf]  ;;  %v4193_v25 = vor.u32 %v4191_v12, %v4189_v43 }
 0x347   : > { %4531 = vmatmul.mubr.bf16.gmra.mrb[8].mxu0 %v4174_v21  ;;  %v14357_v21 = vcombine.low %v4663_v28, %v19147_v35  ;;  %22996 = vst [vmem:[#allocation48_spill] sm:$0xff] %v19169_v20 }
 0x348   : > { %4540 = vmatprep.mubr.bf16.mxu0 %v22839_v11 }
 0x349   : > { %v4848_v48 = vshrl.u32 %v14357_v21, 16  ;;  %v4851_v28 = vshll.u32 %v14357_v21, 16 }
 0x34f   : > { %4541 = vmatmul.mubr.bf16.gmra.mrb[132].mxu0 %v4182_v4 }
 0x350   : > { %4550 = vmatprep.mubr.bf16.mxu0 %v22839_v11 }
 0x352   : > { %v3678_v56 = vpop.f32.mrb[192].mxu0 }
 0x353   : > { %v3680_v10 = vpop.f32.mrb[193].mxu0  ;;  %v19155_v61 = vadd.f32 %v3678_v56, %v19001_v57  ;;  %v4856_v57 = vshrl.u32 %v14358_v23, 16  ;;  %v4859_v56 = vshll.u32 %v14358_v23, 16 }
 0x354   : > { %v3682_v1 = vpop.f32.mrb[194].mxu0  ;;  %v19167_v10 = vld [vmem:[#allocation2 + $0x28] sm:$0xf] }
 0x355   : > { %v3684_v22 = vpop.f32.mrb[195].mxu0  ;;  %v19161_v13 = vadd.f32 %v3682_v1, %v19010_v26  ;;  %v4850_v26 = vrot.slane %v4848_v48, 3  ;;  %v4853_v1 = vrot.slane %v4851_v28, 4  ;;  %v14359_v21 = vcombine.low %v19167_v10, %v19169_v20  ;;  %v19183_v48 = vld [vmem:[#allocation2 + $0x30] sm:$0xf] }
 0x356   : > { %v19164_v4 = vadd.f32 %v3684_v22, %v19016_v44  ;;  %v4861_v22 = vrot.slane %v4859_v56, 4  ;;  %22997 = vst [vmem:[#allocation49_spill] sm:$0xff] %v19183_v48  ;;  %v19185_v28 = vld [vmem:[#allocation2 + $0x34] sm:$0xf]  ;;  %v17152_v56 = vld [vmem:[#allocation6 + $0x380] ss:$8 sps:$4 sm:$0xff]  }
 0x357   : > { %4551 = vmatmul.mubr.bf16.gmra.mrb[16].mxu0 %v4190_v29  ;;  %v4858_v29 = vrot.slane %v4856_v57, 3  ;;  %v4854_v43 = vor.u32 %v4853_v1, %v4850_v26  ;;  %22998 = vst [vmem:[#allocation50_spill] sm:$0xff] %v19185_v28 }
 0x358   : > { %4560 = vmatprep.mubr.bf16.mxu0 %v22839_v11 }
 0x359   : > { %v4862_v12 = vor.u32 %v4861_v22, %v4858_v29  ;;  %v19191_v29 = vld [vmem:[#allocation2 + $0x38] sm:$0xf]  ;;  %v19193_v22 = vld [vmem:[#allocation2 + $0x3c] sm:$0xf] }
 0x35a   : > { %v3688_v42 = vpop.f32.mrb[196].mxu0  ;;  %22999 = vst [vmem:[#allocation51_spill] sm:$0xff] %v19191_v29  ;;  %23000 = vst [vmem:[#allocation52_spill] sm:$0xff] %v19193_v22 }
 0x35b   : > { %v3690_v14 = vpop.f32.mrb[197].mxu0  ;;  %v19172_v44 = vadd.f32 %v3688_v42, %v19025_v49  ;;  %v4865_v49 = vshrl.u32 %v14359_v21, 16  ;;  %v4868_v42 = vshll.u32 %v14359_v21, 16  ;;  %v4863_v57 = vsel %vm22747_vm1, %v4854_v43, %v4862_v12  ;;  %v17169_v21 = vld [vmem:[#allocation6 + $0x3a4] ss:$8 sps:$4 sm:$0xff]  }
 0x35c   : > { %v3692_v52 = vpop.f32.mrb[198].mxu0  ;;  %v19177_v23 = vadd.f32 %v3690_v14, %v19033_v27 }
 0x35d   : > { %v3694_v36 = vpop.f32.mrb[199].mxu0  ;;  %v19180_v58 = vadd.f32 %v3692_v52, %v19039_v9  ;;  %v4867_v27 = vrot.slane %v4865_v49, 3  ;;  %v4870_v14 = vrot.slane %v4868_v42, 4  ;;  %v14360_v9 = vcombine.low %v19183_v48, %v19185_v28  ;;  %v17160_v52 = vld [vmem:[#allocation6 + $0x390] ss:$8 sps:$4 sm:$0xff]  }
 0x35e   : > { %v17162_v36 = vld [vmem:[#allocation6 + $0x394] ss:$8 sps:$4 sm:$0xff]  }
 0x35f   : > { %4561 = vmatmul.mubr.bf16.gmra.mrb[20].mxu0 %v4193_v25  ;;  %v4871_v25 = vor.u32 %v4870_v14, %v4867_v27  ;;  %v4874_v26 = vshrl.u32 %v14360_v9, 16  ;;  %v4877_v1 = vshll.u32 %v14360_v9, 16  ;;  %v14361_v27 = vcombine.low %v19191_v29, %v19193_v22  ;;  %v17167_v14 = vld [vmem:[#allocation6 + $0x3a0] ss:$8 sps:$4 sm:$0xff]   ;;  %v17176_v48 = vld [vmem:[#allocation6 + $0x3b4] ss:$8 sps:$4 sm:$0xff]  }
 0x360   : > { %5198 = vmatprep.mubr.bf16.mxu0 %v22839_v11  ;;  %v17181_v29 = vld [vmem:[#allocation6 + $0x3c0] ss:$8 sps:$4 sm:$0xff]  }
 0x361   : > { %v4879_v20 = vrot.slane %v4877_v1, 4  ;;  %v4883_v1 = vshrl.u32 %v14361_v27, 16 }
 0x367   : > { %5199 = vmatmul.mubr.bf16.vlgmr.msra.gmra.mrb[0].mxu0 %v4863_v57  ;;  %v4872_v57 = vsel %vm22747_vm1, %v4862_v12, %v4871_v25 }
 0x368   : > { %5676 = vmatpush1.bf16.msra.mxu0 %v17152_v56  ;;  %5208 = vmatprep.mubr.bf16.mxu0 %v22839_v11  ;;  %v4876_v56 = vrot.slane %v4874_v26, 3  ;;  %v19210_v26 = vld [vmem:[#allocation2 + $0x44] sm:$0xf] }
 0x369   : > { %5677 = vmatprep.subr.bf16.mxu0 %v17162_v36  ;;  %23003 = vst [vmem:[#allocation55_spill] sm:$0xff] %v19210_v26 }
 0x36a   : > { %v3708_v43 = vpop.f32.mrb[200].mxu0  ;;  %v4880_v12 = vor.u32 %v4879_v20, %v4876_v56  ;;  %v4885_v20 = vrot.slane %v4883_v1, 3  ;;  %v17197_v1 = vld [vmem:[#allocation6 + $0x3e4] ss:$8 sps:$4 sm:$0xff]  }
 0x36b   : > { %v3710_v49 = vpop.f32.mrb[201].mxu0  ;;  %v19196_v42 = vadd.f32 %v3708_v43, %v19057_v24  ;;  %v19207_v24 = vld [vmem:[#allocation2 + $0x40] sm:$0xf]  ;;  %v17174_v43 = vld [vmem:[#allocation6 + $0x3b0] ss:$8 sps:$4 sm:$0xff]  }
 0x36c   : > { %v3712_v28 = vpop.f32.mrb[202].mxu0  ;;  %5678 = vmatpush1.bf16.msra.mxu0 %v17160_v52  ;;  %v4886_v52 = vshll.u32 %v14361_v27, 16 }
 0x36d   : > { %v3714_v9 = vpop.f32.mrb[203].mxu0  ;;  %5679 = vmatprep.subr.bf16.mxu0 %v17169_v21  ;;  %v19202_v36 = vadd.f32 %v3712_v28, %v19066_v55  ;;  %v17183_v21 = vld [vmem:[#allocation6 + $0x3c4] ss:$8 sps:$4 sm:$0xff]  }
 0x36e   : > { %v19205_v49 = vadd.f32 %v3714_v9, %v19072_v47  ;;  %v14362_v47 = vcombine.low %v19207_v24, %v19210_v26  ;;  %v4881_v9 = vsel %vm22747_vm1, %v4871_v25, %v4880_v12  ;;  %v4888_v56 = vrot.slane %v4886_v52, 4  ;;  %v17188_v25 = vld [vmem:[#allocation6 + $0x3d0] ss:$8 sps:$4 sm:$0xff]  }
 0x36f   : > { %23001 = vst [vmem:[#allocation53_spill] sm:$0xff] %v19202_v36  ;;  %5209 = vmatmul.mubr.bf16.gmra.mrb[28].mxu0 %v4872_v57 }
 0x370   : > { %23002 = vst [vmem:[#allocation54_spill] sm:$0xff] %v19205_v49  ;;  %5218 = vmatprep.mubr.bf16.mxu0 %v22839_v11  ;;  %5680 = vmatpush1.bf16.msra.mxu0 %v17167_v14  ;;  %v17190_v14 = vld [vmem:[#allocation6 + $0x3d4] ss:$8 sps:$4 sm:$0xff]   ;;  %v4892_v49 = vshrl.u32 %v14362_v47, 16  ;;  %v4895_v36 = vshll.u32 %v14362_v47, 16 }
 0x371   : > { %5681 = vmatprep.subr.bf16.mxu0 %v17176_v48 }
 0x372   : > { %v3718_v22 = vpop.f32.mrb[204].mxu0 }
 0x373   : > { %v3720_v55 = vpop.f32.mrb[205].mxu0  ;;  %v19215_v28 = vadd.f32 %v3718_v22, %v19081_v17  ;;  %v4889_v17 = vor.u32 %v4888_v56, %v4885_v20  ;;  %v19222_v22 = vld [vmem:[#allocation2 + $0x48] sm:$0xf]  ;;  %v19232_v56 = vld [vmem:[#allocation2 + $0x54] sm:$0xf] }
 0x374   : > { %v3722_v57 = vpop.f32.mrb[206].mxu0  ;;  %5682 = vmatpush1.bf16.msra.mxu0 %v17174_v43  ;;  %v19219_v27 = vadd.f32 %v3720_v55, %v19088_v62  ;;  %23004 = vst [vmem:[#allocation56_spill] sm:$0xff] %v19222_v22  ;;  %v4894_v43 = vrot.slane %v4892_v49, 3  ;;  %v17195_v55 = vld [vmem:[#allocation6 + $0x3e0] ss:$8 sps:$4 sm:$0xff]   ;;  %23007 = vst [vmem:[#allocation59_spill] sm:$0xff] %v19232_v56 }
 0x375   : > { %v3723_v48 = vpop.f32.mrb[207].mxu0  ;;  %5683 = vmatprep.subr.bf16.mxu0 %v17183_v21  ;;  %v19224_v57 = vld [vmem:[#allocation2 + $0x4c] sm:$0xf]  ;;  %v4890_v52 = vsel %vm22747_vm1, %v4880_v12, %v4889_v17  ;;  %v4897_v21 = vrot.slane %v4895_v36, 4 }
 0x376   : > { %23005 = vst [vmem:[#allocation57_spill] sm:$0xff] %v19224_v57  ;;  %v14363_v62 = vcombine.low %v19222_v22, %v19224_v57  ;;  %v19263_v22 = vld [vmem:[#allocation2 + $0xcc] sm:$0xf] }
 0x377   : > { %5219 = vmatmul.mubr.bf16.gmra.mrb[32].mxu0 %v4881_v9  ;;  %v4898_v20 = vor.u32 %v4897_v21, %v4894_v43  ;;  %23017 = vst [vmem:[#allocation66_spill] sm:$0xff] %v19263_v22 }
 0x378   : > { %5228 = vmatprep.mubr.bf16.mxu0 %v22839_v11  ;;  %5684 = vmatpush1.bf16.msra.mxu0 %v17181_v29  ;;  %v4901_v47 = vshrl.u32 %v14363_v62, 16  ;;  %v4904_v9 = vshll.u32 %v14363_v62, 16  ;;  %v19230_v29 = vld [vmem:[#allocation2 + $0x50] sm:$0xf] }
 0x379   : > { %5685 = vmatprep.subr.bf16.mxu0 %v17190_v14  ;;  %23006 = vst [vmem:[#allocation58_spill] sm:$0xff] %v19230_v29  ;;  %v4899_v49 = vsel %vm22747_vm1, %v4889_v17, %v4898_v20  ;;  %v19249_v17 = vld [vmem:[#allocation2 + $0x5c] sm:$0xf] }
 0x37a   : > { %v4903_v57 = vrot.slane %v4901_v47, 3  ;;  %v4906_v12 = vrot.slane %v4904_v9, 4  ;;  %v19247_v47 = vld [vmem:[#allocation2 + $0x58] sm:$0xf]  ;;  %23010 = vst [vmem:[#allocation62_spill] sm:$0xff] %v19249_v17 }
 0x37b   : > { %23009 = vst [vmem:[#allocation61_spill] sm:$0xff] %v19247_v47 }
 0x37c   : > { %5686 = vmatpush1.bf16.msra.mxu0 %v17188_v25  ;;  %v4907_v21 = vor.u32 %v4906_v12, %v4903_v57 }
 0x37d   : > { %5687 = vmatprep.subr.bf16.mxu0 %v17197_v1  ;;  %v14364_v1 = vcombine.low %v19230_v29, %v19232_v56  ;;  %v23011_v56 = vld [vmem:[#allocation35_spill] sm:$0xff]  ;;  %v23015_v29 = vld [vmem:[#allocation37_spill] sm:$0xff] }
 0x37f   : > { %5229 = vmatmul.mubr.bf16.gmra.mrb[12].mxu0 %v4890_v52 }
 0x380   : > { %5238 = vmatprep.mubr.bf16.mxu0 %v22839_v11  ;;  %5688 = vmatpush1.bf16.msra.mxu0 %v17195_v55  ;;  %v4910_v55 = vshrl.u32 %v14364_v1, 16 }
 0x382   : > { %v4342_v48 = vpop.f32.mrb[208].mxu0  ;;  %v4912_v57 = vrot.slane %v4910_v55, 3 }
 0x383   : > { %v4344_v14 = vpop.f32.mrb[209].mxu0  ;;  %v19235_v36 = vadd.f32 %v4342_v48, %v18914_v15  ;;  %v4913_v15 = vshll.u32 %v14364_v1, 16 }
 0x384   : > { %v4346_v25 = vpop.f32.mrb[210].mxu0  ;;  %v4908_v14 = vsel %vm22747_vm1, %v4898_v20, %v4907_v21 }
 0x385   : > { %v4348_v62 = vpop.f32.mrb[211].mxu0  ;;  %v19241_v52 = vadd.f32 %v4346_v25, %v18924_v39  ;;  %v4915_v12 = vrot.slane %v4913_v15, 4 }
 0x386   : > { %v19244_v43 = vadd.f32 %v4348_v62, %v18927_v30  ;;  %v14365_v30 = vcombine.low %v19247_v47, %v19249_v17 }
 0x387   : > { %5239 = vmatmul.mubr.bf16.gmra.mrb[40].mxu0 %v4899_v49  ;;  %v23013_v49 = vld [vmem:[#allocation36_spill] sm:$0xff]  ;;  %v4916_v55 = vor.u32 %v4915_v12, %v4912_v57  ;;  %v19280_v57 = vld [vmem:[#allocation2 + $0x6c] sm:$0xf] }
 0x388   : > { %23008 = vst [vmem:[#allocation60_spill] sm:$0xff] %v19244_v43  ;;  %5248 = vmatprep.mubr.bf16.mxu0 %v22839_v11  ;;  %v19265_v43 = vld [vmem:[#allocation2 + $0xd0] sm:$0xf]  ;;  %v4919_v15 = vshrl.u32 %v14365_v30, 16  ;;  %23021 = vst [vmem:[#allocation24_spill] sm:$0xff] %v19280_v57 }
 0x38a   : > { %v4352_v9 = vpop.f32.mrb[212].mxu0 }
 0x38b   : > { %v4354_v48 = vpop.f32.mrb[213].mxu0  ;;  %v19253_v39 = vadd.f32 %v4352_v9, %v23011_v56  ;;  %v17203_v56 = vld [vmem:[#allocation6 + $0x3f0] ss:$8 sps:$4 sm:$0xff]   ;;  %v17205_v9 = vld [vmem:[#allocation6 + $0x3f4] ss:$8 sps:$4 sm:$0xff]  }
 0x38c   : > { %v4356_v25 = vpop.f32.mrb[214].mxu0  ;;  %v19258_v62 = vadd.f32 %v4354_v48, %v23013_v49  ;;  %v4922_v48 = vshll.u32 %v14365_v30, 16  ;;  %v19270_v49 = vld [vmem:[#allocation2 + $0x60] sm:$0xf]  ;;  %5689 = vmatprep.subr.bf16.mxu0 %v17205_v9  ;;  %v19278_v30 = vld [vmem:[#allocation2 + $0x68] sm:$0xf] }
 0x38d   : > { %23012 = vst [vmem:[#allocation63_spill] sm:$0xff] %v19253_v39  ;;  %v4358_v1 = vpop.f32.mrb[215].mxu0  ;;  %v19261_v26 = vadd.f32 %v4356_v25, %v23015_v29  ;;  %23018 = vst [vmem:[#allocation67_spill] sm:$0xff] %v19270_v49  ;;  %5690 = vmatpush1.bf16.msra.mxu0 %v17203_v56  ;;  %v4921_v25 = vrot.slane %v4919_v15, 3  ;;  %v23022_v39 = vld [vmem:[#allocation28_spill] sm:$0xff] }
 0x38e   : > { %23014 = vst [vmem:[#allocation64_spill] sm:$0xff] %v19258_v62  ;;  %v19272_v1 = vld [vmem:[#allocation2 + $0x64] sm:$0xf]  ;;  %v4924_v20 = vrot.slane %v4922_v48, 4  ;;  %23020 = vst [vmem:[#allocation69_spill] sm:$0xff] %v19278_v30  ;;  %v14367_v48 = vcombine.low %v19278_v30, %v19280_v57  ;;  %v23030_v30 = vld [vmem:[#allocation39_spill] sm:$0xff] }
 0x38f   : > { %23016 = vst [vmem:[#allocation65_spill] sm:$0xff] %v19261_v26  ;;  %5249 = vmatmul.mubr.bf16.gmra.mrb[44].mxu0 %v4908_v14  ;;  %23019 = vst [vmem:[#allocation68_spill] sm:$0xff] %v19272_v1  ;;  %v14366_v29 = vcombine.low %v19270_v49, %v19272_v1  ;;  %v4917_v14 = vsel %vm22747_vm1, %v4907_v21, %v4916_v55 }
 0x390   : > { %5258 = vmatprep.mubr.bf16.mxu0 %v22839_v11  ;;  %v4925_v26 = vor.u32 %v4924_v20, %v4921_v25 }
 0x391   : > { %v4928_v17 = vshrl.u32 %v14366_v29, 16  ;;  %v4931_v47 = vshll.u32 %v14366_v29, 16 }
 0x392   : > { %v4926_v21 = vsel %vm22747_vm1, %v4916_v55, %v4925_v26  ;;  %v19297_v55 = vld [vmem:[#allocation2 + $0x74] sm:$0xf] }
 0x393   : > { %v4930_v56 = vrot.slane %v4928_v17, 3  ;;  %v4933_v62 = vrot.slane %v4931_v47, 4  ;;  %v4937_v47 = vshrl.u32 %v14367_v48, 16  ;;  %v4940_v17 = vshll.u32 %v14367_v48, 16  ;;  %23027 = vst [vmem:[#allocation30_spill] sm:$0xff] %v19297_v55 }
 0x397   : > { %5259 = vmatmul.mubr.bf16.gmra.mrb[24].mxu0 %v4917_v14  ;;  %v23025_v14 = vld [vmem:[#allocation21_spill] sm:$0xff] }
 0x398   : > { %5268 = vmatprep.mubr.bf16.mxu0 %v22839_v11 }
 0x39a   : > { %v4372_v12 = vpop.f32.mrb[216].mxu0 }
 0x39b   : > { %v4374_v9 = vpop.f32.mrb[217].mxu0  ;;  %v19283_v1 = vadd.f32 %v4372_v12, %v23022_v39  ;;  %v19295_v39 = vld [vmem:[#allocation2 + $0x70] sm:$0xf] }
 0x39c   : > { %v4376_v15 = vpop.f32.mrb[218].mxu0  ;;  %v4934_v9 = vor.u32 %v4933_v62, %v4930_v56  ;;  %v4939_v62 = vrot.slane %v4937_v47, 3  ;;  %v4942_v56 = vrot.slane %v4940_v17, 4 }
 0x39d   : > { %23023 = vst [vmem:[#allocation25_spill] sm:$0xff] %v19283_v1  ;;  %v4378_v20 = vpop.f32.mrb[219].mxu0  ;;  %v19289_v29 = vadd.f32 %v4376_v15, %v18966_v31  ;;  %v19314_v1 = vld [vmem:[#allocation2 + $0x7c] sm:$0xf] }
 0x39e   : > { %v19292_v25 = vadd.f32 %v4378_v20, %v23025_v14  ;;  %v4935_v57 = vsel %vm22747_vm1, %v4925_v26, %v4934_v9  ;;  %v23029_v20 = vld [vmem:[#allocation38_spill] sm:$0xff]  ;;  %v4943_v26 = vor.u32 %v4942_v56, %v4939_v62  ;;  %23032 = vst [vmem:[#allocation18_spill] sm:$0xff] %v19314_v1  ;;  %v19320_v62 = vld [vmem:[#allocation2 + $0x80] sm:$0xf] }
 0x39f   : > { %23024 = vst [vmem:[#allocation26_spill] sm:$0xff] %v19289_v29  ;;  %5269 = vmatmul.mubr.bf16.gmra.mrb[52].mxu0 %v4926_v21  ;;  %v14368_v21 = vcombine.low %v19295_v39, %v19297_v55  ;;  %v17209_v29 = vld [vmem:[#allocation6 + $0x404] ss:$8 sps:$4 sm:$0xff]   ;;  %23033 = vst [vmem:[#allocation35_spill] sm:$0xff] %v19320_v62 }
 0x3a0   : > { %23026 = vst [vmem:[#allocation27_spill] sm:$0xff] %v19292_v25  ;;  %5278 = vmatprep.mubr.bf16.mxu0 %v22839_v11  ;;  %6519 = vmatprep.subr.bf16.mxu0 %v17209_v29  ;;  %v4944_v47 = vsel %vm22747_vm1, %v4934_v9, %v4943_v26 }
 0x3a2   : > { %v4382_v12 = vpop.f32.mrb[220].mxu0 }
 0x3a3   : > { %v4384_v49 = vpop.f32.mrb[221].mxu0  ;;  %v19301_v31 = vadd.f32 %v4382_v12, %v18979_v3  ;;  %v4946_v3 = vshrl.u32 %v14368_v21, 16  ;;  %v4949_v12 = vshll.u32 %v14368_v21, 16  ;;  %v19322_v21 = vld [vmem:[#allocation2 + $0x84] sm:$0xf] }
 0x3a4   : > { %v4386_v15 = vpop.f32.mrb[222].mxu0  ;;  %v19306_v14 = vadd.f32 %v4384_v49, %v23029_v20  ;;  %23034 = vst [vmem:[#allocation36_spill] sm:$0xff] %v19322_v21 }
 0x3a5   : > { %23028 = vst [vmem:[#allocation34_spill] sm:$0xff] %v19301_v31  ;;  %v4388_v48 = vpop.f32.mrb[223].mxu0  ;;  %v19309_v25 = vadd.f32 %v4386_v15, %v23030_v30  ;;  %v19312_v31 = vld [vmem:[#allocation2 + $0x78] sm:$0xf]  ;;  %v4948_v17 = vrot.slane %v4946_v3, 3  ;;  %v4951_v30 = vrot.slane %v4949_v12, 4  ;;  %v14370_v12 = vcombine.low %v19320_v62, %v19322_v21 }
 0x3a6   : > { %23031 = vst [vmem:[#allocation20_spill] sm:$0xff] %v19312_v31  ;;  %v14369_v49 = vcombine.low %v19312_v31, %v19314_v1  ;;  %v19356_v31 = vld [vmem:[#allocation2 + $0x94] sm:$0xf] }
 0x3a7   : > { %5279 = vmatmul.mubr.bf16.gmra.mrb[56].mxu0 %v4935_v57  ;;  %v4952_v20 = vor.u32 %v4951_v30, %v4948_v17  ;;  %23038 = vst [vmem:[#allocation38_spill] sm:$0xff] %v19356_v31 }
 0x3a8   : > { %5288 = vmatprep.mubr.bf16.mxu0 %v22839_v11  ;;  %v4955_v57 = vshrl.u32 %v14369_v49, 16  ;;  %v4958_v15 = vshll.u32 %v14369_v49, 16 }
 0x3a9   : > { %v4953_v9 = vsel %vm22747_vm1, %v4943_v26, %v4952_v20  ;;  %v19339_v26 = vld [vmem:[#allocation2 + $0x8c] sm:$0xf] }
 0x3aa   : > { %v4957_v29 = vrot.slane %v4955_v57, 3  ;;  %v4960_v55 = vrot.slane %v4958_v15, 4  ;;  %v4964_v57 = vshrl.u32 %v14370_v12, 16  ;;  %v19337_v15 = vld [vmem:[#allocation2 + $0x88] sm:$0xf]  ;;  %23036 = vst [vmem:[#allocation28_spill] sm:$0xff] %v19339_v26 }
 0x3ab   : > { %23035 = vst [vmem:[#allocation37_spill] sm:$0xff] %v19337_v15 }
 0x3ac   : > { %v4961_v30 = vor.u32 %v4960_v55, %v4957_v29  ;;  %v4966_v55 = vrot.slane %v4964_v57, 3 }
 0x3ae   : > { %v4962_v21 = vsel %vm22747_vm1, %v4952_v20, %v4961_v30 }
 0x3af   : > { %5289 = vmatmul.mubr.bf16.gmra.mrb[36].mxu0 %v4944_v47 }
 0x3b0   : > { %5298 = vmatprep.mubr.bf16.mxu0 %v22839_v11 }
 0x3b2   : > { %v4402_v56 = vpop.f32.mrb[224].mxu0 }
 0x3b3   : > { %v4404_v48 = vpop.f32.mrb[225].mxu0  ;;  %v19325_v1 = vadd.f32 %v4402_v56, %v19004_v16  ;;  %v4967_v16 = vshll.u32 %v14370_v12, 16 }
 0x3b4   : > { %v4406_v3 = vpop.f32.mrb[226].mxu0 }
 0x3b5   : > { %v4408_v49 = vpop.f32.mrb[227].mxu0  ;;  %v19331_v47 = vadd.f32 %v4406_v3, %v19013_v37  ;;  %v4969_v29 = vrot.slane %v4967_v16, 4 }
 0x3b6   : > { %v19334_v17 = vadd.f32 %v4408_v49, %v19019_v2  ;;  %v14371_v2 = vcombine.low %v19337_v15, %v19339_v26 }
 0x3b7   : > { %5299 = vmatmul.mubr.bf16.gmra.mrb[64].mxu0 %v4953_v9  ;;  %v4970_v20 = vor.u32 %v4969_v29, %v4966_v55  ;;  %v19362_v55 = vld [vmem:[#allocation2 + $0x98] sm:$0xf] }
 0x3b8   : > { %5308 = vmatprep.mubr.bf16.mxu0 %v22839_v11  ;;  %v4973_v62 = vshrl.u32 %v14371_v2, 16  ;;  %23039 = vst [vmem:[#allocation39_spill] sm:$0xff] %v19362_v55 }
 0x3ba   : > { %v4412_v56 = vpop.f32.mrb[228].mxu0  ;;  %v4975_v16 = vrot.slane %v4973_v62, 3 }
 0x3bb   : > { %v4414_v48 = vpop.f32.mrb[229].mxu0  ;;  %v19343_v37 = vadd.f32 %v4412_v56, %v19028_v33  ;;  %v4976_v33 = vshll.u32 %v14371_v2, 16  ;;  %v19354_v56 = vld [vmem:[#allocation2 + $0x90] sm:$0xf]  ;;  %v19364_v2 = vld [vmem:[#allocation2 + $0x9c] sm:$0xf] }
 0x3bc   : > { %v4416_v3 = vpop.f32.mrb[230].mxu0  ;;  %v19348_v9 = vadd.f32 %v4414_v48, %v19036_v63  ;;  %23037 = vst [vmem:[#allocation21_spill] sm:$0xff] %v19354_v56  ;;  %v14372_v57 = vcombine.low %v19354_v56, %v19356_v31  ;;  %v4971_v63 = vsel %vm22747_vm1, %v4961_v30, %v4970_v20  ;;  %23040 = vst [vmem:[#allocation83_spill] sm:$0xff] %v19364_v2  ;;  %v19398_v56 = vld [vmem:[#allocation2 + $0xac] sm:$0xf] }
 0x3bd   : > { %v4418_v12 = vpop.f32.mrb[231].mxu0  ;;  %v19351_v49 = vadd.f32 %v4416_v3, %v19042_v59  ;;  %v4978_v48 = vrot.slane %v4976_v33, 4  ;;  %v14373_v33 = vcombine.low %v19362_v55, %v19364_v2  ;;  %23043 = vst [vmem:[#allocation86_spill] sm:$0xff] %v19398_v56 }
 0x3be   : > { %v4982_v59 = vshrl.u32 %v14372_v57, 16  ;;  %v4985_v3 = vshll.u32 %v14372_v57, 16 }
 0x3bf   : > { %5309 = vmatmul.mubr.bf16.gmra.mrb[68].mxu0 %v4962_v21  ;;  %v4979_v21 = vor.u32 %v4978_v48, %v4975_v16 }
 0x3c0   : > { %5318 = vmatprep.mubr.bf16.mxu0 %v22839_v11  ;;  %v4984_v26 = vrot.slane %v4982_v59, 3  ;;  %v4987_v15 = vrot.slane %v4985_v3, 4  ;;  %v4991_v59 = vshrl.u32 %v14373_v33, 16  ;;  %v19379_v3 = vld [vmem:[#allocation2 + $0xa0] sm:$0xf] }
 0x3c1   : > { %v4980_v62 = vsel %vm22747_vm1, %v4970_v20, %v4979_v21  ;;  %v19381_v20 = vld [vmem:[#allocation2 + $0xa4] sm:$0xf] }
 0x3c2   : > { %v4988_v48 = vor.u32 %v4987_v15, %v4984_v26  ;;  %23041 = vst [vmem:[#allocation84_spill] sm:$0xff] %v19381_v20  ;;  %v4993_v15 = vrot.slane %v4991_v59, 3 }
 0x3c4   : > { %v4989_v2 = vsel %vm22747_vm1, %v4979_v21, %v4988_v48 }
 0x3c7   : > { %5319 = vmatmul.mubr.bf16.gmra.mrb[48].mxu0 %v4971_v63 }
 0x3c8   : > { %5328 = vmatprep.mubr.bf16.mxu0 %v22839_v11 }
 0x3ca   : > { %v4432_v29 = vpop.f32.mrb[232].mxu0 }
 0x3cb   : > { %v4434_v12 = vpop.f32.mrb[233].mxu0  ;;  %v19367_v31 = vadd.f32 %v4432_v29, %v19060_v45  ;;  %v4994_v45 = vshll.u32 %v14373_v33, 16 }
 0x3cc   : > { %v4436_v30 = vpop.f32.mrb[234].mxu0 }
 0x3cd   : > { %v4438_v57 = vpop.f32.mrb[235].mxu0  ;;  %v19373_v63 = vadd.f32 %v4436_v30, %v19069_v40  ;;  %v4996_v26 = vrot.slane %v4994_v45, 4 }
 0x3ce   : > { %v19376_v16 = vadd.f32 %v4438_v57, %v19075_v0  ;;  %v14374_v0 = vcombine.low %v19379_v3, %v19381_v20 }
 0x3cf   : > { %5329 = vmatmul.mubr.bf16.gmra.mrb[72].mxu0 %v4980_v62  ;;  %v4997_v21 = vor.u32 %v4996_v26, %v4993_v15  ;;  %v19404_v15 = vld [vmem:[#allocation2 + $0xb0] sm:$0xf] }
 0x3d0   : > { %5338 = vmatprep.mubr.bf16.mxu0 %v22839_v11  ;;  %v5000_v55 = vshrl.u32 %v14374_v0, 16  ;;  %23044 = vst [vmem:[#allocation87_spill] sm:$0xff] %v19404_v15 }
 0x3d2   : > { %v4442_v29 = vpop.f32.mrb[236].mxu0  ;;  %v5002_v45 = vrot.slane %v5000_v55, 3 }
 0x3d3   : > { %v4444_v12 = vpop.f32.mrb[237].mxu0  ;;  %v19385_v40 = vadd.f32 %v4442_v29, %v19084_v46  ;;  %v5003_v46 = vshll.u32 %v14374_v0, 16  ;;  %v19396_v29 = vld [vmem:[#allocation2 + $0xa8] sm:$0xf]  ;;  %v19406_v0 = vld [vmem:[#allocation2 + $0xb4] sm:$0xf] }
 0x3d4   : > { %v4446_v30 = vpop.f32.mrb[238].mxu0  ;;  %v19390_v62 = vadd.f32 %v4444_v12, %v19091_v34  ;;  %23042 = vst [vmem:[#allocation85_spill] sm:$0xff] %v19396_v29  ;;  %v14375_v59 = vcombine.low %v19396_v29, %v19398_v56  ;;  %v4998_v34 = vsel %vm22747_vm1, %v4988_v48, %v4997_v21  ;;  %23045 = vst [vmem:[#allocation88_spill] sm:$0xff] %v19406_v0 }
 0x3d5   : > { %v4448_v33 = vpop.f32.mrb[239].mxu0  ;;  %v19393_v57 = vadd.f32 %v4446_v30, %v19094_v5  ;;  %v5005_v12 = vrot.slane %v5003_v46, 4  ;;  %v14376_v46 = vcombine.low %v19404_v15, %v19406_v0 }
 0x3d6   : > { %v5009_v5 = vshrl.u32 %v14375_v59, 16  ;;  %v5012_v30 = vshll.u32 %v14375_v59, 16 }
 0x3d7   : > { %5339 = vmatmul.mubr.bf16.gmra.mrb[76].mxu0 %v4989_v2  ;;  %v5006_v2 = vor.u32 %v5005_v12, %v5002_v45 }
 0x3d8   : > { %5348 = vmatprep.mubr.bf16.mxu0 %v22839_v11  ;;  %v5011_v56 = vrot.slane %v5009_v5, 3  ;;  %v5014_v29 = vrot.slane %v5012_v30, 4  ;;  %v19421_v5 = vld [vmem:[#allocation2 + $0xb8] sm:$0xf] }
 0x3d9   : > { %v5007_v55 = vsel %vm22747_vm1, %v4997_v21, %v5006_v2  ;;  %23046 = vst [vmem:[#allocation89_spill] sm:$0xff] %v19421_v5  ;;  %v19423_v21 = vld [vmem:[#allocation2 + $0xbc] sm:$0xf] }
 0x3da   : > { %v5015_v12 = vor.u32 %v5014_v29, %v5011_v56  ;;  %23047 = vst [vmem:[#allocation90_spill] sm:$0xff] %v19423_v21  ;;  %v14377_v56 = vcombine.low %v19421_v5, %v19423_v21 }
 0x3dc   : > { %v5030_v15 = vshll.u32 %v14377_v56, 16 }
 0x3de   : > { %v5032_v21 = vrot.slane %v5030_v15, 4 }
 0x3df   : > { %5349 = vmatmul.mubr.bf16.gmra.mrb[60].mxu0 %v4998_v34 }
 0x3e0   : > { %5358 = vmatprep.mubr.bf16.mxu0 %v22839_v11 }
 0x3e2   : > { %v4462_v26 = vpop.f32.mrb[240].mxu0 }
 0x3e3   : > { %v19409_v33 = vadd.f32 %v4462_v26, %v19100_v60  ;;  %v4464_v20 = vpop.f32.mrb[241].mxu0  ;;  %v5018_v60 = vshrl.u32 %v14376_v46, 16 }
 0x3e4   : > { %v4466_v48 = vpop.f32.mrb[242].mxu0  ;;  %v5021_v20 = vshll.u32 %v14376_v46, 16 }
 0x3e5   : > { %v19415_v59 = vadd.f32 %v4466_v48, %v19104_v51  ;;  %v4468_v34 = vpop.f32.mrb[243].mxu0  ;;  %v5016_v48 = vsel %vm22747_vm1, %v5006_v2, %v5015_v12  ;;  %v5020_v29 = vrot.slane %v5018_v60, 3  ;;  %v19438_v2 = vld [vmem:[#allocation2 + $0xc0] sm:$0xf] }
 0x3e6   : > { %v19418_v45 = vadd.f32 %v4468_v34, %v19107_v18  ;;  %v5023_v46 = vrot.slane %v5021_v20, 4 }
 0x3e7   : > { %5359 = vmatmul.mubr.bf16.gmra.mrb[80].mxu0 %v5007_v55 }
 0x3e8   : > { %5368 = vmatprep.mubr.bf16.mxu0 %v22839_v11 }
 0x3ea   : > { %v4472_v30 = vpop.f32.mrb[244].mxu0 }
 0x3eb   : > { %v19426_v26 = vadd.f32 %v4472_v30, %v19111_v19  ;;  %v4474_v51 = vpop.f32.mrb[245].mxu0  ;;  %v5024_v19 = vor.u32 %v5023_v46, %v5020_v29  ;;  %v5027_v30 = vshrl.u32 %v14377_v56, 16 }
 0x3ec   : > { %v19430_v18 = vadd.f32 %v4474_v51, %v19115_v54  ;;  %v4476_v55 = vpop.f32.mrb[246].mxu0  ;;  %v19440_v54 = vld [vmem:[#allocation2 + $0xc4] sm:$0xf] }
 0x3ed   : > { %v19435_v34 = vadd.f32 %v4476_v55, %v19118_v53  ;;  %v4478_v0 = vpop.f32.mrb[247].mxu0  ;;  %23049 = vst [vmem:[#allocation92_spill] sm:$0xff] %v19440_v54  ;;  %v14378_v51 = vcombine.low %v19438_v2, %v19440_v54  ;;  %v5025_v60 = vsel %vm22747_vm1, %v5015_v12, %v5024_v19  ;;  %v5029_v20 = vrot.slane %v5027_v30, 3  ;;  %v19446_v55 = vld [vmem:[#allocation2 + $0xc8] sm:$0xf] }
 0x3ee   : > { %v14379_v15 = vcombine.low %v19446_v55, %v19263_v22 }
 0x3ef   : > { %23048 = vst [vmem:[#allocation91_spill] sm:$0xff] %v19435_v34  ;;  %5369 = vmatmul.mubr.bf16.gmra.mrb[84].mxu0 %v5016_v48  ;;  %v5036_v53 = vshrl.u32 %v14378_v51, 16  ;;  %v5039_v0 = vshll.u32 %v14378_v51, 16  ;;  %v5033_v48 = vor.u32 %v5032_v21, %v5029_v20 }
 0x3f0   : > { %5378 = vmatprep.mubr.bf16.mxu0 %v22839_v11  ;;  %v5048_v20 = vshll.u32 %v14379_v15, 16 }
 0x3f1   : > { %v5038_v5 = vrot.slane %v5036_v53, 3  ;;  %v5041_v34 = vrot.slane %v5039_v0, 4  ;;  %v5034_v54 = vsel %vm22747_vm1, %v5024_v19, %v5033_v48  ;;  %v19461_v53 = vld [vmem:[#allocation2 + $0xd4] sm:$0xf] }
 0x3f7   : > { %5379 = vmatmul.mubr.bf16.gmra.mrb[120].mxu0 %v5025_v60  ;;  %v5042_v60 = vor.u32 %v5041_v34, %v5038_v5  ;;  %v14380_v5 = vcombine.low %v19265_v43, %v19461_v53 }
 0x3f8   : > { %5388 = vmatprep.mubr.bf16.mxu0 %v22839_v11 }
 0x3fa   : > { %v4492_v56 = vpop.f32.mrb[248].mxu0 }
 0x3fb   : > { %v19449_v29 = vadd.f32 %v4492_v56, %v19124_v32  ;;  %v4494_v46 = vpop.f32.mrb[249].mxu0  ;;  %v5045_v32 = vshrl.u32 %v14379_v15, 16 }
 0x3fc   : > { %v4496_v12 = vpop.f32.mrb[250].mxu0 }
 0x3fd   : > { %v19455_v30 = vadd.f32 %v4496_v12, %v19128_v7  ;;  %v4498_v21 = vpop.f32.mrb[251].mxu0  ;;  %v5043_v7 = vsel %vm22747_vm1, %v5033_v48, %v5042_v60  ;;  %v5047_v34 = vrot.slane %v5045_v32, 3 }
 0x3fe   : > { %v19458_v51 = vadd.f32 %v4498_v21, %v19131_v6  ;;  %v5054_v21 = vshrl.u32 %v14380_v5, 16 }
 0x3ff   : > { %5389 = vmatmul.mubr.bf16.gmra.mrb[88].mxu0 %v5034_v54  ;;  %v5050_v54 = vrot.slane %v5048_v20, 4 }
 0x400   : > { %5398 = vmatprep.mubr.bf16.mxu0 %v22839_v11 }
 0x402   : > { %v4502_v19 = vpop.f32.mrb[252].mxu0 }
 0x403   : > { %v19464_v0 = vadd.f32 %v4502_v19, %v19135_v41  ;;  %v4504_v56 = vpop.f32.mrb[253].mxu0  ;;  %v5051_v41 = vor.u32 %v5050_v54, %v5047_v34  ;;  %v5057_v19 = vshll.u32 %v14380_v5, 16 }
 0x404   : > { %v19468_v46 = vadd.f32 %v4504_v56, %v19139_v50  ;;  %v4506_v6 = vpop.f32.mrb[254].mxu0  ;;  %v5056_v50 = vrot.slane %v5054_v21, 3 }
 0x405   : > { %v19473_v12 = vadd.f32 %v4506_v6, %v19142_v8  ;;  %v4508_v15 = vpop.f32.mrb[255].mxu0  ;;  %v5052_v48 = vsel %vm22747_vm1, %v5042_v60, %v5051_v41  ;;  %v5059_v56 = vrot.slane %v5057_v19, 4 }
 0x407   : > { %5399 = vmatmul.mubr.bf16.gmra.mrb[92].mxu0 %v5043_v7  ;;  %v5060_v22 = vor.u32 %v5059_v56, %v5056_v50  ;;  %v17214_v50 = vld [vmem:[#allocation6 + $0x414] ss:$8 sps:$4 sm:$0xff]  }
 0x408   : > { %5408 = vmatprep.mubr.bf16.mxu0 %v22839_v11 }
 0x409   : > { %v5061_v7 = vsel %vm22747_vm1, %v5051_v41, %v5060_v22 }
 0x40f   : > { %5409 = vmatmul.mubr.bf16.gmra.mrb[132].mxu0 %v5052_v48  ;;  %v17207_v48 = vld [vmem:[#allocation6 + $0x400] ss:$8 sps:$4 sm:$0xff]  }
 0x410   : > { %5418 = vmatprep.mubr.bf16.mxu0 %v22839_v11 }
 0x412   : > { %v4522_v32 = vpop.f32.mrb[4].mxu0 }
 0x413   : > { %v19479_v20 = vadd.f32 %v4522_v32, %v19155_v61  ;;  %v4524_v8 = vpop.f32.mrb[5].mxu0 }
 0x414   : > { %v4526_v6 = vpop.f32.mrb[6].mxu0 }
 0x415   : > { %v19483_v34 = vadd.f32 %v4526_v6, %v19161_v13  ;;  %v4528_v5 = vpop.f32.mrb[7].mxu0 }
 0x416   : > { %v19486_v60 = vadd.f32 %v4528_v5, %v19164_v4  ;;  %v14397_v4 = vcombine.low %v19147_v35, %v19149_v38  ;;  %v17217_v35 = vld [vmem:[#allocation6 + $0x420] ss:$8 sps:$4 sm:$0xff]  }
 0x417   : > { %5419 = vmatmul.mubr.bf16.gmra.mrb[96].mxu0 %v5061_v7  ;;  %v23051_v38 = vld [vmem:[#allocation53_spill] sm:$0xff] }
 0x418   : > { %5428 = vmatprep.mubr.bf16.mxu0 %v22839_v11 }
 0x41a   : > { %v4532_v54 = vpop.f32.mrb[8].mxu0 }
 0x41b   : > { %v19490_v15 = vadd.f32 %v4532_v54, %v19172_v44  ;;  %v4534_v61 = vpop.f32.mrb[9].mxu0  ;;  %v17212_v44 = vld [vmem:[#allocation6 + $0x410] ss:$8 sps:$4 sm:$0xff]   ;;  %v17224_v54 = vld [vmem:[#allocation6 + $0x434] ss:$8 sps:$4 sm:$0xff]  }
 0x41c   : > { %v19493_v21 = vadd.f32 %v4534_v61, %v19177_v23  ;;  %v4536_v41 = vpop.f32.mrb[10].mxu0  ;;  %v17219_v23 = vld [vmem:[#allocation6 + $0x424] ss:$8 sps:$4 sm:$0xff]  }
 0x41d   : > { %v19496_v19 = vadd.f32 %v4536_v41, %v19180_v58  ;;  %v4538_v13 = vpop.f32.mrb[11].mxu0  ;;  %v23050_v58 = vld [vmem:[#allocation47_spill] sm:$0xff]  ;;  %v23052_v61 = vld [vmem:[#allocation54_spill] sm:$0xff] }
 0x41e   : > { %v14398_v32 = vcombine.low %v23050_v58, %v19167_v10  ;;  %v17222_v10 = vld [vmem:[#allocation6 + $0x430] ss:$8 sps:$4 sm:$0xff]  }
 0x41f   : > { %5429 = vmatmul.mubr.bf16.gmra.mrb[100].mxu0 %v5060_v22 }
 0x420   : > { %5707 = vmatprep.mubr.bf16.mxu0 %v22839_v11 }
 0x427   : > { %5708 = vmatmul.mubr.bf16.vlgmr.msra.gmra.mrb[0].mxu0 %v14397_v4 }
 0x428   : > { %6520 = vmatpush1.bf16.msra.mxu0 %v17207_v48  ;;  %5717 = vmatprep.mubr.bf16.mxu0 %v22839_v11 }
 0x429   : > { %6521 = vmatprep.subr.bf16.mxu0 %v17214_v50  ;;  %v23053_v50 = vld [vmem:[#allocation49_spill] sm:$0xff] }
 0x42a   : > { %v4552_v56 = vpop.f32.mrb[16].mxu0 }
 0x42b   : > { %v19505_v22 = vadd.f32 %v4552_v56, %v19196_v42  ;;  %v4554_v8 = vpop.f32.mrb[17].mxu0  ;;  %v17229_v42 = vld [vmem:[#allocation6 + $0x444] ss:$8 sps:$4 sm:$0xff]  }
 0x42c   : > { %v4556_v7 = vpop.f32.mrb[18].mxu0  ;;  %6522 = vmatpush1.bf16.msra.mxu0 %v17212_v44  ;;  %v23054_v44 = vld [vmem:[#allocation48_spill] sm:$0xff] }
 0x42d   : > { %v19508_v6 = vadd.f32 %v4556_v7, %v23051_v38  ;;  %v4558_v5 = vpop.f32.mrb[19].mxu0  ;;  %6523 = vmatprep.subr.bf16.mxu0 %v17219_v23  ;;  %v14399_v56 = vcombine.low %v23054_v44, %v23053_v50  ;;  %v17234_v7 = vld [vmem:[#allocation6 + $0x454] ss:$8 sps:$4 sm:$0xff]  }
 0x42e   : > { %v19511_v41 = vadd.f32 %v4558_v5, %v23052_v61  ;;  %v23055_v38 = vld [vmem:[#allocation51_spill] sm:$0xff]  ;;  %v23056_v5 = vld [vmem:[#allocation50_spill] sm:$0xff] }
 0x42f   : > { %5718 = vmatmul.mubr.bf16.gmra.mrb[104].mxu0 %v14398_v32  ;;  %v17227_v32 = vld [vmem:[#allocation6 + $0x440] ss:$8 sps:$4 sm:$0xff]  }
 0x430   : > { %5727 = vmatprep.mubr.bf16.mxu0 %v22839_v11  ;;  %6524 = vmatpush1.bf16.msra.mxu0 %v17217_v35  ;;  %v17232_v35 = vld [vmem:[#allocation6 + $0x450] ss:$8 sps:$4 sm:$0xff]   ;;  %v17237_v61 = vld [vmem:[#allocation6 + $0x460] ss:$8 sps:$4 sm:$0xff]  }
 0x431   : > { %6525 = vmatprep.subr.bf16.mxu0 %v17224_v54  ;;  %v14400_v54 = vcombine.low %v23056_v5, %v23055_v38  ;;  %v23062_v5 = vld [vmem:[#allocation64_spill] sm:$0xff] }
 0x432   : > { %v4562_v13 = vpop.f32.mrb[20].mxu0 }
 0x433   : > { %v19515_v4 = vadd.f32 %v4562_v13, %v19215_v28  ;;  %v4564_v48 = vpop.f32.mrb[21].mxu0  ;;  %v17239_v28 = vld [vmem:[#allocation6 + $0x464] ss:$8 sps:$4 sm:$0xff]  }
 0x434   : > { %v19520_v23 = vadd.f32 %v4564_v48, %v19219_v27  ;;  %v4566_v58 = vpop.f32.mrb[22].mxu0  ;;  %6526 = vmatpush1.bf16.msra.mxu0 %v17222_v10  ;;  %v23057_v10 = vld [vmem:[#allocation52_spill] sm:$0xff] }
 0x435   : > { %v4567_v8 = vpop.f32.mrb[23].mxu0  ;;  %6527 = vmatprep.subr.bf16.mxu0 %v17229_v42  ;;  %v14401_v42 = vcombine.low %v23057_v10, %v19207_v24  ;;  %v23058_v58 = vld [vmem:[#allocation60_spill] sm:$0xff] }
 0x437   : > { %5728 = vmatmul.mubr.bf16.gmra.mrb[108].mxu0 %v14399_v56 }
 0x438   : > { %5737 = vmatprep.mubr.bf16.mxu0 %v22839_v11  ;;  %6528 = vmatpush1.bf16.msra.mxu0 %v17227_v32 }
 0x439   : > { %6529 = vmatprep.subr.bf16.mxu0 %v17234_v7  ;;  %v23059_v7 = vld [vmem:[#allocation63_spill] sm:$0xff] }
 0x43c   : > { %6530 = vmatpush1.bf16.msra.mxu0 %v17232_v35 }
 0x43d   : > { %6531 = vmatprep.subr.bf16.mxu0 %v17239_v28  ;;  %v23060_v28 = vld [vmem:[#allocation56_spill] sm:$0xff] }
 0x43f   : > { %5738 = vmatmul.mubr.bf16.gmra.mrb[12].mxu0 %v14400_v54 }
 0x440   : > { %5747 = vmatprep.mubr.bf16.mxu0 %v22839_v11  ;;  %6532 = vmatpush1.bf16.msra.mxu0 %v17237_v61  ;;  %v23063_v61 = vld [vmem:[#allocation65_spill] sm:$0xff] }
 0x442   : > { %v5210_v27 = vpop.f32.mrb[28].mxu0 }
 0x443   : > { %v19529_v13 = vadd.f32 %v5210_v27, %v19235_v36  ;;  %v5212_v48 = vpop.f32.mrb[29].mxu0  ;;  %v23061_v36 = vld [vmem:[#allocation55_spill] sm:$0xff] }
 0x444   : > { %v5214_v50 = vpop.f32.mrb[30].mxu0  ;;  %v14402_v38 = vcombine.low %v23061_v36, %v23060_v28  ;;  %v17244_v48 = vld [vmem:[#allocation6 + $0x474] ss:$8 sps:$4 sm:$0xff]   ;;  %v23069_v36 = vld [vmem:[#allocation25_spill] sm:$0xff] }
 0x445   : > { %v19532_v44 = vadd.f32 %v5214_v50, %v19241_v52  ;;  %v5216_v56 = vpop.f32.mrb[31].mxu0  ;;  %6533 = vmatprep.subr.bf16.mxu0 %v17244_v48  ;;  %v23065_v50 = vld [vmem:[#allocation58_spill] sm:$0xff] }
 0x446   : > { %v19535_v32 = vadd.f32 %v5216_v56, %v23058_v58  ;;  %v23066_v56 = vld [vmem:[#allocation57_spill] sm:$0xff] }
 0x447   : > { %5748 = vmatmul.mubr.bf16.gmra.mrb[112].mxu0 %v14401_v42  ;;  %v17242_v42 = vld [vmem:[#allocation6 + $0x470] ss:$8 sps:$4 sm:$0xff]   ;;  %v14403_v58 = vcombine.low %v23066_v56, %v23065_v50  ;;  %v23073_v56 = vld [vmem:[#allocation34_spill] sm:$0xff] }
 0x448   : > { %5757 = vmatprep.mubr.bf16.mxu0 %v22839_v11  ;;  %6534 = vmatpush1.bf16.msra.mxu0 %v17242_v42  ;;  %v23071_v42 = vld [vmem:[#allocation27_spill] sm:$0xff] }
 0x44a   : > { %v5220_v8 = vpop.f32.mrb[32].mxu0 }
 0x44b   : > { %v19539_v35 = vadd.f32 %v5220_v8, %v23059_v7  ;;  %v5222_v24 = vpop.f32.mrb[33].mxu0  ;;  %v23067_v7 = vld [vmem:[#allocation61_spill] sm:$0xff] }
 0x44c   : > { %v19544_v54 = vadd.f32 %v5222_v24, %v23062_v5  ;;  %v5224_v52 = vpop.f32.mrb[34].mxu0  ;;  %v23068_v24 = vld [vmem:[#allocation59_spill] sm:$0xff] }
 0x44d   : > { %v19547_v27 = vadd.f32 %v5224_v52, %v23063_v61  ;;  %v5226_v10 = vpop.f32.mrb[35].mxu0  ;;  %v14404_v28 = vcombine.low %v23068_v24, %v23067_v7  ;;  %v23070_v61 = vld [vmem:[#allocation26_spill] sm:$0xff]  ;;  %v23074_v24 = vld [vmem:[#allocation67_spill] sm:$0xff] }
 0x44f   : > { %23064 = vst [vmem:[#allocation47_spill] sm:$0xff] %v19547_v27  ;;  %5758 = vmatmul.mubr.bf16.gmra.mrb[116].mxu0 %v14402_v38 }
 0x450   : > { %5767 = vmatprep.mubr.bf16.mxu0 %v22839_v11 }
 0x457   : > { %5768 = vmatmul.mubr.bf16.gmra.mrb[24].mxu0 %v14403_v58 }
 0x458   : > { %5777 = vmatprep.mubr.bf16.mxu0 %v22839_v11 }
 0x45a   : > { %v5240_v8 = vpop.f32.mrb[40].mxu0 }
 0x45b   : > { %v19556_v5 = vadd.f32 %v5240_v8, %v23069_v36  ;;  %v5242_v38 = vpop.f32.mrb[41].mxu0  ;;  %v23075_v8 = vld [vmem:[#allocation62_spill] sm:$0xff] }
 0x45c   : > { %v5244_v52 = vpop.f32.mrb[42].mxu0  ;;  %v14405_v36 = vcombine.low %v23075_v8, %v23074_v24 }
 0x45d   : > { %v19559_v10 = vadd.f32 %v5244_v52, %v23070_v61  ;;  %v5246_v48 = vpop.f32.mrb[43].mxu0 }
 0x45e   : > { %v19562_v27 = vadd.f32 %v5246_v48, %v23071_v42  ;;  %v23077_v42 = vld [vmem:[#allocation68_spill] sm:$0xff] }
 0x45f   : > { %5778 = vmatmul.mubr.bf16.gmra.mrb[124].mxu0 %v14404_v28  ;;  %v23076_v28 = vld [vmem:[#allocation69_spill] sm:$0xff] }
 0x460   : > { %23072 = vst [vmem:[#allocation53_spill] sm:$0xff] %v19562_v27  ;;  %5787 = vmatprep.mubr.bf16.mxu0 %v22839_v11  ;;  %v14406_v27 = vcombine.low %v23077_v42, %v23076_v28  ;;  %v23079_v28 = vld [vmem:[#allocation20_spill] sm:$0xff] }
 0x462   : > { %v5250_v50 = vpop.f32.mrb[44].mxu0 }
 0x463   : > { %v19566_v58 = vadd.f32 %v5250_v50, %v23073_v56  ;;  %v5252_v7 = vpop.f32.mrb[45].mxu0  ;;  %v23078_v56 = vld [vmem:[#allocation24_spill] sm:$0xff] }
 0x464   : > { %v19571_v38 = vadd.f32 %v5252_v7, %v19306_v14  ;;  %v5254_v52 = vpop.f32.mrb[46].mxu0  ;;  %v14407_v24 = vcombine.low %v23078_v56, %v19295_v39 }
 0x465   : > { %v19574_v61 = vadd.f32 %v5254_v52, %v19309_v25  ;;  %v5256_v48 = vpop.f32.mrb[47].mxu0 }
 0x467   : > { %5788 = vmatmul.mubr.bf16.gmra.mrb[128].mxu0 %v14405_v36 }
 0x468   : > { %5797 = vmatprep.mubr.bf16.mxu0 %v22839_v11 }
 0x46f   : > { %5798 = vmatmul.mubr.bf16.gmra.mrb[36].mxu0 %v14406_v27 }
 0x470   : > { %5807 = vmatprep.mubr.bf16.mxu0 %v22839_v11 }
 0x472   : > { %v5270_v50 = vpop.f32.mrb[52].mxu0 }
 0x473   : > { %v19583_v14 = vadd.f32 %v5270_v50, %v19325_v1  ;;  %v5272_v7 = vpop.f32.mrb[53].mxu0  ;;  %v23080_v1 = vld [vmem:[#allocation30_spill] sm:$0xff] }
 0x474   : > { %v5274_v25 = vpop.f32.mrb[54].mxu0  ;;  %v14408_v42 = vcombine.low %v23080_v1, %v23079_v28  ;;  %v23082_v7 = vld [vmem:[#allocation18_spill] sm:$0xff] }
 0x475   : > { %v19586_v8 = vadd.f32 %v5274_v25, %v19331_v47  ;;  %v5276_v36 = vpop.f32.mrb[55].mxu0 }
 0x476   : > { %v19589_v52 = vadd.f32 %v5276_v36, %v19334_v17  ;;  %v23083_v36 = vld [vmem:[#allocation37_spill] sm:$0xff] }
 0x477   : > { %5808 = vmatmul.mubr.bf16.gmra.mrb[136].mxu0 %v14407_v24  ;;  %v23081_v24 = vld [vmem:[#allocation35_spill] sm:$0xff] }
 0x478   : > { %5817 = vmatprep.mubr.bf16.mxu0 %v22839_v11  ;;  %v14409_v25 = vcombine.low %v23082_v7, %v23081_v24 }
 0x47a   : > { %v5280_v27 = vpop.f32.mrb[56].mxu0 }
 0x47b   : > { %v19593_v48 = vadd.f32 %v5280_v27, %v19343_v37  ;;  %v5282_v39 = vpop.f32.mrb[57].mxu0  ;;  %v23084_v27 = vld [vmem:[#allocation36_spill] sm:$0xff] }
 0x47c   : > { %v19598_v50 = vadd.f32 %v5282_v39, %v19348_v9  ;;  %v5284_v47 = vpop.f32.mrb[58].mxu0  ;;  %v14410_v28 = vcombine.low %v23084_v27, %v23083_v36 }
 0x47d   : > { %v19601_v56 = vadd.f32 %v5284_v47, %v19351_v49  ;;  %v5286_v17 = vpop.f32.mrb[59].mxu0 }
 0x47f   : > { %5818 = vmatmul.mubr.bf16.gmra.mrb[140].mxu0 %v14408_v42 }
 0x480   : > { %5827 = vmatprep.mubr.bf16.mxu0 %v22839_v11 }
 0x487   : > { %5828 = vmatmul.mubr.bf16.gmra.mrb[48].mxu0 %v14409_v25  ;;  %v23085_v25 = vld [vmem:[#allocation21_spill] sm:$0xff] }
 0x488   : > { %5837 = vmatprep.mubr.bf16.mxu0 %v22839_v11 }
 0x48a   : > { %v5300_v37 = vpop.f32.mrb[64].mxu0 }
 0x48b   : > { %v19610_v9 = vadd.f32 %v5300_v37, %v19367_v31  ;;  %v5302_v39 = vpop.f32.mrb[65].mxu0  ;;  %v23086_v31 = vld [vmem:[#allocation28_spill] sm:$0xff] }
 0x48c   : > { %v5304_v49 = vpop.f32.mrb[66].mxu0  ;;  %v14411_v37 = vcombine.low %v23086_v31, %v23085_v25  ;;  %v23088_v39 = vld [vmem:[#allocation38_spill] sm:$0xff] }
 0x48d   : > { %v19613_v1 = vadd.f32 %v5304_v49, %v19373_v63  ;;  %v5306_v42 = vpop.f32.mrb[67].mxu0 }
 0x48e   : > { %v19616_v47 = vadd.f32 %v5306_v42, %v19376_v16  ;;  %v23089_v42 = vld [vmem:[#allocation83_spill] sm:$0xff] }
 0x48f   : > { %5838 = vmatmul.mubr.bf16.gmra.mrb[144].mxu0 %v14410_v28  ;;  %v23087_v28 = vld [vmem:[#allocation39_spill] sm:$0xff] }
 0x490   : > { %5847 = vmatprep.mubr.bf16.mxu0 %v22839_v11  ;;  %v14412_v49 = vcombine.low %v23088_v39, %v23087_v28  ;;  %v23090_v28 = vld [vmem:[#allocation85_spill] sm:$0xff] }
 0x492   : > { %v5310_v17 = vpop.f32.mrb[68].mxu0 }
 0x493   : > { %v19620_v24 = vadd.f32 %v5310_v17, %v19385_v40  ;;  %v5312_v7 = vpop.f32.mrb[69].mxu0  ;;  %v14413_v17 = vcombine.low %v23089_v42, %v19379_v3 }
 0x494   : > { %v19625_v36 = vadd.f32 %v5312_v7, %v19390_v62  ;;  %v5314_v63 = vpop.f32.mrb[70].mxu0 }
 0x495   : > { %v19628_v27 = vadd.f32 %v5314_v63, %v19393_v57  ;;  %v5316_v16 = vpop.f32.mrb[71].mxu0 }
 0x497   : > { %5848 = vmatmul.mubr.bf16.gmra.mrb[148].mxu0 %v14411_v37 }
 0x498   : > { %5857 = vmatprep.mubr.bf16.mxu0 %v22839_v11 }
 0x49f   : > { %5858 = vmatmul.mubr.bf16.gmra.mrb[60].mxu0 %v14412_v49 }
 0x4a0   : > { %5867 = vmatprep.mubr.bf16.mxu0 %v22839_v11 }
 0x4a2   : > { %v5330_v40 = vpop.f32.mrb[72].mxu0 }
 0x4a3   : > { %v19637_v62 = vadd.f32 %v5330_v40, %v19409_v33  ;;  %v5332_v7 = vpop.f32.mrb[73].mxu0  ;;  %v23091_v33 = vld [vmem:[#allocation84_spill] sm:$0xff]  ;;  %v23092_v40 = vld [vmem:[#allocation91_spill] sm:$0xff] }
 0x4a4   : > { %v5334_v57 = vpop.f32.mrb[74].mxu0  ;;  %v14414_v39 = vcombine.low %v23091_v33, %v23090_v28  ;;  %v23094_v7 = vld [vmem:[#allocation86_spill] sm:$0xff] }
 0x4a5   : > { %v19640_v25 = vadd.f32 %v5334_v57, %v19415_v59  ;;  %v5336_v31 = vpop.f32.mrb[75].mxu0 }
 0x4a6   : > { %v19643_v37 = vadd.f32 %v5336_v31, %v19418_v45  ;;  %v23095_v31 = vld [vmem:[#allocation89_spill] sm:$0xff] }
 0x4a7   : > { %5868 = vmatmul.mubr.bf16.gmra.mrb[152].mxu0 %v14413_v17  ;;  %v23093_v17 = vld [vmem:[#allocation87_spill] sm:$0xff] }
 0x4a8   : > { %5877 = vmatprep.mubr.bf16.mxu0 %v22839_v11  ;;  %v14415_v57 = vcombine.low %v23094_v7, %v23093_v17 }
 0x4aa   : > { %v5340_v63 = vpop.f32.mrb[76].mxu0 }
 0x4ab   : > { %v19647_v16 = vadd.f32 %v5340_v63, %v19426_v26  ;;  %v5342_v3 = vpop.f32.mrb[77].mxu0  ;;  %v23096_v63 = vld [vmem:[#allocation88_spill] sm:$0xff] }
 0x4ac   : > { %v19652_v49 = vadd.f32 %v5342_v3, %v19430_v18  ;;  %v5344_v59 = vpop.f32.mrb[78].mxu0  ;;  %v14416_v28 = vcombine.low %v23096_v63, %v23095_v31  ;;  %v23098_v63 = vld [vmem:[#allocation92_spill] sm:$0xff] }
 0x4ad   : > { %v19655_v42 = vadd.f32 %v5344_v59, %v23092_v40  ;;  %v5346_v45 = vpop.f32.mrb[79].mxu0 }
 0x4af   : > { %5878 = vmatmul.mubr.bf16.gmra.mrb[156].mxu0 %v14414_v39 }
 0x4b0   : > { %5887 = vmatprep.mubr.bf16.mxu0 %v22839_v11 }
 0x4b7   : > { %5888 = vmatmul.mubr.bf16.gmra.mrb[120].mxu0 %v14415_v57 }
 0x4b8   : > { %5897 = vmatprep.mubr.bf16.mxu0 %v22839_v11 }
 0x4ba   : > { %v5360_v26 = vpop.f32.mrb[80].mxu0 }
 0x4bb   : > { %v19664_v18 = vadd.f32 %v5360_v26, %v19449_v29  ;;  %v5362_v3 = vpop.f32.mrb[81].mxu0  ;;  %v23097_v29 = vld [vmem:[#allocation90_spill] sm:$0xff] }
 0x4bc   : > { %v5364_v33 = vpop.f32.mrb[82].mxu0  ;;  %v14417_v57 = vcombine.low %v23097_v29, %v19438_v2  ;;  %v17246_v29 = vld [vmem:[#allocation2 + $0x24] sm:$0xff]  }
 0x4bd   : > { %v19667_v59 = vadd.f32 %v5364_v33, %v19455_v30  ;;  %v5366_v39 = vpop.f32.mrb[83].mxu0  ;;  %v17245_v33 = vld [vmem:[#allocation2 + $0x1c] sm:$0xff]  }
 0x4be   : > { %v19670_v40 = vadd.f32 %v5366_v39, %v19458_v51 }
 0x4bf   : > { %5898 = vmatmul.mubr.bf16.gmra.mrb[160].mxu0 %v14416_v28  ;;  %v14418_v28 = vcombine.low %v23098_v63, %v19446_v55 }
 0x4c0   : > { %5907 = vmatprep.mubr.bf16.mxu0 %v22839_v11 }
 0x4c2   : > { %v5370_v45 = vpop.f32.mrb[84].mxu0 }
 0x4c3   : > { %v19674_v17 = vadd.f32 %v5370_v45, %v19464_v0  ;;  %v5372_v7 = vpop.f32.mrb[85].mxu0 }
 0x4c4   : > { %v19679_v26 = vadd.f32 %v5372_v7, %v19468_v46  ;;  %v5374_v30 = vpop.f32.mrb[86].mxu0  ;;  %v23099_v7 = vld [vmem:[#allocation66_spill] sm:$0xff] }
 0x4c5   : > { %v19682_v31 = vadd.f32 %v5374_v30, %v19473_v12  ;;  %v5376_v51 = vpop.f32.mrb[87].mxu0  ;;  %v23100_v55 = vcombine.low %v23099_v7, %v19265_v43  ;;  %v14420_v30 = vcombine.low %v19461_v53, %v19461_v53  ;;  %v6232_v43 = vshll.u32 %v17246_v29, 16  ;;  %v17247_v7 = vld [vmem:[#allocation2 + $0x2c] sm:$0xff]  }
 0x4c7   : > { %5908 = vmatmul.mubr.bf16.gmra.mrb[164].mxu0 %v14417_v57  ;;  %v6227_v57 = vshll.u32 %v17245_v33, 16  ;;  %v6234_v53 = vrot.slane %v6232_v43, 1 }
 0x4c8   : > { %5917 = vmatprep.mubr.bf16.mxu0 %v22839_v11 }
 0x4cf   : > { %5918 = vmatmul.mubr.bf16.gmra.mrb[132].mxu0 %v14418_v28  ;;  %v6225_v28 = vshrl.u32 %v17245_v33, 16 }
 0x4d0   : > { %5927 = vmatprep.mubr.bf16.mxu0 %v22839_v11 }
 0x4d2   : > { %v5390_v0 = vpop.f32.mrb[88].mxu0 }
 0x4d3   : > { %v19689_v2 = vadd.f32 %v5390_v0, %v19479_v20  ;;  %v5392_v46 = vpop.f32.mrb[89].mxu0  ;;  %v6229_v0 = vrot.slane %v6227_v57, 1  ;;  %v17248_v57 = vld [vmem:[#allocation2 + $0x34] sm:$0xff]  }
 0x4d4   : > { %v5394_v3 = vpop.f32.mrb[90].mxu0  ;;  %v6248_v43 = vshll.u32 %v17248_v57, 16 }
 0x4d5   : > { %v19692_v12 = vadd.f32 %v5394_v3, %v19483_v34  ;;  %v5396_v39 = vpop.f32.mrb[91].mxu0 }
 0x4d6   : > { %v19695_v45 = vadd.f32 %v5396_v39, %v19486_v60  ;;  %v6230_v39 = vor.u32 %v6229_v0, %v6225_v28  ;;  %v6244_v0 = vshrl.u32 %v17247_v7, 16 }
 0x4d7   : > { %5928 = vmatmul.mubr.bf16.gmra.mrb[168].mxu0 %v23100_v55  ;;  %v6236_v55 = vshrl.u32 %v17246_v29, 16 }
 0x4d8   : > { %5937 = vmatprep.mubr.bf16.mxu0 %v22839_v11 }
 0x4da   : > { %v5400_v20 = vpop.f32.mrb[92].mxu0 }
 0x4db   : > { %v19704_v51 = vadd.f32 %v5400_v20, %v19490_v15  ;;  %v5402_v34 = vpop.f32.mrb[93].mxu0  ;;  %v6235_v15 = vsel %vm22746_vm0, %v6230_v39, %v6234_v53  ;;  %v6240_v20 = vshll.u32 %v17247_v7, 16 }
 0x4dc   : > { %v19707_v63 = vadd.f32 %v5402_v34, %v19493_v21  ;;  %v5404_v60 = vpop.f32.mrb[94].mxu0  ;;  %v6238_v21 = vor.u32 %v6236_v55, %v6234_v53 }
 0x4dd   : > { %v19710_v46 = vadd.f32 %v5404_v60, %v19496_v19  ;;  %v5406_v3 = vpop.f32.mrb[95].mxu0  ;;  %v6242_v33 = vrot.slane %v6240_v20, 1 }
 0x4df   : > { %5938 = vmatmul.mubr.bf16.gmra.mrb[172].mxu0 %v14420_v30  ;;  %v6243_v28 = vsel %vm22746_vm0, %v6238_v21, %v6242_v33  ;;  %v6246_v53 = vor.u32 %v6244_v0, %v6242_v33  ;;  %v17250_v0 = vld [vmem:[#allocation2 + $0x44] sm:$0xff]  }
 0x4e0   : > { %6551 = vmatprep.mubr.bf16.mxu0 %v22839_v11 }
 0x4e7   : > { %6552 = vmatmul.mubr.bf16.vlgmr.msra.gmra.mrb[0].mxu0 %v6235_v15  ;;  %v6250_v15 = vrot.slane %v6248_v43, 1 }
 0x4e8   : > { %6561 = vmatprep.mubr.bf16.mxu0 %v22839_v11 }
 0x4ea   : > { %v5420_v34 = vpop.f32.mrb[96].mxu0 }
 0x4eb   : > { %v19716_v19 = vadd.f32 %v5420_v34, %v19505_v22  ;;  %v5422_v30 = vpop.f32.mrb[97].mxu0  ;;  %v17249_v22 = vld [vmem:[#allocation2 + $0x3c] sm:$0xff]   ;;  %v6251_v34 = vsel %vm22746_vm0, %v6246_v53, %v6250_v15 }
 0x4ec   : > { %v5424_v60 = vpop.f32.mrb[98].mxu0  ;;  %v6252_v30 = vshrl.u32 %v17248_v57, 16 }
 0x4ed   : > { %v19720_v3 = vadd.f32 %v5424_v60, %v19508_v6  ;;  %v5426_v29 = vpop.f32.mrb[99].mxu0 }
 0x4ee   : > { %v19723_v39 = vadd.f32 %v5426_v29, %v19511_v41  ;;  %v6256_v41 = vshll.u32 %v17249_v22, 16  ;;  %v6254_v33 = vor.u32 %v6252_v30, %v6250_v15  ;;  %v6264_v29 = vshll.u32 %v17250_v0, 16 }
 0x4ef   : > { %6562 = vmatmul.mubr.bf16.gmra.mrb[176].mxu0 %v6243_v28  ;;  %v6268_v30 = vshrl.u32 %v17250_v0, 16 }
 0x4f0   : > { %6571 = vmatprep.mubr.bf16.mxu0 %v22839_v11  ;;  %v6258_v28 = vrot.slane %v6256_v41, 1 }
 0x4f2   : > { %v5430_v55 = vpop.f32.mrb[100].mxu0  ;;  %v6259_v43 = vsel %vm22746_vm0, %v6254_v33, %v6258_v28 }
 0x4f3   : > { %v19727_v20 = vadd.f32 %v5430_v55, %v19515_v4  ;;  %v5432_v21 = vpop.f32.mrb[101].mxu0  ;;  %v6260_v4 = vshrl.u32 %v17249_v22, 16 }
 0x4f4   : > { %v19730_v7 = vadd.f32 %v5432_v21, %v19520_v23  ;;  %v5434_v6 = vpop.f32.mrb[102].mxu0  ;;  %v6266_v23 = vrot.slane %v6264_v29, 1  ;;  %v17251_v21 = vld [vmem:[#allocation2 + $0x4c] sm:$0xff]  }
 0x4f5   : > { %v5435_v60 = vpop.f32.mrb[103].mxu0  ;;  %v6262_v55 = vor.u32 %v6260_v4, %v6258_v28  ;;  %v6272_v41 = vshll.u32 %v17251_v21, 16 }
 0x4f6   : > { %v6270_v28 = vor.u32 %v6268_v30, %v6266_v23 }
 0x4f7   : > { %6572 = vmatmul.mubr.bf16.gmra.mrb[180].mxu0 %v6251_v34  ;;  %v6267_v15 = vsel %vm22746_vm0, %v6262_v55, %v6266_v23 }
 0x4f8   : > { %6581 = vmatprep.mubr.bf16.mxu0 %v22839_v11 }
 0x4ff   : > { %6582 = vmatmul.mubr.bf16.gmra.mrb[12].mxu0 %v6259_v43  ;;  %v6274_v43 = vrot.slane %v6272_v41, 1 }
 0x500   : > { %6591 = vmatprep.mubr.bf16.mxu0 %v22839_v11 }
 0x502   : > { %v5719_v53 = vpop.f32.mrb[104].mxu0 }
 0x503   : > { %v19737_v57 = vadd.f32 %v5719_v53, %v19529_v13  ;;  %v5721_v6 = vpop.f32.mrb[105].mxu0  ;;  %v17252_v13 = vld [vmem:[#allocation2 + $0x54] sm:$0xff]   ;;  %v6275_v53 = vsel %vm22746_vm0, %v6270_v28, %v6274_v43  ;;  %v17254_v28 = vld [vmem:[#allocation2 + $0x64] sm:$0xff]  }
 0x504   : > { %v5723_v34 = vpop.f32.mrb[106].mxu0  ;;  %v6276_v6 = vshrl.u32 %v17251_v21, 16 }
 0x505   : > { %v19741_v60 = vadd.f32 %v5723_v34, %v19532_v44  ;;  %v5725_v22 = vpop.f32.mrb[107].mxu0  ;;  %v23102_v34 = vld [vmem:[#allocation47_spill] sm:$0xff] }
 0x506   : > { %v19744_v33 = vadd.f32 %v5725_v22, %v19535_v32  ;;  %v6280_v32 = vshll.u32 %v17252_v13, 16  ;;  %v6278_v23 = vor.u32 %v6276_v6, %v6274_v43 }
 0x507   : > { %6592 = vmatmul.mubr.bf16.gmra.mrb[184].mxu0 %v6267_v15 }
 0x508   : > { %6601 = vmatprep.mubr.bf16.mxu0 %v22839_v11  ;;  %v6282_v30 = vrot.slane %v6280_v32, 1  ;;  %v6296_v32 = vshll.u32 %v17254_v28, 16 }
 0x50a   : > { %v5729_v4 = vpop.f32.mrb[108].mxu0  ;;  %v6283_v41 = vsel %vm22746_vm0, %v6278_v23, %v6282_v30  ;;  %v23104_v23 = vld [vmem:[#allocation53_spill] sm:$0xff] }
 0x50b   : > { %v19748_v29 = vadd.f32 %v5729_v4, %v19539_v35  ;;  %v5731_v55 = vpop.f32.mrb[109].mxu0  ;;  %v17253_v35 = vld [vmem:[#allocation2 + $0x5c] sm:$0xff]   ;;  %v6284_v4 = vshrl.u32 %v17252_v13, 16 }
 0x50c   : > { %v19751_v0 = vadd.f32 %v5731_v55, %v19544_v54  ;;  %v5733_v44 = vpop.f32.mrb[110].mxu0  ;;  %v6288_v54 = vshll.u32 %v17253_v35, 16  ;;  %v6292_v6 = vshrl.u32 %v17253_v35, 16 }
 0x50d   : > { %v19755_v15 = vadd.f32 %v5733_v44, %v23102_v34  ;;  %v5735_v22 = vpop.f32.mrb[111].mxu0  ;;  %v6286_v55 = vor.u32 %v6284_v4, %v6282_v30  ;;  %v6298_v4 = vrot.slane %v6296_v32, 1 }
 0x50e   : > { %23101 = vst [vmem:[#allocation54_spill] sm:$0xff] %v19751_v0  ;;  %v6290_v21 = vrot.slane %v6288_v54, 1 }
 0x50f   : > { %6602 = vmatmul.mubr.bf16.gmra.mrb[188].mxu0 %v6275_v53 }
 0x510   : > { %6611 = vmatprep.mubr.bf16.mxu0 %v22839_v11  ;;  %v6291_v43 = vsel %vm22746_vm0, %v6286_v55, %v6290_v21 }
 0x517   : > { %6612 = vmatmul.mubr.bf16.gmra.mrb[24].mxu0 %v6283_v41  ;;  %v6294_v41 = vor.u32 %v6292_v6, %v6290_v21 }
 0x518   : > { %6621 = vmatprep.mubr.bf16.mxu0 %v22839_v11 }
 0x51a   : > { %v5749_v0 = vpop.f32.mrb[112].mxu0 }
 0x51b   : > { %v19761_v44 = vadd.f32 %v5749_v0, %v19556_v5  ;;  %v5751_v53 = vpop.f32.mrb[113].mxu0  ;;  %v17255_v5 = vld [vmem:[#allocation2 + $0x6c] sm:$0xff]  }
 0x51c   : > { %v5753_v34 = vpop.f32.mrb[114].mxu0  ;;  %v6299_v53 = vsel %vm22746_vm0, %v6294_v41, %v6298_v4  ;;  %v17257_v41 = vld [vmem:[#allocation2 + $0x7c] sm:$0xff]  }
 0x51d   : > { %v19765_v22 = vadd.f32 %v5753_v34, %v19559_v10  ;;  %v5755_v13 = vpop.f32.mrb[115].mxu0  ;;  %v6300_v34 = vshrl.u32 %v17254_v28, 16 }
 0x51e   : > { %v19768_v30 = vadd.f32 %v5755_v13, %v23104_v23  ;;  %v6304_v13 = vshll.u32 %v17255_v5, 16 }
 0x51f   : > { %23103 = vst [vmem:[#allocation49_spill] sm:$0xff] %v19765_v22  ;;  %6622 = vmatmul.mubr.bf16.gmra.mrb[192].mxu0 %v6291_v43  ;;  %v6302_v21 = vor.u32 %v6300_v34, %v6298_v4 }
 0x520   : > { %23105 = vst [vmem:[#allocation48_spill] sm:$0xff] %v19768_v30  ;;  %6631 = vmatprep.mubr.bf16.mxu0 %v22839_v11  ;;  %v6306_v6 = vrot.slane %v6304_v13, 1 }
 0x522   : > { %v5759_v0 = vpop.f32.mrb[116].mxu0  ;;  %v6307_v32 = vsel %vm22746_vm0, %v6302_v21, %v6306_v6 }
 0x523   : > { %v19772_v54 = vadd.f32 %v5759_v0, %v19566_v58  ;;  %v5761_v55 = vpop.f32.mrb[117].mxu0  ;;  %v17256_v58 = vld [vmem:[#allocation2 + $0x74] sm:$0xff]   ;;  %v6308_v0 = vshrl.u32 %v17255_v5, 16 }
 0x524   : > { %v19775_v35 = vadd.f32 %v5761_v55, %v19571_v38  ;;  %v5763_v10 = vpop.f32.mrb[118].mxu0  ;;  %v6312_v38 = vshll.u32 %v17256_v58, 16  ;;  %v17269_v55 = vld [vmem:[#allocation8 + $0x40] sm:$0xff]   ;;  %v6316_v5 = vshrl.u32 %v17256_v58, 16  ;;  %v17272_v58 = vld [vmem:[#allocation8 + $0x58] sm:$0xff]  }
 0x525   : > { %23106 = vst [vmem:[#allocation51_spill] sm:$0xff] %v19772_v54  ;;  %v19779_v43 = vadd.f32 %v5763_v10, %v19574_v61  ;;  %v5765_v23 = vpop.f32.mrb[119].mxu0  ;;  %15453 = vmatprep.subr.bf16.mxu1 %v17269_v55  ;;  %v17270_v10 = vld [vmem:[#allocation8 + $0x48] sm:$0xff]  }
 0x526   : > { %23107 = vst [vmem:[#allocation50_spill] sm:$0xff] %v19775_v35  ;;  %v6310_v35 = vor.u32 %v6308_v0, %v6306_v6  ;;  %v6314_v28 = vrot.slane %v6312_v38, 1  ;;  %15454 = vmatpush3.bf16.msra.mxu1 %v17269_v55  ;;  %v6320_v23 = vshll.u32 %v17257_v41, 16  ;;  %v17258_v55 = vld [vmem:[#allocation2 + $0x84] sm:$0xff]  }
 0x527   : > { %23108 = vst [vmem:[#allocation52_spill] sm:$0xff] %v19779_v43  ;;  %6632 = vmatmul.mubr.bf16.gmra.mrb[196].mxu0 %v6299_v53  ;;  %15455 = vmatprep.subr.bf16.mxu1 %v17270_v10 }
 0x528   : > { %6641 = vmatprep.mubr.bf16.mxu0 %v22839_v11  ;;  %v6315_v13 = vsel %vm22746_vm0, %v6310_v35, %v6314_v28  ;;  %v6322_v38 = vrot.slane %v6320_v23, 1  ;;  %v17273_v23 = vld [vmem:[#allocation8 + $0x60] sm:$0xff]  }
 0x52a   : > { %15456 = vmatpush3.bf16.msra.mxu1 %v17270_v10 }
 0x52f   : > { %6642 = vmatmul.mubr.bf16.gmra.mrb[36].mxu0 %v6307_v32  ;;  %v17271_v32 = vld [vmem:[#allocation8 + $0x50] sm:$0xff]  }
 0x530   : > { %6651 = vmatprep.mubr.bf16.mxu0 %v22839_v11  ;;  %15457 = vmatprep.subr.bf16.mxu1 %v17271_v32 }
 0x531   : > { %15458 = vmatpush3.bf16.msra.mxu1 %v17271_v32  ;;  %v17259_v32 = vld [vmem:[#allocation2 + $0x8c] sm:$0xff]  }
 0x532   : > { %v5779_v61 = vpop.f32.mrb[124].mxu0  ;;  %15459 = vmatprep.subr.bf16.mxu1 %v17272_v58 }
 0x533   : > { %v19785_v53 = vadd.f32 %v5779_v61, %v19583_v14  ;;  %v5781_v4 = vpop.f32.mrb[125].mxu0  ;;  %v6318_v14 = vor.u32 %v6316_v5, %v6314_v28 }
 0x534   : > { %v5783_v34 = vpop.f32.mrb[126].mxu0 }
 0x535   : > { %23109 = vst [vmem:[#allocation60_spill] sm:$0xff] %v19785_v53  ;;  %v19789_v21 = vadd.f32 %v5783_v34, %v19586_v8  ;;  %v5785_v6 = vpop.f32.mrb[127].mxu0  ;;  %v6324_v34 = vshrl.u32 %v17257_v41, 16  ;;  %15460 = vmatpush3.bf16.msra.mxu1 %v17272_v58  ;;  %v6332_v41 = vshrl.u32 %v17258_v55, 16 }
 0x536   : > { %v19792_v0 = vadd.f32 %v5785_v6, %v19589_v52  ;;  %v6323_v52 = vsel %vm22746_vm0, %v6318_v14, %v6322_v38  ;;  %15461 = vmatprep.subr.bf16.mxu1 %v17273_v23 }
 0x537   : > { %23110 = vst [vmem:[#allocation63_spill] sm:$0xff] %v19789_v21  ;;  %6652 = vmatmul.mubr.bf16.gmra.mrb[200].mxu0 %v6315_v13  ;;  %v6328_v13 = vshll.u32 %v17258_v55, 16 }
 0x538   : > { %23111 = vst [vmem:[#allocation56_spill] sm:$0xff] %v19792_v0  ;;  %6661 = vmatprep.mubr.bf16.mxu0 %v22839_v11 }
 0x539   : > { %v6330_v6 = vrot.slane %v6328_v13, 1  ;;  %15462 = vmatpush3.bf16.msra.mxu1 %v17273_v23 }
 0x53a   : > { %v5789_v35 = vpop.f32.mrb[128].mxu0 }
 0x53b   : > { %v19796_v61 = vadd.f32 %v5789_v35, %v19593_v48  ;;  %v5791_v8 = vpop.f32.mrb[129].mxu0  ;;  %v6326_v48 = vor.u32 %v6324_v34, %v6322_v38  ;;  %v6336_v35 = vshll.u32 %v17259_v32, 16 }
 0x53c   : > { %v19799_v10 = vadd.f32 %v5791_v8, %v19598_v50  ;;  %v5793_v4 = vpop.f32.mrb[130].mxu0  ;;  %v17274_v50 = vld [vmem:[#allocation8 + $0x68] sm:$0xff]   ;;  %v6334_v8 = vor.u32 %v6332_v41, %v6330_v6 }
 0x53d   : > { %23112 = vst [vmem:[#allocation55_spill] sm:$0xff] %v19796_v61  ;;  %v19803_v28 = vadd.f32 %v5793_v4, %v19601_v56  ;;  %v5795_v5 = vpop.f32.mrb[131].mxu0  ;;  %v6331_v14 = vsel %vm22746_vm0, %v6326_v48, %v6330_v6  ;;  %15463 = vmatprep.subr.bf16.mxu1 %v17274_v50  ;;  %v17275_v56 = vld [vmem:[#allocation8 + $0x70] sm:$0xff]   ;;  %v6338_v58 = vrot.slane %v6336_v35, 1  ;;  %v17260_v4 = vld [vmem:[#allocation2 + $0x94] sm:$0xff]  }
 0x53e   : > { %23113 = vst [vmem:[#allocation64_spill] sm:$0xff] %v19799_v10  ;;  %15464 = vmatpush3.bf16.msra.mxu1 %v17274_v50  ;;  %v6340_v5 = vshrl.u32 %v17259_v32, 16  ;;  %v6344_v48 = vshll.u32 %v17260_v4, 16  ;;  %v19812_v50 = vld [vmem:[#allocation2 + $0x4] sm:$0xf] }
 0x53f   : > { %23114 = vst [vmem:[#allocation65_spill] sm:$0xff] %v19803_v28  ;;  %6662 = vmatmul.mubr.bf16.gmra.mrb[204].mxu0 %v6323_v52  ;;  %15465 = vmatprep.subr.bf16.mxu1 %v17275_v56  ;;  %v17276_v52 = vld [vmem:[#allocation8 + $0x78] sm:$0xff]   ;;  %v6339_v23 = vsel %vm22746_vm0, %v6334_v8, %v6338_v58  ;;  %v19814_v6 = vld [vmem:[#allocation2 + $0x8] sm:$0xf]  ;;  %v17261_v8 = vld [vmem:[#allocation2 + $0x9c] sm:$0xff]  }
 0x540   : > { %6671 = vmatprep.mubr.bf16.mxu0 %v22839_v11  ;;  %v6342_v32 = vor.u32 %v6340_v5, %v6338_v58  ;;  %v8209_v28 = vld [vmem:[#allocation2] sm:$0x8] }
 0x542   : > { %15466 = vmatpush3.bf16.msra.mxu1 %v17275_v56  ;;  %v6346_v56 = vrot.slane %v6344_v48, 1 }
 0x543   : > { %15467 = vmatprep.subr.bf16.mxu1 %v17276_v52 }
 0x546   : > { %15468 = vmatpush3.bf16.msra.mxu1 %v17276_v52 }
 0x547   : > { %6672 = vmatmul.mubr.bf16.gmra.mrb[48].mxu0 %v6331_v14 }
 0x548   : > { %6681 = vmatprep.mubr.bf16.mxu0 %v22839_v11 }
 0x54a   : > { %v5809_v38 = vpop.f32.mrb[136].mxu0 }
 0x54b   : > { %v19809_v34 = vadd.f32 %v5809_v38, %v19610_v9  ;;  %v5811_v13 = vpop.f32.mrb[137].mxu0  ;;  %v14525_v9 = vcombine.low %v19812_v50, %v19814_v6 }
 0x54c   : > { %v5813_v55 = vpop.f32.mrb[138].mxu0 }
 0x54d   : > { %23115 = vst [vmem:[#allocation58_spill] sm:$0xff] %v19809_v34  ;;  %v19817_v14 = vadd.f32 %v5813_v55, %v19613_v1  ;;  %v5815_v41 = vpop.f32.mrb[139].mxu0  ;;  %15469 = vmatprep.mubr.bf16.mxu1 %v14525_v9  ;;  %v6347_v55 = vsel %vm22746_vm0, %v6342_v32, %v6346_v56  ;;  %v17263_v32 = vld [vmem:[#allocation2 + $0xac] sm:$0xff]  }
 0x54e   : > { %v19820_v35 = vadd.f32 %v5815_v41, %v19616_v47  ;;  %v6348_v41 = vshrl.u32 %v17260_v4, 16 }
 0x54f   : > { %23116 = vst [vmem:[#allocation57_spill] sm:$0xff] %v19817_v14  ;;  %6682 = vmatmul.mubr.bf16.gmra.mrb[208].mxu0 %v6339_v23 }
 0x550   : > { %23117 = vst [vmem:[#allocation61_spill] sm:$0xff] %v19820_v35  ;;  %6691 = vmatprep.mubr.bf16.mxu0 %v22839_v11  ;;  %v6352_v35 = vshll.u32 %v17261_v8, 16  ;;  %v6350_v5 = vor.u32 %v6348_v41, %v6346_v56  ;;  %v6368_v41 = vshll.u32 %v17263_v32, 16 }
 0x552   : > { %v5819_v38 = vpop.f32.mrb[140].mxu0  ;;  %v6354_v48 = vrot.slane %v6352_v35, 1 }
 0x553   : > { %v19826_v13 = vadd.f32 %v5819_v38, %v19620_v24  ;;  %v5821_v1 = vpop.f32.mrb[141].mxu0  ;;  %v17262_v24 = vld [vmem:[#allocation2 + $0xa4] sm:$0xff]   ;;  %v6356_v38 = vshrl.u32 %v17261_v8, 16 }
 0x554   : > { %v19829_v52 = vadd.f32 %v5821_v1, %v19625_v36  ;;  %v5823_v47 = vpop.f32.mrb[142].mxu0  ;;  %v6355_v9 = vsel %vm22746_vm0, %v6350_v5, %v6354_v48  ;;  %v6360_v36 = vshll.u32 %v17262_v24, 16  ;;  %v6364_v35 = vshrl.u32 %v17262_v24, 16 }
 0x555   : > { %23118 = vst [vmem:[#allocation59_spill] sm:$0xff] %v19826_v13  ;;  %v19833_v23 = vadd.f32 %v5823_v47, %v19628_v27  ;;  %v5825_v58 = vpop.f32.mrb[143].mxu0  ;;  %v6358_v1 = vor.u32 %v6356_v38, %v6354_v48 }
 0x556   : > { %23119 = vst [vmem:[#allocation25_spill] sm:$0xff] %v19829_v52  ;;  %v6362_v4 = vrot.slane %v6360_v36, 1 }
 0x557   : > { %23120 = vst [vmem:[#allocation26_spill] sm:$0xff] %v19833_v23  ;;  %6692 = vmatmul.mubr.bf16.gmra.mrb[212].mxu0 %v6347_v55 }
 0x558   : > { %6701 = vmatprep.mubr.bf16.mxu0 %v22839_v11  ;;  %v6363_v56 = vsel %vm22746_vm0, %v6358_v1, %v6362_v4  ;;  %v6366_v48 = vor.u32 %v6364_v35, %v6362_v4 }
 0x55f   : > { %6702 = vmatmul.mubr.bf16.gmra.mrb[60].mxu0 %v6355_v9  ;;  %v6370_v9 = vrot.slane %v6368_v41, 1 }
 0x560   : > { %6711 = vmatprep.mubr.bf16.mxu0 %v22839_v11 }
 0x561   : > { %v6371_v1 = vsel %vm22746_vm0, %v6366_v48, %v6370_v9  ;;  %v17266_v48 = vld [vmem:[#allocation2 + $0xc4] sm:$0xff]  }
 0x562   : > { %v5839_v52 = vpop.f32.mrb[144].mxu0 }
 0x563   : > { %v19839_v27 = vadd.f32 %v5839_v52, %v19637_v62  ;;  %v5841_v47 = vpop.f32.mrb[145].mxu0  ;;  %v17264_v62 = vld [vmem:[#allocation2 + $0xb4] sm:$0xff]  }
 0x564   : > { %v5843_v55 = vpop.f32.mrb[146].mxu0  ;;  %v6372_v47 = vshrl.u32 %v17263_v32, 16 }
 0x565   : > { %23121 = vst [vmem:[#allocation27_spill] sm:$0xff] %v19839_v27  ;;  %v19843_v58 = vadd.f32 %v5843_v55, %v19640_v25  ;;  %v5845_v8 = vpop.f32.mrb[147].mxu0 }
 0x566   : > { %v19846_v5 = vadd.f32 %v5845_v8, %v19643_v37  ;;  %v6376_v37 = vshll.u32 %v17264_v62, 16  ;;  %v6374_v4 = vor.u32 %v6372_v47, %v6370_v9  ;;  %v6380_v8 = vshrl.u32 %v17264_v62, 16 }
 0x567   : > { %23122 = vst [vmem:[#allocation34_spill] sm:$0xff] %v19843_v58  ;;  %6712 = vmatmul.mubr.bf16.gmra.mrb[216].mxu0 %v6363_v56 }
 0x568   : > { %23123 = vst [vmem:[#allocation67_spill] sm:$0xff] %v19846_v5  ;;  %6721 = vmatprep.mubr.bf16.mxu0 %v22839_v11  ;;  %v6378_v35 = vrot.slane %v6376_v37, 1  ;;  %v6392_v37 = vshll.u32 %v17266_v48, 16  ;;  %v20069_v5 = vld [vmem:[#allocation8] sm:$0xff]  }
 0x569   : > { %15517 = vmatprep.subr.bf16.mxu1 %v20069_v5 }
 0x56a   : > { %v5849_v52 = vpop.f32.mrb[148].mxu0  ;;  %v6379_v41 = vsel %vm22746_vm0, %v6374_v4, %v6378_v35 }
 0x56b   : > { %v19850_v38 = vadd.f32 %v5849_v52, %v19647_v16  ;;  %v5851_v36 = vpop.f32.mrb[149].mxu0  ;;  %v17265_v16 = vld [vmem:[#allocation2 + $0xbc] sm:$0xff]   ;;  %v6382_v52 = vor.u32 %v6380_v8, %v6378_v35  ;;  %v6394_v8 = vrot.slane %v6392_v37, 1 }
 0x56c   : > { %v19853_v24 = vadd.f32 %v5851_v36, %v19652_v49  ;;  %v5853_v25 = vpop.f32.mrb[150].mxu0  ;;  %v6384_v49 = vshll.u32 %v17265_v16, 16  ;;  %v6388_v47 = vshrl.u32 %v17265_v16, 16 }
 0x56d   : > { %23124 = vst [vmem:[#allocation62_spill] sm:$0xff] %v19850_v38  ;;  %v19857_v55 = vadd.f32 %v5853_v25, %v19655_v42  ;;  %v5855_v56 = vpop.f32.mrb[151].mxu0 }
 0x56e   : > { %23125 = vst [vmem:[#allocation69_spill] sm:$0xff] %v19853_v24  ;;  %v6386_v32 = vrot.slane %v6384_v49, 1  ;;  %v6985_v56 = vlaneseq }
 0x56f   : > { %23126 = vst [vmem:[#allocation68_spill] sm:$0xff] %v19857_v55  ;;  %6722 = vmatmul.mubr.bf16.gmra.mrb[220].mxu0 %v6371_v1 }
 0x570   : > { %6731 = vmatprep.mubr.bf16.mxu0 %v22839_v11  ;;  %v6387_v9 = vsel %vm22746_vm0, %v6382_v52, %v6386_v32  ;;  %v19873_v49 = vshrl.u32 %v6985_v56, 7 }
 0x572   : > { %v6988_v56 = vadd.s32 16, %v19873_v49 }
 0x577   : > { %6732 = vmatmul.mubr.bf16.gmra.mrb[120].mxu0 %v6379_v41  ;;  %v17267_v41 = vld [vmem:[#allocation2 + $0xcc] sm:$0xff]  }
 0x578   : > { %6741 = vmatprep.mubr.bf16.mxu0 %v22839_v11 }
 0x57a   : > { %v5869_v36 = vpop.f32.mrb[152].mxu0 }
 0x57b   : > { %v19863_v42 = vadd.f32 %v5869_v36, %v19664_v18  ;;  %v5871_v25 = vpop.f32.mrb[153].mxu0  ;;  %v6390_v18 = vor.u32 %v6388_v47, %v6386_v32 }
 0x57c   : > { %v5873_v1 = vpop.f32.mrb[154].mxu0  ;;  %v6396_v25 = vshrl.u32 %v17266_v48, 16 }
 0x57d   : > { %23127 = vst [vmem:[#allocation24_spill] sm:$0xff] %v19863_v42  ;;  %v19867_v62 = vadd.f32 %v5873_v1, %v19667_v59  ;;  %v5875_v4 = vpop.f32.mrb[155].mxu0  ;;  %v6400_v59 = vshll.u32 %v17267_v41, 16 }
 0x57e   : > { %v19870_v35 = vadd.f32 %v5875_v4, %v19670_v40  ;;  %v6398_v37 = vor.u32 %v6396_v25, %v6394_v8  ;;  %v19904_v25 = vadd.s32 32, %v19873_v49 }
 0x57f   : > { %23128 = vst [vmem:[#allocation20_spill] sm:$0xff] %v19867_v62  ;;  %6742 = vmatmul.mubr.bf16.gmra.mrb[224].mxu0 %v6387_v9  ;;  %v6395_v9 = vsel %vm22746_vm0, %v6390_v18, %v6394_v8  ;;  %v6402_v48 = vrot.slane %v6400_v59, 1 }
 0x580   : > { %23129 = vst [vmem:[#allocation30_spill] sm:$0xff] %v19870_v35  ;;  %6751 = vmatprep.mubr.bf16.mxu0 %v22839_v11  ;;  %v19883_v4 = vmul.u32.u64.low 2863311531, %v19873_v49  ;;  %v19884_v35 = vmul.u32.u64.high 2863311531, %v19873_v49, %v19883_v4 }
 0x581   : > { %v6404_v4 = vshrl.u32 %v17267_v41, 16 }
 0x582   : > { %v5879_v36 = vpop.f32.mrb[156].mxu0 }
 0x583   : > { %v19876_v16 = vadd.f32 %v5879_v36, %v19674_v17  ;;  %v5881_v52 = vpop.f32.mrb[157].mxu0  ;;  %v6987_v17 = vadd.s32 8, %v19873_v49 }
 0x584   : > { %v19879_v1 = vadd.f32 %v5881_v52, %v19679_v26  ;;  %v5883_v40 = vpop.f32.mrb[158].mxu0  ;;  %v17268_v26 = vld [vmem:[#allocation2 + $0xd4] sm:$0x1f]   ;;  %v6403_v52 = vsel %vm22746_vm0, %v6398_v37, %v6402_v48 }
 0x585   : > { %23130 = vst [vmem:[#allocation35_spill] sm:$0xff] %v19876_v16  ;;  %v19887_v32 = vadd.f32 %v5883_v40, %v19682_v31  ;;  %v5885_v47 = vpop.f32.mrb[159].mxu0  ;;  %v19892_v36 = vmul.u32.u64.low 2863311531, %v6987_v17  ;;  %v19893_v18 = vmul.u32.u64.high 2863311531, %v6987_v17, %v19892_v36  ;;  %v19897_v31 = vadd.s32 24, %v19873_v49 }
 0x586   : > { %23131 = vst [vmem:[#allocation18_spill] sm:$0xff] %v19879_v1  ;;  %v6408_v40 = vshll.u32 %v17268_v26, 16  ;;  %v7039_v47 = vshrl.u32 %v19884_v35, 4  ;;  %v6406_v36 = vor.u32 %v6404_v4, %v6402_v48  ;;  %v6412_v4 = vshrl.u32 %v17268_v26, 16 }
 0x587   : > { %23132 = vst [vmem:[#allocation37_spill] sm:$0xff] %v19887_v32  ;;  %6752 = vmatmul.mubr.bf16.gmra.mrb[228].mxu0 %v6395_v9  ;;  %v19900_v9 = vmul.u32.u64.low 2863311531, %v6988_v56  ;;  %v19901_v8 = vmul.u32.u64.high 2863311531, %v6988_v56, %v19900_v9  ;;  %v19907_v59 = vmul.u32.u64.low 2863311531, %v19897_v31  ;;  %v19908_v32 = vmul.u32.u64.high 2863311531, %v19897_v31, %v19907_v59 }
 0x588   : > { %6761 = vmatprep.mubr.bf16.mxu0 %v22839_v11  ;;  %v6410_v41 = vrot.slane %v6408_v40, 1  ;;  %v7040_v37 = vmul.u32 24, %v7039_v47  ;;  %v7050_v1 = vshrl.u32 %v19893_v18, 4  ;;  %v19917_v9 = vadd.s32 40, %v19873_v49 }
 0x589   : > { %v19913_v35 = vmul.u32.u64.low 2863311531, %v19904_v25  ;;  %v19914_v16 = vmul.u32.u64.high 2863311531, %v19904_v25, %v19913_v35  ;;  %v7061_v18 = vshrl.u32 %v19901_v8, 4  ;;  %v7072_v26 = vshrl.u32 %v19908_v32, 4 }
 0x58a   : > { %v6411_v48 = vsel %vm22746_vm0, %v6406_v36, %v6410_v41  ;;  %v19924_v40 = vsub.s32 %v19873_v49, %v7040_v37  ;;  %v7051_v55 = vmul.u32 24, %v7050_v1  ;;  %v6414_v1 = vor.u32 %v6412_v4, %v6410_v41 }
 0x58b   : > { %v19931_v24 = vmul.u32.u64.low 2863311531, %v19917_v9  ;;  %v19932_v38 = vmul.u32.u64.high 2863311531, %v19917_v9, %v19931_v24  ;;  %v7062_v8 = vmul.u32 24, %v7061_v18  ;;  %v7083_v36 = vshrl.u32 %v19914_v16, 4 }
 0x58c   : > { %v19949_v24 = vadd.s32 72, %v19873_v49  ;;  %vm7550_vm2 = vcmp.ne.s32.totalorder %v19924_v40, 0  ;;  %vm7597_vm3 = vcmp.lt.s32.totalorder %v19924_v40, 0  ;;  %v7073_v18 = vmul.u32 24, %v7072_v26 }
 0x58d   : > { %v19984_v26 = vadd.s32 24, %v19924_v40  ;;  %vm19991_vm4 = vmand %vm7597_vm3, %vm7550_vm2 }
 0x58f   : > { %6762 = vmatmul.mubr.bf16.gmra.mrb[132].mxu0 %v6403_v52 }
 0x590   : > { %6771 = vmatprep.mubr.bf16.mxu0 %v22839_v11 }
 0x592   : > { %v5899_v62 = vpop.f32.mrb[160].mxu0 }
 0x593   : > { %v19920_v52 = vadd.f32 %v5899_v62, %v19689_v2  ;;  %v5901_v42 = vpop.f32.mrb[161].mxu0  ;;  %v19941_v62 = vadd.s32 56, %v19873_v49 }
 0x594   : > { %v5903_v59 = vpop.f32.mrb[162].mxu0  ;;  %v19938_v42 = vadd.s32 48, %v19873_v49 }
 0x595   : > { %23133 = vst [vmem:[#allocation36_spill] sm:$0xff] %v19920_v52  ;;  %v19928_v47 = vadd.f32 %v5903_v59, %v19692_v12  ;;  %v5905_v35 = vpop.f32.mrb[163].mxu0  ;;  %v19945_v12 = vadd.s32 64, %v19873_v49  ;;  %v20067_v52 = vadd.s32 104, %v19873_v49 }
 0x596   : > { %v19935_v2 = vadd.f32 %v5905_v35, %v19695_v45  ;;  %v19953_v45 = vsub.s32 %v6987_v17, %v7051_v55  ;;  %v19957_v32 = vmul.u32.u64.low 2863311531, %v19938_v42  ;;  %v19958_v59 = vmul.u32.u64.high 2863311531, %v19938_v42, %v19957_v32 }
 0x597   : > { %23134 = vst [vmem:[#allocation21_spill] sm:$0xff] %v19928_v47  ;;  %6772 = vmatmul.mubr.bf16.gmra.mrb[232].mxu0 %v6411_v48  ;;  %v19968_v35 = vmul.u32.u64.low 2863311531, %v19945_v12  ;;  %v19969_v55 = vmul.u32.u64.high 2863311531, %v19945_v12, %v19968_v35  ;;  %v19977_v32 = vmul.u32.u64.low 2863311531, %v19949_v24  ;;  %v19978_v47 = vmul.u32.u64.high 2863311531, %v19949_v24, %v19977_v32 }
 0x598   : > { %23135 = vst [vmem:[#allocation28_spill] sm:$0xff] %v19935_v2  ;;  %6781 = vmatprep.mubr.bf16.mxu0 %v22839_v11  ;;  %v19961_v41 = vmul.u32.u64.low 2863311531, %v19941_v62  ;;  %v19962_v11 = vmul.u32.u64.high 2863311531, %v19941_v62, %v19961_v41  ;;  %v19974_v2 = vsub.s32 %v6988_v56, %v7062_v8  ;;  %vm7551_vm5 = vcmp.ne.s32.totalorder %v19953_v45, 0  ;;  %v19997_v56 = vld [vmem:[#allocation2 + $0xc] sm:$0xf] }
 0x599   : > { %vm7598_vm6 = vcmp.lt.s32.totalorder %v19953_v45, 0  ;;  %v20000_v8 = vadd.s32 80, %v19873_v49 }
 0x59a   : > { %v5909_v37 = vpop.f32.mrb[164].mxu0  ;;  %vm7552_vm7 = vcmp.ne.s32.totalorder %v19974_v2, 0  ;;  %vm7599_vm8 = vcmp.lt.s32.totalorder %v19974_v2, 0  ;;  %vm20016_vm9 = vmand %vm7598_vm6, %vm7551_vm5  ;;  %v20024_v32 = vadd.s32 24, %v19974_v2 }
 0x59b   : > { %v19965_v48 = vadd.f32 %v5909_v37, %v19704_v51  ;;  %v5911_v4 = vpop.f32.mrb[165].mxu0  ;;  %v7094_v37 = vshrl.u32 %v19932_v38, 4  ;;  %v20003_v38 = vadd.s32 24, %v19953_v45  ;;  %vm20032_vm10 = vmand %vm7599_vm8, %vm7552_vm7 }
 0x59c   : > { %v19972_v16 = vadd.f32 %v5911_v4, %v19707_v63  ;;  %v5913_v17 = vpop.f32.mrb[166].mxu0  ;;  %v20008_v4 = vsub.s32 %v19897_v31, %v7073_v18  ;;  %v14558_v18 = vcombine.low %v19814_v6, %v19997_v56  ;;  %v7138_v6 = vshrl.u32 %v19978_v47, 4 }
 0x59d   : > { %23136 = vst [vmem:[#allocation39_spill] sm:$0xff] %v19965_v48  ;;  %v19981_v41 = vadd.f32 %v5913_v17, %v19710_v46  ;;  %v5915_v51 = vpop.f32.mrb[167].mxu0  ;;  %v7084_v46 = vmul.u32 24, %v7083_v36  ;;  %v7095_v35 = vmul.u32 24, %v7094_v37  ;;  %v20021_v17 = vadd.s32 88, %v19873_v49 }
 0x59e   : > { %23137 = vst [vmem:[#allocation38_spill] sm:$0xff] %v19972_v16  ;;  %v7105_v51 = vshrl.u32 %v19958_v59, 4  ;;  %v7116_v37 = vshrl.u32 %v19962_v11, 4  ;;  %v20039_v16 = vmul.u32.u64.low 2863311531, %v20000_v8  ;;  %v20040_v48 = vmul.u32.u64.high 2863311531, %v20000_v8, %v20039_v16 }
 0x59f   : > { %23138 = vst [vmem:[#allocation83_spill] sm:$0xff] %v19981_v41  ;;  %6782 = vmatmul.mubr.bf16.gmra.mrb[236].mxu0 %v6414_v1  ;;  %v20027_v31 = vsub.s32 %v19904_v25, %v7084_v46  ;;  %v7127_v41 = vshrl.u32 %v19969_v55, 4  ;;  %vm7553_vm11 = vcmp.ne.s32.totalorder %v20008_v4, 0  ;;  %v20049_v59 = vadd.s32 96, %v19873_v49 }
 0x5a0   : > { %vm7600_vm12 = vcmp.lt.s32.totalorder %v20008_v4, 0  ;;  %v20053_v11 = vsub.s32 %v19917_v9, %v7095_v35  ;;  %v20056_v55 = vmul.u32.u64.low 2863311531, %v20021_v17  ;;  %v20057_v16 = vmul.u32.u64.high 2863311531, %v20021_v17, %v20056_v55 }
 0x5a1   : > { %v20064_v25 = vadd.s32 24, %v20008_v4  ;;  %v7106_v47 = vmul.u32 24, %v7105_v51  ;;  %vm7554_vm13 = vcmp.ne.s32.totalorder %v20027_v31, 0  ;;  %v8738_v9 = vshrl.u32 %v14558_v18, 16  ;;  %vm20131_vm5 = vmand %vm7600_vm12, %vm7553_vm11 }
 0x5a2   : > { %v7117_v35 = vmul.u32 24, %v7116_v37  ;;  %v7128_v58 = vmul.u32 24, %v7127_v41  ;;  %v8741_v55 = vshll.u32 %v14558_v18, 16  ;;  %vm7601_vm14 = vcmp.lt.s32.totalorder %v20027_v31, 0 }
 0x5a3   : > { %v7139_v27 = vmul.u32 24, %v7138_v6  ;;  %v20073_v23 = vmul.u32.u64.low 2863311531, %v20049_v59  ;;  %v20074_v13 = vmul.u32.u64.high 2863311531, %v20049_v59, %v20073_v23  ;;  %v20079_v51 = vadd.s32 24, %v20027_v31  ;;  %vm20144_vm8 = vmand %vm7601_vm14, %vm7554_vm13 }
 0x5a4   : > { %vm7555_vm15 = vcmp.ne.s32.totalorder %v20053_v11, 0  ;;  %v20083_v46 = vadd.s32 112, %v19873_v49  ;;  %vm7602_vm2 = vcmp.lt.s32.totalorder %v20053_v11, 0  ;;  %v20087_v41 = vsub.s32 %v19938_v42, %v7106_v47 }
 0x5a5   : > { %v20090_v23 = vmul.u32.u64.low 2863311531, %v20067_v52  ;;  %v20091_v18 = vmul.u32.u64.high 2863311531, %v20067_v52, %v20090_v23  ;;  %v20097_v34 = vadd.s32 24, %v20053_v11  ;;  %v20100_v10 = vsub.s32 %v19941_v62, %v7117_v35  ;;  %vm20160_vm12 = vmand %vm7602_vm2, %vm7555_vm15 }
 0x5a6   : > { %v7149_v61 = vshrl.u32 %v20040_v48, 4  ;;  %v20104_v42 = vsub.s32 %v19945_v12, %v7128_v58  ;;  %v20107_v47 = vsub.s32 %v19949_v24, %v7139_v27  ;;  %v8740_v23 = vrot.slane %v8738_v9, 3 }
 0x5a7   : > { %v20114_v62 = vmul.u32.u64.low 2863311531, %v20083_v46  ;;  %v20115_v35 = vmul.u32.u64.high 2863311531, %v20083_v46, %v20114_v62  ;;  %v20121_v58 = vcombine.low %v8209_v28, %v19812_v50  ;;  %vm7556_vm3 = vcmp.ne.s32.totalorder %v20087_v41, 0 }
 0x5a8   : > { %v20125_v27 = vadd.s32 120, %v19873_v49  ;;  %vm7603_vm6 = vcmp.lt.s32.totalorder %v20087_v41, 0  ;;  %vm7557_vm7 = vcmp.ne.s32.totalorder %v20100_v10, 0  ;;  %vm7604_vm11 = vcmp.lt.s32.totalorder %v20100_v10, 0 }
 0x5a9   : > { %23148 = vst [vmem:[#allocation87_spill] sm:$0xff] %v20121_v58  ;;  %v20150_v50 = vadd.s32 24, %v20100_v10  ;;  %v7171_v12 = vshrl.u32 %v20074_v13, 4  ;;  %v20154_v24 = vadd.s32 128, %v19873_v49  ;;  %vm7558_vm13 = vcmp.ne.s32.totalorder %v20104_v42, 0  ;;  %vm20171_vm1 = vmand %vm7603_vm6, %vm7556_vm3 }
 0x5aa   : > { %v5929_v37 = vpop.f32.mrb[168].mxu0  ;;  %vm7605_vm14 = vcmp.lt.s32.totalorder %v20104_v42, 0  ;;  %vm7559_vm0 = vcmp.ne.s32.totalorder %v20107_v47, 0  ;;  %vm7606_vm15 = vcmp.lt.s32.totalorder %v20107_v47, 0  ;;  %vm20188_vm2 = vmand %vm7604_vm11, %vm7557_vm7  ;;  %v20193_v21 = vadd.s32 24, %v20104_v42 }
 0x5ab   : > { %v20094_v6 = vadd.f32 %v5929_v37, %v19716_v19  ;;  %v5931_v14 = vpop.f32.mrb[169].mxu0  ;;  %v8743_v19 = vrot.slane %v8741_v55, 4  ;;  %v7182_v55 = vshrl.u32 %v20091_v18, 4  ;;  %v20196_v18 = vadd.s32 24, %v20107_v47  ;;  %vm20208_vm3 = vmand %vm7605_vm14, %vm7558_vm13 }
 0x5ac   : > { %v5933_v0 = vpop.f32.mrb[170].mxu0  ;;  %v7172_v53 = vmul.u32 24, %v7171_v12  ;;  %v20213_v43 = vmul.u32.u64.low 2863311531, %v20154_v24  ;;  %v20214_v54 = vmul.u32.u64.high 2863311531, %v20154_v24, %v20213_v43  ;;  %vm20228_vm6 = vmand %vm7606_vm15, %vm7559_vm0  ;;  %v20330_v58 = vadd.s32 152, %v19873_v49 }
 0x5ad   : > { %23145 = vst [vmem:[#allocation85_spill] sm:$0xff] %v20094_v6  ;;  %v20110_v14 = vadd.f32 %v5933_v0, %v19720_v3  ;;  %v5935_v37 = vpop.f32.mrb[171].mxu0  ;;  %v7160_v6 = vshrl.u32 %v20057_v16, 4  ;;  %v7150_v0 = vmul.u32 24, %v7149_v61  ;;  %v7193_v43 = vshrl.u32 %v20115_v35, 4 }
 0x5ae   : > { %v20118_v48 = vadd.f32 %v5935_v37, %v19723_v39  ;;  %v20137_v39 = vadd.s32 24, %v20087_v41  ;;  %v20178_v37 = vmul.u32.u64.low 2863311531, %v20125_v27  ;;  %v20179_v62 = vmul.u32.u64.high 2863311531, %v20125_v27, %v20178_v37 }
 0x5af   : > { %23146 = vst [vmem:[#allocation84_spill] sm:$0xff] %v20110_v14  ;;  %v7161_v16 = vmul.u32 24, %v7160_v6  ;;  %v20199_v37 = vsub.s32 %v20000_v8, %v7150_v0  ;;  %v23163_v0 = vmov 0  ;;  %v20241_v3 = vadd.s32 136, %v19873_v49 }
 0x5b0   : > { %23147 = vst [vmem:[#allocation91_spill] sm:$0xff] %v20118_v48  ;;  %v23164_v0 = vsel %vm20228_vm6, 4294967295, %v23163_v0  ;;  %v20243_v12 = vor.u32 %v8743_v19, %v8740_v23  ;;  %v23166_v23 = vsel %vm19991_vm4, %v19984_v26, %v19924_v40  ;;  %v20283_v26 = vsub.s32 %v20049_v59, %v7172_v53 }
 0x5b1   : > { %vm20260_vm0 = vcmp.lt.s32.totalorder %v23166_v23, 16  ;;  %vm7560_vm4 = vcmp.ne.s32.totalorder %v20199_v37, 0  ;;  %v20293_v23 = vld [vmem:[%s22694_s3] ss:$0 sm:$0xff]  ;;  %v7204_v53 = vshrl.u32 %v20179_v62, 4  ;;  %v20309_v35 = vadd.s32 144, %v19873_v49 }
 0x5b2   : > { %v5939_v9 = vpop.f32.mrb[172].mxu0  ;;  %23165 = vst [vmem:[#allocation88_spill] sm:$0xff] %v20243_v12  ;;  %v7215_v62 = vshrl.u32 %v20214_v54, 4  ;;  %v20320_v8 = vadd.s32 24, %v20283_v26 }
 0x5b3   : > { %v20182_v48 = vadd.f32 %v5939_v9, %v19727_v20  ;;  %v5941_v6 = vpop.f32.mrb[173].mxu0 }
 0x5b4   : > { %v20202_v20 = vadd.f32 %v5941_v6, %v19730_v7  ;;  %v5943_v9 = vpop.f32.mrb[174].mxu0  ;;  %v7741_v7 = vsel %vm20131_vm5, %v20064_v25, %v20008_v4  ;;  %v7183_v25 = vmul.u32 24, %v7182_v55  ;;  %v23173_v6 = vld [vmem:[#allocation70_spill] sm:$0xff] }
 0x5b5   : > { %23157 = vst [vmem:[#allocation86_spill] sm:$0xff] %v20182_v48  ;;  %v5944_v30 = vpop.f32.mrb[175].mxu0  ;;  %v20300_v59 = vmul.u32.u64.low 2863311531, %v20241_v3  ;;  %v20301_v9 = vmul.u32.u64.high 2863311531, %v20241_v3, %v20300_v59  ;;  %vm20346_vm15 = vcmp.lt.s32.totalorder %v7741_v7, 16  ;;  %v23274_v7 = vld [vmem:[#allocation79_spill] sm:$0xff] }
 0x5b6   : > { %23160 = vst [vmem:[#allocation89_spill] sm:$0xff] %v20202_v20  ;;  %v20233_v30 = vsub.s32 %v20021_v17, %v7161_v16  ;;  %v23169_v16 = vsel %vm20016_vm9, %v20003_v38, %v19953_v45  ;;  %vm7607_vm9 = vcmp.lt.s32.totalorder %v20199_v37, 0  ;;  %v20287_v45 = vadd.s32 24, %v20199_v37  ;;  %v23174_v17 = vld [vmem:[#allocation71_spill] sm:$0xff] }
 0x5b7   : > { %vm20269_vm5 = vcmp.lt.s32.totalorder %v23169_v16, 16  ;;  %v7194_v38 = vmul.u32 24, %v7193_v43  ;;  %v20296_v16 = vsub.s32 %v20067_v52, %v7183_v25  ;;  %vm20366_vm13 = vmand %vm7607_vm9, %vm7560_vm4 }
 0x5b8   : > { %vm7561_vm7 = vcmp.ne.s32.totalorder %v20233_v30, 0  ;;  %v20306_v43 = vadd.s32 24, %v20233_v30  ;;  %vm23188_vm4 = vcmp.lt.s32.totalorder %v20233_v30, 0 }
 0x5b9   : > { %23172 = vst [vmem:[#allocation90_spill] sm:$0xff] %v20296_v16  ;;  %v20323_v20 = vsub.s32 %v20083_v46, %v7194_v38  ;;  %v23180_v46 = vsel %vm20032_vm10, %v20024_v32, %v19974_v2  ;;  %v20360_v2 = vadd.s32 168, %v19873_v49  ;;  %vm20387_vm9 = vmand %vm23188_vm4, %vm7561_vm7  ;;  %vm23196_vm7 = vcmp.ne.s32.totalorder %v20296_v16, 0 }
 0x5ba   : > { %v6553_v36 = vpop.f32.mrb[0].mxu0  ;;  %vm20342_vm14 = vcmp.lt.s32.totalorder %v23180_v46, 16  ;;  %vm23197_vm4 = vcmp.lt.s32.totalorder %v20296_v16, 0 }
 0x5bb   : > { %v16045_v40 = vadd.f32 %v6553_v36, %v23173_v6  ;;  %v6555_v63 = vpop.f32.mrb[1].mxu0  ;;  %v23176_v36 = vld [vmem:[#allocation72_spill] sm:$0xff]  ;;  %23177 = vst [vmem:[#allocation66_spill] sm:$0xff] %v20323_v20  ;;  %vm7564_vm10 = vcmp.ne.s32.totalorder %v20323_v20, 0 }
 0x5bc   : > { %v20312_v52 = vadd.f32 %v6555_v63, %v23174_v17  ;;  %v6557_v25 = vpop.f32.mrb[2].mxu0  ;;  %v23178_v17 = vld [vmem:[#allocation73_spill] sm:$0xff] }
 0x5bd   : > { %v6891_v6 = vadd.f32 %v16045_v40, %v20293_v23  ;;  %v16047_v59 = vadd.f32 %v6557_v25, %v23176_v36  ;;  %v6559_v4 = vpop.f32.mrb[3].mxu0  ;;  %v20334_v25 = vmul.u32.u64.low 2863311531, %v20309_v35  ;;  %v20335_v36 = vmul.u32.u64.high 2863311531, %v20309_v35, %v20334_v25 }
 0x5be   : > { %23175 = vst [vmem:[#allocation92_spill] sm:$0xff] %v20312_v52  ;;  %v20326_v63 = vadd.f32 %v6559_v4, %v23178_v17  ;;  %v7205_v52 = vmul.u32 24, %v7204_v53  ;;  %v20352_v53 = vadd.s32 24, %v20296_v16  ;;  %v7226_v17 = vshrl.u32 %v20301_v9, 4 }
 0x5bf   : > { %v6938_v54 = vmax.f32 %v6891_v6, 0.0  ;;  %v6892_v40 = vadd.f32 %v16047_v59, %v20293_v23  ;;  %v7216_v6 = vmul.u32 24, %v7215_v62  ;;  %v20355_v59 = vadd.s32 160, %v19873_v49 }
 0x5c0   : > { %23179 = vst [vmem:[#allocation47_spill] sm:$0xff] %v20326_v63  ;;  %v20371_v62 = vsub.s32 %v20125_v27, %v7205_v52  ;;  %v20392_v9 = vadd.s32 24, %v20323_v20 }
 0x5c1   : > { %v6939_v1 = vmax.f32 %v6892_v40, 0.0  ;;  %v20375_v40 = vmul.u32.u64.low 2863311531, %v20330_v58  ;;  %v20376_v25 = vmul.u32.u64.high 2863311531, %v20330_v58, %v20375_v40  ;;  %v7926_v46 = vsel %vm20260_vm0, %v6938_v54, 0.0 }
 0x5c2   : > { %v6563_v32 = vpop.f32.mrb[176].mxu0  ;;  %23187 = vst [vmem:[#allocation53_spill] sm:$0xff] %v20371_v62  ;;  %23191 = vst [vmem:[#allocation70_spill] sm:$0xff] %v20392_v9  ;;  %vm23192_vm0 = vcmp.ne.s32.totalorder %v20283_v26, 0  ;;  %v20406_v55 = vmul.u32.u64.low 2863311531, %v20355_v59  ;;  %v20407_v54 = vmul.u32.u64.high 2863311531, %v20355_v59, %v20406_v55 }
 0x5c3   : > { %v7927_v63 = vsel %vm20269_vm5, %v6939_v1, 0.0  ;;  %v6794_v12 = vadd.f32 %v6563_v32, %v19737_v57  ;;  %v6565_v22 = vpop.f32.mrb[177].mxu0  ;;  %vm23193_vm5 = vcmp.lt.s32.totalorder %v20283_v26, 0  ;;  %v23198_v40 = vmov 0  ;;  %v23215_v9 = vld [vmem:[#allocation54_spill] sm:$0xff] }
 0x5c4   : > { %v14935_v52 = vpack.c.bf16 %v7927_v63, %v7926_v46  ;;  %v6567_v19 = vpop.f32.mrb[178].mxu0  ;;  %vm20398_vm11 = vmand %vm23193_vm5, %vm23192_vm0  ;;  %v20403_v22 = vsub.s32 %v20154_v24, %v7216_v6  ;;  %v20420_v24 = vmul.u32.u64.low 2863311531, %v20360_v2  ;;  %v20421_v6 = vmul.u32.u64.high 2863311531, %v20360_v2, %v20420_v24 }
 0x5c5   : > { %v6893_v1 = vadd.f32 %v20293_v23, %v6794_v12  ;;  %v6796_v63 = vadd.f32 %v6567_v19, %v19741_v60  ;;  %v6569_v32 = vpop.f32.mrb[179].mxu0  ;;  %vm20415_vm0 = vmand %vm23197_vm4, %vm23196_vm7  ;;  %vm23201_vm5 = vcmp.lt.s32.totalorder %v20323_v20, 0  ;;  %v23202_v60 = vmov 0  ;;  %v17328_v24 = vld [vmem:[#allocation8 + $0x38] sm:$0xff]  }
 0x5c6   : > { %v23199_v40 = vsel %vm20415_vm0, 4294967295, %v23198_v40  ;;  %15127 = vst [vmem:[#allocation2 + $0x10] sm:$0xff] %v14935_v52   ;;  %v20424_v46 = vadd.f32 %v6569_v32, %v19744_v33  ;;  %vm20430_vm6 = vmand %vm23201_vm5, %vm7564_vm10  ;;  %vm7565_vm7 = vcmp.ne.s32.totalorder %v20371_v62, 0  ;;  %v7227_v12 = vmul.u32 24, %v7226_v17 }
 0x5c7   : > { %v23203_v60 = vsel %vm20430_vm6, 4294967295, %v23202_v60  ;;  %v20436_v19 = vadd.s32 176, %v19873_v49  ;;  %v6940_v55 = vmax.f32 %v6893_v1, 0.0  ;;  %v6894_v52 = vadd.f32 %v20293_v23, %v6796_v63 }
 0x5c8   : > { %23200 = vst [vmem:[#allocation71_spill] sm:$0xff] %v20424_v46  ;;  %23204 = vst [vmem:[#allocation72_spill] sm:$0xff] %v23203_v60  ;;  %vm7612_vm4 = vcmp.lt.s32.totalorder %v20371_v62, 0  ;;  %v7237_v33 = vshrl.u32 %v20335_v36, 4  ;;  %v23205_v32 = vsel %vm20144_vm8, %v20079_v51, %v20027_v31  ;;  %v23208_v17 = vsel %vm20160_vm12, %v20097_v34, %v20053_v11 }
 0x5c9   : > { %vm20446_vm10 = vcmp.lt.s32.totalorder %v23205_v32, 16  ;;  %vm20455_vm5 = vcmp.lt.s32.totalorder %v23208_v17, 16  ;;  %v6941_v11 = vmax.f32 %v6894_v52, 0.0  ;;  %v20480_v36 = vadd.s32 24, %v20371_v62  ;;  %vm20487_vm12 = vmand %vm7612_vm4, %vm7565_vm7 }
 0x5ca   : > { %vm7566_vm8 = vcmp.ne.s32.totalorder %v20403_v22, 0  ;;  %v6573_v63 = vpop.f32.mrb[180].mxu0  ;;  %v23212_v32 = vmov 0  ;;  %vm7613_vm0 = vcmp.lt.s32.totalorder %v20403_v22, 0  ;;  %v20493_v52 = vsub.s32 %v20241_v3, %v7227_v12 }
 0x5cb   : > { %23211 = vst [vmem:[#allocation73_spill] sm:$0xff] %v20480_v36  ;;  %v23213_v32 = vsel %vm20487_vm12, 4294967295, %v23212_v32  ;;  %v20496_v17 = vmul.u32.u64.low 2863311531, %v20436_v19  ;;  %v20497_v61 = vmul.u32.u64.high 2863311531, %v20436_v19, %v20496_v17  ;;  %v7928_v34 = vsel %vm20342_vm14, %v6940_v55, 0.0  ;;  %v6575_v28 = vpop.f32.mrb[181].mxu0 }
 0x5cc   : > { %23214 = vst [vmem:[#allocation93_spill] sm:$0xff] %v23213_v32  ;;  %v7929_v51 = vsel %vm20346_vm15, %v6941_v11, 0.0  ;;  %v6798_v31 = vadd.f32 %v6573_v63, %v19748_v29  ;;  %v7238_v46 = vmul.u32 24, %v7237_v33  ;;  %v20505_v60 = vadd.f32 %v6575_v28, %v23215_v9  ;;  %v6577_v3 = vpop.f32.mrb[182].mxu0 }
 0x5cd   : > { %v14940_v20 = vpack.c.bf16 %v7929_v51, %v7928_v34  ;;  %v7248_v12 = vshrl.u32 %v20376_v25, 4  ;;  %v7259_v16 = vshrl.u32 %v20407_v54, 4  ;;  %v6800_v4 = vadd.f32 %v6577_v3, %v19755_v15  ;;  %v6579_v55 = vpop.f32.mrb[183].mxu0  ;;  %v8213_v38 = vld [vmem:[#allocation2 + $0x10] sm:$0xf]  ;;  %v17304_v15 = vld [vmem:[#allocation8 + $0x8] sm:$0xff]  }
 0x5ce   : > { %23216 = vst [vmem:[#allocation54_spill] sm:$0xff] %v20505_v60  ;;  %v6895_v17 = vadd.f32 %v20293_v23, %v6798_v31  ;;  %v8214_v11 = vld [vmem:[#allocation2 + $0x14] sm:$0xf]  ;;  %v7270_v9 = vshrl.u32 %v20421_v6, 4  ;;  %v14526_v33 = vcombine.low %v19997_v56, %v8213_v38  ;;  %v20518_v54 = vadd.s32 24, %v20403_v22 }
 0x5cf   : > { %15128 = vst [vmem:[#allocation2 + $0x18] sm:$0xff] %v14940_v20   ;;  %v14559_v25 = vcombine.low %v8213_v38, %v8214_v11  ;;  %v20521_v28 = vadd.s32 184, %v19873_v49  ;;  %v6896_v51 = vadd.f32 %v20293_v23, %v6800_v4  ;;  %vm7567_vm14 = vcmp.ne.s32.totalorder %v20493_v52, 0  ;;  %v17312_v60 = vld [vmem:[#allocation8 + $0x18] sm:$0xff]  }
 0x5d0   : > { %v6942_v31 = vmax.f32 %v6895_v17, 0.0  ;;  %vm7614_vm15 = vcmp.lt.s32.totalorder %v20493_v52, 0  ;;  %15470 = vmatmul.mubr.bf16.vlgmr.msra.gmra.mrb[176].mxu1 %v14526_v33  ;;  %v23217_v56 = vsel %vm20171_vm1, %v20137_v39, %v20087_v41  ;;  %v23220_v6 = vsel %vm20188_vm2, %v20150_v50, %v20100_v10  ;;  %vm20574_vm1 = vmand %vm7613_vm0, %vm7566_vm8 }
 0x5d1   : > { %vm20531_vm7 = vcmp.lt.s32.totalorder %v23217_v56, 16  ;;  %vm20540_vm4 = vcmp.lt.s32.totalorder %v23220_v6, 16  ;;  %v20545_v63 = vadd.s32 24, %v20493_v52  ;;  %v20548_v13 = vsub.s32 %v20309_v35, %v7238_v46  ;;  %15518 = vmatpush3.bf16.msra.mxu1 %v20069_v5  ;;  %v17309_v35 = vld [vmem:[#allocation8 + $0x10] sm:$0xff]   ;;  %vm20590_vm2 = vmand %vm7614_vm15, %vm7567_vm14 }
 0x5d2   : > { %v7249_v41 = vmul.u32 24, %v7248_v12  ;;  %v20551_v39 = vadd.s32 192, %v19873_v49  ;;  %v6943_v3 = vmax.f32 %v6896_v51, 0.0  ;;  %v8747_v17 = vshrl.u32 %v14559_v25, 16  ;;  %v6583_v10 = vpop.f32.mrb[12].mxu0  ;;  %15519 = vmatprep.subr.bf16.mxu1 %v17304_v15 }
 0x5d3   : > { %v7260_v14 = vmul.u32 24, %v7259_v16  ;;  %v7271_v4 = vmul.u32 24, %v7270_v9  ;;  %v8750_v50 = vshll.u32 %v14559_v25, 16  ;;  %v7281_v55 = vshrl.u32 %v20497_v61, 4  ;;  %v23223_v16 = vld [vmem:[#allocation74_spill] sm:$0xff]  ;;  %v6585_v51 = vpop.f32.mrb[13].mxu0 }
 0x5d4   : > { %v20556_v38 = vmul.u32.u64.low 2863311531, %v20521_v28  ;;  %v20557_v33 = vmul.u32.u64.high 2863311531, %v20521_v28, %v20556_v38  ;;  %v7930_v46 = vsel %vm20446_vm10, %v6942_v31, 0.0  ;;  %v7931_v12 = vsel %vm20455_vm5, %v6943_v3, 0.0  ;;  %v23224_v61 = vld [vmem:[#allocation75_spill] sm:$0xff]  ;;  %v6587_v6 = vpop.f32.mrb[14].mxu0 }
 0x5d5   : > { %v16049_v9 = vadd.f32 %v6583_v10, %v23223_v16  ;;  %v20565_v5 = vadd.s32 200, %v19873_v49  ;;  %v14945_v25 = vpack.c.bf16 %v7931_v12, %v7930_v46  ;;  %v20568_v56 = vadd.f32 %v6585_v51, %v23224_v61  ;;  %v23228_v10 = vld [vmem:[#allocation76_spill] sm:$0xff]  ;;  %v6589_v46 = vpop.f32.mrb[15].mxu0  ;;  %15520 = vmatpush3.bf16.msra.mxu1 %v17304_v15 }
 0x5d6   : > { %v20579_v1 = vmul.u32.u64.low 2863311531, %v20551_v39  ;;  %v20580_v31 = vmul.u32.u64.high 2863311531, %v20551_v39, %v20579_v1  ;;  %v16051_v38 = vadd.f32 %v6587_v6, %v23228_v10  ;;  %v8215_v12 = vld [vmem:[#allocation2 + $0x18] sm:$0xf]  ;;  %v8749_v16 = vrot.slane %v8747_v17, 3  ;;  %15521 = vmatprep.subr.bf16.mxu1 %v17309_v35 }
 0x5d7   : > { %23225 = vst [vmem:[#allocation74_spill] sm:$0xff] %v20568_v56  ;;  %v6897_v3 = vadd.f32 %v16049_v9, %v20293_v23  ;;  %v20584_v51 = vld [vmem:[#allocation2 + $0x1c] sm:$0xf]  ;;  %v20595_v29 = vsub.s32 %v20330_v58, %v7249_v41  ;;  %15129 = vst [vmem:[#allocation2 + $0x20] sm:$0xff] %v14945_v25   ;;  %v14527_v1 = vcombine.low %v8214_v11, %v8215_v12  ;;  %v8752_v17 = vrot.slane %v8750_v50, 4 }
 0x5d8   : > { %v23231_v9 = vld [vmem:[#allocation77_spill] sm:$0xff]  ;;  %v20601_v10 = vcombine.low %v8215_v12, %v20584_v51  ;;  %v6898_v62 = vadd.f32 %v16051_v38, %v20293_v23  ;;  %v20605_v36 = vmul.u32.u64.low 2863311531, %v20565_v5  ;;  %v20606_v32 = vmul.u32.u64.high 2863311531, %v20565_v5, %v20605_v36 }
 0x5d9   : > { %v20598_v6 = vadd.f32 %v6589_v46, %v23231_v9  ;;  %v6944_v56 = vmax.f32 %v6897_v3, 0.0  ;;  %15473 = vmatprep.mubr.bf16.mxu1 %v14527_v1  ;;  %v23233_v58 = vsel %vm20208_vm3, %v20193_v21, %v20104_v42  ;;  %vm23236_vm10 = vnez %v23164_v0  ;;  %15522 = vmatpush3.bf16.msra.mxu1 %v17309_v35  ;;  %v17317_v3 = vld [vmem:[#allocation8 + $0x20] sm:$0xff]  }
 0x5da   : > { %vm20613_vm0 = vcmp.lt.s32.totalorder %v23233_v58, 16  ;;  %v23237_v15 = vsel %vm23236_vm10, %v20196_v18, %v20107_v47  ;;  %vm7568_vm3 = vcmp.ne.s32.totalorder %v20548_v13, 0  ;;  %v20636_v42 = vadd.s32 208, %v19873_v49  ;;  %v6593_v0 = vpop.f32.mrb[184].mxu0  ;;  %15523 = vmatprep.subr.bf16.mxu1 %v17312_v60  ;;  %v23240_v1 = vld [vmem:[#allocation49_spill] sm:$0xff] }
 0x5db   : > { %23232 = vst [vmem:[#allocation75_spill] sm:$0xff] %v20598_v6  ;;  %vm20622_vm5 = vcmp.lt.s32.totalorder %v23237_v15, 16  ;;  %v6945_v47 = vmax.f32 %v6898_v62, 0.0  ;;  %vm7615_vm8 = vcmp.lt.s32.totalorder %v20548_v13, 0  ;;  %v20640_v18 = vadd.s32 24, %v20548_v13  ;;  %v6595_v12 = vpop.f32.mrb[185].mxu0 }
 0x5dc   : > { %vm7569_vm14 = vcmp.ne.s32.totalorder %v20595_v29, 0  ;;  %v20644_v36 = vsub.s32 %v20355_v59, %v7260_v14  ;;  %v20647_v50 = vsub.s32 %v20360_v2, %v7271_v4  ;;  %v7292_v25 = vshrl.u32 %v20557_v33, 4  ;;  %v6597_v9 = vpop.f32.mrb[186].mxu0  ;;  %vm20670_vm15 = vmand %vm7615_vm8, %vm7568_vm3  ;;  %v23246_v15 = vld [vmem:[#allocation48_spill] sm:$0xff] }
 0x5dd   : > { %v20650_v62 = vor.u32 %v8752_v17, %v8749_v16  ;;  %v7932_v38 = vsel %vm20531_vm7, %v6944_v56, 0.0  ;;  %v7933_v46 = vsel %vm20540_vm4, %v6945_v47, 0.0  ;;  %v6806_v35 = vadd.f32 %v6593_v0, %v19761_v44  ;;  %v6599_v56 = vpop.f32.mrb[187].mxu0  ;;  %15524 = vmatpush3.bf16.msra.mxu1 %v17312_v60 }
 0x5de   : > { %v7282_v59 = vmul.u32 24, %v7281_v55  ;;  %v14950_v14 = vpack.c.bf16 %v7933_v46, %v7932_v38  ;;  %v7303_v2 = vshrl.u32 %v20580_v31, 4  ;;  %v6808_v20 = vadd.f32 %v6597_v9, %v23240_v1  ;;  %v8217_v17 = vld [vmem:[#allocation2 + $0x20] sm:$0xf]  ;;  %v20664_v34 = vld [vmem:[#allocation2 + $0x24] sm:$0xf]  ;;  %15525 = vmatprep.subr.bf16.mxu1 %v17317_v3 }
 0x5df   : > { %v20659_v4 = vmul.u32.u64.low 2863311531, %v20636_v42  ;;  %v20660_v33 = vmul.u32.u64.high 2863311531, %v20636_v42, %v20659_v4  ;;  %v6899_v16 = vadd.f32 %v20293_v23, %v6806_v35  ;;  %v20675_v55 = vadd.s32 216, %v19873_v49  ;;  %v23243_v31 = vld [vmem:[#allocation88_spill] sm:$0xff] }
 0x5e0   : > { %vm23244_vm7 = vsmask.f32 4352  ;;  %15130 = vst [vmem:[#allocation2 + $0x28] sm:$0xff] %v14950_v14   ;;  %v20683_v47 = vadd.f32 %v6599_v56, %v23246_v15  ;;  %v14528_v0 = vcombine.low %v20584_v51, %v8217_v17  ;;  %v20687_v38 = vcombine.low %v8217_v17, %v20664_v34  ;;  %v23256_v56 = vld [vmem:[#allocation51_spill] sm:$0xff]  ;;  %v23277_v51 = vld [vmem:[#allocation80_spill] sm:$0xff] }
 0x5e1   : > { %v20680_v58 = vsel %vm23244_vm7, %v23243_v31, %v20650_v62  ;;  %v7293_v46 = vmul.u32 24, %v7292_v25  ;;  %v6946_v35 = vmax.f32 %v6899_v16, 0.0  ;;  %v6900_v12 = vadd.f32 %v20293_v23, %v6808_v20  ;;  %15526 = vmatpush3.bf16.msra.mxu1 %v17317_v3 }
 0x5e2   : > { %23245 = vst [vmem:[#allocation76_spill] sm:$0xff] %v20680_v58  ;;  %23247 = vst [vmem:[#allocation77_spill] sm:$0xff] %v20683_v47  ;;  %vm7616_vm4 = vcmp.lt.s32.totalorder %v20595_v29, 0  ;;  %v7314_v60 = vshrl.u32 %v20606_v32, 4  ;;  %15474 = vmatmul.mubr.bf16.gmra.mrb[180].mxu1 %v14528_v0  ;;  %v23248_v14 = vsel %vm20366_vm13, %v20287_v45, %v20199_v37  ;;  %v23251_v25 = vsel %vm20387_vm9, %v20306_v43, %v20233_v30  ;;  %v6603_v27 = vpop.f32.mrb[188].mxu0 }
 0x5e3   : > { %vm20697_vm10 = vcmp.lt.s32.totalorder %v23248_v14, 16  ;;  %vm20706_vm3 = vcmp.lt.s32.totalorder %v23251_v25, 16  ;;  %v20715_v37 = vadd.s32 24, %v20595_v29  ;;  %vm7570_vm13 = vcmp.ne.s32.totalorder %v20644_v36, 0  ;;  %vm20727_vm9 = vmand %vm7616_vm4, %vm7569_vm14  ;;  %v6605_v15 = vpop.f32.mrb[189].mxu0  ;;  %v23257_v14 = vld [vmem:[#allocation50_spill] sm:$0xff] }
 0x5e4   : > { %v7304_v45 = vmul.u32 24, %v7303_v2  ;;  %v6947_v32 = vmax.f32 %v6900_v12, 0.0  ;;  %vm7617_vm8 = vcmp.lt.s32.totalorder %v20644_v36, 0  ;;  %v20732_v16 = vadd.s32 24, %v20644_v36 }
 0x5e5   : > { %v20720_v30 = vmul.u32.u64.low 2863311531, %v20675_v55  ;;  %v20721_v43 = vmul.u32.u64.high 2863311531, %v20675_v55, %v20720_v30  ;;  %vm7571_vm7 = vcmp.ne.s32.totalorder %v20647_v50, 0  ;;  %v20736_v2 = vsub.s32 %v20436_v19, %v7282_v59  ;;  %v23259_v59 = vld [vmem:[#allocation52_spill] sm:$0xff]  ;;  %vm20786_vm14 = vmand %vm7617_vm8, %vm7570_vm13 }
 0x5e6   : > { %v20739_v1 = vsub.s32 %v20521_v28, %v7293_v46  ;;  %v7934_v3 = vsel %vm20613_vm0, %v6946_v35, 0.0  ;;  %v7935_v20 = vsel %vm20622_vm5, %v6947_v32, 0.0  ;;  %v6810_v17 = vadd.f32 %v6603_v27, %v23256_v56  ;;  %v6607_v30 = vpop.f32.mrb[190].mxu0 }
 0x5e7   : > { %v7315_v0 = vmul.u32 24, %v7314_v60  ;;  %v14955_v12 = vpack.c.bf16 %v7935_v20, %v7934_v3  ;;  %v20747_v25 = vadd.f32 %v6605_v15, %v23257_v14  ;;  %v20750_v19 = vsub.s32 %v20551_v39, %v7304_v45  ;;  %v6609_v41 = vpop.f32.mrb[191].mxu0  ;;  %v8219_v35 = vld [vmem:[#allocation2 + $0x28] sm:$0xf]  ;;  %v20755_v32 = vld [vmem:[#allocation2 + $0x2c] sm:$0xf] }
 0x5e8   : > { %v7325_v28 = vshrl.u32 %v20660_v33, 4  ;;  %v6901_v11 = vadd.f32 %v20293_v23, %v6810_v17  ;;  %v6812_v46 = vadd.f32 %v6607_v30, %v23259_v59  ;;  %v20762_v27 = vadd.s32 224, %v19873_v49  ;;  %v17320_v3 = vld [vmem:[#allocation8 + $0x28] sm:$0xff]  }
 0x5e9   : > { %23258 = vst [vmem:[#allocation49_spill] sm:$0xff] %v20747_v25  ;;  %15131 = vst [vmem:[#allocation2 + $0x30] sm:$0xff] %v14955_v12   ;;  %v14529_v39 = vcombine.low %v20664_v34, %v8219_v35  ;;  %v20766_v33 = vcombine.low %v8219_v35, %v20755_v32  ;;  %v20770_v45 = vadd.s32 232, %v19873_v49  ;;  %v23260_v17 = vsel %vm20398_vm11, %v20320_v8, %v20283_v26  ;;  %v23266_v8 = vld [vmem:[#allocation90_spill] sm:$0xff] }
 0x5ea   : > { %v6948_v20 = vmax.f32 %v6901_v11, 0.0  ;;  %v6902_v56 = vadd.f32 %v20293_v23, %v6812_v46  ;;  %vm20778_vm5 = vcmp.lt.s32.totalorder %v23260_v17, 16  ;;  %v20791_v12 = vadd.s32 24, %v20647_v50  ;;  %15527 = vmatprep.subr.bf16.mxu1 %v17320_v3  ;;  %v6613_v17 = vpop.f32.mrb[24].mxu0 }
 0x5eb   : > { %v20794_v57 = vadd.s32 24, %v20736_v2  ;;  %15477 = vmatprep.mubr.bf16.mxu1 %v14529_v39  ;;  %vm23265_vm11 = vnez %v23199_v40  ;;  %v20808_v30 = vadd.s32 24, %v20739_v1  ;;  %v20811_v11 = vadd.s32 24, %v20750_v19  ;;  %15528 = vmatpush3.bf16.msra.mxu1 %v17320_v3 }
 0x5ec   : > { %v23267_v26 = vsel %vm23265_vm11, %v20352_v53, %v23266_v8  ;;  %v20814_v59 = vsub.s32 %v20565_v5, %v7315_v0  ;;  %v7326_v40 = vmul.u32 24, %v7325_v28  ;;  %v6949_v53 = vmax.f32 %v6902_v56, 0.0  ;;  %v6615_v5 = vpop.f32.mrb[25].mxu0 }
 0x5ed   : > { %vm20801_vm4 = vcmp.lt.s32.totalorder %v23267_v26, 16  ;;  %v7336_v46 = vshrl.u32 %v20721_v43, 4  ;;  %v20820_v41 = vmul.u32.u64.low 2863311531, %v20762_v27  ;;  %v20821_v35 = vmul.u32.u64.high 2863311531, %v20762_v27, %v20820_v41  ;;  %v23273_v26 = vld [vmem:[#allocation78_spill] sm:$0xff]  ;;  %v6617_v48 = vpop.f32.mrb[26].mxu0 }
 0x5ee   : > { %v8756_v39 = vshrl.u32 %v20601_v10, 16  ;;  %vm23270_vm11 = vcmp.lt.s32.totalorder %v20647_v50, 0  ;;  %v23271_v0 = vmov 0  ;;  %vm7574_vm8 = vcmp.ne.s32.totalorder %v20750_v19, 0  ;;  %v6619_v47 = vpop.f32.mrb[27].mxu0 }
 0x5ef   : > { %vm20832_vm0 = vmand %vm23270_vm11, %vm7571_vm7  ;;  %vm7621_vm13 = vcmp.lt.s32.totalorder %v20750_v19, 0  ;;  %v20839_v43 = vmul.u32.u64.low 2863311531, %v20770_v45  ;;  %v20840_v28 = vmul.u32.u64.high 2863311531, %v20770_v45, %v20839_v43  ;;  %v8759_v3 = vshll.u32 %v20601_v10, 16 }
 0x5f0   : > { %v23272_v0 = vsel %vm20832_vm0, 4294967295, %v23271_v0  ;;  %v7936_v56 = vsel %vm20697_vm10, %v6948_v20, 0.0  ;;  %v7937_v8 = vsel %vm20706_vm3, %v6949_v53, 0.0  ;;  %v16053_v41 = vadd.f32 %v6613_v17, %v23273_v26  ;;  %v8221_v9 = vld [vmem:[#allocation2 + $0x30] sm:$0xf]  ;;  %v23278_v17 = vld [vmem:[#allocation81_spill] sm:$0xff] }
 0x5f1   : > { %v14960_v60 = vpack.c.bf16 %v7937_v8, %v7936_v56  ;;  %v20849_v21 = vadd.f32 %v6615_v5, %v23274_v7  ;;  %v20853_v43 = vsub.s32 %v20636_v42, %v7326_v40  ;;  %v16055_v20 = vadd.f32 %v6617_v48, %v23277_v51  ;;  %v20857_v53 = vld [vmem:[#allocation2 + $0x34] sm:$0xf]  ;;  %v17325_v56 = vld [vmem:[#allocation8 + $0x30] sm:$0xff]  }
 0x5f2   : > { %v6903_v10 = vadd.f32 %v16053_v41, %v20293_v23  ;;  %v20865_v5 = vadd.f32 %v6619_v47, %v23278_v17  ;;  %v14530_v42 = vcombine.low %v20755_v32, %v8221_v9  ;;  %v20869_v40 = vcombine.low %v8221_v9, %v20857_v53  ;;  %v23282_v47 = vld [vmem:[#allocation66_spill] sm:$0xff]  ;;  %15529 = vmatprep.subr.bf16.mxu1 %v17325_v56 }
 0x5f3   : > { %23275 = vst [vmem:[#allocation88_spill] sm:$0xff] %v20849_v21  ;;  %23276 = vst [vmem:[#allocation48_spill] sm:$0xff] %v20853_v43  ;;  %v7337_v48 = vmul.u32 24, %v7336_v46  ;;  %v6904_v26 = vadd.f32 %v16055_v20, %v20293_v23  ;;  %v8758_v41 = vrot.slane %v8756_v39, 3  ;;  %v8761_v51 = vrot.slane %v8759_v3, 4  ;;  %v23287_v46 = vld [vmem:[#allocation73_spill] sm:$0xff]  ;;  %15530 = vmatpush3.bf16.msra.mxu1 %v17325_v56 }
 0x5f4   : > { %15132 = vst [vmem:[#allocation2 + $0x38] sm:$0xff] %v14960_v60   ;;  %23279 = vst [vmem:[#allocation51_spill] sm:$0xff] %v20865_v5  ;;  %v6950_v8 = vmax.f32 %v6903_v10, 0.0  ;;  %v8765_v7 = vshrl.u32 %v20687_v38, 16  ;;  %15478 = vmatmul.mubr.bf16.gmra.mrb[184].mxu1 %v14530_v42  ;;  %v23281_v60 = vld [vmem:[#allocation70_spill] sm:$0xff]  ;;  %v23288_v10 = vld [vmem:[#allocation53_spill] sm:$0xff]  ;;  %15531 = vmatprep.subr.bf16.mxu1 %v17328_v24 }
 0x5f5   : > { %v23283_v17 = vsel %vm20430_vm6, %v23281_v60, %v23282_v47  ;;  %v23289_v5 = vsel %vm20487_vm12, %v23287_v46, %v23288_v10  ;;  %v20892_v3 = vadd.s32 24, %v20814_v59  ;;  %v20896_v21 = vadd.s32 240, %v19873_v49  ;;  %v6623_v47 = vpop.f32.mrb[192].mxu0 }
 0x5f6   : > { %vm20878_vm3 = vcmp.lt.s32.totalorder %v23283_v17, 16  ;;  %vm20887_vm11 = vcmp.lt.s32.totalorder %v23289_v5, 16  ;;  %v8768_v20 = vshll.u32 %v20687_v38, 16  ;;  %v6951_v42 = vmax.f32 %v6904_v26, 0.0  ;;  %v23293_v26 = vld [vmem:[#allocation60_spill] sm:$0xff]  ;;  %v6625_v25 = vpop.f32.mrb[193].mxu0 }
 0x5f7   : > { %23292 = vst [vmem:[#allocation50_spill] sm:$0xff] %v20896_v21  ;;  %v20901_v60 = vadd.s32 24, %v20853_v43  ;;  %v7938_v5 = vsel %vm20778_vm5, %v6950_v8, 0.0  ;;  %v7347_v17 = vshrl.u32 %v20821_v35, 4  ;;  %v7358_v9 = vshrl.u32 %v20840_v28, 4  ;;  %v6627_v8 = vpop.f32.mrb[194].mxu0  ;;  %15532 = vmatpush3.bf16.msra.mxu1 %v17328_v24 }
 0x5f8   : > { %v20908_v46 = vadd.s32 248, %v19873_v49  ;;  %v7939_v38 = vsel %vm20801_vm4, %v6951_v42, 0.0  ;;  %v6818_v10 = vadd.f32 %v6623_v47, %v23293_v26  ;;  %vm23294_vm12 = vcmp.ne.s32.totalorder %v20736_v2, 0 }
 0x5f9   : > { %vm23295_vm6 = vcmp.lt.s32.totalorder %v20736_v2, 0  ;;  %v20922_v35 = vsub.s32 %v20675_v55, %v7337_v48  ;;  %v8762_v28 = vor.u32 %v8761_v51, %v8758_v41  ;;  %v14965_v56 = vpack.c.bf16 %v7939_v38, %v7938_v5  ;;  %v23303_v55 = vld [vmem:[#allocation63_spill] sm:$0xff]  ;;  %v6629_v41 = vpop.f32.mrb[195].mxu0 }
 0x5fa   : > { %vm20917_vm10 = vmand %vm23295_vm6, %vm23294_vm12  ;;  %vm23299_vm5 = vcmp.ne.s32.totalorder %v20739_v1, 0  ;;  %vm23300_vm4 = vcmp.lt.s32.totalorder %v20739_v1, 0  ;;  %v20933_v14 = vmul.u32.u64.low 2863311531, %v20896_v21  ;;  %v20934_v42 = vmul.u32.u64.high 2863311531, %v20896_v21, %v20933_v14 }
 0x5fb   : > { %23298 = vst [vmem:[#allocation52_spill] sm:$0xff] %v20922_v35  ;;  %vm20928_vm7 = vmand %vm23300_vm4, %vm23299_vm5  ;;  %v8767_v47 = vrot.slane %v8765_v7, 3  ;;  %v6905_v26 = vadd.f32 %v20293_v23, %v6818_v10  ;;  %v6820_v48 = vadd.f32 %v6627_v8, %v23303_v55  ;;  %v8223_v51 = vld [vmem:[#allocation2 + $0x38] sm:$0xf]  ;;  %v8224_v5 = vld [vmem:[#allocation2 + $0x3c] sm:$0xf] }
 0x5fc   : > { %vm20942_vm6 = vmand %vm7621_vm13, %vm7574_vm8  ;;  %vm23306_vm12 = vsmask.f32 4352  ;;  %v8770_v7 = vrot.slane %v8768_v20, 4  ;;  %15133 = vst [vmem:[#allocation2 + $0x40] sm:$0xff] %v14965_v56   ;;  %v23308_v10 = vld [vmem:[#allocation56_spill] sm:$0xff]  ;;  %v14531_v8 = vcombine.low %v20857_v53, %v8223_v51  ;;  %v20954_v55 = vcombine.low %v8223_v51, %v8224_v5 }
 0x5fd   : > { %v20948_v6 = vsel %vm23306_vm12, %v20650_v62, %v8762_v28  ;;  %v20951_v14 = vadd.f32 %v6629_v41, %v23308_v10  ;;  %vm23310_vm5 = vcmp.ne.s32.totalorder %v20814_v59, 0  ;;  %vm23311_vm13 = vcmp.lt.s32.totalorder %v20814_v59, 0  ;;  %v23326_v56 = vld [vmem:[#allocation64_spill] sm:$0xff] }
 0x5fe   : > { %23307 = vst [vmem:[#allocation90_spill] sm:$0xff] %v20948_v6  ;;  %vm20960_vm8 = vmand %vm23311_vm13, %vm23310_vm5  ;;  %v7348_v21 = vmul.u32 24, %v7347_v17  ;;  %v6952_v62 = vmax.f32 %v6905_v26, 0.0  ;;  %v6906_v20 = vadd.f32 %v20293_v23, %v6820_v48  ;;  %vm23314_vm4 = vcmp.ne.s32.totalorder %v20853_v43, 0  ;;  %15481 = vmatprep.mubr.bf16.mxu1 %v14531_v8  ;;  %v23346_v51 = vld [vmem:[#allocation16_spill] sm:$0xff] }
 0x5ff   : > { %23309 = vst [vmem:[#allocation78_spill] sm:$0xff] %v20951_v14  ;;  %vm23315_vm12 = vcmp.lt.s32.totalorder %v20853_v43, 0  ;;  %v7359_v41 = vmul.u32 24, %v7358_v9  ;;  %v23318_v17 = vsel %vm20574_vm1, %v20518_v54, %v20403_v22  ;;  %v23321_v48 = vsel %vm20590_vm2, %v20545_v63, %v20493_v52  ;;  %v6633_v9 = vpop.f32.mrb[196].mxu0 }
 0x600   : > { %vm20973_vm0 = vmand %vm23315_vm12, %vm23314_vm4  ;;  %vm20982_vm5 = vcmp.lt.s32.totalorder %v23318_v17, 16  ;;  %vm20991_vm13 = vcmp.lt.s32.totalorder %v23321_v48, 16  ;;  %vm7577_vm1 = vcmp.ne.s32.totalorder %v20922_v35, 0  ;;  %vm7624_vm4 = vcmp.lt.s32.totalorder %v20922_v35, 0  ;;  %v23325_v48 = vld [vmem:[#allocation55_spill] sm:$0xff]  ;;  %v6635_v10 = vpop.f32.mrb[197].mxu0 }
 0x601   : > { %v6953_v54 = vmax.f32 %v6906_v20, 0.0  ;;  %v21006_v52 = vmul.u32.u64.low 2863311531, %v20908_v46  ;;  %v21007_v63 = vmul.u32.u64.high 2863311531, %v20908_v46, %v21006_v52  ;;  %v21009_v61 = vor.u32 %v8770_v7, %v8767_v47  ;;  %v6637_v6 = vpop.f32.mrb[198].mxu0  ;;  %vm21040_vm2 = vmand %vm7624_vm4, %vm7577_vm1 }
 0x602   : > { %v21020_v17 = vadd.s32 24, %v20922_v35  ;;  %v21023_v20 = vsub.s32 %v20762_v27, %v7348_v21  ;;  %v7940_v47 = vsel %vm20878_vm3, %v6952_v62, 0.0  ;;  %v6822_v52 = vadd.f32 %v6633_v9, %v23325_v48  ;;  %v23330_v62 = vld [vmem:[#allocation65_spill] sm:$0xff]  ;;  %v23333_v48 = vld [vmem:[#allocation87_spill] sm:$0xff] }
 0x603   : > { %v7941_v7 = vsel %vm20887_vm11, %v6953_v54, 0.0  ;;  %v21031_v22 = vsub.s32 %v20770_v45, %v7359_v41  ;;  %v21034_v14 = vadd.f32 %v6635_v10, %v23326_v56  ;;  %v7369_v32 = vshrl.u32 %v20934_v42, 4  ;;  %v6639_v41 = vpop.f32.mrb[199].mxu0  ;;  %v8225_v54 = vld [vmem:[#allocation2 + $0x40] sm:$0xf] }
 0x604   : > { %23324 = vst [vmem:[#allocation79_spill] sm:$0xff] %v21020_v17  ;;  %v14970_v8 = vpack.c.bf16 %v7941_v7, %v7940_v47  ;;  %v21046_v39 = vadd.s32 256, %v19873_v49  ;;  %v8774_v45 = vshrl.u32 %v20766_v33, 16  ;;  %v6907_v21 = vadd.f32 %v20293_v23, %v6822_v52  ;;  %v8226_v9 = vld [vmem:[#allocation2 + $0x44] sm:$0xf] }
 0x605   : > { %23327 = vst [vmem:[#allocation80_spill] sm:$0xff] %v21034_v14  ;;  %v6824_v56 = vadd.f32 %v6637_v6, %v23330_v62  ;;  %vm23331_vm3 = vsmask.f32 4352  ;;  %v8777_v47 = vshll.u32 %v20766_v33, 16  ;;  %v14532_v42 = vcombine.low %v8224_v5, %v8225_v54  ;;  %v21171_v5 = vld [vmem:[%s22694_s3] ss:$0 sm:$0xff] }
 0x606   : > { %v21053_v10 = vsel %vm23331_vm3, %v8762_v28, %v21009_v61  ;;  %15134 = vst [vmem:[#allocation2 + $0x48] sm:$0xff] %v14970_v8   ;;  %v21056_v7 = vcombine.low %v8225_v54, %v8226_v9  ;;  %v23334_v14 = vshrl.u32 %v23333_v48, 16  ;;  %v6954_v43 = vmax.f32 %v6907_v21, 0.0 }
 0x607   : > { %23332 = vst [vmem:[#allocation81_spill] sm:$0xff] %v21053_v10  ;;  %v6908_v6 = vadd.f32 %v20293_v23, %v6824_v56  ;;  %v21066_v28 = vadd.s32 24, %v21023_v20  ;;  %15482 = vmatmul.mubr.bf16.gmra.mrb[188].mxu1 %v14532_v42  ;;  %v23335_v33 = vsel %vm20670_vm15, %v20640_v18, %v20548_v13  ;;  %v21087_v8 = vadd.s32 24, %v21031_v22  ;;  %v6643_v42 = vpop.f32.mrb[36].mxu0  ;;  %vm23345_vm15 = vmmov %vm23331_vm3 }
 0x608   : > { %v8732_v52 = vrot.slane %v23334_v14, 3  ;;  %vm21073_vm11 = vcmp.lt.s32.totalorder %v23335_v33, 16  ;;  %v23338_v14 = vsel %vm20727_vm9, %v20715_v37, %v20595_v29  ;;  %v23341_v13 = vshll.u32 %v23333_v48, 16  ;;  %v17333_v37 = vld [vmem:[#allocation8 + $0x80] sm:$0xff]   ;;  %v6645_v35 = vpop.f32.mrb[37].mxu0 }
 0x609   : > { %vm21082_vm12 = vcmp.lt.s32.totalorder %v23338_v14, 16  ;;  %v21090_v44 = vmul.u32.u64.low 2863311531, %v21046_v39  ;;  %v21091_v21 = vmul.u32.u64.high 2863311531, %v21046_v39, %v21090_v44  ;;  %v8783_v4 = vshrl.u32 %v20869_v40, 16  ;;  %15581 = vmatprep.subr.bf16.mxu1 %v17333_v37 }
 0x60a   : > { %v8735_v18 = vrot.slane %v23341_v13, 4  ;;  %v6955_v56 = vmax.f32 %v6908_v6, 0.0  ;;  %v7380_v29 = vshrl.u32 %v21007_v63, 4  ;;  %v8776_v41 = vrot.slane %v8774_v45, 3  ;;  %v23342_v44 = vld [vmem:[#allocation14_spill] sm:$0xff]  ;;  %v23343_v45 = vld [vmem:[#allocation15_spill] sm:$0xff] }
 0x60b   : > { %v8786_v54 = vshll.u32 %v20869_v40, 16  ;;  %v7370_v33 = vmul.u32 24, %v7369_v32  ;;  %v8779_v62 = vrot.slane %v8777_v47, 4  ;;  %v7942_v10 = vsel %vm20982_vm5, %v6954_v43, 0.0  ;;  %v6647_v47 = vpop.f32.mrb[38].mxu0 }
 0x60c   : > { %v8736_v14 = vor.u32 %v8735_v18, %v8732_v52  ;;  %v7943_v48 = vsel %vm20991_vm13, %v6955_v56, 0.0  ;;  %v16057_v13 = vadd.f32 %v6643_v42, %v23342_v44  ;;  %v21105_v6 = vadd.s32 264, %v19873_v49  ;;  %v6649_v18 = vpop.f32.mrb[39].mxu0 }
 0x60d   : > { %v14975_v63 = vpack.c.bf16 %v7943_v48, %v7942_v10  ;;  %v8792_v40 = vshrl.u32 %v20954_v55, 16  ;;  %v21109_v32 = vadd.f32 %v6645_v35, %v23343_v45  ;;  %v16059_v52 = vadd.f32 %v6647_v47, %v23346_v51  ;;  %v8227_v56 = vld [vmem:[#allocation2 + $0x48] sm:$0xf]  ;;  %v8228_v42 = vld [vmem:[#allocation2 + $0x4c] sm:$0xf] }
 0x60e   : > { %v21113_v43 = vsel %vm23345_vm15, %v8736_v14, %v23243_v31  ;;  %v6909_v26 = vadd.f32 %v16057_v13, %v20293_v23  ;;  %v8780_v44 = vor.u32 %v8779_v62, %v8776_v41  ;;  %v8785_v37 = vrot.slane %v8783_v4, 3  ;;  %v23347_v10 = vld [vmem:[#allocation82_spill] sm:$0xff] }
 0x60f   : > { %23344 = vst [vmem:[#allocation72_spill] sm:$0xff] %v21109_v32  ;;  %15135 = vst [vmem:[#allocation2 + $0x50] sm:$0xff] %v14975_v63   ;;  %v21118_v48 = vadd.f32 %v6649_v18, %v23347_v10  ;;  %v14533_v35 = vcombine.low %v8226_v9, %v8227_v56  ;;  %v14566_v45 = vcombine.low %v8227_v56, %v8228_v42  ;;  %v8788_v32 = vrot.slane %v8786_v54, 4  ;;  %v23358_v18 = vld [vmem:[#allocation58_spill] sm:$0xff] }
 0x610   : > { %v8795_v17 = vshll.u32 %v20954_v55, 16  ;;  %v6956_v31 = vmax.f32 %v6909_v26, 0.0  ;;  %v6910_v14 = vadd.f32 %v16059_v52, %v20293_v23  ;;  %vm7578_vm9 = vcmp.ne.s32.totalorder %v21023_v20, 0 }
 0x611   : > { %23348 = vst [vmem:[#allocation70_spill] sm:$0xff] %v21118_v48  ;;  %vm7625_vm5 = vcmp.lt.s32.totalorder %v21023_v20, 0  ;;  %v7381_v13 = vmul.u32 24, %v7380_v29  ;;  %15485 = vmatprep.mubr.bf16.mxu1 %v14533_v35  ;;  %v8801_v62 = vshrl.u32 %v21056_v7, 16  ;;  %v8804_v4 = vshll.u32 %v21056_v7, 16 }
 0x612   : > { %v23349_v9 = vsel %vm20786_vm14, %v20732_v16, %v20644_v36  ;;  %vm23352_vm1 = vnez %v23272_v0  ;;  %v21145_v7 = vmul.u32.u64.low 2863311531, %v21105_v6  ;;  %v21146_v41 = vmul.u32.u64.high 2863311531, %v21105_v6, %v21145_v7  ;;  %v23356_v36 = vld [vmem:[#allocation50_spill] sm:$0xff]  ;;  %vm23357_vm14 = vmmov %vm23331_vm3  ;;  %v6653_v0 = vpop.f32.mrb[200].mxu0 }
 0x613   : > { %vm21131_vm13 = vcmp.lt.s32.totalorder %v23349_v9, 16  ;;  %v23353_v23 = vsel %vm23352_vm1, %v20791_v12, %v20647_v50  ;;  %v6957_v34 = vmax.f32 %v6910_v14, 0.0  ;;  %v8810_v54 = vshrl.u32 %v14566_v45, 16  ;;  %v6655_v56 = vpop.f32.mrb[201].mxu0  ;;  %vm23359_vm1 = vmmov %vm23357_vm14 }
 0x614   : > { %vm21140_vm4 = vcmp.lt.s32.totalorder %v23353_v23, 16  ;;  %v21149_v16 = vsub.s32 %v23356_v36, %v7370_v33  ;;  %v21153_v63 = vsel %vm23357_vm14, %v21009_v61, %v8780_v44  ;;  %v8813_v47 = vshll.u32 %v14566_v45, 16  ;;  %v6657_v61 = vpop.f32.mrb[202].mxu0 }
 0x615   : > { %v21156_v50 = vadd.s32 272, %v19873_v49  ;;  %v8789_v12 = vor.u32 %v8788_v32, %v8785_v37  ;;  %v8794_v26 = vrot.slane %v8792_v40, 3  ;;  %v7944_v51 = vsel %vm21073_vm11, %v6956_v31, 0.0  ;;  %v23360_v37 = vld [vmem:[#allocation57_spill] sm:$0xff]  ;;  %v6659_v31 = vpop.f32.mrb[203].mxu0  ;;  %vm23363_vm11 = vmmov %vm23359_vm1 }
 0x616   : > { %v7945_v52 = vsel %vm21082_vm12, %v6957_v34, 0.0  ;;  %v6830_v33 = vadd.f32 %v6653_v0, %v23358_v18  ;;  %v8797_v10 = vrot.slane %v8795_v17, 4  ;;  %vm7579_vm3 = vcmp.ne.s32.totalorder %v21031_v22, 0  ;;  %v8229_v14 = vld [vmem:[#allocation2 + $0x50] sm:$0xf]  ;;  %v23361_v34 = vld [vmem:[#allocation61_spill] sm:$0xff] }
 0x617   : > { %v14980_v35 = vpack.c.bf16 %v7945_v52, %v7944_v51  ;;  %vm7626_vm15 = vcmp.lt.s32.totalorder %v21031_v22, 0  ;;  %v21166_v45 = vsel %vm23359_vm1, %v8780_v44, %v8789_v12  ;;  %v8803_v40 = vrot.slane %v8801_v62, 3  ;;  %v8230_v9 = vld [vmem:[#allocation2 + $0x54] sm:$0xf]  ;;  %v6663_v56 = vpop.f32.mrb[204].mxu0 }
 0x618   : > { %v8806_v32 = vrot.slane %v8804_v4, 4  ;;  %v6911_v24 = vadd.f32 %v21171_v5, %v6830_v33  ;;  %v6832_v17 = vadd.f32 %v6657_v61, %v23360_v37  ;;  %v8798_v23 = vor.u32 %v8797_v10, %v8794_v26 }
 0x619   : > { %v8812_v7 = vrot.slane %v8810_v54, 3  ;;  %15136 = vst [vmem:[#allocation2 + $0x58] sm:$0xff] %v14980_v35   ;;  %v21176_v44 = vadd.f32 %v6659_v31, %v23361_v34  ;;  %v14534_v62 = vcombine.low %v8228_v42, %v8229_v14  ;;  %v14567_v4 = vcombine.low %v8229_v14, %v8230_v9 }
 0x61a   : > { %v8807_v36 = vor.u32 %v8806_v32, %v8803_v40  ;;  %v6958_v0 = vmax.f32 %v6911_v24, 0.0  ;;  %v6912_v51 = vadd.f32 %v21171_v5, %v6832_v17  ;;  %v21180_v52 = vsel %vm23363_vm11, %v8789_v12, %v8798_v23  ;;  %v23372_v24 = vld [vmem:[#allocation59_spill] sm:$0xff]  ;;  %v6665_v17 = vpop.f32.mrb[205].mxu0 }
 0x61b   : > { %23362 = vst [vmem:[#allocation66_spill] sm:$0xff] %v21176_v44  ;;  %v8815_v18 = vrot.slane %v8813_v47, 4  ;;  %15486 = vmatmul.mubr.bf16.gmra.mrb[192].mxu1 %v14534_v62  ;;  %v23364_v54 = vsel %vm20917_vm10, %v20794_v57, %v20736_v2  ;;  %v23367_v42 = vsel %vm20928_vm7, %v20808_v30, %v20739_v1  ;;  %v8819_v47 = vshrl.u32 %v14567_v4, 16  ;;  %vm21216_vm7 = vmand %vm7625_vm5, %vm7578_vm9  ;;  %v23375_v62 = vld [vmem:[#allocation26_spill] sm:$0xff] }
 0x61c   : > { %vm21187_vm12 = vcmp.lt.s32.totalorder %v23364_v54, 16  ;;  %vm21196_vm14 = vcmp.lt.s32.totalorder %v23367_v42, 16  ;;  %v8822_v12 = vshll.u32 %v14567_v4, 16  ;;  %v21201_v15 = vsub.s32 %v20908_v46, %v7381_v13  ;;  %vm23376_vm9 = vmmov %vm23359_vm1 }
 0x61d   : > { %v21204_v2 = vsel %vm23359_vm1, %v8798_v23, %v8807_v36  ;;  %v6959_v57 = vmax.f32 %v6912_v51, 0.0  ;;  %vm7580_vm10 = vcmp.ne.s32.totalorder %v21149_v16, 0  ;;  %vm7627_vm11 = vcmp.lt.s32.totalorder %v21149_v16, 0  ;;  %v23373_v23 = vld [vmem:[#allocation25_spill] sm:$0xff]  ;;  %vm21256_vm5 = vmand %vm7626_vm15, %vm7579_vm3 }
 0x61e   : > { %v21209_v25 = vmul.u32.u64.low 2863311531, %v21156_v50  ;;  %v21210_v1 = vmul.u32.u64.high 2863311531, %v21156_v50, %v21209_v25  ;;  %v8816_v30 = vor.u32 %v8815_v18, %v8812_v7  ;;  %v7391_v13 = vshrl.u32 %v21091_v21, 4  ;;  %v6667_v21 = vpop.f32.mrb[206].mxu0 }
 0x61f   : > { %v7402_v10 = vshrl.u32 %v21146_v41, 4  ;;  %v8821_v35 = vrot.slane %v8819_v47, 3  ;;  %v8824_v61 = vrot.slane %v8822_v12, 4  ;;  %v7946_v40 = vsel %vm21131_vm13, %v6958_v0, 0.0  ;;  %v6669_v4 = vpop.f32.mrb[207].mxu0 }
 0x620   : > { %v7947_v32 = vsel %vm21140_vm4, %v6959_v57, 0.0  ;;  %v6834_v37 = vadd.f32 %v6663_v56, %v23372_v24  ;;  %v21228_v31 = vsel %vm23359_vm1, %v8807_v36, %v8816_v30  ;;  %v21231_v7 = vadd.f32 %v6665_v17, %v23373_v23  ;;  %v8231_v0 = vld [vmem:[#allocation2 + $0x58] sm:$0xf]  ;;  %v8232_v51 = vld [vmem:[#allocation2 + $0x5c] sm:$0xf]  ;;  %v6673_v58 = vpop.f32.mrb[48].mxu0 }
 0x621   : > { %v14985_v14 = vpack.c.bf16 %v7947_v32, %v7946_v40  ;;  %v21234_v41 = vadd.s32 280, %v19873_v49  ;;  %v8825_v34 = vor.u32 %v8824_v61, %v8821_v35  ;;  %v6836_v29 = vadd.f32 %v6667_v21, %v23375_v62 }
 0x622   : > { %23374 = vst [vmem:[#allocation93_spill] sm:$0xff] %v21231_v7  ;;  %v6913_v55 = vadd.f32 %v21171_v5, %v6834_v37  ;;  %v7766_v36 = vsel %vm21216_vm7, %v21066_v28, %v21023_v20  ;;  %v21243_v18 = vadd.s32 288, %v19873_v49  ;;  %v14535_v54 = vcombine.low %v8230_v9, %v8231_v0 }
 0x623   : > { %15137 = vst [vmem:[#allocation2 + $0x60] sm:$0xff] %v14985_v14   ;;  %v14568_v42 = vcombine.low %v8231_v0, %v8232_v51  ;;  %v21246_v47 = vadd.s32 24, %v21149_v16  ;;  %v21249_v12 = vsel %vm23376_vm9, %v8816_v30, %v8825_v34  ;;  %v6914_v25 = vadd.f32 %v21171_v5, %v6836_v29  ;;  %v6675_v29 = vpop.f32.mrb[49].mxu0 }
 0x624   : > { %v6960_v57 = vmax.f32 %v6913_v55, 0.0  ;;  %vm7581_vm13 = vcmp.ne.s32.totalorder %v21201_v15, 0  ;;  %vm7628_vm4 = vcmp.lt.s32.totalorder %v21201_v15, 0  ;;  %v7392_v9 = vmul.u32 24, %v7391_v13  ;;  %15489 = vmatprep.mubr.bf16.mxu1 %v14535_v54  ;;  %v23385_v55 = vld [vmem:[#allocation19_spill] sm:$0xff]  ;;  %v23386_v54 = vld [vmem:[#allocation22_spill] sm:$0xff] }
 0x625   : > { %v23379_v30 = vsel %vm20942_vm6, %v20811_v11, %v20750_v19  ;;  %v23382_v61 = vsel %vm20960_vm8, %v20892_v3, %v20814_v59  ;;  %v8828_v13 = vshrl.u32 %v14568_v42, 16  ;;  %v8831_v32 = vshll.u32 %v14568_v42, 16  ;;  %vm21310_vm6 = vmand %vm7627_vm11, %vm7580_vm10 }
 0x626   : > { %vm21267_vm1 = vcmp.lt.s32.totalorder %v23379_v30, 16  ;;  %vm21276_vm3 = vcmp.lt.s32.totalorder %v23382_v61, 16  ;;  %v21281_v38 = vmul.u32.u64.low 2863311531, %v21234_v41  ;;  %v21282_v24 = vmul.u32.u64.high 2863311531, %v21234_v41, %v21281_v38  ;;  %vm23393_vm8 = vmmov %vm23376_vm9 }
 0x627   : > { %v6961_v19 = vmax.f32 %v6914_v25, 0.0  ;;  %v7403_v11 = vmul.u32 24, %v7402_v10  ;;  %v21285_v37 = vmul.u32.u64.low 2863311531, %v21243_v18  ;;  %v21286_v17 = vmul.u32.u64.high 2863311531, %v21243_v18, %v21285_v37  ;;  %v6677_v25 = vpop.f32.mrb[50].mxu0  ;;  %vm23409_vm9 = vmmov %vm23393_vm8 }
 0x628   : > { %v7767_v59 = vsel %vm21256_vm5, %v21087_v8, %v21031_v22  ;;  %v21293_v3 = vadd.s32 24, %v21201_v15  ;;  %v8830_v14 = vrot.slane %v8828_v13, 3  ;;  %v8833_v23 = vrot.slane %v8831_v32, 4  ;;  %v6679_v61 = vpop.f32.mrb[51].mxu0  ;;  %v23391_v37 = vld [vmem:[#allocation13_spill] sm:$0xff] }
 0x629   : > { %v7948_v21 = vsel %vm21187_vm12, %v6960_v57, 0.0  ;;  %v7949_v10 = vsel %vm21196_vm14, %v6961_v19, 0.0  ;;  %v16061_v62 = vadd.f32 %v6673_v58, %v23385_v55  ;;  %v21301_v4 = vsub.s32 %v21046_v39, %v7392_v9  ;;  %v23390_v39 = vld [vmem:[#allocation23_spill] sm:$0xff]  ;;  %v6683_v27 = vpop.f32.mrb[208].mxu0 }
 0x62a   : > { %v14990_v0 = vpack.c.bf16 %v7949_v10, %v7948_v21  ;;  %v21304_v42 = vadd.f32 %v6675_v29, %v23386_v54  ;;  %v7413_v33 = vshrl.u32 %v21210_v1, 4  ;;  %v8834_v57 = vor.u32 %v8833_v23, %v8830_v14  ;;  %v8233_v13 = vld [vmem:[#allocation2 + $0x60] sm:$0xf]  ;;  %v8234_v32 = vld [vmem:[#allocation2 + $0x64] sm:$0xf] }
 0x62b   : > { %v6915_v30 = vadd.f32 %v21171_v5, %v16061_v62  ;;  %v16063_v9 = vadd.f32 %v6677_v25, %v23390_v39  ;;  %v21318_v38 = vsub.s32 %v21105_v6, %v7403_v11  ;;  %v21321_v19 = vadd.s32 296, %v19873_v49  ;;  %v23394_v11 = vld [vmem:[#allocation48_spill] sm:$0xff]  ;;  %v22098_v44 = vld [vmem:[#allocation2 + $0x64] sm:$0xf] }
 0x62c   : > { %23387 = vst [vmem:[#allocation73_spill] sm:$0xff] %v21304_v42  ;;  %15138 = vst [vmem:[#allocation2 + $0x68] sm:$0xff] %v14990_v0   ;;  %v21324_v58 = vadd.f32 %v6679_v61, %v23391_v37  ;;  %v14536_v21 = vcombine.low %v8232_v51, %v8233_v13  ;;  %v14569_v1 = vcombine.low %v8233_v13, %v8234_v32  ;;  %vm7582_vm15 = vcmp.ne.s32.totalorder %v21301_v4, 0  ;;  %v23399_v62 = vld [vmem:[#allocation52_spill] sm:$0xff] }
 0x62d   : > { %v21327_v14 = vsel %vm23393_vm8, %v8825_v34, %v8834_v57  ;;  %v6962_v23 = vmax.f32 %v6915_v30, 0.0  ;;  %v6916_v10 = vadd.f32 %v21171_v5, %v16063_v9  ;;  %v23395_v51 = vsel %vm20973_vm0, %v20901_v60, %v23394_v11  ;;  %v23398_v34 = vld [vmem:[#allocation79_spill] sm:$0xff]  ;;  %vm21365_vm0 = vmand %vm7628_vm4, %vm7581_vm13  ;;  %v6685_v11 = vpop.f32.mrb[209].mxu0 }
 0x62e   : > { %23392 = vst [vmem:[#allocation53_spill] sm:$0xff] %v21324_v58  ;;  %15490 = vmatmul.mubr.bf16.gmra.mrb[196].mxu1 %v14536_v21  ;;  %vm21340_vm12 = vcmp.lt.s32.totalorder %v23395_v51, 16  ;;  %v23400_v29 = vsel %vm21040_vm2, %v23398_v34, %v23399_v62  ;;  %v8837_v54 = vshrl.u32 %v14569_v1, 16  ;;  %v8840_v25 = vshll.u32 %v14569_v1, 16  ;;  %v23405_v1 = vld [vmem:[#allocation27_spill] sm:$0xff]  ;;  %v6687_v62 = vpop.f32.mrb[210].mxu0 }
 0x62f   : > { %vm21349_vm14 = vcmp.lt.s32.totalorder %v23400_v29, 16  ;;  %vm7629_vm10 = vcmp.lt.s32.totalorder %v21301_v4, 0  ;;  %v7414_v53 = vmul.u32 24, %v7413_v33  ;;  %v6963_v30 = vmax.f32 %v6916_v10, 0.0  ;;  %v6689_v40 = vpop.f32.mrb[211].mxu0 }
 0x630   : > { %v21355_v60 = vadd.s32 24, %v21301_v4  ;;  %v21358_v39 = vmul.u32.u64.low 2863311531, %v21321_v19  ;;  %v21359_v9 = vmul.u32.u64.high 2863311531, %v21321_v19, %v21358_v39  ;;  %vm7583_vm2 = vcmp.ne.s32.totalorder %v21318_v38, 0  ;;  %v6693_v56 = vpop.f32.mrb[212].mxu0  ;;  %vm21428_vm7 = vmand %vm7629_vm10, %vm7582_vm15 }
 0x631   : > { %vm7630_vm11 = vcmp.lt.s32.totalorder %v21318_v38, 0  ;;  %v8839_v33 = vrot.slane %v8837_v54, 3  ;;  %v8842_v13 = vrot.slane %v8840_v25, 4  ;;  %v7950_v37 = vsel %vm21267_vm1, %v6962_v23, 0.0  ;;  %v23406_v23 = vld [vmem:[#allocation34_spill] sm:$0xff]  ;;  %vm23424_vm15 = vmmov %vm23409_vm9 }
 0x632   : > { %v7951_v21 = vsel %vm21276_vm3, %v6963_v30, 0.0  ;;  %v6842_v10 = vadd.f32 %v6683_v27, %v23405_v1  ;;  %v7424_v51 = vshrl.u32 %v21282_v24, 4  ;;  %v21378_v29 = vsub.s32 %v21156_v50, %v7414_v53  ;;  %v23407_v50 = vld [vmem:[#allocation67_spill] sm:$0xff]  ;;  %vm21451_vm5 = vmand %vm7630_vm11, %vm7583_vm2  ;;  %v22094_v58 = vld [vmem:[#allocation2 + $0x60] sm:$0xf] }
 0x633   : > { %v14995_v34 = vpack.c.bf16 %v7951_v21, %v7950_v37  ;;  %v21381_v39 = vadd.s32 304, %v19873_v49  ;;  %v8843_v54 = vor.u32 %v8842_v13, %v8839_v33  ;;  %v6844_v25 = vadd.f32 %v6687_v62, %v23406_v23  ;;  %v8235_v30 = vld [vmem:[#allocation2 + $0x68] sm:$0xf]  ;;  %v8236_v6 = vld [vmem:[#allocation2 + $0x6c] sm:$0xf] }
 0x634   : > { %v6917_v35 = vadd.f32 %v21171_v5, %v6842_v10  ;;  %v7769_v24 = vsel %vm21365_vm0, %v21293_v3, %v21201_v15  ;;  %v7435_v27 = vshrl.u32 %v21286_v17, 4  ;;  %v21391_v53 = vadd.f32 %v6689_v40, %v23407_v50  ;;  %v23417_v40 = vld [vmem:[#allocation69_spill] sm:$0xff]  ;;  %v22100_v7 = vld [vmem:[#allocation2 + $0x6c] sm:$0xf] }
 0x635   : > { %15139 = vst [vmem:[#allocation2 + $0x70] sm:$0xff] %v14995_v34   ;;  %v14537_v37 = vcombine.low %v8234_v32, %v8235_v30  ;;  %v14570_v33 = vcombine.low %v8235_v30, %v8236_v6  ;;  %v21394_v13 = vsel %vm23409_vm9, %v8834_v57, %v8843_v54  ;;  %v6918_v1 = vadd.f32 %v21171_v5, %v6844_v25  ;;  %v23416_v34 = vld [vmem:[#allocation62_spill] sm:$0xff]  ;;  %v23435_v15 = vld [vmem:[#allocation17_spill] sm:$0xff] }
 0x636   : > { %23408 = vst [vmem:[#allocation60_spill] sm:$0xff] %v21391_v53  ;;  %v6964_v21 = vmax.f32 %v6917_v35, 0.0  ;;  %v21398_v10 = vadd.s32 24, %v21318_v38  ;;  %v7425_v11 = vmul.u32 24, %v7424_v51  ;;  %vm21405_vm13 = vcmp.lt.s32.totalorder %v7766_v36, 16  ;;  %v6695_v35 = vpop.f32.mrb[213].mxu0 }
 0x637   : > { %15493 = vmatprep.mubr.bf16.mxu1 %v14537_v37  ;;  %vm21414_vm4 = vcmp.lt.s32.totalorder %v7767_v59, 16  ;;  %v8846_v3 = vshrl.u32 %v14570_v33, 16  ;;  %v8849_v57 = vshll.u32 %v14570_v33, 16  ;;  %vm7584_vm1 = vcmp.ne.s32.totalorder %v21378_v29, 0  ;;  %v23421_v37 = vld [vmem:[#allocation68_spill] sm:$0xff] }
 0x638   : > { %vm7631_vm3 = vcmp.lt.s32.totalorder %v21378_v29, 0  ;;  %v6965_v20 = vmax.f32 %v6918_v1, 0.0  ;;  %v21421_v28 = vadd.s32 24, %v21378_v29  ;;  %v7436_v46 = vmul.u32 24, %v7435_v27  ;;  %v6697_v27 = vpop.f32.mrb[214].mxu0 }
 0x639   : > { %v7446_v36 = vshrl.u32 %v21359_v9, 4  ;;  %v21433_v8 = vmul.u32.u64.low 2863311531, %v21381_v39  ;;  %v21434_v59 = vmul.u32.u64.high 2863311531, %v21381_v39, %v21433_v8  ;;  %v8848_v32 = vrot.slane %v8846_v3, 3  ;;  %vm21468_vm8 = vmand %vm7631_vm3, %vm7584_vm1  ;;  %v22096_v53 = vld [vmem:[#allocation2 + $0x68] sm:$0xf] }
 0x63a   : > { %v8851_v61 = vrot.slane %v8849_v57, 4  ;;  %v7952_v51 = vsel %vm21340_vm12, %v6964_v21, 0.0  ;;  %v7953_v9 = vsel %vm21349_vm14, %v6965_v20, 0.0  ;;  %v6846_v62 = vadd.f32 %v6693_v56, %v23416_v34  ;;  %v6699_v21 = vpop.f32.mrb[215].mxu0 }
 0x63b   : > { %v21442_v23 = vsub.s32 %v21234_v41, %v7425_v11  ;;  %v15000_v25 = vpack.c.bf16 %v7953_v9, %v7952_v51  ;;  %v21445_v30 = vadd.f32 %v6695_v35, %v23417_v40  ;;  %v21456_v0 = vadd.s32 312, %v19873_v49  ;;  %v6703_v9 = vpop.f32.mrb[60].mxu0  ;;  %v23432_v40 = vld [vmem:[#allocation31_spill] sm:$0xff] }
 0x63c   : > { %v8852_v50 = vor.u32 %v8851_v61, %v8848_v32  ;;  %v6919_v41 = vadd.f32 %v21171_v5, %v6846_v62  ;;  %v6848_v33 = vadd.f32 %v6697_v27, %v23421_v37  ;;  %v8237_v1 = vld [vmem:[#allocation2 + $0x70] sm:$0xf]  ;;  %v8238_v11 = vld [vmem:[#allocation2 + $0x74] sm:$0xf]  ;;  %v7770_v3 = vsel %vm21428_vm7, %v21355_v60, %v21301_v4  ;;  %v6705_v55 = vpop.f32.mrb[61].mxu0 }
 0x63d   : > { %23418 = vst [vmem:[#allocation63_spill] sm:$0xff] %v21445_v30  ;;  %v7447_v20 = vmul.u32 24, %v7446_v36  ;;  %15140 = vst [vmem:[#allocation2 + $0x78] sm:$0xff] %v15000_v25   ;;  %v14538_v56 = vcombine.low %v8236_v6, %v8237_v1  ;;  %v14571_v8 = vcombine.low %v8237_v1, %v8238_v11  ;;  %v21473_v32 = vsub.s32 %v21243_v18, %v7436_v46  ;;  %v23433_v37 = vld [vmem:[#allocation32_spill] sm:$0xff]  ;;  %v6707_v21 = vpop.f32.mrb[62].mxu0 }
 0x63e   : > { %v21476_v61 = vsel %vm23424_vm15, %v8843_v54, %v8852_v50  ;;  %v6966_v22 = vmax.f32 %v6919_v41, 0.0  ;;  %v6920_v4 = vadd.f32 %v21171_v5, %v6848_v33  ;;  %vm7585_vm12 = vcmp.ne.s32.totalorder %v21442_v23, 0  ;;  %v22102_v48 = vld [vmem:[#allocation2 + $0x70] sm:$0xf] }
 0x63f   : > { %vm7632_vm14 = vcmp.lt.s32.totalorder %v21442_v23, 0  ;;  %15494 = vmatmul.mubr.bf16.gmra.mrb[200].mxu1 %v14538_v56  ;;  %v23425_v6 = vsel %vm21310_vm6, %v21246_v47, %v21149_v16  ;;  %vm21490_vm0 = vcmp.lt.s32.totalorder %v7769_v24, 16  ;;  %v8855_v54 = vshrl.u32 %v14571_v8, 16 }
 0x640   : > { %vm21486_vm10 = vcmp.lt.s32.totalorder %v23425_v6, 16  ;;  %v8858_v46 = vshll.u32 %v14571_v8, 16  ;;  %v7771_v36 = vsel %vm21451_vm5, %v21398_v10, %v21318_v38  ;;  %v7772_v16 = vsel %vm21468_vm8, %v21421_v28, %v21378_v29  ;;  %vm21509_vm6 = vmand %vm7632_vm14, %vm7585_vm12  ;;  %v6709_v8 = vpop.f32.mrb[63].mxu0 }
 0x641   : > { %v6967_v47 = vmax.f32 %v6920_v4, 0.0  ;;  %v21503_v26 = vadd.s32 24, %v21442_v23  ;;  %v21506_v24 = vmul.u32.u64.low 2863311531, %v21456_v0  ;;  %v21507_v51 = vmul.u32.u64.high 2863311531, %v21456_v0, %v21506_v24  ;;  %vm23448_vm5 = vmmov %vm23409_vm9 }
 0x642   : > { %vm7586_vm2 = vcmp.ne.s32.totalorder %v21473_v32, 0  ;;  %v21515_v38 = vsub.s32 %v21321_v19, %v7447_v20  ;;  %v8857_v10 = vrot.slane %v8855_v54, 3  ;;  %v8860_v62 = vrot.slane %v8858_v46, 4  ;;  %v23436_v54 = vld [vmem:[#allocation33_spill] sm:$0xff] }
 0x643   : > { %v7954_v35 = vsel %vm21405_vm13, %v6966_v22, 0.0  ;;  %v7955_v25 = vsel %vm21414_vm4, %v6967_v47, 0.0  ;;  %v16065_v27 = vadd.f32 %v6703_v9, %v23432_v40  ;;  %vm7633_vm11 = vcmp.lt.s32.totalorder %v21473_v32, 0  ;;  %23549 = vst [vmem:[#allocation33_spill] sm:$0xff] %v22094_v58 }
 0x644   : > { %v15005_v41 = vpack.c.bf16 %v7955_v25, %v7954_v35  ;;  %v21524_v33 = vadd.f32 %v6705_v55, %v23433_v37  ;;  %v7457_v19 = vshrl.u32 %v21434_v59, 4  ;;  %v8861_v1 = vor.u32 %v8860_v62, %v8857_v10  ;;  %v8239_v17 = vld [vmem:[#allocation2 + $0x78] sm:$0xf]  ;;  %v8240_v22 = vld [vmem:[#allocation2 + $0x7c] sm:$0xf]  ;;  %vm21579_vm7 = vmand %vm7633_vm11, %vm7586_vm2 }
 0x645   : > { %v6921_v20 = vadd.f32 %v21171_v5, %v16065_v27  ;;  %v16067_v56 = vadd.f32 %v6707_v21, %v23435_v15  ;;  %v7773_v4 = vsel %vm21509_vm6, %v21503_v26, %v21442_v23  ;;  %v21534_v6 = vadd.s32 320, %v19873_v49  ;;  %v23442_v15 = vld [vmem:[#allocation24_spill] sm:$0xff]  ;;  %vm23461_vm6 = vmmov %vm23448_vm5 }
 0x646   : > { %23434 = vst [vmem:[#allocation56_spill] sm:$0xff] %v21524_v33  ;;  %15141 = vst [vmem:[#allocation2 + $0x80] sm:$0xff] %v15005_v41   ;;  %v21537_v46 = vadd.f32 %v6709_v8, %v23436_v54  ;;  %v14539_v59 = vcombine.low %v8238_v11, %v8239_v17  ;;  %v14572_v47 = vcombine.low %v8239_v17, %v8240_v22  ;;  %v21544_v62 = vadd.s32 24, %v21473_v32  ;;  %v22092_v33 = vld [vmem:[#allocation2 + $0x5c] sm:$0xf] }
 0x647   : > { %v21540_v24 = vsel %vm23409_vm9, %v8852_v50, %v8861_v1  ;;  %v6968_v9 = vmax.f32 %v6921_v20, 0.0  ;;  %v6922_v10 = vadd.f32 %v21171_v5, %v16067_v56  ;;  %vm7587_vm13 = vcmp.ne.s32.totalorder %v21515_v38, 0  ;;  %23548 = vst [vmem:[#allocation17_spill] sm:$0xff] %v22092_v33  ;;  %23550 = vst [vmem:[#allocation24_spill] sm:$0xff] %v22096_v53 }
 0x648   : > { %23437 = vst [vmem:[#allocation55_spill] sm:$0xff] %v21537_v46  ;;  %15497 = vmatprep.mubr.bf16.mxu1 %v14539_v59  ;;  %vm21547_vm4 = vcmp.lt.s32.totalorder %v7770_v3, 16  ;;  %vm21551_vm1 = vcmp.lt.s32.totalorder %v7771_v36, 16  ;;  %v8864_v11 = vshrl.u32 %v14572_v47, 16  ;;  %v8867_v50 = vshll.u32 %v14572_v47, 16  ;;  %v6713_v3 = vpop.f32.mrb[216].mxu0 }
 0x649   : > { %vm7634_vm3 = vcmp.lt.s32.totalorder %v21515_v38, 0  ;;  %v21557_v34 = vadd.s32 328, %v19873_v49  ;;  %v6969_v35 = vmax.f32 %v6922_v10, 0.0  ;;  %v7458_v25 = vmul.u32 24, %v7457_v19  ;;  %v6715_v56 = vpop.f32.mrb[217].mxu0 }
 0x64a   : > { %v21560_v40 = vmul.u32.u64.low 2863311531, %v21534_v6  ;;  %v21561_v27 = vmul.u32.u64.high 2863311531, %v21534_v6, %v21560_v40  ;;  %v21564_v55 = vadd.s32 24, %v21515_v38  ;;  %v7468_v36 = vshrl.u32 %v21507_v51, 4  ;;  %v6717_v54 = vpop.f32.mrb[218].mxu0  ;;  %vm21630_vm8 = vmand %vm7634_vm3, %vm7587_vm13 }
 0x64b   : > { %v8866_v41 = vrot.slane %v8864_v11, 3  ;;  %v8869_v37 = vrot.slane %v8867_v50, 4  ;;  %v7956_v21 = vsel %vm21486_vm10, %v6968_v9, 0.0  ;;  %v7957_v20 = vsel %vm21490_vm0, %v6969_v35, 0.0  ;;  %v23445_v9 = vld [vmem:[#allocation20_spill] sm:$0xff]  ;;  %v6719_v11 = vpop.f32.mrb[219].mxu0 }
 0x64c   : > { %v6854_v19 = vadd.f32 %v6713_v3, %v23442_v15  ;;  %v21573_v8 = vadd.s32 336, %v19873_v49  ;;  %v15010_v17 = vpack.c.bf16 %v7957_v20, %v7956_v21  ;;  %v6856_v10 = vadd.f32 %v6717_v54, %v23445_v9  ;;  %v23446_v21 = vld [vmem:[#allocation30_spill] sm:$0xff]  ;;  %v6723_v28 = vpop.f32.mrb[220].mxu0  ;;  %v23455_v9 = vld [vmem:[#allocation35_spill] sm:$0xff]  ;;  %v22086_v46 = vld [vmem:[#allocation2 + $0x54] sm:$0xf] }
 0x64d   : > { %v21584_v60 = vmul.u32.u64.low 2863311531, %v21557_v34  ;;  %v21585_v18 = vmul.u32.u64.high 2863311531, %v21557_v34, %v21584_v60  ;;  %v8870_v59 = vor.u32 %v8869_v37, %v8866_v41  ;;  %v8241_v50 = vld [vmem:[#allocation2 + $0x80] sm:$0xf]  ;;  %v8242_v35 = vld [vmem:[#allocation2 + $0x84] sm:$0xf]  ;;  %v21590_v40 = vsub.s32 %v21381_v39, %v7458_v25 }
 0x64e   : > { %v6923_v47 = vadd.f32 %v21171_v5, %v6854_v19  ;;  %v21593_v3 = vadd.s32 344, %v19873_v49  ;;  %15142 = vst [vmem:[#allocation2 + $0x88] sm:$0xff] %v15010_v17   ;;  %v21596_v20 = vadd.f32 %v6719_v11, %v23446_v21  ;;  %v14540_v15 = vcombine.low %v8240_v22, %v8241_v50  ;;  %v6725_v11 = vpop.f32.mrb[221].mxu0  ;;  %v23471_v22 = vld [vmem:[#allocation42_spill] sm:$0xff]  ;;  %23547 = vst [vmem:[#allocation32_spill] sm:$0xff] %v22086_v46 }
 0x64f   : > { %v14573_v56 = vcombine.low %v8241_v50, %v8242_v35  ;;  %v21599_v41 = vsel %vm23448_vm5, %v8861_v1, %v8870_v59  ;;  %v6924_v19 = vadd.f32 %v21171_v5, %v6856_v10  ;;  %v7774_v39 = vsel %vm21579_vm7, %v21544_v62, %v21473_v32  ;;  %23551 = vst [vmem:[#allocation20_spill] sm:$0xff] %v22098_v44 }
 0x650   : > { %23447 = vst [vmem:[#allocation64_spill] sm:$0xff] %v21596_v20  ;;  %v6970_v37 = vmax.f32 %v6923_v47, 0.0  ;;  %v7469_v25 = vmul.u32 24, %v7468_v36  ;;  %15498 = vmatmul.mubr.bf16.gmra.mrb[204].mxu1 %v14540_v15  ;;  %vm21611_vm15 = vcmp.lt.s32.totalorder %v7772_v16, 16  ;;  %vm21615_vm12 = vcmp.lt.s32.totalorder %v7773_v4, 16  ;;  %v23456_v15 = vld [vmem:[#allocation18_spill] sm:$0xff] }
 0x651   : > { %v8873_v17 = vshrl.u32 %v14573_v56, 16  ;;  %v8876_v54 = vshll.u32 %v14573_v56, 16  ;;  %v21620_v51 = vmul.u32.u64.low 2863311531, %v21573_v8  ;;  %v21621_v32 = vmul.u32.u64.high 2863311531, %v21573_v8, %v21620_v51  ;;  %v17348_v20 = vld [vmem:[#allocation8 + $0xc8] sm:$0xff]   ;;  %23552 = vst [vmem:[#allocation30_spill] sm:$0xff] %v22100_v7 }
 0x652   : > { %v6971_v62 = vmax.f32 %v6924_v19, 0.0  ;;  %vm7588_vm14 = vcmp.ne.s32.totalorder %v21590_v40, 0  ;;  %vm7635_vm10 = vcmp.lt.s32.totalorder %v21590_v40, 0  ;;  %v7479_v29 = vshrl.u32 %v21561_v27, 4  ;;  %v6727_v19 = vpop.f32.mrb[222].mxu0  ;;  %23553 = vst [vmem:[#allocation35_spill] sm:$0xff] %v22102_v48 }
 0x653   : > { %v21635_v16 = vmul.u32.u64.low 2863311531, %v21593_v3  ;;  %v21636_v4 = vmul.u32.u64.high 2863311531, %v21593_v3, %v21635_v16  ;;  %v8875_v36 = vrot.slane %v8873_v17, 3  ;;  %v8878_v60 = vrot.slane %v8876_v54, 4  ;;  %v6729_v51 = vpop.f32.mrb[223].mxu0  ;;  %vm21662_vm0 = vmand %vm7635_vm10, %vm7588_vm14 }
 0x654   : > { %v7958_v47 = vsel %vm21547_vm4, %v6970_v37, 0.0  ;;  %v7959_v27 = vsel %vm21551_vm1, %v6971_v62, 0.0  ;;  %v6858_v10 = vadd.f32 %v6723_v28, %v23455_v9  ;;  %v21644_v50 = vsub.s32 %v21456_v0, %v7469_v25  ;;  %v23458_v37 = vld [vmem:[#allocation37_spill] sm:$0xff]  ;;  %v23468_v51 = vld [vmem:[#allocation40_spill] sm:$0xff]  ;;  %vm23474_vm1 = vmmov %vm23448_vm5 }
 0x655   : > { %v15015_v21 = vpack.c.bf16 %v7959_v27, %v7958_v47  ;;  %v21647_v56 = vadd.f32 %v6725_v11, %v23456_v15  ;;  %v21650_v17 = vadd.s32 24, %v21590_v40  ;;  %v8879_v54 = vor.u32 %v8878_v60, %v8875_v36  ;;  %v8243_v62 = vld [vmem:[#allocation2 + $0x88] sm:$0xf]  ;;  %v8244_v25 = vld [vmem:[#allocation2 + $0x8c] sm:$0xf]  ;;  %v6733_v15 = vpop.f32.mrb[120].mxu0  ;;  %vm23485_vm14 = vmmov %vm23474_vm1 }
 0x656   : > { %v6925_v23 = vadd.f32 %v21171_v5, %v6858_v10  ;;  %v6860_v26 = vadd.f32 %v6727_v19, %v23458_v37  ;;  %v7775_v0 = vsel %vm21630_vm8, %v21564_v55, %v21515_v38  ;;  %v7490_v16 = vshrl.u32 %v21585_v18, 4  ;;  %v23482_v55 = vld [vmem:[#allocation21_spill] sm:$0xff] }
 0x657   : > { %23457 = vst [vmem:[#allocation65_spill] sm:$0xff] %v21647_v56  ;;  %15143 = vst [vmem:[#allocation2 + $0x90] sm:$0xff] %v15015_v21   ;;  %v14541_v36 = vcombine.low %v8242_v35, %v8243_v62  ;;  %v14574_v60 = vcombine.low %v8243_v62, %v8244_v25  ;;  %v7480_v47 = vmul.u32 24, %v7479_v29  ;;  %v21668_v27 = vsel %vm23461_vm6, %v8870_v59, %v8879_v54  ;;  %v22084_v56 = vld [vmem:[#allocation2 + $0x4c] sm:$0xf] }
 0x658   : > { %v6972_v57 = vmax.f32 %v6925_v23, 0.0  ;;  %v6926_v38 = vadd.f32 %v21171_v5, %v6860_v26  ;;  %vm7589_vm2 = vcmp.ne.s32.totalorder %v21644_v50, 0  ;;  %vm7636_vm11 = vcmp.lt.s32.totalorder %v21644_v50, 0  ;;  %23546 = vst [vmem:[#allocation31_spill] sm:$0xff] %v22084_v56  ;;  %v22140_v56 = vld [vmem:[#allocation2 + $0x84] sm:$0xf] }
 0x659   : > { %15501 = vmatprep.mubr.bf16.mxu1 %v14541_v36  ;;  %vm21673_vm9 = vcmp.lt.s32.totalorder %v7774_v39, 16  ;;  %vm21677_vm13 = vcmp.lt.s32.totalorder %v7775_v0, 16  ;;  %v8882_v35 = vshrl.u32 %v14574_v60, 16  ;;  %v8885_v29 = vshll.u32 %v14574_v60, 16  ;;  %vm21695_vm4 = vmand %vm7636_vm11, %vm7589_vm2  ;;  %v6735_v0 = vpop.f32.mrb[121].mxu0  ;;  %v23469_v60 = vld [vmem:[#allocation41_spill] sm:$0xff] }
 0x65a   : > { %v7776_v59 = vsel %vm21662_vm0, %v21650_v17, %v21590_v40  ;;  %v7501_v9 = vshrl.u32 %v21621_v32, 4  ;;  %v6973_v10 = vmax.f32 %v6926_v38, 0.0  ;;  %v7730_v11 = vadd.s32 24, %v21644_v50 }
 0x65b   : > { %v21688_v39 = vadd.s32 352, %v19873_v49  ;;  %v21691_v21 = vadd.s32 360, %v19873_v49  ;;  %v21700_v40 = vsub.s32 %v21534_v6, %v7480_v47  ;;  %v7491_v32 = vmul.u32 24, %v7490_v16  ;;  %v6737_v6 = vpop.f32.mrb[122].mxu0 }
 0x65c   : > { %v8884_v17 = vrot.slane %v8882_v35, 3  ;;  %v8887_v23 = vrot.slane %v8885_v29, 4  ;;  %v7960_v37 = vsel %vm21611_vm15, %v6972_v57, 0.0  ;;  %v7961_v26 = vsel %vm21615_vm12, %v6973_v10, 0.0  ;;  %v6739_v29 = vpop.f32.mrb[123].mxu0 }
 0x65d   : > { %v16069_v62 = vadd.f32 %v6733_v15, %v23468_v51  ;;  %v21708_v28 = vadd.s32 368, %v19873_v49  ;;  %v15020_v36 = vpack.c.bf16 %v7961_v26, %v7960_v37  ;;  %v21711_v38 = vadd.f32 %v6735_v0, %v23469_v60  ;;  %v23472_v37 = vld [vmem:[#allocation43_spill] sm:$0xff] }
 0x65e   : > { %v7502_v16 = vmul.u32 24, %v7501_v9  ;;  %v8888_v47 = vor.u32 %v8887_v23, %v8884_v17  ;;  %v16071_v57 = vadd.f32 %v6737_v6, %v23471_v22  ;;  %v8245_v1 = vld [vmem:[#allocation2 + $0x90] sm:$0xf]  ;;  %v7777_v10 = vsel %vm21695_vm4, %v7730_v11, %v21644_v50  ;;  %v8246_v15 = vld [vmem:[#allocation2 + $0x94] sm:$0xf]  ;;  %v6743_v6 = vpop.f32.mrb[224].mxu0 }
 0x65f   : > { %23470 = vst [vmem:[#allocation87_spill] sm:$0xff] %v21711_v38  ;;  %v6927_v35 = vadd.f32 %v21171_v5, %v16069_v62  ;;  %v7512_v49 = vshrl.u32 %v21636_v4, 4  ;;  %15144 = vst [vmem:[#allocation2 + $0x98] sm:$0xff] %v15020_v36   ;;  %v21720_v26 = vadd.f32 %v6739_v29, %v23472_v37  ;;  %v14542_v51 = vcombine.low %v8244_v25, %v8245_v1  ;;  %v22079_v38 = vld [vmem:[#allocation2 + $0x50] sm:$0xf] }
 0x660   : > { %v14575_v9 = vcombine.low %v8245_v1, %v8246_v15  ;;  %v21723_v17 = vsel %vm23474_vm1, %v8879_v54, %v8888_v47  ;;  %v6928_v62 = vadd.f32 %v21171_v5, %v16071_v57  ;;  %vm7590_vm3 = vcmp.ne.s32.totalorder %v21700_v40, 0  ;;  %23544 = vst [vmem:[#allocation69_spill] sm:$0xff] %v22079_v38  ;;  %v22123_v38 = vld [vmem:[#allocation2 + $0x90] sm:$0xf] }
 0x661   : > { %23473 = vst [vmem:[#allocation14_spill] sm:$0xff] %v21720_v26  ;;  %v6974_v23 = vmax.f32 %v6927_v35, 0.0  ;;  %vm7637_vm7 = vcmp.lt.s32.totalorder %v21700_v40, 0  ;;  %15502 = vmatmul.mubr.bf16.gmra.mrb[208].mxu1 %v14542_v51  ;;  %vm21728_vm5 = vcmp.lt.s32.totalorder %v7776_v59, 16  ;;  %vm21732_vm15 = vcmp.lt.s32.totalorder %v7777_v10, 16  ;;  %23561 = vst [vmem:[#allocation43_spill] sm:$0xff] %v22123_v38 }
 0x662   : > { %v8891_v25 = vshrl.u32 %v14575_v9, 16  ;;  %v8894_v11 = vshll.u32 %v14575_v9, 16  ;;  %v21737_v54 = vmul.u32.u64.low 2863311531, %v21688_v39  ;;  %v21738_v19 = vmul.u32.u64.high 2863311531, %v21688_v39, %v21737_v54  ;;  %vm21744_vm12 = vmand %vm7637_vm7, %vm7590_vm3  ;;  %v22228_v38 = vld [vmem:[#allocation2 + $0x1c] sm:$0xf] }
 0x663   : > { %v6975_v0 = vmax.f32 %v6928_v62, 0.0  ;;  %v7731_v36 = vadd.s32 24, %v21700_v40  ;;  %v21742_v60 = vsub.s32 %v21557_v34, %v7491_v32  ;;  %v7513_v59 = vmul.u32 24, %v7512_v49  ;;  %v23481_v34 = vld [vmem:[#allocation36_spill] sm:$0xff]  ;;  %v6745_v49 = vpop.f32.mrb[225].mxu0 }
 0x664   : > { %v21749_v22 = vmul.u32.u64.low 2863311531, %v21691_v21  ;;  %v21750_v57 = vmul.u32.u64.high 2863311531, %v21691_v21, %v21749_v22  ;;  %v8893_v29 = vrot.slane %v8891_v25, 3  ;;  %v8896_v1 = vrot.slane %v8894_v11, 4  ;;  %v6747_v62 = vpop.f32.mrb[226].mxu0 }
 0x665   : > { %v7962_v10 = vsel %vm21673_vm9, %v6974_v23, 0.0  ;;  %v7963_v37 = vsel %vm21677_vm13, %v6975_v0, 0.0  ;;  %v6866_v32 = vadd.f32 %v6743_v6, %v23481_v34  ;;  %v21758_v51 = vsub.s32 %v21573_v8, %v7502_v16  ;;  %v6749_v22 = vpop.f32.mrb[227].mxu0  ;;  %v23483_v16 = vld [vmem:[#allocation28_spill] sm:$0xff] }
 0x666   : > { %v15025_v9 = vpack.c.bf16 %v7963_v37, %v7962_v10  ;;  %v21761_v54 = vmul.u32.u64.low 2863311531, %v21708_v28  ;;  %v21762_v26 = vmul.u32.u64.high 2863311531, %v21708_v28, %v21761_v54  ;;  %v8897_v25 = vor.u32 %v8896_v1, %v8893_v29  ;;  %v8247_v18 = vld [vmem:[#allocation2 + $0x98] sm:$0xf]  ;;  %v8248_v6 = vld [vmem:[#allocation2 + $0x9c] sm:$0xf] }
 0x667   : > { %v6929_v11 = vadd.f32 %v21171_v5, %v6866_v32  ;;  %v6868_v23 = vadd.f32 %v6747_v62, %v23482_v55  ;;  %v7778_v0 = vsel %vm21744_vm12, %v7731_v36, %v21700_v40  ;;  %v21770_v8 = vsub.s32 %v21593_v3, %v7513_v59  ;;  %v6753_v49 = vpop.f32.mrb[228].mxu0  ;;  %v23490_v55 = vld [vmem:[#allocation39_spill] sm:$0xff] }
 0x668   : > { %15145 = vst [vmem:[#allocation2 + $0xa0] sm:$0xff] %v15025_v9   ;;  %v21773_v10 = vadd.f32 %v6749_v22, %v23483_v16  ;;  %v14543_v37 = vcombine.low %v8246_v15, %v8247_v18  ;;  %v14576_v29 = vcombine.low %v8247_v18, %v8248_v6  ;;  %v21776_v1 = vsel %vm23485_vm14, %v8888_v47, %v8897_v25  ;;  %v6755_v22 = vpop.f32.mrb[229].mxu0  ;;  %v23491_v16 = vld [vmem:[#allocation38_spill] sm:$0xff]  ;;  %vm23506_vm14 = vmmov %vm23474_vm1 }
 0x669   : > { %v6976_v34 = vmax.f32 %v6929_v11, 0.0  ;;  %v6930_v32 = vadd.f32 %v21171_v5, %v6868_v23  ;;  %vm7591_vm10 = vcmp.ne.s32.totalorder %v21742_v60, 0  ;;  %vm7638_vm8 = vcmp.lt.s32.totalorder %v21742_v60, 0  ;;  %23566 = vst [vmem:[#allocation38_spill] sm:$0xff] %v22140_v56 }
 0x66a   : > { %23484 = vst [vmem:[#allocation15_spill] sm:$0xff] %v21773_v10  ;;  %15505 = vmatprep.mubr.bf16.mxu1 %v14543_v37  ;;  %vm21781_vm0 = vcmp.lt.s32.totalorder %v7778_v0, 16  ;;  %v7732_v40 = vadd.s32 24, %v21742_v60  ;;  %v8900_v36 = vshrl.u32 %v14576_v29, 16  ;;  %v8903_v15 = vshll.u32 %v14576_v29, 16  ;;  %vm21792_vm11 = vmand %vm7638_vm8, %vm7591_vm10  ;;  %v6757_v29 = vpop.f32.mrb[230].mxu0 }
 0x66b   : > { %v7523_v59 = vshrl.u32 %v21738_v19, 4  ;;  %v6977_v47 = vmax.f32 %v6930_v32, 0.0  ;;  %vm7592_vm6 = vcmp.ne.s32.totalorder %v21758_v51, 0  ;;  %vm7639_vm2 = vcmp.lt.s32.totalorder %v21758_v51, 0  ;;  %v22077_v10 = vld [vmem:[#allocation2 + $0x48] sm:$0xf] }
 0x66c   : > { %v7733_v35 = vadd.s32 24, %v21758_v51  ;;  %vm7593_vm9 = vcmp.ne.s32.totalorder %v21770_v8, 0  ;;  %vm7640_vm13 = vcmp.lt.s32.totalorder %v21770_v8, 0  ;;  %v8902_v62 = vrot.slane %v8900_v36, 3  ;;  %vm21811_vm4 = vmand %vm7639_vm2, %vm7592_vm6  ;;  %v23495_v36 = vld [vmem:[#allocation83_spill] sm:$0xff]  ;;  %23543 = vst [vmem:[#allocation62_spill] sm:$0xff] %v22077_v10 }
 0x66d   : > { %v8905_v19 = vrot.slane %v8903_v15, 4  ;;  %v7964_v54 = vsel %vm21728_vm5, %v6976_v34, 0.0  ;;  %v7965_v11 = vsel %vm21732_vm15, %v6977_v47, 0.0  ;;  %v6870_v23 = vadd.f32 %v6753_v49, %v23490_v55  ;;  %v6759_v47 = vpop.f32.mrb[231].mxu0  ;;  %vm21838_vm3 = vmand %vm7640_vm13, %vm7593_vm9  ;;  %v17349_v10 = vld [vmem:[#allocation2 + $0x34] sm:$0xff]  }
 0x66e   : > { %v7534_v18 = vshrl.u32 %v21750_v57, 4  ;;  %v15030_v0 = vpack.c.bf16 %v7965_v11, %v7964_v54  ;;  %v21805_v37 = vadd.f32 %v6755_v22, %v23491_v16  ;;  %v7524_v4 = vmul.u32 24, %v7523_v59 }
 0x66f   : > { %v8906_v34 = vor.u32 %v8905_v19, %v8902_v62  ;;  %v6931_v32 = vadd.f32 %v21171_v5, %v6870_v23  ;;  %v6872_v15 = vadd.f32 %v6757_v29, %v23495_v36  ;;  %v7779_v57 = vsel %vm21792_vm11, %v7732_v40, %v21742_v60  ;;  %v8249_v49 = vld [vmem:[#allocation2 + $0xa0] sm:$0xf]  ;;  %v8250_v54 = vld [vmem:[#allocation2 + $0xa4] sm:$0xf]  ;;  %v6763_v29 = vpop.f32.mrb[132].mxu0 }
 0x670   : > { %23492 = vst [vmem:[#allocation16_spill] sm:$0xff] %v21805_v37  ;;  %v7545_v11 = vshrl.u32 %v21762_v26, 4  ;;  %15146 = vst [vmem:[#allocation2 + $0xa8] sm:$0xff] %v15030_v0   ;;  %v14544_v55 = vcombine.low %v8248_v6, %v8249_v49  ;;  %v7734_v22 = vadd.s32 24, %v21770_v8  ;;  %v14577_v16 = vcombine.low %v8249_v49, %v8250_v54  ;;  %v21828_v62 = vld [vmem:[%s22694_s3] ss:$0 sm:$0xff] }
 0x671   : > { %v21823_v59 = vsel %vm23474_vm1, %v8897_v25, %v8906_v34  ;;  %v6978_v5 = vmax.f32 %v6931_v32, 0.0  ;;  %v6932_v60 = vadd.f32 %v21828_v62, %v6872_v15  ;;  %v7780_v26 = vsel %vm21811_vm4, %v7733_v35, %v21758_v51  ;;  %v23500_v15 = vld [vmem:[#allocation44_spill] sm:$0xff]  ;;  %v23501_v49 = vld [vmem:[#allocation29_spill] sm:$0xff]  ;;  %vm23517_vm4 = vmmov %vm23474_vm1 }
 0x672   : > { %v7535_v25 = vmul.u32 24, %v7534_v18  ;;  %vm7826_vm7 = vcmp.lt.s32.totalorder %v7779_v57, 16  ;;  %15506 = vmatmul.mubr.bf16.gmra.mrb[212].mxu1 %v14544_v55  ;;  %v8909_v40 = vshrl.u32 %v14577_v16, 16  ;;  %v8912_v9 = vshll.u32 %v14577_v16, 16  ;;  %v22062_v37 = vld [vmem:[#allocation2 + $0x40] sm:$0xf] }
 0x673   : > { %v21843_v19 = vsub.s32 %v21688_v39, %v7524_v4  ;;  %v6979_v23 = vmax.f32 %v6932_v60, 0.0  ;;  %v7546_v0 = vmul.u32 24, %v7545_v11  ;;  %vm21845_vm5 = vcmp.lt.s32.totalorder %v7780_v26, 16  ;;  %v6765_v4 = vpop.f32.mrb[133].mxu0  ;;  %23539 = vst [vmem:[#allocation52_spill] sm:$0xff] %v22062_v37 }
 0x674   : > { %v7781_v35 = vsel %vm21838_vm3, %v7734_v22, %v21770_v8  ;;  %v8911_v50 = vrot.slane %v8909_v40, 3  ;;  %v8914_v18 = vrot.slane %v8912_v9, 4  ;;  %v7966_v32 = vsel %vm21781_vm0, %v6978_v5, 0.0  ;;  %v6767_v55 = vpop.f32.mrb[134].mxu0  ;;  %v23503_v22 = vld [vmem:[#allocation45_spill] sm:$0xff] }
 0x675   : > { %v7967_v36 = vsel %vm7826_vm7, %v6979_v23, 0.0  ;;  %v16073_v39 = vadd.f32 %v6763_v29, %v23500_v15  ;;  %v7536_v57 = vsub.s32 %v21691_v21, %v7535_v25  ;;  %v21857_v11 = vadd.f32 %v6765_v4, %v23501_v49  ;;  %v6769_v3 = vpop.f32.mrb[135].mxu0  ;;  %v23504_v21 = vld [vmem:[#allocation46_spill] sm:$0xff]  ;;  %v23511_v49 = vld [vmem:[#allocation85_spill] sm:$0xff]  ;;  %v22111_v37 = vld [vmem:[#allocation2 + $0x74] sm:$0xf] }
 0x676   : > { %v15035_v47 = vpack.c.bf16 %v7967_v36, %v7966_v32  ;;  %vm7594_vm15 = vcmp.ne.s32.totalorder %v21843_v19, 0  ;;  %v8915_v16 = vor.u32 %v8914_v18, %v8911_v50  ;;  %v16075_v60 = vadd.f32 %v6767_v55, %v23503_v22  ;;  %v6773_v36 = vpop.f32.mrb[232].mxu0  ;;  %23555 = vst [vmem:[#allocation18_spill] sm:$0xff] %v22111_v37  ;;  %v22152_v53 = vld [vmem:[#allocation2 + $0xa4] sm:$0xf] }
 0x677   : > { %23502 = vst [vmem:[#allocation82_spill] sm:$0xff] %v21857_v11  ;;  %v6933_v8 = vadd.f32 %v21828_v62, %v16073_v39  ;;  %v8251_v5 = vld [vmem:[#allocation2 + $0xa8] sm:$0xf]  ;;  %vm7641_vm12 = vcmp.lt.s32.totalorder %v21843_v19, 0  ;;  %v8252_v26 = vld [vmem:[#allocation2 + $0xac] sm:$0xf]  ;;  %v7547_v6 = vsub.s32 %v21708_v28, %v7546_v0  ;;  %v21865_v25 = vadd.f32 %v6769_v3, %v23504_v21 }
 0x678   : > { %15147 = vst [vmem:[#allocation2 + $0xb0] sm:$0xff] %v15035_v47   ;;  %v14545_v40 = vcombine.low %v8250_v54, %v8251_v5  ;;  %v14578_v9 = vcombine.low %v8251_v5, %v8252_v26  ;;  %v21868_v23 = vsel %vm23506_vm14, %v8906_v34, %v8915_v16  ;;  %v6934_v50 = vadd.f32 %v21828_v62, %v16075_v60  ;;  %vm21876_vm6 = vmand %vm7641_vm12, %vm7594_vm15  ;;  %v22154_v44 = vld [vmem:[#allocation2 + $0xac] sm:$0xf]  ;;  %v22240_v37 = vld [vmem:[#allocation2 + $0x38] sm:$0xf] }
 0x679   : > { %23505 = vst [vmem:[#allocation50_spill] sm:$0xff] %v21865_v25  ;;  %v6980_v29 = vmax.f32 %v6933_v8, 0.0  ;;  %vm7595_vm10 = vcmp.ne.s32.totalorder %v7536_v57, 0  ;;  %vm7642_vm8 = vcmp.lt.s32.totalorder %v7536_v57, 0  ;;  %vm7828_vm0 = vcmp.lt.s32.totalorder %v7781_v35, 16  ;;  %v6775_v8 = vpop.f32.mrb[233].mxu0  ;;  %vm23524_vm15 = vmmov %vm23517_vm4 }
 0x67a   : > { %15509 = vmatprep.mubr.bf16.mxu1 %v14545_v40  ;;  %v7735_v18 = vadd.s32 24, %v21843_v19  ;;  %v8918_v32 = vshrl.u32 %v14578_v9, 16  ;;  %v8921_v28 = vshll.u32 %v14578_v9, 16  ;;  %v6981_v0 = vmax.f32 %v6934_v50, 0.0  ;;  %vm21880_vm2 = vmand %vm7642_vm8, %vm7595_vm10  ;;  %v6777_v3 = vpop.f32.mrb[234].mxu0  ;;  %v23512_v40 = vld [vmem:[#allocation84_spill] sm:$0xff] }
 0x67b   : > { %v7736_v34 = vadd.s32 24, %v7536_v57  ;;  %vm7596_vm11 = vcmp.ne.s32.totalorder %v7547_v6, 0  ;;  %v7968_v4 = vsel %vm21845_vm5, %v6980_v29, 0.0  ;;  %v6878_v55 = vadd.f32 %v6773_v36, %v23511_v49  ;;  %v6779_v29 = vpop.f32.mrb[235].mxu0  ;;  %vm23523_vm5 = vmmov %vm23517_vm4  ;;  %v22054_v25 = vld [vmem:[#allocation2 + $0x2c] sm:$0xff]   ;;  %23570 = vst [vmem:[#allocation45_spill] sm:$0xff] %v22152_v53 }
 0x67c   : > { %v8920_v35 = vrot.slane %v8918_v32, 3  ;;  %v8923_v39 = vrot.slane %v8921_v28, 4  ;;  %v7969_v47 = vsel %vm7828_vm0, %v6981_v0, 0.0  ;;  %vm7643_vm9 = vcmp.lt.s32.totalorder %v7547_v6, 0  ;;  %v23513_v0 = vld [vmem:[#allocation91_spill] sm:$0xff]  ;;  %23571 = vst [vmem:[#allocation46_spill] sm:$0xff] %v22154_v44 }
 0x67d   : > { %v15040_v22 = vpack.c.bf16 %v7969_v47, %v7968_v4  ;;  %v7782_v60 = vsel %vm21876_vm6, %v7735_v18, %v21843_v19  ;;  %v6935_v21 = vadd.f32 %v21828_v62, %v6878_v55  ;;  %v6880_v9 = vadd.f32 %v6777_v3, %v23512_v40  ;;  %vm21899_vm13 = vmand %vm7643_vm9, %vm7596_vm11  ;;  %v6783_v47 = vpop.f32.mrb[236].mxu0  ;;  %v23518_v3 = vld [vmem:[#allocation86_spill] sm:$0xff]  ;;  %v17353_v44 = vld [vmem:[#allocation2 + $0x4c] sm:$0xff]  }
 0x67e   : > { %v8924_v5 = vor.u32 %v8923_v39, %v8920_v35  ;;  %v7783_v51 = vsel %vm21880_vm2, %v7736_v34, %v7536_v57  ;;  %v7737_v32 = vadd.s32 24, %v7547_v6  ;;  %v21895_v36 = vadd.f32 %v6779_v29, %v23513_v0  ;;  %v6785_v40 = vpop.f32.mrb[237].mxu0  ;;  %v17354_v53 = vld [vmem:[#allocation2 + $0x54] sm:$0xff]  }
 0x67f   : > { %v8253_v50 = vld [vmem:[#allocation2 + $0xb0] sm:$0xf]  ;;  %v8254_v28 = vld [vmem:[#allocation2 + $0xb4] sm:$0xf]  ;;  %15148 = vst [vmem:[#allocation2 + $0xb8] sm:$0xff] %v15040_v22   ;;  %v6982_v57 = vmax.f32 %v6935_v21, 0.0  ;;  %v6936_v34 = vadd.f32 %v21828_v62, %v6880_v9 }
 0x680   : > { %23514 = vst [vmem:[#allocation58_spill] sm:$0xff] %v21895_v36  ;;  %v14546_v4 = vcombine.low %v8252_v26, %v8253_v50  ;;  %v14579_v18 = vcombine.low %v8253_v50, %v8254_v28  ;;  %v21904_v54 = vsel %vm23517_vm4, %v8915_v16, %v8924_v5  ;;  %vm7829_vm1 = vcmp.lt.s32.totalorder %v7782_v60, 16  ;;  %v23521_v60 = vld [vmem:[#allocation89_spill] sm:$0xff]  ;;  %v6787_v50 = vpop.f32.mrb[238].mxu0  ;;  %v17338_v9 = vld [vmem:[#allocation8 + $0xa8] sm:$0xff]  }
 0x681   : > { %vm7830_vm3 = vcmp.lt.s32.totalorder %v7783_v51, 16  ;;  %v6983_v39 = vmax.f32 %v6936_v34, 0.0  ;;  %v7784_v26 = vsel %vm21899_vm13, %v7737_v32, %v7547_v6  ;;  %v7970_v8 = vsel %vm7829_vm1, %v6982_v57, 0.0  ;;  %v6788_v34 = vpop.f32.mrb[239].mxu0  ;;  %v21940_v50 = vld [vmem:[#allocation2 + $0x68] sm:$0xf] }
 0x682   : > { %15510 = vmatmul.mubr.bf16.gmra.mrb[216].mxu1 %v14546_v4  ;;  %v8927_v15 = vshrl.u32 %v14579_v18, 16  ;;  %v8930_v35 = vshll.u32 %v14579_v18, 16  ;;  %v6882_v16 = vadd.f32 %v6783_v47, %v23518_v3  ;;  %vm21910_vm7 = vcmp.lt.s32.totalorder %v7784_v26, 16  ;;  %v17659_v3 = vld [vmem:[#allocation8 + $0x80] sm:$0xff]   ;;  %23528 = vst [vmem:[#allocation61_spill] sm:$0xff] %v21940_v50 }
 0x683   : > { %v7971_v22 = vsel %vm7830_vm3, %v6983_v39, 0.0  ;;  %v21915_v51 = vadd.f32 %v6785_v40, %v23521_v60  ;;  %v23527_v40 = vld [vmem:[#allocation81_spill] sm:$0xff]  ;;  %v21958_v34 = vld [vmem:[#allocation2 + $0x8c] sm:$0xf]  ;;  %v22045_v36 = vld [vmem:[#allocation2 + $0x28] sm:$0xf] }
 0x684   : > { %v8929_v49 = vrot.slane %v8927_v15, 3  ;;  %v8932_v55 = vrot.slane %v8930_v35, 4  ;;  %v15045_v21 = vpack.c.bf16 %v7971_v22, %v7970_v8  ;;  %v6937_v6 = vadd.f32 %v21828_v62, %v6882_v16  ;;  %v23525_v8 = vld [vmem:[#allocation76_spill] sm:$0xff]  ;;  %v23526_v22 = vld [vmem:[#allocation90_spill] sm:$0xff]  ;;  %v17335_v16 = vld [vmem:[#allocation8 + $0x90] sm:$0xff]   ;;  %23533 = vst [vmem:[#allocation22_spill] sm:$0xff] %v22045_v36 }
 0x685   : > { %23522 = vst [vmem:[#allocation57_spill] sm:$0xff] %v21915_v51  ;;  %v21935_v60 = vld [vmem:[#allocation2 + $0x60] sm:$0xf]  ;;  %vm23535_vm12 = vsmask.f32 7424 }
 0x686   : > { %v8933_v29 = vor.u32 %v8932_v55, %v8929_v49  ;;  %v8255_v32 = vld [vmem:[#allocation2 + $0xb8] sm:$0xf]  ;;  %v8256_v0 = vld [vmem:[#allocation2 + $0xbc] sm:$0xf]  ;;  %15149 = vst [vmem:[#allocation2 + $0xc0] sm:$0xff] %v15045_v21   ;;  %v6984_v15 = vmax.f32 %v6937_v6, 0.0  ;;  %vm23554_vm14 = vmmov %vm23535_vm12 }
 0x687   : > { %v14547_v4 = vcombine.low %v8254_v28, %v8255_v32  ;;  %v14548_v19 = vcombine.low %v8256_v0, %v8256_v0  ;;  %v14580_v18 = vcombine.low %v8255_v32, %v8256_v0  ;;  %v17334_v55 = vld [vmem:[#allocation8 + $0x88] sm:$0xff]   ;;  %v17337_v21 = vld [vmem:[#allocation8 + $0xa0] sm:$0xff]   ;;  %v21942_v6 = vld [vmem:[#allocation2 + $0x6c] sm:$0xf] }
 0x688   : > { %v21919_v57 = vsel %vm23523_vm5, %v8924_v5, %v8933_v29  ;;  %v7972_v26 = vsel %vm21910_vm7, %v6984_v15, 0.0  ;;  %v21946_v32 = vld [vmem:[#allocation2 + $0x74] sm:$0xf]  ;;  %v17339_v0 = vld [vmem:[#allocation8 + $0xb0] sm:$0xff]   ;;  %v22075_v51 = vld [vmem:[#allocation2 + $0x44] sm:$0xf] }
 0x689   : > { %15513 = vmatprep.mubr.bf16.mxu1 %v14547_v4  ;;  %v8936_v35 = vshrl.u32 %v14580_v18, 16  ;;  %v8939_v39 = vshll.u32 %v14580_v18, 16  ;;  %v14898_v47 = vpack.c.bf16 %v7972_v26, %v7972_v26  ;;  %v21948_v4 = vld [vmem:[#allocation2 + $0x78] sm:$0xf]  ;;  %v21954_v18 = vld [vmem:[#allocation2 + $0x84] sm:$0xf]  ;;  %vm23559_vm10 = vmmov %vm23535_vm12 }
 0x68a   : > { %15514 = vmatmul.mubr.bf16.gmra.mrb[220].mxu1 %v14548_v19  ;;  %v21952_v19 = vld [vmem:[#allocation2 + $0x80] sm:$0xf]  ;;  %v21960_v15 = vld [vmem:[#allocation2 + $0x90] sm:$0xf]  ;;  %v17340_v26 = vld [vmem:[#allocation8 + $0xb8] sm:$0xff]   ;;  %23542 = vst [vmem:[#allocation67_spill] sm:$0xff] %v22075_v51 }
 0x68b   : > { %15533 = vmatprep.mubr.bf16.mxu1 %v21113_v43  ;;  %v8938_v62 = vrot.slane %v8936_v35, 3  ;;  %v8941_v49 = vrot.slane %v8939_v39, 4  ;;  %8208 = vst [vmem:[#allocation2 + $0xc8] sm:$0xf] %v14898_v47  ;;  %v17336_v43 = vld [vmem:[#allocation8 + $0x98] sm:$0xff]   ;;  %v17352_v51 = vld [vmem:[#allocation8 + $0xd0] sm:$0xff]   ;;  %vm23574_vm8 = vmmov %vm23559_vm10 }
 0x68c   : > { %v21962_v35 = vld [vmem:[#allocation2 + $0x94] sm:$0xf]  ;;  %v21966_v47 = vld [vmem:[#allocation2 + $0x98] sm:$0xf]  ;;  %vm23575_vm0 = vmmov %vm23574_vm8 }
 0x68d   : > { %v21924_v28 = vor.u32 %v8941_v49, %v8938_v62  ;;  %v21968_v62 = vld [vmem:[#allocation2 + $0x9c] sm:$0xf]  ;;  %vm23578_vm6 = vmmov %vm23575_vm0 }
 0x68e   : > { %vm23579_vm2 = vmmov %vm23575_vm0 }
 0x68f   : > { %v21928_v5 = vsel %vm23524_vm15, %v8933_v29, %v21924_v28  ;;  %v21937_v29 = vld [vmem:[#allocation2 + $0x64] sm:$0xf]  ;;  %vm23582_vm11 = vmmov %vm23575_vm0 }
 0x690   : > { %vm23584_vm9 = vmmov %vm23575_vm0 }
 0x691   : > { %vm23586_vm13 = vmmov %vm23575_vm0 }
 0x692   : > { %15534 = vmatmul.mubr.bf16.vlgmr.msra.gmra.mrb[176].mxu1 %v23525_v8  ;;  %v22032_v8 = vld [vmem:[#allocation2 + $0x1c] sm:$0xff]   ;;  %vm23587_vm4 = vmmov %vm23575_vm0 }
 0x693   : > { %15537 = vmatprep.mubr.bf16.mxu1 %v23526_v22  ;;  %15582 = vmatpush3.bf16.msra.mxu1 %v17659_v3  ;;  %v17343_v22 = vld [vmem:[#allocation2 + $0x14] sm:$0xff]   ;;  %v23572_v46 = vshrl.u32 %v22032_v8, 16  ;;  %vm23588_vm1 = vmmov %vm23575_vm0 }
 0x694   : > { %15583 = vmatprep.subr.bf16.mxu1 %v17334_v55  ;;  %v9444_v39 = vshrl.u32 %v17343_v22, 16  ;;  %vm23589_vm3 = vmmov %vm23575_vm0 }
 0x695   : > { %vm23590_vm7 = vmmov %vm23575_vm0 }
 0x696   : > { %vm23591_vm5 = vmmov %vm23575_vm0 }
 0x697   : > { %15584 = vmatpush3.bf16.msra.mxu1 %v17334_v55  ;;  %v9440_v55 = vshll.u32 %v17343_v22, 16  ;;  %v22060_v22 = vld [vmem:[#allocation2 + $0x38] sm:$0xf]  ;;  %vm23592_vm15 = vmmov %vm23575_vm0 }
 0x698   : > { %15585 = vmatprep.subr.bf16.mxu1 %v17335_v16  ;;  %23538 = vst [vmem:[#allocation79_spill] sm:$0xff] %v22060_v22  ;;  %v22117_v22 = vld [vmem:[#allocation2 + $0x80] sm:$0xf] }
 0x699   : > { %23558 = vst [vmem:[#allocation41_spill] sm:$0xff] %v22117_v22 }
 0x69a   : > { %15538 = vmatmul.mubr.bf16.gmra.mrb[180].mxu1 %v23527_v40  ;;  %v21986_v40 = vld [vmem:[#allocation8 + $0xc0] sm:$0xff]  }
 0x69b   : > { %15541 = vmatprep.mubr.bf16.mxu1 %v21153_v63  ;;  %15586 = vmatpush3.bf16.msra.mxu1 %v17335_v16  ;;  %v21944_v63 = vld [vmem:[#allocation2 + $0x70] sm:$0xf]  ;;  %v22007_v16 = vld [vmem:[#allocation2 + $0xb4] sm:$0xf] }
 0x69c   : > { %15587 = vmatprep.subr.bf16.mxu1 %v17336_v43 }
 0x69f   : > { %15588 = vmatpush3.bf16.msra.mxu1 %v17336_v43  ;;  %v22005_v43 = vld [vmem:[#allocation2 + $0xb0] sm:$0xf] }
 0x6a0   : > { %15589 = vmatprep.subr.bf16.mxu1 %v17337_v21 }
 0x6a2   : > { %15542 = vmatmul.mubr.bf16.gmra.mrb[184].mxu1 %v21166_v45  ;;  %v21950_v45 = vld [vmem:[#allocation2 + $0x7c] sm:$0xf] }
 0x6a3   : > { %15545 = vmatprep.mubr.bf16.mxu1 %v21180_v52  ;;  %15590 = vmatpush3.bf16.msra.mxu1 %v17337_v21  ;;  %v21956_v52 = vld [vmem:[#allocation2 + $0x88] sm:$0xf]  ;;  %v21989_v21 = vld [vmem:[#allocation2 + $0xa0] sm:$0xf] }
 0x6a4   : > { %15591 = vmatprep.subr.bf16.mxu1 %v17338_v9 }
 0x6a7   : > { %15592 = vmatpush3.bf16.msra.mxu1 %v17338_v9  ;;  %v21991_v9 = vld [vmem:[#allocation2 + $0xa4] sm:$0xf] }
 0x6a8   : > { %15593 = vmatprep.subr.bf16.mxu1 %v17339_v0 }
 0x6aa   : > { %15546 = vmatmul.mubr.bf16.gmra.mrb[188].mxu1 %v21204_v2  ;;  %v22015_v2 = vld [vmem:[#allocation2 + $0xbc] sm:$0xf] }
 0x6ab   : > { %15549 = vmatprep.mubr.bf16.mxu1 %v21228_v31  ;;  %15594 = vmatpush3.bf16.msra.mxu1 %v17339_v0  ;;  %v21997_v31 = vld [vmem:[#allocation2 + $0xa8] sm:$0xf]  ;;  %v21999_v0 = vld [vmem:[#allocation2 + $0xac] sm:$0xf] }
 0x6ac   : > { %15595 = vmatprep.subr.bf16.mxu1 %v17340_v26 }
 0x6af   : > { %15596 = vmatpush3.bf16.msra.mxu1 %v17340_v26  ;;  %v22023_v26 = vld [vmem:[#allocation2 + $0xc4] sm:$0xf] }
 0x6b0   : > { %15645 = vmatprep.subr.bf16.mxu1 %v21986_v40 }
 0x6b2   : > { %15550 = vmatmul.mubr.bf16.gmra.mrb[192].mxu1 %v21249_v12 }
 0x6b3   : > { %15553 = vmatprep.mubr.bf16.mxu1 %v21327_v14  ;;  %v22013_v14 = vld [vmem:[#allocation2 + $0xb8] sm:$0xf] }
 0x6b4   : > { %23529 = vst [vmem:[#allocation59_spill] sm:$0xff] %v22013_v14 }
 0x6ba   : > { %15554 = vmatmul.mubr.bf16.gmra.mrb[196].mxu1 %v21394_v13 }
 0x6bb   : > { %15557 = vmatprep.mubr.bf16.mxu1 %v21476_v61  ;;  %v22021_v61 = vld [vmem:[#allocation2 + $0xc0] sm:$0xf] }
 0x6bc   : > { %23530 = vst [vmem:[#allocation25_spill] sm:$0xff] %v22021_v61 }
 0x6c2   : > { %15558 = vmatmul.mubr.bf16.gmra.mrb[200].mxu1 %v21540_v24 }
 0x6c3   : > { %15561 = vmatprep.mubr.bf16.mxu1 %v21599_v41  ;;  %v17341_v41 = vld [vmem:[#allocation2 + $0x4] sm:$0xff]  }
 0x6c4   : > { %v9425_v12 = vshrl.u32 %v17341_v41, 16 }
 0x6ca   : > { %15562 = vmatmul.mubr.bf16.gmra.mrb[204].mxu1 %v21668_v27  ;;  %v9427_v27 = vshll.u32 %v17341_v41, 16  ;;  %v9448_v41 = vshll.u32 %v22032_v8, 16  ;;  %v17360_v8 = vld [vmem:[#allocation8 + $0xe0] sm:$0xff]  }
 0x6cb   : > { %15565 = vmatprep.mubr.bf16.mxu1 %v21723_v17  ;;  %v17342_v17 = vld [vmem:[#allocation2 + $0xc] sm:$0xff]  }
 0x6cc   : > { %v9429_v13 = vrot.slane %v9427_v27, 1  ;;  %v9432_v3 = vshll.u32 %v17342_v17, 16  ;;  %v9436_v49 = vshrl.u32 %v17342_v17, 16  ;;  %v22058_v17 = vld [vmem:[#allocation2 + $0x2c] sm:$0xf] }
 0x6cd   : > { %23537 = vst [vmem:[#allocation48_spill] sm:$0xff] %v22058_v17 }
 0x6ce   : > { %v9430_v24 = vor.u32 %v9429_v13, %v9425_v12  ;;  %v9442_v13 = vrot.slane %v9440_v55, 1  ;;  %v22067_v55 = vld [vmem:[#allocation2 + $0x34] sm:$0xf] }
 0x6cf   : > { %23540 = vst [vmem:[#allocation27_spill] sm:$0xff] %v22067_v55  ;;  %v22142_v55 = vld [vmem:[#allocation2 + $0x8c] sm:$0xf] }
 0x6d0   : > { %v9446_v42 = vor.u32 %v9444_v39, %v9442_v13  ;;  %v22113_v39 = vld [vmem:[#allocation2 + $0x78] sm:$0xf]  ;;  %23567 = vst [vmem:[#allocation83_spill] sm:$0xff] %v22142_v55 }
 0x6d1   : > { %23556 = vst [vmem:[#allocation37_spill] sm:$0xff] %v22113_v39  ;;  %v22238_v39 = vld [vmem:[#allocation2 + $0x30] sm:$0xf] }
 0x6d2   : > { %15566 = vmatmul.mubr.bf16.gmra.mrb[208].mxu1 %v21776_v1  ;;  %v22035_v1 = vld [vmem:[#allocation2 + $0x20] sm:$0xf] }
 0x6d3   : > { %15569 = vmatprep.mubr.bf16.mxu1 %v21823_v59  ;;  %23531 = vst [vmem:[#allocation26_spill] sm:$0xff] %v22035_v1  ;;  %v22037_v59 = vld [vmem:[#allocation2 + $0x24] sm:$0xff]   ;;  %v22266_v1 = vld [vmem:[#allocation2 + $0x50] sm:$0xf] }
 0x6d4   : > { %v9456_v27 = vshll.u32 %v22037_v59, 16  ;;  %v23573_v48 = vshrl.u32 %v22037_v59, 16  ;;  %v22180_v59 = vld [vmem:[#allocation2 + $0xb4] sm:$0xf]  ;;  %23603 = vst [vmem:[#allocation81_spill] sm:$0xff] %v22266_v1 }
 0x6d5   : > { %23577 = vst [vmem:[#allocation84_spill] sm:$0xff] %v22180_v59 }
 0x6d6   : > { %v22064_v11 = vrot.slane %v9456_v27, 1  ;;  %v22081_v27 = vld [vmem:[#allocation2 + $0x58] sm:$0xf] }
 0x6d7   : > { %23545 = vst [vmem:[#allocation68_spill] sm:$0xff] %v22081_v27  ;;  %v22136_v27 = vld [vmem:[#allocation2 + $0xb0] sm:$0xf] }
 0x6d8   : > { %23565 = vst [vmem:[#allocation39_spill] sm:$0xff] %v22136_v27  ;;  %v9462_v7 = vor.u32 %v23573_v48, %v22064_v11  ;;  %v9468_v48 = vshrl.u32 %v22054_v25, 16 }
 0x6da   : > { %15570 = vmatmul.mubr.bf16.gmra.mrb[212].mxu1 %v21868_v23  ;;  %v22039_v23 = vld [vmem:[#allocation2 + $0x1c] sm:$0xf] }
 0x6db   : > { %15573 = vmatprep.mubr.bf16.mxu1 %v21904_v54  ;;  %23532 = vst [vmem:[#allocation19_spill] sm:$0xff] %v22039_v23  ;;  %v9434_v54 = vrot.slane %v9432_v3, 1  ;;  %v22051_v3 = vrot.slane %v9448_v41, 1 }
 0x6dd   : > { %v9435_v12 = vsel %vm23535_vm12, %v9430_v24, %v9434_v54  ;;  %v22069_v24 = vld [vmem:[#allocation2 + $0x3c] sm:$0xf]  ;;  %v9438_v30 = vor.u32 %v9436_v49, %v9434_v54  ;;  %v9451_v41 = vsel %vm23559_vm10, %v9446_v42, %v22051_v3  ;;  %v22125_v49 = vld [vmem:[#allocation2 + $0x98] sm:$0xf]  ;;  %v22134_v42 = vld [vmem:[#allocation2 + $0xa8] sm:$0xf] }
 0x6de   : > { %23541 = vst [vmem:[#allocation34_spill] sm:$0xff] %v22069_v24  ;;  %v22115_v24 = vld [vmem:[#allocation2 + $0x7c] sm:$0xf]  ;;  %23562 = vst [vmem:[#allocation36_spill] sm:$0xff] %v22125_v49  ;;  %v17356_v49 = vld [vmem:[#allocation8 + $0xd8] sm:$0xff]  }
 0x6df   : > { %v9443_v54 = vsel %vm23554_vm14, %v9438_v30, %v9442_v13  ;;  %23557 = vst [vmem:[#allocation40_spill] sm:$0xff] %v22115_v24  ;;  %23564 = vst [vmem:[#allocation28_spill] sm:$0xff] %v22134_v42  ;;  %v22144_v30 = vld [vmem:[#allocation2 + $0x94] sm:$0xf]  ;;  %v22150_v13 = vld [vmem:[#allocation2 + $0x9c] sm:$0xf] }
 0x6e0   : > { %23568 = vst [vmem:[#allocation44_spill] sm:$0xff] %v22144_v30  ;;  %23569 = vst [vmem:[#allocation29_spill] sm:$0xff] %v22150_v13  ;;  %v22177_v24 = vld [vmem:[#allocation2 + $0xb8] sm:$0xf]  ;;  %v22226_v13 = vld [vmem:[#allocation2 + $0x28] sm:$0xf] }
 0x6e1   : > { %23576 = vst [vmem:[#allocation85_spill] sm:$0xff] %v22177_v24  ;;  %v17355_v24 = vld [vmem:[#allocation2 + $0x5c] sm:$0xff]   ;;  %vm23593_vm12 = vmmov %vm23575_vm0 }
 0x6e2   : > { %15574 = vmatmul.mubr.bf16.gmra.mrb[216].mxu1 %v21919_v57  ;;  %v22056_v57 = vld [vmem:[#allocation2 + $0x24] sm:$0xf]  ;;  %v9512_v59 = vshll.u32 %v17355_v24, 16  ;;  %vm23594_vm14 = vmmov %vm23575_vm0 }
 0x6e3   : > { %15577 = vmatprep.mubr.bf16.mxu1 %v21928_v5  ;;  %v22047_v5 = vld [vmem:[#allocation2 + $0x30] sm:$0xf]  ;;  %23536 = vst [vmem:[#allocation13_spill] sm:$0xff] %v22056_v57  ;;  %vm23595_vm10 = vmmov %vm23575_vm0 }
 0x6e4   : > { %23534 = vst [vmem:[#allocation23_spill] sm:$0xff] %v22047_v5  ;;  %v17380_v5 = vld [vmem:[#allocation8 + $0x108] sm:$0xff]  }
 0x6ea   : > { %15578 = vmatmul.mubr.bf16.gmra.mrb[220].mxu1 %v21924_v28  ;;  %v9464_v28 = vshll.u32 %v22054_v25, 16  ;;  %v9496_v25 = vshll.u32 %v17353_v44, 16 }
 0x6eb   : > { %15597 = vmatprep.mubr.bf16.mxu1 %v9435_v12  ;;  %v22121_v12 = vld [vmem:[#allocation2 + $0x88] sm:$0xf] }
 0x6ec   : > { %23560 = vst [vmem:[#allocation42_spill] sm:$0xff] %v22121_v12  ;;  %v9466_v58 = vrot.slane %v9464_v28, 1  ;;  %v9454_v12 = vor.u32 %v23572_v46, %v22051_v3  ;;  %v9472_v28 = vshll.u32 %v17349_v10, 16  ;;  %v9476_v3 = vshrl.u32 %v17349_v10, 16  ;;  %v22186_v10 = vld [vmem:[#allocation2 + $0xc0] sm:$0xf] }
 0x6ed   : > { %23580 = vst [vmem:[#allocation91_spill] sm:$0xff] %v22186_v10 }
 0x6ee   : > { %v9467_v22 = vsel %vm23575_vm0, %v9462_v7, %v9466_v58  ;;  %v9474_v46 = vrot.slane %v9472_v28, 1  ;;  %v9470_v7 = vor.u32 %v9468_v48, %v9466_v58 }
 0x6f2   : > { %15598 = vmatmul.mubr.bf16.vlgmr.msra.gmra.mrb[176].mxu1 %v9443_v54  ;;  %v22132_v54 = vld [vmem:[#allocation2 + $0xa0] sm:$0xf] }
 0x6f3   : > { %15601 = vmatprep.mubr.bf16.mxu1 %v9451_v41  ;;  %15646 = vmatpush3.bf16.msra.mxu1 %v21986_v40  ;;  %23563 = vst [vmem:[#allocation21_spill] sm:$0xff] %v22132_v54  ;;  %v17350_v41 = vld [vmem:[#allocation2 + $0x3c] sm:$0xff]   ;;  %v9459_v40 = vsel %vm23574_vm8, %v9454_v12, %v22064_v11  ;;  %v17364_v12 = vld [vmem:[#allocation8 + $0xe8] sm:$0xff]   ;;  %v17368_v11 = vld [vmem:[#allocation8 + $0xf0] sm:$0xff]  }
 0x6f4   : > { %15647 = vmatprep.subr.bf16.mxu1 %v17348_v20  ;;  %v9480_v42 = vshll.u32 %v17350_v41, 16  ;;  %v9484_v58 = vshrl.u32 %v17350_v41, 16  ;;  %v17359_v54 = vld [vmem:[#allocation2 + $0x74] sm:$0xff]   ;;  %vm23596_vm8 = vmmov %vm23575_vm0 }
 0x6f6   : > { %v9482_v27 = vrot.slane %v9480_v42, 1 }
 0x6f7   : > { %15648 = vmatpush3.bf16.msra.mxu1 %v17348_v20  ;;  %v17351_v20 = vld [vmem:[#allocation2 + $0x44] sm:$0xff]  }
 0x6f8   : > { %15649 = vmatprep.subr.bf16.mxu1 %v17352_v51  ;;  %v9492_v48 = vshrl.u32 %v17351_v20, 16 }
 0x6fa   : > { %15602 = vmatmul.mubr.bf16.gmra.mrb[180].mxu1 %v9459_v40  ;;  %v9475_v40 = vsel %vm23578_vm6, %v9470_v7, %v9474_v46  ;;  %v9486_v7 = vor.u32 %v9484_v58, %v9482_v27  ;;  %v9500_v58 = vshrl.u32 %v17353_v44, 16  ;;  %vm23597_vm6 = vmmov %vm23575_vm0 }
 0x6fb   : > { %15605 = vmatprep.mubr.bf16.mxu1 %v9467_v22  ;;  %15650 = vmatpush3.bf16.msra.mxu1 %v17352_v51  ;;  %v9478_v22 = vor.u32 %v9476_v3, %v9474_v46  ;;  %v9488_v51 = vshll.u32 %v17351_v20, 16  ;;  %v9498_v3 = vrot.slane %v9496_v25, 1  ;;  %v22196_v20 = vld [vmem:[#allocation2 + $0xc4] sm:$0xf] }
 0x6fc   : > { %15651 = vmatprep.subr.bf16.mxu1 %v17356_v49  ;;  %23585 = vst [vmem:[#allocation76_spill] sm:$0xff] %v22196_v20  ;;  %v17357_v46 = vld [vmem:[#allocation2 + $0x64] sm:$0xff]   ;;  %v17363_v20 = vld [vmem:[#allocation2 + $0x8c] sm:$0xff]  }
 0x6fd   : > { %v9483_v28 = vsel %vm23579_vm2, %v9478_v22, %v9482_v27  ;;  %v9490_v42 = vrot.slane %v9488_v51, 1  ;;  %v22198_v27 = vld [vmem:[#allocation8 + $0x100] sm:$0xff]   ;;  %v9520_v10 = vshll.u32 %v17357_v46, 16  ;;  %v9524_v44 = vshrl.u32 %v17357_v46, 16  ;;  %vm23598_vm2 = vmmov %vm23575_vm0 }
 0x6ff   : > { %15652 = vmatpush3.bf16.msra.mxu1 %v17356_v49  ;;  %v22188_v49 = vld [vmem:[#allocation2 + $0xbc] sm:$0xf]  ;;  %v9494_v22 = vor.u32 %v9492_v48, %v9490_v42  ;;  %v9491_v51 = vsel %vm23582_vm11, %v9486_v7, %v9490_v42  ;;  %v9508_v42 = vshrl.u32 %v17354_v53, 16  ;;  %v9514_v48 = vrot.slane %v9512_v59, 1  ;;  %v17358_v7 = vld [vmem:[#allocation2 + $0x6c] sm:$0xff]  }
 0x700   : > { %15653 = vmatprep.subr.bf16.mxu1 %v17360_v8  ;;  %23581 = vst [vmem:[#allocation86_spill] sm:$0xff] %v22188_v49  ;;  %v9522_v49 = vrot.slane %v9520_v10, 1  ;;  %v17361_v59 = vld [vmem:[#allocation2 + $0x7c] sm:$0xff]   ;;  %vm23599_vm11 = vsmask.f32 4352 }
 0x701   : > { %v9499_v41 = vsel %vm23584_vm9, %v9494_v22, %v9498_v3  ;;  %vm23601_vm9 = vmmov %vm23599_vm11 }
 0x702   : > { %15606 = vmatmul.mubr.bf16.gmra.mrb[184].mxu1 %v9475_v40  ;;  %v9504_v40 = vshll.u32 %v17354_v53, 16 }
 0x703   : > { %15609 = vmatprep.mubr.bf16.mxu1 %v9483_v28  ;;  %15654 = vmatpush3.bf16.msra.mxu1 %v17360_v8  ;;  %v17372_v8 = vld [vmem:[#allocation8 + $0xf8] sm:$0xff]   ;;  %v22193_v28 = vld [vmem:[#allocation2 + $0xc8] sm:$0xf] }
 0x704   : > { %15655 = vmatprep.subr.bf16.mxu1 %v17364_v12  ;;  %23583 = vst [vmem:[#allocation89_spill] sm:$0xff] %v22193_v28  ;;  %v9506_v25 = vrot.slane %v9504_v40, 1 }
 0x706   : > { %v9510_v22 = vor.u32 %v9508_v42, %v9506_v25 }
 0x707   : > { %15656 = vmatpush3.bf16.msra.mxu1 %v17364_v12  ;;  %v9516_v12 = vshrl.u32 %v17355_v24, 16 }
 0x708   : > { %15657 = vmatprep.subr.bf16.mxu1 %v17368_v11  ;;  %v9515_v40 = vsel %vm23587_vm4, %v9510_v22, %v9514_v48  ;;  %v17362_v22 = vld [vmem:[#allocation2 + $0x84] sm:$0xff]   ;;  %vm23605_vm4 = vmmov %vm23601_vm9 }
 0x709   : > { %v9518_v28 = vor.u32 %v9516_v12, %v9514_v48 }
 0x70a   : > { %15610 = vmatmul.mubr.bf16.gmra.mrb[188].mxu1 %v9491_v51  ;;  %v9502_v51 = vor.u32 %v9500_v58, %v9498_v3  ;;  %v9526_v3 = vor.u32 %v9524_v44, %v9522_v49  ;;  %v17365_v44 = vld [vmem:[#allocation2 + $0x94] sm:$0xff]  }
 0x70b   : > { %15613 = vmatprep.mubr.bf16.mxu1 %v9499_v41  ;;  %15658 = vmatpush3.bf16.msra.mxu1 %v17368_v11  ;;  %v9528_v41 = vshll.u32 %v17358_v7, 16  ;;  %v9523_v58 = vsel %vm23588_vm1, %v9518_v28, %v9522_v49  ;;  %v9560_v49 = vshll.u32 %v17363_v20, 16  ;;  %vm23606_vm1 = vmmov %vm23605_vm4 }
 0x70c   : > { %15659 = vmatprep.subr.bf16.mxu1 %v17372_v8  ;;  %v9507_v11 = vsel %vm23586_vm13, %v9502_v51, %v9506_v25  ;;  %v9544_v25 = vshll.u32 %v17361_v59, 16  ;;  %vm23602_vm13 = vmmov %vm23601_vm9 }
 0x70d   : > { %v9530_v53 = vrot.slane %v9528_v41, 1  ;;  %v9552_v41 = vshll.u32 %v17362_v22, 16 }
 0x70e   : > { %v9546_v10 = vrot.slane %v9544_v25, 1  ;;  %v9568_v25 = vshll.u32 %v17365_v44, 16 }
 0x70f   : > { %15660 = vmatpush3.bf16.msra.mxu1 %v17372_v8  ;;  %v9536_v8 = vshll.u32 %v17359_v54, 16  ;;  %v9531_v42 = vsel %vm23589_vm3, %v9526_v3, %v9530_v53  ;;  %v9554_v28 = vrot.slane %v9552_v41, 1  ;;  %v9548_v3 = vshrl.u32 %v17361_v59, 16  ;;  %vm23607_vm3 = vmmov %vm23606_vm1 }
 0x710   : > { %15709 = vmatprep.subr.bf16.mxu1 %v22198_v27 }
 0x711   : > { %v9538_v51 = vrot.slane %v9536_v8, 1  ;;  %v9562_v8 = vrot.slane %v9560_v49, 1 }
 0x712   : > { %15614 = vmatmul.mubr.bf16.gmra.mrb[192].mxu1 %v9507_v11  ;;  %v9532_v11 = vshrl.u32 %v17358_v7, 16  ;;  %v9550_v7 = vor.u32 %v9548_v3, %v9546_v10 }
 0x713   : > { %15617 = vmatprep.mubr.bf16.mxu1 %v9515_v40  ;;  %v9540_v40 = vshrl.u32 %v17359_v54, 16 }
 0x714   : > { %v9534_v24 = vor.u32 %v9532_v11, %v9530_v53  ;;  %v9555_v53 = vsel %vm23592_vm15, %v9550_v7, %v9554_v28  ;;  %v17370_v7 = vld [vmem:[#allocation2 + $0xb4] sm:$0xff]   ;;  %vm23610_vm15 = vmmov %vm23606_vm1 }
 0x715   : > { %v9542_v46 = vor.u32 %v9540_v40, %v9538_v51  ;;  %v9570_v40 = vrot.slane %v9568_v25, 1 }
 0x716   : > { %v9539_v12 = vsel %vm23590_vm7, %v9534_v24, %v9538_v51  ;;  %v17367_v24 = vld [vmem:[#allocation2 + $0xa4] sm:$0xff]   ;;  %vm23608_vm7 = vmmov %vm23606_vm1 }
 0x717   : > { %v9547_v48 = vsel %vm23591_vm5, %v9542_v46, %v9546_v10  ;;  %v9564_v46 = vshrl.u32 %v17363_v20, 16  ;;  %v9584_v49 = vshll.u32 %v17367_v24, 16  ;;  %vm23609_vm5 = vmmov %vm23606_vm1 }
 0x719   : > { %v9566_v59 = vor.u32 %v9564_v46, %v9562_v8 }
 0x71a   : > { %15618 = vmatmul.mubr.bf16.gmra.mrb[196].mxu1 %v9523_v58  ;;  %v9556_v58 = vshrl.u32 %v17362_v22, 16 }
 0x71b   : > { %15621 = vmatprep.mubr.bf16.mxu1 %v9531_v42  ;;  %v17366_v42 = vld [vmem:[#allocation2 + $0x9c] sm:$0xff]   ;;  %v9571_v10 = vsel %vm23594_vm14, %v9566_v59, %v9570_v40  ;;  %v22218_v59 = vld [vmem:[#allocation2 + $0x14] sm:$0xf]  ;;  %vm23612_vm14 = vmmov %vm23606_vm1 }
 0x71c   : > { %v9558_v54 = vor.u32 %v9556_v58, %v9554_v28  ;;  %v9576_v51 = vshll.u32 %v17366_v42, 16  ;;  %v9586_v58 = vrot.slane %v9584_v49, 1 }
 0x71e   : > { %v9563_v11 = vsel %vm23593_vm12, %v9558_v54, %v9562_v8  ;;  %v9578_v41 = vrot.slane %v9576_v51, 1  ;;  %v9580_v54 = vshrl.u32 %v17366_v42, 16  ;;  %v9600_v8 = vshll.u32 %v17370_v7, 16  ;;  %vm23611_vm12 = vmmov %vm23606_vm1 }
 0x720   : > { %v9582_v20 = vor.u32 %v9580_v54, %v9578_v41 }
 0x722   : > { %15622 = vmatmul.mubr.bf16.gmra.mrb[200].mxu1 %v9539_v12  ;;  %v9572_v12 = vshrl.u32 %v17365_v44, 16  ;;  %v22213_v44 = vld [vmem:[#allocation2 + $0x18] sm:$0xf]  ;;  %v9587_v46 = vsel %vm23596_vm8, %v9582_v20, %v9586_v58  ;;  %vm23614_vm8 = vmmov %vm23606_vm1 }
 0x723   : > { %15625 = vmatprep.mubr.bf16.mxu1 %v9547_v48  ;;  %v17369_v48 = vld [vmem:[#allocation2 + $0xac] sm:$0xff]   ;;  %v14622_v42 = vcombine.low %v22218_v59, %v22213_v44 }
 0x724   : > { %v9574_v22 = vor.u32 %v9572_v12, %v9570_v40  ;;  %v9592_v28 = vshll.u32 %v17369_v48, 16  ;;  %v9958_v12 = vld [vmem:[#allocation2 + $0xc] sm:$0x8]  ;;  %v22216_v40 = vld [vmem:[#allocation2 + $0x10] sm:$0xf] }
 0x725   : > { %v10154_v54 = vshll.u32 %v14622_v42, 16 }
 0x726   : > { %v9579_v3 = vsel %vm23595_vm10, %v9574_v22, %v9578_v41  ;;  %v9594_v25 = vrot.slane %v9592_v28, 1  ;;  %v14621_v41 = vcombine.low %v9958_v12, %v22216_v40  ;;  %vm23613_vm10 = vmmov %vm23606_vm1 }
 0x728   : > { %v10146_v30 = vshll.u32 %v14621_v41, 16 }
 0x72a   : > { %15626 = vmatmul.mubr.bf16.gmra.mrb[204].mxu1 %v9555_v53  ;;  %v9588_v53 = vshrl.u32 %v17367_v24, 16  ;;  %v9602_v24 = vrot.slane %v9600_v8, 1 }
 0x72b   : > { %15629 = vmatprep.mubr.bf16.mxu1 %v9563_v11  ;;  %v17371_v11 = vld [vmem:[#allocation2 + $0xbc] sm:$0x1f]  }
 0x72c   : > { %v9590_v51 = vor.u32 %v9588_v53, %v9586_v58  ;;  %v9608_v49 = vshll.u32 %v17371_v11, 16  ;;  %v10151_v58 = vshrl.u32 %v14622_v42, 16  ;;  %v22224_v53 = vld [vmem:[#allocation2 + $0x20] sm:$0xf]  ;;  %v9612_v55 = vshrl.u32 %v17371_v11, 16 }
 0x72d   : > { %v14623_v8 = vcombine.low %v22228_v38, %v22224_v53 }
 0x72e   : > { %v9595_v22 = vsel %vm23575_vm0, %v9590_v51, %v9594_v25  ;;  %v9610_v28 = vrot.slane %v9608_v49, 1  ;;  %v10143_v51 = vshrl.u32 %v14621_v41, 16  ;;  %v10153_v12 = vrot.slane %v10151_v58, 3  ;;  %v22242_v58 = vld [vmem:[#allocation2 + $0x2c] sm:$0xf]  ;;  %vm23615_vm0 = vmmov %vm23606_vm1 }
 0x72f   : > { %v10156_v49 = vrot.slane %v10154_v54, 4  ;;  %v10148_v41 = vrot.slane %v10146_v30, 4  ;;  %v22246_v30 = vld [vmem:[#allocation2 + $0x34] sm:$0xf] }
 0x730   : > { %v10145_v42 = vrot.slane %v10143_v51, 3  ;;  %v14625_v51 = vcombine.low %v22242_v58, %v22238_v39 }
 0x732   : > { %15630 = vmatmul.mubr.bf16.gmra.mrb[208].mxu1 %v9571_v10  ;;  %v9596_v10 = vshrl.u32 %v17369_v48, 16  ;;  %v22233_v48 = vld [vmem:[#allocation2 + $0x24] sm:$0xf] }
 0x733   : > { %15633 = vmatprep.mubr.bf16.mxu1 %v9579_v3  ;;  %v9604_v3 = vshrl.u32 %v17370_v7, 16 }
 0x734   : > { %v9598_v20 = vor.u32 %v9596_v10, %v9594_v25  ;;  %v14624_v25 = vcombine.low %v22233_v48, %v22226_v13  ;;  %v10160_v10 = vshrl.u32 %v14623_v8, 16 }
 0x736   : > { %v10172_v56 = vshll.u32 %v14624_v25, 16  ;;  %v10162_v54 = vrot.slane %v10160_v10, 3  ;;  %v22251_v10 = vld [vmem:[#allocation2 + $0x40] sm:$0xf] }
 0x73a   : > { %15634 = vmatmul.mubr.bf16.gmra.mrb[212].mxu1 %v9587_v46  ;;  %v9606_v46 = vor.u32 %v9604_v3, %v9602_v24  ;;  %v10163_v3 = vshll.u32 %v14623_v8, 16 }
 0x73b   : > { %15637 = vmatprep.mubr.bf16.mxu1 %v9595_v22  ;;  %v9603_v22 = vsel %vm23597_vm6, %v9598_v20, %v9602_v24  ;;  %v10157_v24 = vor.u32 %v10156_v49, %v10153_v12  ;;  %v10169_v20 = vshrl.u32 %v14624_v25, 16  ;;  %v14626_v12 = vcombine.low %v22246_v30, %v22240_v37  ;;  %vm23616_vm6 = vmmov %vm23615_vm0 }
 0x73c   : > { %v9611_v7 = vsel %vm23598_vm2, %v9606_v46, %v9610_v28  ;;  %v10149_v46 = vor.u32 %v10148_v41, %v10145_v42  ;;  %v10165_v33 = vrot.slane %v10163_v3, 4  ;;  %v10181_v49 = vshll.u32 %v14625_v51, 16  ;;  %v22253_v3 = vld [vmem:[#allocation2 + $0x48] sm:$0xf]  ;;  %vm23617_vm2 = vmmov %vm23615_vm0 }
 0x73d   : > { %v10171_v8 = vrot.slane %v10169_v20, 3  ;;  %v10187_v42 = vshrl.u32 %v14626_v12, 16  ;;  %v10190_v41 = vshll.u32 %v14626_v12, 16  ;;  %23600 = vst [vmem:[#allocation90_spill] sm:$0xff] %v22253_v3 }
 0x73e   : > { %v10158_v11 = vsel %vm23599_vm11, %v10149_v46, %v10157_v24  ;;  %v10183_v46 = vrot.slane %v10181_v49, 4  ;;  %vm23618_vm11 = vmmov %vm23615_vm0 }
 0x742   : > { %15638 = vmatmul.mubr.bf16.gmra.mrb[216].mxu1 %v9603_v22  ;;  %v9614_v22 = vor.u32 %v9612_v55, %v9610_v28  ;;  %v10166_v55 = vor.u32 %v10165_v33, %v10162_v54  ;;  %v10178_v28 = vshrl.u32 %v14625_v51, 16  ;;  %v22260_v33 = vld [vmem:[#allocation2 + $0x44] sm:$0xf]  ;;  %v10189_v51 = vrot.slane %v10187_v42, 3  ;;  %v22270_v42 = vld [vmem:[#allocation2 + $0x4c] sm:$0xf] }
 0x743   : > { %15641 = vmatprep.mubr.bf16.mxu1 %v9611_v7  ;;  %v10174_v7 = vrot.slane %v10172_v56, 4  ;;  %23604 = vst [vmem:[#allocation94_spill] sm:$0xff] %v22270_v42 }
 0x744   : > { %v10167_v20 = vsel %vm23601_vm9, %v10157_v24, %v10166_v55  ;;  %v10180_v56 = vrot.slane %v10178_v28, 3  ;;  %v17384_v24 = vld [vmem:[#allocation8 + $0x110] sm:$0xff]   ;;  %vm23619_vm9 = vmmov %vm23615_vm0 }
 0x745   : > { %v10175_v25 = vor.u32 %v10174_v7, %v10171_v8  ;;  %v10192_v8 = vrot.slane %v10190_v41, 4  ;;  %v14628_v7 = vcombine.low %v22260_v33, %v22253_v3  ;;  %v17388_v41 = vld [vmem:[#allocation8 + $0x118] sm:$0xff]  }
 0x746   : > { %v10184_v12 = vor.u32 %v10183_v46, %v10180_v56  ;;  %v14629_v56 = vcombine.low %v22270_v42, %v22266_v1  ;;  %v22275_v46 = vld [vmem:[#allocation2 + $0x54] sm:$0xf]  ;;  %v22280_v42 = vld [vmem:[#allocation2 + $0x5c] sm:$0xf] }
 0x747   : > { %v10176_v54 = vsel %vm23602_vm13, %v10166_v55, %v10175_v25  ;;  %v10193_v17 = vor.u32 %v10192_v8, %v10189_v51  ;;  %v10205_v36 = vshrl.u32 %v14628_v7, 16  ;;  %v10208_v57 = vshll.u32 %v14628_v7, 16  ;;  %v22268_v55 = vld [vmem:[#allocation2 + $0x58] sm:$0xf]  ;;  %v17392_v7 = vld [vmem:[#allocation8 + $0x120] sm:$0xff]   ;;  %vm23620_vm13 = vmmov %vm23615_vm0 }
 0x748   : > { %v14630_v8 = vcombine.low %v22275_v46, %v22268_v55 }
 0x749   : > { %v10207_v51 = vrot.slane %v10205_v36, 3 }
 0x74a   : > { %15642 = vmatmul.mubr.bf16.gmra.mrb[220].mxu1 %v9614_v22  ;;  %v22255_v22 = vld [vmem:[#allocation2 + $0x3c] sm:$0xf]  ;;  %v10223_v3 = vshrl.u32 %v14630_v8, 16  ;;  %v10226_v1 = vshll.u32 %v14630_v8, 16 }
 0x74b   : > { %15661 = vmatprep.mubr.bf16.mxu1 %v10158_v11  ;;  %v14627_v11 = vcombine.low %v22255_v22, %v22251_v10 }
 0x74d   : > { %v10196_v28 = vshrl.u32 %v14627_v11, 16  ;;  %v10199_v49 = vshll.u32 %v14627_v11, 16  ;;  %v10194_v11 = vsel %vm23606_vm1, %v10184_v12, %v10193_v17  ;;  %vm23622_vm1 = vmmov %vm23615_vm0 }
 0x752   : > { %15662 = vmatmul.mubr.bf16.vlgmr.msra.gmra.mrb[176].mxu1 %v10167_v20  ;;  %v10185_v20 = vsel %vm23605_vm4, %v10175_v25, %v10184_v12  ;;  %v17396_v12 = vld [vmem:[#allocation8 + $0x128] sm:$0xff]   ;;  %vm23621_vm4 = vmmov %vm23615_vm0 }
 0x753   : > { %15665 = vmatprep.mubr.bf16.mxu1 %v10176_v54  ;;  %15710 = vmatpush3.bf16.msra.mxu1 %v22198_v27  ;;  %v10198_v27 = vrot.slane %v10196_v28, 3  ;;  %v10201_v54 = vrot.slane %v10199_v49, 4  ;;  %v10214_v28 = vshrl.u32 %v14629_v56, 16  ;;  %v10217_v49 = vshll.u32 %v14629_v56, 16 }
 0x754   : > { %15711 = vmatprep.subr.bf16.mxu1 %v17380_v5  ;;  %v10228_v56 = vrot.slane %v10226_v1, 4 }
 0x755   : > { %v10202_v25 = vor.u32 %v10201_v54, %v10198_v27  ;;  %v10225_v54 = vrot.slane %v10223_v3, 3 }
 0x757   : > { %15712 = vmatpush3.bf16.msra.mxu1 %v17380_v5  ;;  %v10210_v5 = vrot.slane %v10208_v57, 4  ;;  %v10203_v36 = vsel %vm23607_vm3, %v10193_v17, %v10202_v25  ;;  %v10216_v57 = vrot.slane %v10214_v28, 3  ;;  %v10229_v8 = vor.u32 %v10228_v56, %v10225_v54  ;;  %vm23623_vm3 = vmmov %vm23615_vm0 }
 0x758   : > { %15713 = vmatprep.subr.bf16.mxu1 %v17384_v24 }
 0x759   : > { %v10211_v23 = vor.u32 %v10210_v5, %v10207_v51 }
 0x75a   : > { %15666 = vmatmul.mubr.bf16.gmra.mrb[180].mxu1 %v10185_v20  ;;  %v10219_v20 = vrot.slane %v10217_v49, 4 }
 0x75b   : > { %15669 = vmatprep.mubr.bf16.mxu1 %v10194_v11  ;;  %15714 = vmatpush3.bf16.msra.mxu1 %v17384_v24  ;;  %v14631_v24 = vcombine.low %v22280_v42, %v21935_v60  ;;  %v10212_v27 = vsel %vm23608_vm7, %v10202_v25, %v10211_v23  ;;  %v14632_v11 = vcombine.low %v21937_v29, %v21940_v50  ;;  %vm23624_vm7 = vmmov %vm23615_vm0 }
 0x75c   : > { %15715 = vmatprep.subr.bf16.mxu1 %v17388_v41  ;;  %v10220_v51 = vor.u32 %v10219_v20, %v10216_v57  ;;  %v14633_v50 = vcombine.low %v21942_v6, %v21944_v63  ;;  %v14634_v20 = vcombine.low %v21946_v32, %v21948_v4 }
 0x75d   : > { %v10232_v5 = vshrl.u32 %v14631_v24, 16  ;;  %v10235_v17 = vshll.u32 %v14631_v24, 16  ;;  %v10241_v28 = vshrl.u32 %v14632_v11, 16  ;;  %v10244_v49 = vshll.u32 %v14632_v11, 16 }
 0x75e   : > { %v10221_v25 = vsel %vm23609_vm5, %v10211_v23, %v10220_v51  ;;  %v10250_v23 = vshrl.u32 %v14633_v50, 16  ;;  %v10253_v54 = vshll.u32 %v14633_v50, 16  ;;  %v10259_v11 = vshrl.u32 %v14634_v20, 16 }
 0x75f   : > { %15716 = vmatpush3.bf16.msra.mxu1 %v17388_v41  ;;  %v17400_v41 = vld [vmem:[#allocation8 + $0x130] sm:$0xff]   ;;  %v10234_v3 = vrot.slane %v10232_v5, 3  ;;  %v10237_v1 = vrot.slane %v10235_v17, 4  ;;  %v10246_v57 = vrot.slane %v10244_v49, 4  ;;  %v10262_v5 = vshll.u32 %v14634_v20, 16 }
 0x760   : > { %15717 = vmatprep.subr.bf16.mxu1 %v17392_v7  ;;  %v10252_v17 = vrot.slane %v10250_v23, 3  ;;  %v14635_v49 = vcombine.low %v21950_v45, %v21952_v19  ;;  %v14636_v50 = vcombine.low %v21954_v18, %v21956_v52  ;;  %vm23644_vm5 = vsmask.f32 7424 }
 0x761   : > { %v10238_v24 = vor.u32 %v10237_v1, %v10234_v3  ;;  %v10264_v3 = vrot.slane %v10262_v5, 4 }
 0x762   : > { %15670 = vmatmul.mubr.bf16.gmra.mrb[184].mxu1 %v10203_v36  ;;  %v17404_v36 = vld [vmem:[#allocation8 + $0x138] sm:$0xff]  }
 0x763   : > { %15673 = vmatprep.mubr.bf16.mxu1 %v10212_v27  ;;  %15718 = vmatpush3.bf16.msra.mxu1 %v17392_v7  ;;  %v10230_v7 = vsel %vm23610_vm15, %v10220_v51, %v10229_v8  ;;  %v10243_v27 = vrot.slane %v10241_v28, 3  ;;  %v10239_v51 = vsel %vm23611_vm12, %v10229_v8, %v10238_v24  ;;  %v10255_v28 = vrot.slane %v10253_v54, 4  ;;  %vm23645_vm15 = vmmov %vm23644_vm5 }
 0x764   : > { %15719 = vmatprep.subr.bf16.mxu1 %v17396_v12  ;;  %v10280_v8 = vshll.u32 %v14636_v50, 16  ;;  %vm23646_vm12 = vmmov %vm23644_vm5 }
 0x765   : > { %v10247_v56 = vor.u32 %v10246_v57, %v10243_v27  ;;  %v10256_v1 = vor.u32 %v10255_v28, %v10252_v17  ;;  %v10277_v57 = vshrl.u32 %v14636_v50, 16  ;;  %v14638_v17 = vcombine.low %v21962_v35, %v21966_v47 }
 0x766   : > { %v10282_v5 = vrot.slane %v10280_v8, 4 }
 0x767   : > { %15720 = vmatpush3.bf16.msra.mxu1 %v17396_v12  ;;  %v22294_v12 = vld [vmem:[#allocation8 + $0x140] sm:$0xff]   ;;  %v10257_v20 = vsel %vm23613_vm10, %v10247_v56, %v10256_v1  ;;  %vm23648_vm10 = vmmov %vm23644_vm5 }
 0x768   : > { %15721 = vmatprep.subr.bf16.mxu1 %v17400_v41 }
 0x76a   : > { %15674 = vmatmul.mubr.bf16.gmra.mrb[188].mxu1 %v10221_v25  ;;  %v10261_v25 = vrot.slane %v10259_v11, 3  ;;  %v10279_v11 = vrot.slane %v10277_v57, 3 }
 0x76b   : > { %15677 = vmatprep.mubr.bf16.mxu1 %v10230_v7  ;;  %15722 = vmatpush3.bf16.msra.mxu1 %v17400_v41  ;;  %v10248_v41 = vsel %vm23612_vm14, %v10238_v24, %v10247_v56  ;;  %v10271_v7 = vshll.u32 %v14635_v49, 16  ;;  %v10298_v56 = vshll.u32 %v14638_v17, 16  ;;  %vm23647_vm14 = vmmov %vm23644_vm5 }
 0x76c   : > { %15723 = vmatprep.subr.bf16.mxu1 %v17404_v36  ;;  %v10265_v27 = vor.u32 %v10264_v3, %v10261_v25  ;;  %v10283_v25 = vor.u32 %v10282_v5, %v10279_v11  ;;  %v10295_v3 = vshrl.u32 %v14638_v17, 16 }
 0x76d   : > { %v10273_v54 = vrot.slane %v10271_v7, 4  ;;  %v10300_v8 = vrot.slane %v10298_v56, 4 }
 0x76e   : > { %v10266_v24 = vsel %vm23614_vm8, %v10256_v1, %v10265_v27  ;;  %v10297_v57 = vrot.slane %v10295_v3, 3  ;;  %vm23649_vm8 = vmmov %vm23644_vm5 }
 0x76f   : > { %15724 = vmatpush3.bf16.msra.mxu1 %v17404_v36  ;;  %v10268_v36 = vshrl.u32 %v14635_v49, 16 }
 0x770   : > { %15773 = vmatprep.subr.bf16.mxu1 %v22294_v12  ;;  %v10301_v11 = vor.u32 %v10300_v8, %v10297_v57 }
 0x771   : > { %v10270_v23 = vrot.slane %v10268_v36, 3 }
 0x772   : > { %15678 = vmatmul.mubr.bf16.gmra.mrb[192].mxu1 %v10239_v51  ;;  %v14637_v51 = vcombine.low %v21958_v34, %v21960_v15 }
 0x773   : > { %15681 = vmatprep.mubr.bf16.mxu1 %v10248_v41  ;;  %v10274_v28 = vor.u32 %v10273_v54, %v10270_v23  ;;  %v14640_v23 = vcombine.low %v21991_v9, %v21997_v31 }
 0x774   : > { %v10286_v49 = vshrl.u32 %v14637_v51, 16  ;;  %v10289_v41 = vshll.u32 %v14637_v51, 16 }
 0x775   : > { %v10275_v50 = vsel %vm23615_vm0, %v10265_v27, %v10274_v28  ;;  %v10284_v1 = vsel %vm23616_vm6, %v10274_v28, %v10283_v25  ;;  %v10313_v5 = vshrl.u32 %v14640_v23, 16  ;;  %v10316_v27 = vshll.u32 %v14640_v23, 16  ;;  %v22321_v23 = vld [vmem:[#allocation2 + $0xc8] sm:$0xf]  ;;  %vm23650_vm0 = vmmov %vm23644_vm5 }
 0x776   : > { %v10288_v36 = vrot.slane %v10286_v49, 3  ;;  %v10291_v7 = vrot.slane %v10289_v41, 4  ;;  %vm23651_vm6 = vmmov %vm23650_vm0 }
 0x777   : > { %v10315_v3 = vrot.slane %v10313_v5, 3  ;;  %v10318_v56 = vrot.slane %v10316_v27, 4 }
 0x778   : > { %v10292_v54 = vor.u32 %v10291_v7, %v10288_v36  ;;  %v14642_v36 = vcombine.low %v22007_v16, %v22013_v14 }
 0x779   : > { %v10319_v57 = vor.u32 %v10318_v56, %v10315_v3 }
 0x77a   : > { %15682 = vmatmul.mubr.bf16.gmra.mrb[196].mxu1 %v10257_v20  ;;  %v14639_v20 = vcombine.low %v21968_v62, %v21989_v21  ;;  %v10293_v17 = vsel %vm23617_vm2, %v10283_v25, %v10292_v54  ;;  %v10302_v28 = vsel %vm23618_vm11, %v10292_v54, %v10301_v11  ;;  %v10331_v8 = vshrl.u32 %v14642_v36, 16  ;;  %vm23652_vm2 = vmmov %vm23650_vm0 }
 0x77b   : > { %15685 = vmatprep.mubr.bf16.mxu1 %v10266_v24  ;;  %v10334_v25 = vshll.u32 %v14642_v36, 16  ;;  %v14643_v54 = vcombine.low %v22015_v2, %v22021_v61  ;;  %vm23653_vm11 = vmmov %vm23650_vm0 }
 0x77c   : > { %v10304_v51 = vshrl.u32 %v14639_v20, 16  ;;  %v10307_v24 = vshll.u32 %v14639_v20, 16  ;;  %v10333_v27 = vrot.slane %v10331_v8, 3 }
 0x77d   : > { %v10343_v3 = vshll.u32 %v14643_v54, 16 }
 0x77e   : > { %v10306_v49 = vrot.slane %v10304_v51, 3  ;;  %v10309_v41 = vrot.slane %v10307_v24, 4 }
 0x77f   : > { %v10345_v14 = vrot.slane %v10343_v3, 4 }
 0x780   : > { %v10310_v7 = vor.u32 %v10309_v41, %v10306_v49  ;;  %v14644_v49 = vcombine.low %v22023_v26, %v22321_v23 }
 0x782   : > { %15686 = vmatmul.mubr.bf16.gmra.mrb[200].mxu1 %v10275_v50  ;;  %v14641_v50 = vcombine.low %v21999_v0, %v22005_v43  ;;  %v10311_v51 = vsel %vm23619_vm9, %v10301_v11, %v10310_v7  ;;  %v10320_v5 = vsel %vm23620_vm13, %v10310_v7, %v10319_v57  ;;  %v10349_v36 = vshrl.u32 %v14644_v49, 16  ;;  %vm23654_vm9 = vmmov %vm23650_vm0 }
 0x783   : > { %15689 = vmatprep.mubr.bf16.mxu1 %v10284_v1  ;;  %v10352_v11 = vshll.u32 %v14644_v49, 16  ;;  %vm23655_vm13 = vmmov %vm23650_vm0 }
 0x784   : > { %v10322_v20 = vshrl.u32 %v14641_v50, 16  ;;  %v10325_v1 = vshll.u32 %v14641_v50, 16  ;;  %v10340_v50 = vshrl.u32 %v14643_v54, 16  ;;  %v10351_v7 = vrot.slane %v10349_v36, 3  ;;  %v17411_v54 = vld [vmem:[#allocation8 + $0x148] sm:$0xff]   ;;  %v17442_v36 = vld [vmem:[#allocation2 + $0x30] sm:$0xff]  }
 0x785   : > { %v10354_v8 = vrot.slane %v10352_v11, 4 }
 0x786   : > { %v10324_v24 = vrot.slane %v10322_v20, 3 }
 0x787   : > { %v10355_v61 = vor.u32 %v10354_v8, %v10351_v7  ;;  %v11299_v8 = vshll.u32 %v17442_v36, 16 }
 0x78a   : > { %15690 = vmatmul.mubr.bf16.gmra.mrb[204].mxu1 %v10293_v17  ;;  %v10327_v17 = vrot.slane %v10325_v1, 4  ;;  %v10342_v1 = vrot.slane %v10340_v50, 3  ;;  %v23632_v50 = vcombine.low %v21948_v4, %v21950_v45  ;;  %v23639_v4 = vcombine.low %v22005_v43, %v22007_v16  ;;  %v17437_v45 = vld [vmem:[#allocation2 + $0x10] sm:$0xff]  }
 0x78b   : > { %15693 = vmatprep.mubr.bf16.mxu1 %v10302_v28  ;;  %v10336_v28 = vrot.slane %v10334_v25, 4  ;;  %v14676_v16 = vcombine.low %v22321_v23, %v22321_v23 }
 0x78c   : > { %v10328_v41 = vor.u32 %v10327_v17, %v10324_v24  ;;  %v10346_v25 = vor.u32 %v10345_v14, %v10342_v1  ;;  %v14653_v17 = vcombine.low %v22216_v40, %v22218_v59  ;;  %v17415_v14 = vld [vmem:[#allocation8 + $0x150] sm:$0xff]   ;;  %v14657_v40 = vcombine.low %v22238_v39, %v22246_v30  ;;  %v17427_v59 = vld [vmem:[#allocation8 + $0x168] sm:$0xff]   ;;  %v17435_v30 = vld [vmem:[#allocation8 + $0x178] sm:$0xff]  }
 0x78d   : > { %v10337_v56 = vor.u32 %v10336_v28, %v10333_v27  ;;  %v14655_v27 = vcombine.low %v22224_v53, %v22233_v48  ;;  %v14656_v28 = vcombine.low %v22226_v13, %v22242_v58  ;;  %v14659_v53 = vcombine.low %v22251_v10, %v22260_v33  ;;  %v17431_v13 = vld [vmem:[#allocation8 + $0x170] sm:$0xff]   ;;  %v23625_v39 = vld [vmem:[#allocation94_spill] sm:$0xff]  ;;  %v23629_v33 = vld [vmem:[#allocation61_spill] sm:$0xff] }
 0x78e   : > { %v10329_v20 = vsel %vm23621_vm4, %v10319_v57, %v10328_v41  ;;  %v10356_v24 = vsel %vm23624_vm7, %v10346_v25, %v10355_v61  ;;  %v14654_v57 = vcombine.low %v22213_v44, %v22228_v38  ;;  %v17423_v38 = vld [vmem:[#allocation8 + $0x160] sm:$0xff]   ;;  %v14658_v44 = vcombine.low %v22240_v37, %v22255_v22  ;;  %v23626_v48 = vld [vmem:[#allocation90_spill] sm:$0xff]  ;;  %vm23656_vm4 = vmmov %vm23650_vm0 }
 0x78f   : > { %v14660_v58 = vcombine.low %v23626_v48, %v23625_v39  ;;  %v17440_v37 = vld [vmem:[#allocation8 + $0x180] sm:$0xff]   ;;  %v14662_v10 = vcombine.low %v22268_v55, %v22280_v42  ;;  %v23628_v22 = vcombine.low %v21935_v60, %v21937_v29  ;;  %v23633_v55 = vcombine.low %v21952_v19, %v21954_v18  ;;  %vm23659_vm7 = vmmov %vm23650_vm0 }
 0x790   : > { %v23634_v60 = vcombine.low %v21956_v52, %v21958_v34  ;;  %v23635_v29 = vcombine.low %v21960_v15, %v21962_v35  ;;  %v17438_v19 = vld [vmem:[#allocation2 + $0x18] sm:$0xff]   ;;  %v11270_v18 = vshll.u32 %v17437_v45, 16  ;;  %v23640_v52 = vld [vmem:[#allocation59_spill] sm:$0xff] }
 0x791   : > { %v23641_v34 = vcombine.low %v23640_v52, %v22015_v2  ;;  %v11275_v15 = vshll.u32 %v17438_v19, 16  ;;  %v23642_v35 = vld [vmem:[#allocation25_spill] sm:$0xff]  ;;  %v11279_v11 = vshrl.u32 %v17438_v19, 16  ;;  %v17451_v19 = vld [vmem:[#allocation2 + $0x68] sm:$0xff]  }
 0x792   : > { %15694 = vmatmul.mubr.bf16.gmra.mrb[208].mxu1 %v10311_v51  ;;  %v10338_v51 = vsel %vm23622_vm1, %v10328_v41, %v10337_v56  ;;  %v23630_v41 = vcombine.low %v23629_v33, %v21942_v6  ;;  %v23636_v6 = vcombine.low %v21966_v47, %v21968_v62  ;;  %v23643_v47 = vcombine.low %v23642_v35, %v22023_v26  ;;  %v17443_v1 = vld [vmem:[#allocation2 + $0x38] sm:$0xff]   ;;  %vm23657_vm1 = vmmov %vm23650_vm0 }
 0x793   : > { %15697 = vmatprep.mubr.bf16.mxu1 %v10320_v5  ;;  %v10347_v5 = vsel %vm23623_vm3, %v10337_v56, %v10346_v25  ;;  %v11272_v62 = vrot.slane %v11270_v18, 1  ;;  %v17444_v25 = vld [vmem:[#allocation8 + $0x188] sm:$0xff]   ;;  %vm23658_vm3 = vmmov %vm23650_vm0 }
 0x79a   : > { %15698 = vmatmul.mubr.bf16.gmra.mrb[212].mxu1 %v10329_v20 }
 0x79b   : > { %15701 = vmatprep.mubr.bf16.mxu1 %v10338_v51 }
 0x7a2   : > { %15702 = vmatmul.mubr.bf16.gmra.mrb[216].mxu1 %v10347_v5 }
 0x7a3   : > { %15705 = vmatprep.mubr.bf16.mxu1 %v10356_v24  ;;  %v11307_v24 = vshll.u32 %v17443_v1, 16 }
 0x7aa   : > { %15706 = vmatmul.mubr.bf16.gmra.mrb[220].mxu1 %v10355_v61  ;;  %v17419_v61 = vld [vmem:[#allocation8 + $0x158] sm:$0xff]  }
 0x7ab   : > { %15725 = vmatprep.mubr.bf16.mxu1 %v14653_v17  ;;  %v11301_v17 = vrot.slane %v11299_v8, 1 }
 0x7b2   : > { %15726 = vmatmul.mubr.bf16.vlgmr.msra.gmra.mrb[176].mxu1 %v14654_v57  ;;  %v17445_v57 = vld [vmem:[#allocation2 + $0x40] sm:$0xff]  }
 0x7b3   : > { %15729 = vmatprep.mubr.bf16.mxu1 %v14655_v27  ;;  %15774 = vmatpush3.bf16.msra.mxu1 %v22294_v12  ;;  %v23627_v12 = vld [vmem:[#allocation81_spill] sm:$0xff] }
 0x7b4   : > { %15775 = vmatprep.subr.bf16.mxu1 %v17411_v54  ;;  %v14661_v49 = vcombine.low %v23627_v12, %v22275_v46  ;;  %v23631_v46 = vcombine.low %v21944_v63, %v21946_v32  ;;  %v23637_v63 = vcombine.low %v21989_v21, %v21991_v9  ;;  %v23638_v32 = vcombine.low %v21997_v31, %v21999_v0  ;;  %v17439_v21 = vld [vmem:[#allocation2 + $0x20] sm:$0xff]   ;;  %v17441_v0 = vld [vmem:[#allocation2 + $0x28] sm:$0xff]  }
 0x7b5   : > { %v11268_v9 = vshrl.u32 %v17437_v45, 16  ;;  %v11277_v31 = vrot.slane %v11275_v15, 1  ;;  %v11283_v42 = vshll.u32 %v17439_v21, 16  ;;  %v11291_v2 = vshll.u32 %v17441_v0, 16  ;;  %v17468_v15 = vld [vmem:[#allocation8 + $0x1b8] sm:$0xff]  }
 0x7b6   : > { %v11287_v26 = vshrl.u32 %v17439_v21, 16  ;;  %v11295_v27 = vshrl.u32 %v17441_v0, 16  ;;  %v11311_v12 = vshrl.u32 %v17443_v1, 16  ;;  %v17455_v1 = vld [vmem:[#allocation2 + $0x80] sm:$0xff]  }
 0x7b7   : > { %15776 = vmatpush3.bf16.msra.mxu1 %v17411_v54  ;;  %v11273_v43 = vor.u32 %v11272_v62, %v11268_v9  ;;  %v11285_v56 = vrot.slane %v11283_v42, 1  ;;  %v11293_v20 = vrot.slane %v11291_v2, 1  ;;  %v11281_v51 = vor.u32 %v11279_v11, %v11277_v31  ;;  %v17448_v54 = vld [vmem:[#allocation8 + $0x190] sm:$0xff]   ;;  %v17454_v42 = vld [vmem:[#allocation2 + $0x78] sm:$0xff]  }
 0x7b8   : > { %15777 = vmatprep.subr.bf16.mxu1 %v17415_v14  ;;  %v11355_v62 = vshll.u32 %v17451_v19, 16  ;;  %v17453_v9 = vld [vmem:[#allocation2 + $0x70] sm:$0xff]  }
 0x7b9   : > { %v11278_v3 = vsel %vm23644_vm5, %v11273_v43, %v11277_v31  ;;  %v11289_v7 = vor.u32 %v11287_v26, %v11285_v56  ;;  %v11286_v5 = vsel %vm23645_vm15, %v11281_v51, %v11285_v56  ;;  %v22404_v31 = vld [vmem:[#allocation8 + $0x1c0] sm:$0xff]   ;;  %v11363_v56 = vshll.u32 %v17453_v9, 16  ;;  %vm23660_vm5 = vmmov %vm23650_vm0 }
 0x7ba   : > { %15730 = vmatmul.mubr.bf16.gmra.mrb[180].mxu1 %v14656_v28  ;;  %v11309_v28 = vrot.slane %v11307_v24, 1  ;;  %v11357_v43 = vrot.slane %v11355_v62, 1  ;;  %v11371_v26 = vshll.u32 %v17454_v42, 16  ;;  %v11359_v51 = vshrl.u32 %v17451_v19, 16  ;;  %vm23661_vm15 = vmmov %vm23650_vm0 }
 0x7bb   : > { %15733 = vmatprep.mubr.bf16.mxu1 %v14657_v40  ;;  %15778 = vmatpush3.bf16.msra.mxu1 %v17415_v14  ;;  %v11294_v23 = vsel %vm23646_vm12, %v11289_v7, %v11293_v20  ;;  %v11303_v14 = vshrl.u32 %v17442_v36, 16  ;;  %v11297_v40 = vor.u32 %v11295_v27, %v11293_v20  ;;  %v11365_v20 = vrot.slane %v11363_v56, 1  ;;  %vm23662_vm12 = vmmov %vm23650_vm0 }
 0x7bc   : > { %15779 = vmatprep.subr.bf16.mxu1 %v17419_v61  ;;  %v11367_v7 = vshrl.u32 %v17453_v9, 16  ;;  %v11373_v8 = vrot.slane %v11371_v26, 1  ;;  %v11379_v24 = vshll.u32 %v17455_v1, 16  ;;  %v17661_v26 = vld [vmem:[#allocation2 + $0x24] sm:$0xf] }
 0x7be   : > { %v11381_v27 = vrot.slane %v11379_v24, 1 }
 0x7bf   : > { %15780 = vmatpush3.bf16.msra.mxu1 %v17419_v61  ;;  %v17446_v61 = vld [vmem:[#allocation2 + $0x48] sm:$0xff]  }
 0x7c0   : > { %15781 = vmatprep.subr.bf16.mxu1 %v17423_v38  ;;  %v11323_v39 = vshll.u32 %v17446_v61, 16 }
 0x7c2   : > { %15734 = vmatmul.mubr.bf16.gmra.mrb[184].mxu1 %v14658_v44  ;;  %v11315_v44 = vshll.u32 %v17445_v57, 16 }
 0x7c3   : > { %15737 = vmatprep.mubr.bf16.mxu1 %v14659_v53  ;;  %15782 = vmatpush3.bf16.msra.mxu1 %v17423_v38  ;;  %v11305_v38 = vor.u32 %v11303_v14, %v11301_v17  ;;  %v11302_v53 = vsel %vm23647_vm14, %v11297_v40, %v11301_v17  ;;  %v17458_v14 = vld [vmem:[#allocation2 + $0x90] sm:$0xff]   ;;  %vm23663_vm14 = vmmov %vm23650_vm0 }
 0x7c4   : > { %15783 = vmatprep.subr.bf16.mxu1 %v17427_v59  ;;  %v11317_v48 = vrot.slane %v11315_v44, 1 }
 0x7c7   : > { %15784 = vmatpush3.bf16.msra.mxu1 %v17427_v59  ;;  %v17452_v59 = vld [vmem:[#allocation8 + $0x198] sm:$0xff]  }
 0x7c8   : > { %15785 = vmatprep.subr.bf16.mxu1 %v17431_v13 }
 0x7ca   : > { %15738 = vmatmul.mubr.bf16.gmra.mrb[188].mxu1 %v14660_v58  ;;  %v17447_v58 = vld [vmem:[#allocation2 + $0x50] sm:$0xff]  }
 0x7cb   : > { %15741 = vmatprep.mubr.bf16.mxu1 %v14661_v49  ;;  %15786 = vmatpush3.bf16.msra.mxu1 %v17431_v13  ;;  %v11310_v13 = vsel %vm23648_vm10, %v11305_v38, %v11309_v28  ;;  %v11319_v49 = vshrl.u32 %v17445_v57, 16  ;;  %v17459_v38 = vld [vmem:[#allocation2 + $0x98] sm:$0xff]   ;;  %vm23664_vm10 = vmmov %vm23650_vm0 }
 0x7cc   : > { %15787 = vmatprep.subr.bf16.mxu1 %v17435_v30 }
 0x7cd   : > { %v11321_v33 = vor.u32 %v11319_v49, %v11317_v48  ;;  %v11399_v49 = vshrl.u32 %v17458_v14, 16 }
 0x7cf   : > { %15788 = vmatpush3.bf16.msra.mxu1 %v17435_v30  ;;  %v17456_v30 = vld [vmem:[#allocation8 + $0x1a0] sm:$0xff]  }
 0x7d0   : > { %15837 = vmatprep.subr.bf16.mxu1 %v17440_v37 }
 0x7d2   : > { %15742 = vmatmul.mubr.bf16.gmra.mrb[192].mxu1 %v14662_v10  ;;  %v17449_v10 = vld [vmem:[#allocation2 + $0x58] sm:$0xff]  }
 0x7d3   : > { %15745 = vmatprep.mubr.bf16.mxu1 %v23628_v22  ;;  %v11313_v22 = vor.u32 %v11311_v12, %v11309_v28  ;;  %v11343_v0 = vshrl.u32 %v17449_v10, 16  ;;  %v11375_v28 = vshrl.u32 %v17454_v42, 16 }
 0x7d5   : > { %v11377_v44 = vor.u32 %v11375_v28, %v11373_v8  ;;  %v17663_v28 = vld [vmem:[#allocation2 + $0x28] sm:$0xf] }
 0x7da   : > { %15746 = vmatmul.mubr.bf16.gmra.mrb[196].mxu1 %v23630_v41  ;;  %v11331_v41 = vshll.u32 %v17447_v58, 16 }
 0x7db   : > { %15749 = vmatprep.mubr.bf16.mxu1 %v23631_v46  ;;  %v17460_v46 = vld [vmem:[#allocation8 + $0x1a8] sm:$0xff]  }
 0x7e2   : > { %15750 = vmatmul.mubr.bf16.gmra.mrb[200].mxu1 %v23632_v50  ;;  %v11318_v50 = vsel %vm23649_vm8, %v11313_v22, %v11317_v48  ;;  %v11403_v48 = vshll.u32 %v17459_v38, 16  ;;  %vm23665_vm8 = vmmov %vm23650_vm0 }
 0x7e3   : > { %15753 = vmatprep.mubr.bf16.mxu1 %v23633_v55 }
 0x7ea   : > { %15754 = vmatmul.mubr.bf16.gmra.mrb[204].mxu1 %v23634_v60  ;;  %v11339_v60 = vshll.u32 %v17449_v10, 16  ;;  %v17462_v10 = vld [vmem:[#allocation2 + $0xa8] sm:$0xff]  }
 0x7eb   : > { %15757 = vmatprep.mubr.bf16.mxu1 %v23635_v29  ;;  %v11333_v29 = vrot.slane %v11331_v41, 1  ;;  %v11423_v62 = vshrl.u32 %v17462_v10, 16 }
 0x7ec   : > { %v11341_v45 = vrot.slane %v11339_v60, 1 }
 0x7f2   : > { %15758 = vmatmul.mubr.bf16.gmra.mrb[208].mxu1 %v23636_v6  ;;  %v17450_v6 = vld [vmem:[#allocation2 + $0x60] sm:$0xff]  }
 0x7f3   : > { %15761 = vmatprep.mubr.bf16.mxu1 %v23637_v63  ;;  %v17464_v63 = vld [vmem:[#allocation8 + $0x1b0] sm:$0xff]  }
 0x7fa   : > { %15762 = vmatmul.mubr.bf16.gmra.mrb[212].mxu1 %v23638_v32  ;;  %v11327_v32 = vshrl.u32 %v17446_v61, 16  ;;  %v11383_v61 = vshrl.u32 %v17455_v1, 16 }
 0x7fb   : > { %15765 = vmatprep.mubr.bf16.mxu1 %v23639_v4  ;;  %v11335_v4 = vshrl.u32 %v17447_v58, 16 }
 0x7fd   : > { %v11337_v52 = vor.u32 %v11335_v4, %v11333_v29  ;;  %v17465_v4 = vld [vmem:[#allocation2 + $0xb8] sm:$0xff]  }
 0x802   : > { %15766 = vmatmul.mubr.bf16.gmra.mrb[216].mxu1 %v23641_v34  ;;  %v11347_v34 = vshll.u32 %v17450_v6, 16 }
 0x803   : > { %15769 = vmatprep.mubr.bf16.mxu1 %v23643_v47  ;;  %v11342_v47 = vsel %vm23652_vm2, %v11337_v52, %v11341_v45 }
 0x804   : > { %v11349_v21 = vrot.slane %v11347_v34, 1 }
 0x80a   : > { %15770 = vmatmul.mubr.bf16.gmra.mrb[220].mxu1 %v14676_v16  ;;  %v11351_v16 = vshrl.u32 %v17450_v6, 16  ;;  %v11407_v6 = vshrl.u32 %v17459_v38, 16 }
 0x80b   : > { %15789 = vmatprep.mubr.bf16.mxu1 %v11278_v3  ;;  %v11345_v3 = vor.u32 %v11343_v0, %v11341_v45  ;;  %v17467_v0 = vld [vmem:[#allocation2 + $0xc8] sm:$0x1f]  }
 0x80c   : > { %v11353_v2 = vor.u32 %v11351_v16, %v11349_v21 }
 0x80d   : > { %v11350_v36 = vsel %vm23653_vm11, %v11345_v3, %v11349_v21 }
 0x80e   : > { %v11358_v11 = vsel %vm23654_vm9, %v11353_v2, %v11357_v43  ;;  %v11801_v2 = vld [vmem:[#allocation2 + $0x18] sm:$0x8] }
 0x812   : > { %15790 = vmatmul.mubr.bf16.vlgmr.msra.gmra.mrb[176].mxu1 %v11286_v5  ;;  %v11361_v5 = vor.u32 %v11359_v51, %v11357_v43  ;;  %v17662_v51 = vld [vmem:[#allocation2 + $0x1c] sm:$0xf] }
 0x813   : > { %15793 = vmatprep.mubr.bf16.mxu1 %v11294_v23  ;;  %15838 = vmatpush3.bf16.msra.mxu1 %v17440_v37  ;;  %v11325_v37 = vrot.slane %v11323_v39, 1  ;;  %v11369_v23 = vor.u32 %v11367_v7, %v11365_v20  ;;  %v14717_v7 = vcombine.low %v11801_v2, %v17662_v51 }
 0x814   : > { %15839 = vmatprep.subr.bf16.mxu1 %v17444_v25  ;;  %v11366_v17 = vsel %vm23655_vm13, %v11361_v5, %v11365_v20 }
 0x815   : > { %v11326_v55 = vsel %vm23650_vm0, %v11321_v33, %v11325_v37  ;;  %v11329_v18 = vor.u32 %v11327_v32, %v11325_v37  ;;  %v11374_v57 = vsel %vm23656_vm4, %v11369_v23, %v11373_v8  ;;  %v11405_v37 = vrot.slane %v11403_v48, 1 }
 0x816   : > { %v11439_v8 = vshrl.u32 %v17465_v4, 16 }
 0x817   : > { %15840 = vmatpush3.bf16.msra.mxu1 %v17444_v25  ;;  %v11334_v35 = vsel %vm23651_vm6, %v11329_v18, %v11333_v29  ;;  %v17457_v25 = vld [vmem:[#allocation2 + $0x88] sm:$0xff]   ;;  %v17463_v29 = vld [vmem:[#allocation2 + $0xb0] sm:$0xff]   ;;  %v11409_v45 = vor.u32 %v11407_v6, %v11405_v37  ;;  %vm23666_vm6 = vsmask.f32 4352 }
 0x818   : > { %15841 = vmatprep.subr.bf16.mxu1 %v17448_v54  ;;  %v11391_v12 = vshrl.u32 %v17457_v25, 16  ;;  %v11427_v18 = vshll.u32 %v17463_v29, 16  ;;  %v11431_v21 = vshrl.u32 %v17463_v29, 16  ;;  %vm23667_vm2 = vmmov %vm23666_vm6 }
 0x819   : > { %vm23668_vm11 = vmmov %vm23667_vm2 }
 0x81a   : > { %15794 = vmatmul.mubr.bf16.gmra.mrb[180].mxu1 %v11302_v53  ;;  %v11395_v53 = vshll.u32 %v17458_v14, 16  ;;  %vm23669_vm9 = vmmov %vm23667_vm2 }
 0x81b   : > { %15797 = vmatprep.mubr.bf16.mxu1 %v11310_v13  ;;  %15842 = vmatpush3.bf16.msra.mxu1 %v17448_v54  ;;  %v11387_v54 = vshll.u32 %v17457_v25, 16  ;;  %v11382_v13 = vsel %vm23657_vm1, %v11377_v44, %v11381_v27  ;;  %vm23670_vm13 = vmmov %vm23667_vm2 }
 0x81c   : > { %15843 = vmatprep.subr.bf16.mxu1 %v17452_v59  ;;  %v11397_v58 = vrot.slane %v11395_v53, 1  ;;  %v17665_v53 = vld [vmem:[#allocation2 + $0x30] sm:$0xf]  ;;  %vm23671_vm4 = vmmov %vm23667_vm2 }
 0x81d   : > { %v11389_v40 = vrot.slane %v11387_v54, 1  ;;  %v11986_v54 = vshrl.u32 %v14717_v7, 16  ;;  %vm23672_vm1 = vmmov %vm23667_vm2 }
 0x81e   : > { %v11401_v33 = vor.u32 %v11399_v49, %v11397_v58  ;;  %v11455_v49 = vshrl.u32 %v17467_v0, 16 }
 0x81f   : > { %15844 = vmatpush3.bf16.msra.mxu1 %v17452_v59  ;;  %v11385_v59 = vor.u32 %v11383_v61, %v11381_v27  ;;  %v11393_v22 = vor.u32 %v11391_v12, %v11389_v40  ;;  %v11989_v27 = vshll.u32 %v14717_v7, 16  ;;  %v17664_v61 = vld [vmem:[#allocation2 + $0x2c] sm:$0xf]  ;;  %v11988_v48 = vrot.slane %v11986_v54, 3  ;;  %v17675_v54 = vld [vmem:[#allocation2 + $0x58] sm:$0xf] }
 0x820   : > { %15845 = vmatprep.subr.bf16.mxu1 %v17456_v30 }
 0x821   : > { %v11390_v39 = vsel %vm23658_vm3, %v11385_v59, %v11389_v40  ;;  %v14719_v40 = vcombine.low %v17663_v28, %v17664_v61  ;;  %vm23673_vm3 = vmmov %vm23672_vm1 }
 0x822   : > { %15798 = vmatmul.mubr.bf16.gmra.mrb[184].mxu1 %v11318_v50  ;;  %v11406_v50 = vsel %vm23660_vm5, %v11401_v33, %v11405_v37  ;;  %vm23675_vm5 = vmmov %vm23672_vm1 }
 0x823   : > { %15801 = vmatprep.mubr.bf16.mxu1 %v11326_v55  ;;  %15846 = vmatpush3.bf16.msra.mxu1 %v17456_v30  ;;  %v17461_v30 = vld [vmem:[#allocation2 + $0xa0] sm:$0xff]   ;;  %v11419_v55 = vshll.u32 %v17462_v10, 16  ;;  %v12006_v12 = vshll.u32 %v14719_v40, 16 }
 0x824   : > { %15847 = vmatprep.subr.bf16.mxu1 %v17460_v46  ;;  %v11411_v41 = vshll.u32 %v17461_v30, 16 }
 0x825   : > { %v11421_v32 = vrot.slane %v11419_v55, 1  ;;  %v17667_v55 = vld [vmem:[#allocation2 + $0x38] sm:$0xf] }
 0x826   : > { %v11413_v60 = vrot.slane %v11411_v41, 1 }
 0x827   : > { %15848 = vmatpush3.bf16.msra.mxu1 %v17460_v46  ;;  %v11398_v46 = vsel %vm23659_vm7, %v11393_v22, %v11397_v58  ;;  %v11425_v16 = vor.u32 %v11423_v62, %v11421_v32  ;;  %v11991_v58 = vrot.slane %v11989_v27, 4  ;;  %v17476_v62 = vld [vmem:[#allocation8 + $0x1c8] sm:$0xff]   ;;  %v17676_v27 = vld [vmem:[#allocation2 + $0x5c] sm:$0xf]  ;;  %vm23674_vm7 = vmmov %vm23672_vm1 }
 0x828   : > { %15849 = vmatprep.subr.bf16.mxu1 %v17464_v63  ;;  %v11414_v52 = vsel %vm23661_vm15, %v11409_v45, %v11413_v60  ;;  %v17670_v45 = vld [vmem:[#allocation2 + $0x44] sm:$0xf]  ;;  %vm23676_vm15 = vmmov %vm23672_vm1 }
 0x829   : > { %v11992_v41 = vor.u32 %v11991_v58, %v11988_v48 }
 0x82a   : > { %15802 = vmatmul.mubr.bf16.gmra.mrb[188].mxu1 %v11334_v35  ;;  %v11429_v35 = vrot.slane %v11427_v18, 1 }
 0x82b   : > { %15805 = vmatprep.mubr.bf16.mxu1 %v11342_v47  ;;  %15850 = vmatpush3.bf16.msra.mxu1 %v17464_v63  ;;  %v11415_v63 = vshrl.u32 %v17461_v30, 16  ;;  %v17466_v47 = vld [vmem:[#allocation2 + $0xc0] sm:$0xff]   ;;  %v12003_v30 = vshrl.u32 %v14719_v40, 16 }
 0x82c   : > { %15851 = vmatprep.subr.bf16.mxu1 %v17468_v15  ;;  %v11433_v43 = vor.u32 %v11431_v21, %v11429_v35  ;;  %v11443_v42 = vshll.u32 %v17466_v47, 16  ;;  %v11430_v3 = vsel %vm23663_vm14, %v11425_v16, %v11429_v35  ;;  %v11447_v25 = vshrl.u32 %v17466_v47, 16  ;;  %v17671_v16 = vld [vmem:[#allocation2 + $0x48] sm:$0xf]  ;;  %v17677_v40 = vld [vmem:[#allocation2 + $0x60] sm:$0xf]  ;;  %vm23678_vm14 = vmmov %vm23672_vm1 }
 0x82d   : > { %v11417_v19 = vor.u32 %v11415_v63, %v11413_v60  ;;  %v17668_v60 = vld [vmem:[#allocation2 + $0x3c] sm:$0xf] }
 0x82e   : > { %v11445_v1 = vrot.slane %v11443_v42, 1  ;;  %v14721_v29 = vcombine.low %v17667_v55, %v17668_v60  ;;  %v17681_v60 = vld [vmem:[#allocation2 + $0x70] sm:$0xf] }
 0x82f   : > { %15852 = vmatpush3.bf16.msra.mxu1 %v17468_v15  ;;  %v11422_v34 = vsel %vm23662_vm12, %v11417_v19, %v11421_v32  ;;  %v11435_v15 = vshll.u32 %v17465_v4, 16  ;;  %v17669_v4 = vld [vmem:[#allocation2 + $0x40] sm:$0xf]  ;;  %vm23677_vm12 = vmmov %vm23672_vm1 }
 0x830   : > { %15901 = vmatprep.subr.bf16.mxu1 %v22404_v31  ;;  %v14722_v19 = vcombine.low %v17669_v4, %v17670_v45 }
 0x831   : > { %v11437_v9 = vrot.slane %v11435_v15, 1 }
 0x832   : > { %15806 = vmatmul.mubr.bf16.gmra.mrb[192].mxu1 %v11350_v36  ;;  %v11451_v36 = vshll.u32 %v17467_v0, 16  ;;  %v12030_v35 = vshrl.u32 %v14722_v19, 16  ;;  %v12033_v47 = vshll.u32 %v14722_v19, 16 }
 0x833   : > { %15809 = vmatprep.mubr.bf16.mxu1 %v11358_v11  ;;  %v11438_v56 = vsel %vm23664_vm10, %v11433_v43, %v11437_v9  ;;  %v17660_v11 = vld [vmem:[#allocation2 + $0x20] sm:$0xf]  ;;  %v17672_v43 = vld [vmem:[#allocation2 + $0x4c] sm:$0xf]  ;;  %vm23679_vm10 = vmmov %vm23672_vm1 }
 0x834   : > { %v14718_v20 = vcombine.low %v17660_v11, %v17661_v26  ;;  %v11453_v5 = vrot.slane %v11451_v36, 1  ;;  %v14723_v42 = vcombine.low %v17671_v16, %v17672_v43  ;;  %v12032_v2 = vrot.slane %v12030_v35, 3  ;;  %v17673_v36 = vld [vmem:[#allocation2 + $0x50] sm:$0xf]  ;;  %v17674_v11 = vld [vmem:[#allocation2 + $0x54] sm:$0xf] }
 0x835   : > { %v14724_v26 = vcombine.low %v17673_v36, %v17674_v11 }
 0x836   : > { %v11994_v23 = vshrl.u32 %v14718_v20, 16  ;;  %v11997_v24 = vshll.u32 %v14718_v20, 16  ;;  %v11457_v33 = vor.u32 %v11455_v49, %v11453_v5  ;;  %v17480_v20 = vld [vmem:[#allocation8 + $0x1d0] sm:$0xff]   ;;  %v12039_v51 = vshrl.u32 %v14723_v42, 16 }
 0x837   : > { %v12042_v7 = vshll.u32 %v14723_v42, 16  ;;  %v17685_v42 = vld [vmem:[#allocation2 + $0x80] sm:$0xf] }
 0x838   : > { %v11996_v44 = vrot.slane %v11994_v23, 3  ;;  %v11999_v59 = vrot.slane %v11997_v24, 4  ;;  %v17484_v23 = vld [vmem:[#allocation8 + $0x1d8] sm:$0xff]  }
 0x83a   : > { %15810 = vmatmul.mubr.bf16.gmra.mrb[196].mxu1 %v11366_v17  ;;  %v11441_v17 = vor.u32 %v11439_v8, %v11437_v9  ;;  %v12000_v37 = vor.u32 %v11999_v59, %v11996_v44  ;;  %v17488_v59 = vld [vmem:[#allocation8 + $0x1e0] sm:$0xff]  }
 0x83b   : > { %15813 = vmatprep.mubr.bf16.mxu1 %v11374_v57  ;;  %v11449_v57 = vor.u32 %v11447_v25, %v11445_v1  ;;  %v12048_v25 = vshrl.u32 %v14724_v26, 16 }
 0x83c   : > { %v11446_v14 = vsel %vm23665_vm8, %v11441_v17, %v11445_v1  ;;  %v12001_v6 = vsel %vm23666_vm6, %v11992_v41, %v12000_v37  ;;  %v12041_v17 = vrot.slane %v12039_v51, 3  ;;  %vm23680_vm8 = vmmov %vm23672_vm1 }
 0x83d   : > { %v11454_v38 = vsel %vm23650_vm0, %v11449_v57, %v11453_v5  ;;  %v12051_v5 = vshll.u32 %v14724_v26, 16  ;;  %v12044_v57 = vrot.slane %v12042_v7, 4  ;;  %v12050_v28 = vrot.slane %v12048_v25, 3  ;;  %vm23681_vm0 = vmmov %vm23672_vm1 }
 0x83e   : > { %vm23682_vm6 = vmmov %vm23681_vm0 }
 0x83f   : > { %v12053_v61 = vrot.slane %v12051_v5, 4  ;;  %v17687_v5 = vld [vmem:[#allocation2 + $0x88] sm:$0xf] }
 0x841   : > { %v12054_v48 = vor.u32 %v12053_v61, %v12050_v28 }
 0x842   : > { %15814 = vmatmul.mubr.bf16.gmra.mrb[200].mxu1 %v11382_v13  ;;  %v17666_v13 = vld [vmem:[#allocation2 + $0x34] sm:$0xf] }
 0x843   : > { %15817 = vmatprep.mubr.bf16.mxu1 %v11390_v39  ;;  %v14720_v39 = vcombine.low %v17665_v53, %v17666_v13  ;;  %v12045_v53 = vor.u32 %v12044_v57, %v12041_v17 }
 0x845   : > { %v12012_v10 = vshrl.u32 %v14720_v39, 16  ;;  %v12015_v22 = vshll.u32 %v14720_v39, 16 }
 0x847   : > { %v12014_v63 = vrot.slane %v12012_v10, 3  ;;  %v12017_v32 = vrot.slane %v12015_v22, 4  ;;  %v17679_v22 = vld [vmem:[#allocation2 + $0x68] sm:$0xf] }
 0x849   : > { %v12018_v15 = vor.u32 %v12017_v32, %v12014_v63  ;;  %v17496_v63 = vld [vmem:[#allocation8 + $0x1f0] sm:$0xff]  }
 0x84a   : > { %15818 = vmatmul.mubr.bf16.gmra.mrb[204].mxu1 %v11398_v46  ;;  %v12005_v46 = vrot.slane %v12003_v30, 3 }
 0x84b   : > { %15821 = vmatprep.mubr.bf16.mxu1 %v11406_v50  ;;  %v12008_v50 = vrot.slane %v12006_v12, 4  ;;  %v17492_v12 = vld [vmem:[#allocation8 + $0x1e8] sm:$0xff]  }
 0x84d   : > { %v12009_v18 = vor.u32 %v12008_v50, %v12005_v46  ;;  %v12055_v46 = vsel %vm23672_vm1, %v12045_v53, %v12054_v48  ;;  %vm23688_vm1 = vmmov %vm23681_vm0 }
 0x84f   : > { %v12010_v21 = vsel %vm23667_vm2, %v12000_v37, %v12009_v18  ;;  %vm23683_vm2 = vmmov %vm23681_vm0 }
 0x852   : > { %15822 = vmatmul.mubr.bf16.gmra.mrb[208].mxu1 %v11414_v52  ;;  %v12021_v52 = vshrl.u32 %v14721_v29, 16 }
 0x853   : > { %15825 = vmatprep.mubr.bf16.mxu1 %v11422_v34  ;;  %v12024_v34 = vshll.u32 %v14721_v29, 16  ;;  %v17682_v29 = vld [vmem:[#allocation2 + $0x74] sm:$0xf] }
 0x854   : > { %v12023_v9 = vrot.slane %v12021_v52, 3 }
 0x855   : > { %v12026_v0 = vrot.slane %v12024_v34, 4  ;;  %v17500_v34 = vld [vmem:[#allocation8 + $0x1f8] sm:$0xff]  }
 0x857   : > { %v12027_v1 = vor.u32 %v12026_v0, %v12023_v9 }
 0x859   : > { %v12028_v24 = vsel %vm23669_vm9, %v12018_v15, %v12027_v1  ;;  %vm23685_vm9 = vmmov %vm23681_vm0 }
 0x85a   : > { %15826 = vmatmul.mubr.bf16.gmra.mrb[212].mxu1 %v11430_v3  ;;  %v12019_v3 = vsel %vm23668_vm11, %v12009_v18, %v12018_v15  ;;  %vm23684_vm11 = vmmov %vm23681_vm0 }
 0x85b   : > { %15829 = vmatprep.mubr.bf16.mxu1 %v11438_v56  ;;  %v12035_v56 = vrot.slane %v12033_v47, 4 }
 0x85d   : > { %v12036_v8 = vor.u32 %v12035_v56, %v12032_v2  ;;  %v22431_v56 = vld [vmem:[#allocation8 + $0x200] sm:$0xff]  }
 0x85f   : > { %v12046_v49 = vsel %vm23671_vm4, %v12036_v8, %v12045_v53  ;;  %vm23687_vm4 = vmmov %vm23681_vm0 }
 0x862   : > { %15830 = vmatmul.mubr.bf16.gmra.mrb[216].mxu1 %v11446_v14  ;;  %v14725_v14 = vcombine.low %v17675_v54, %v17676_v27  ;;  %v17689_v27 = vld [vmem:[#allocation2 + $0x90] sm:$0xf] }
 0x863   : > { %15833 = vmatprep.mubr.bf16.mxu1 %v11454_v38  ;;  %v17678_v38 = vld [vmem:[#allocation2 + $0x64] sm:$0xf] }
 0x864   : > { %v14726_v44 = vcombine.low %v17677_v40, %v17678_v38  ;;  %v12057_v13 = vshrl.u32 %v14725_v14, 16  ;;  %v12060_v39 = vshll.u32 %v14725_v14, 16  ;;  %v17690_v14 = vld [vmem:[#allocation2 + $0x94] sm:$0xf] }
 0x866   : > { %v12066_v58 = vshrl.u32 %v14726_v44, 16  ;;  %v12069_v30 = vshll.u32 %v14726_v44, 16  ;;  %v12059_v37 = vrot.slane %v12057_v13, 3  ;;  %v12062_v10 = vrot.slane %v12060_v39, 4 }
 0x868   : > { %v12068_v50 = vrot.slane %v12066_v58, 3  ;;  %v12071_v55 = vrot.slane %v12069_v30, 4  ;;  %v12063_v32 = vor.u32 %v12062_v10, %v12059_v37  ;;  %v17692_v58 = vld [vmem:[#allocation2 + $0x9c] sm:$0xf]  ;;  %v17693_v10 = vld [vmem:[#allocation2 + $0xa0] sm:$0xf] }
 0x86a   : > { %15834 = vmatmul.mubr.bf16.gmra.mrb[220].mxu1 %v11457_v33  ;;  %v17680_v33 = vld [vmem:[#allocation2 + $0x6c] sm:$0xf]  ;;  %v12072_v19 = vor.u32 %v12071_v55, %v12068_v50  ;;  %v12064_v15 = vsel %vm23673_vm3, %v12054_v48, %v12063_v32  ;;  %v17691_v48 = vld [vmem:[#allocation2 + $0x98] sm:$0xf]  ;;  %vm23755_vm3 = vsmask.f32 7424 }
 0x86b   : > { %15853 = vmatprep.mubr.bf16.mxu1 %v12001_v6  ;;  %v14727_v41 = vcombine.low %v17679_v22, %v17680_v33  ;;  %v14728_v6 = vcombine.low %v17681_v60, %v17682_v29  ;;  %v14733_v30 = vcombine.low %v17691_v48, %v17692_v58  ;;  %v17694_v22 = vld [vmem:[#allocation2 + $0xa4] sm:$0xf] }
 0x86c   : > { %v12073_v0 = vsel %vm23674_vm7, %v12063_v32, %v12072_v19  ;;  %v14734_v33 = vcombine.low %v17693_v10, %v17694_v22  ;;  %vm23756_vm7 = vmmov %vm23755_vm3 }
 0x86d   : > { %v12075_v4 = vshrl.u32 %v14727_v41, 16  ;;  %v12078_v45 = vshll.u32 %v14727_v41, 16  ;;  %v12084_v18 = vshrl.u32 %v14728_v6, 16  ;;  %v12087_v52 = vshll.u32 %v14728_v6, 16 }
 0x86e   : > { %v12132_v50 = vshll.u32 %v14733_v30, 16  ;;  %v12138_v60 = vshrl.u32 %v14734_v33, 16  ;;  %v12141_v29 = vshll.u32 %v14734_v33, 16 }
 0x86f   : > { %v12077_v35 = vrot.slane %v12075_v4, 3  ;;  %v12080_v47 = vrot.slane %v12078_v45, 4  ;;  %v12086_v16 = vrot.slane %v12084_v18, 3  ;;  %v12089_v43 = vrot.slane %v12087_v52, 4  ;;  %v17695_v4 = vld [vmem:[#allocation2 + $0xa8] sm:$0xf] }
 0x870   : > { %v12134_v32 = vrot.slane %v12132_v50, 4  ;;  %v17696_v45 = vld [vmem:[#allocation2 + $0xac] sm:$0xf]  ;;  %v12140_v52 = vrot.slane %v12138_v60, 3 }
 0x871   : > { %v12081_v36 = vor.u32 %v12080_v47, %v12077_v35  ;;  %v17698_v35 = vld [vmem:[#allocation2 + $0xb4] sm:$0xf] }
 0x872   : > { %15854 = vmatmul.mubr.bf16.vlgmr.msra.gmra.mrb[176].mxu1 %v12010_v21  ;;  %v17684_v21 = vld [vmem:[#allocation2 + $0x7c] sm:$0xf] }
 0x873   : > { %15857 = vmatprep.mubr.bf16.mxu1 %v12019_v3  ;;  %15902 = vmatpush3.bf16.msra.mxu1 %v22404_v31  ;;  %v12037_v31 = vsel %vm23670_vm13, %v12027_v1, %v12036_v8  ;;  %v17686_v3 = vld [vmem:[#allocation2 + $0x84] sm:$0xf]  ;;  %v12082_v7 = vsel %vm23675_vm5, %v12072_v19, %v12081_v36  ;;  %v14735_v19 = vcombine.low %v17695_v4, %v17696_v45  ;;  %vm23686_vm13 = vmmov %vm23681_vm0 }
 0x874   : > { %15903 = vmatprep.subr.bf16.mxu1 %v17476_v62  ;;  %v14730_v2 = vcombine.low %v17685_v42, %v17686_v3  ;;  %v17507_v45 = vld [vmem:[#allocation8 + $0x208] sm:$0xff]   ;;  %vm23757_vm5 = vmmov %vm23755_vm3 }
 0x876   : > { %v12102_v1 = vshrl.u32 %v14730_v2, 16  ;;  %v12105_v51 = vshll.u32 %v14730_v2, 16 }
 0x877   : > { %15904 = vmatpush3.bf16.msra.mxu1 %v17476_v62  ;;  %v17683_v62 = vld [vmem:[#allocation2 + $0x78] sm:$0xf] }
 0x878   : > { %15905 = vmatprep.subr.bf16.mxu1 %v17480_v20  ;;  %v14729_v9 = vcombine.low %v17683_v62, %v17684_v21  ;;  %v12104_v57 = vrot.slane %v12102_v1, 3  ;;  %v12107_v54 = vrot.slane %v12105_v51, 4  ;;  %v12147_v21 = vshrl.u32 %v14735_v19, 16 }
 0x87a   : > { %15858 = vmatmul.mubr.bf16.gmra.mrb[180].mxu1 %v12028_v24  ;;  %v12093_v11 = vshrl.u32 %v14729_v9, 16  ;;  %v12096_v26 = vshll.u32 %v14729_v9, 16  ;;  %v12108_v38 = vor.u32 %v12107_v54, %v12104_v57  ;;  %v12150_v9 = vshll.u32 %v14735_v19, 16  ;;  %v23692_v19 = vld [vmem:[#allocation13_spill] sm:$0xff] }
 0x87b   : > { %15861 = vmatprep.mubr.bf16.mxu1 %v12037_v31  ;;  %15906 = vmatpush3.bf16.msra.mxu1 %v17480_v20  ;;  %v12090_v20 = vor.u32 %v12089_v43, %v12086_v16  ;;  %v14732_v31 = vcombine.low %v17689_v27, %v17690_v14  ;;  %v12149_v3 = vrot.slane %v12147_v21, 3  ;;  %v22442_v27 = vld [vmem:[#allocation2 + $0xcc] sm:$0xf]  ;;  %v22444_v14 = vld [vmem:[#allocation2 + $0xd0] sm:$0xf] }
 0x87c   : > { %15907 = vmatprep.subr.bf16.mxu1 %v17484_v23  ;;  %v12095_v8 = vrot.slane %v12093_v11, 3  ;;  %v12098_v25 = vrot.slane %v12096_v26, 4  ;;  %v12152_v2 = vrot.slane %v12150_v9, 4  ;;  %v17700_v11 = vld [vmem:[#allocation2 + $0xbc] sm:$0xf]  ;;  %v23698_v21 = vld [vmem:[#allocation27_spill] sm:$0xff] }
 0x87d   : > { %v12091_v17 = vsel %vm23676_vm15, %v12081_v36, %v12090_v20  ;;  %v12120_v44 = vshrl.u32 %v14732_v31, 16  ;;  %v17699_v36 = vld [vmem:[#allocation2 + $0xb8] sm:$0xf]  ;;  %v23699_v9 = vld [vmem:[#allocation79_spill] sm:$0xff]  ;;  %vm23758_vm15 = vmmov %vm23755_vm3 }
 0x87e   : > { %v12099_v28 = vor.u32 %v12098_v25, %v12095_v8  ;;  %v14737_v26 = vcombine.low %v17699_v36, %v17700_v11  ;;  %v17702_v8 = vld [vmem:[#allocation2 + $0xc4] sm:$0xf] }
 0x87f   : > { %15908 = vmatpush3.bf16.msra.mxu1 %v17484_v23  ;;  %v17688_v23 = vld [vmem:[#allocation2 + $0x8c] sm:$0xf]  ;;  %v23705_v36 = vld [vmem:[#allocation62_spill] sm:$0xff] }
 0x880   : > { %15909 = vmatprep.subr.bf16.mxu1 %v17488_v59  ;;  %v14731_v24 = vcombine.low %v17687_v5, %v17688_v23  ;;  %v12100_v53 = vsel %vm23677_vm12, %v12090_v20, %v12099_v28  ;;  %v12153_v5 = vor.u32 %v12152_v2, %v12149_v3  ;;  %v12165_v23 = vshrl.u32 %v14737_v26, 16  ;;  %v17519_v3 = vld [vmem:[#allocation8 + $0x220] sm:$0xff]   ;;  %v17523_v2 = vld [vmem:[#allocation8 + $0x228] sm:$0xff]   ;;  %vm23759_vm12 = vmmov %vm23755_vm3 }
 0x882   : > { %15862 = vmatmul.mubr.bf16.gmra.mrb[184].mxu1 %v12046_v49  ;;  %v12111_v61 = vshrl.u32 %v14731_v24, 16  ;;  %v12114_v40 = vshll.u32 %v14731_v24, 16  ;;  %v12122_v49 = vrot.slane %v12120_v44, 3  ;;  %v12168_v24 = vshll.u32 %v14737_v26, 16  ;;  %v23707_v26 = vld [vmem:[#allocation31_spill] sm:$0xff] }
 0x883   : > { %15865 = vmatprep.mubr.bf16.mxu1 %v12055_v46  ;;  %15910 = vmatpush3.bf16.msra.mxu1 %v17488_v59  ;;  %v12123_v59 = vshll.u32 %v14732_v31, 16  ;;  %v12129_v46 = vshrl.u32 %v14733_v30, 16  ;;  %v22446_v31 = vld [vmem:[#allocation2 + $0xd4] sm:$0xf] }
 0x884   : > { %15911 = vmatprep.subr.bf16.mxu1 %v17492_v12  ;;  %v12113_v13 = vrot.slane %v12111_v61, 3  ;;  %v12116_v39 = vrot.slane %v12114_v40, 4  ;;  %v12167_v61 = vrot.slane %v12165_v23, 3  ;;  %v12170_v40 = vrot.slane %v12168_v24, 4  ;;  %v23713_v23 = vld [vmem:[#allocation17_spill] sm:$0xff] }
 0x885   : > { %v12125_v37 = vrot.slane %v12123_v59, 4  ;;  %v23714_v24 = vld [vmem:[#allocation33_spill] sm:$0xff] }
 0x886   : > { %v12117_v41 = vor.u32 %v12116_v39, %v12113_v13  ;;  %v14740_v39 = vcombine.low %v22444_v14, %v22446_v31  ;;  %v12171_v48 = vor.u32 %v12170_v40, %v12167_v61  ;;  %v23719_v61 = vld [vmem:[#allocation30_spill] sm:$0xff]  ;;  %v23720_v40 = vld [vmem:[#allocation35_spill] sm:$0xff] }
 0x887   : > { %15912 = vmatpush3.bf16.msra.mxu1 %v17492_v12  ;;  %v12109_v12 = vsel %vm23678_vm14, %v12099_v28, %v12108_v38  ;;  %v12126_v55 = vor.u32 %v12125_v37, %v12122_v49  ;;  %vm23760_vm14 = vmmov %vm23755_vm3 }
 0x888   : > { %15913 = vmatprep.subr.bf16.mxu1 %v17496_v63  ;;  %v12118_v6 = vsel %vm23679_vm10, %v12108_v38, %v12117_v41  ;;  %v17703_v38 = vld [vmem:[#allocation2 + $0xc8] sm:$0xf]  ;;  %v12192_v49 = vshrl.u32 %v14740_v39, 16  ;;  %v12195_v37 = vshll.u32 %v14740_v39, 16  ;;  %v23726_v39 = vld [vmem:[#allocation41_spill] sm:$0xff]  ;;  %vm23761_vm10 = vmmov %vm23755_vm3 }
 0x889   : > { %v12127_v18 = vsel %vm23680_vm8, %v12117_v41, %v12126_v55  ;;  %v14739_v44 = vcombine.low %v17703_v38, %v22442_v27  ;;  %v23721_v38 = vcombine.low %v23719_v61, %v23720_v40  ;;  %v17539_v61 = vld [vmem:[#allocation2 + $0x4c] sm:$0xff]   ;;  %vm23762_vm8 = vmmov %vm23755_vm3 }
 0x88a   : > { %15866 = vmatmul.mubr.bf16.gmra.mrb[188].mxu1 %v12064_v15  ;;  %v17697_v15 = vld [vmem:[#allocation2 + $0xb0] sm:$0xf]  ;;  %v12197_v50 = vrot.slane %v12195_v37, 4 }
 0x88b   : > { %15869 = vmatprep.mubr.bf16.mxu1 %v12073_v0  ;;  %15914 = vmatpush3.bf16.msra.mxu1 %v17496_v63  ;;  %v12131_v63 = vrot.slane %v12129_v46, 3  ;;  %v14736_v47 = vcombine.low %v17697_v15, %v17698_v35  ;;  %v12183_v58 = vshrl.u32 %v14739_v44, 16  ;;  %v12186_v30 = vshll.u32 %v14739_v44, 16  ;;  %v23696_v15 = vld [vmem:[#allocation23_spill] sm:$0xff]  ;;  %v23722_v44 = vld [vmem:[#allocation18_spill] sm:$0xff] }
 0x88c   : > { %15915 = vmatprep.subr.bf16.mxu1 %v17500_v34  ;;  %v12194_v46 = vrot.slane %v12192_v49, 3  ;;  %v23731_v49 = vld [vmem:[#allocation83_spill] sm:$0xff] }
 0x88d   : > { %v12135_v62 = vor.u32 %v12134_v32, %v12131_v63  ;;  %v12156_v16 = vshrl.u32 %v14736_v47, 16  ;;  %v12159_v43 = vshll.u32 %v14736_v47, 16  ;;  %v12185_v22 = vrot.slane %v12183_v58, 3  ;;  %v23689_v63 = vld [vmem:[#allocation19_spill] sm:$0xff]  ;;  %v23690_v32 = vld [vmem:[#allocation26_spill] sm:$0xff] }
 0x88e   : > { %v12188_v33 = vrot.slane %v12186_v30, 4  ;;  %v12198_v60 = vor.u32 %v12197_v50, %v12194_v46  ;;  %v23691_v4 = vcombine.low %v23689_v63, %v23690_v32  ;;  %v17511_v47 = vld [vmem:[#allocation8 + $0x210] sm:$0xff]   ;;  %v23728_v58 = vld [vmem:[#allocation38_spill] sm:$0xff]  ;;  %v23737_v46 = vld [vmem:[#allocation29_spill] sm:$0xff] }
 0x88f   : > { %15916 = vmatpush3.bf16.msra.mxu1 %v17500_v34  ;;  %v12143_v34 = vrot.slane %v12141_v29, 4  ;;  %v12136_v42 = vsel %vm23681_vm0, %v12126_v55, %v12135_v62  ;;  %v12158_v1 = vrot.slane %v12156_v16, 3  ;;  %v12161_v51 = vrot.slane %v12159_v43, 4  ;;  %v23701_v16 = vld [vmem:[#allocation34_spill] sm:$0xff]  ;;  %v23702_v43 = vld [vmem:[#allocation52_spill] sm:$0xff]  ;;  %v23732_v37 = vld [vmem:[#allocation43_spill] sm:$0xff] }
 0x890   : > { %15965 = vmatprep.subr.bf16.mxu1 %v22431_v56  ;;  %v12189_v55 = vor.u32 %v12188_v33, %v12185_v22  ;;  %v23729_v30 = vld [vmem:[#allocation42_spill] sm:$0xff]  ;;  %v23734_v22 = vld [vmem:[#allocation44_spill] sm:$0xff]  ;;  %v23738_v50 = vld [vmem:[#allocation21_spill] sm:$0xff] }
 0x891   : > { %v12144_v0 = vor.u32 %v12143_v34, %v12140_v52  ;;  %v23695_v34 = vld [vmem:[#allocation48_spill] sm:$0xff]  ;;  %v23743_v63 = vld [vmem:[#allocation46_spill] sm:$0xff]  ;;  %v23744_v32 = vld [vmem:[#allocation39_spill] sm:$0xff] }
 0x892   : > { %15870 = vmatmul.mubr.bf16.gmra.mrb[192].mxu1 %v12082_v7  ;;  %v17701_v7 = vld [vmem:[#allocation2 + $0xc0] sm:$0xf]  ;;  %v23697_v35 = vcombine.low %v23695_v34, %v23696_v15  ;;  %v23735_v33 = vld [vmem:[#allocation36_spill] sm:$0xff]  ;;  %v23750_v34 = vld [vmem:[#allocation91_spill] sm:$0xff] }
 0x893   : > { %15873 = vmatprep.mubr.bf16.mxu1 %v12091_v17  ;;  %v12145_v20 = vsel %vm23682_vm6, %v12135_v62, %v12144_v0  ;;  %v14738_v25 = vcombine.low %v17701_v7, %v17702_v8  ;;  %v12162_v17 = vor.u32 %v12161_v51, %v12158_v1  ;;  %v12154_v28 = vsel %vm23683_vm2, %v12144_v0, %v12153_v5  ;;  %v17515_v62 = vld [vmem:[#allocation8 + $0x218] sm:$0xff]   ;;  %v17527_v51 = vld [vmem:[#allocation8 + $0x230] sm:$0xff]   ;;  %vm23763_vm0 = vmmov %vm23755_vm3 }
 0x894   : > { %v23700_v0 = vcombine.low %v23698_v21, %v23699_v9  ;;  %v17530_v7 = vld [vmem:[#allocation8 + $0x238] sm:$0xff]   ;;  %vm23764_vm6 = vmmov %vm23763_vm0 }
 0x895   : > { %v12174_v57 = vshrl.u32 %v14738_v25, 16  ;;  %v12177_v54 = vshll.u32 %v14738_v25, 16  ;;  %v12163_v59 = vsel %vm23684_vm11, %v12153_v5, %v12162_v17  ;;  %v12172_v10 = vsel %vm23685_vm9, %v12162_v17, %v12171_v48  ;;  %v23710_v8 = vld [vmem:[#allocation32_spill] sm:$0xff]  ;;  %vm23765_vm2 = vmmov %vm23763_vm0 }
 0x896   : > { %v23711_v25 = vld [vmem:[#allocation68_spill] sm:$0xff]  ;;  %v23715_v17 = vcombine.low %v23713_v23, %v23714_v24  ;;  %vm23766_vm11 = vmmov %vm23763_vm0 }
 0x897   : > { %v12179_v13 = vrot.slane %v12177_v54, 4  ;;  %v23712_v5 = vcombine.low %v23710_v8, %v23711_v25  ;;  %v23717_v54 = vld [vmem:[#allocation24_spill] sm:$0xff]  ;;  %vm23767_vm9 = vmmov %vm23763_vm0 }
 0x898   : > { %v23752_v9 = vld [vmem:[#allocation76_spill] sm:$0xff] }
 0x89a   : > { %15874 = vmatmul.mubr.bf16.gmra.mrb[196].mxu1 %v12100_v53  ;;  %v12176_v53 = vrot.slane %v12174_v57, 3  ;;  %v23716_v57 = vld [vmem:[#allocation20_spill] sm:$0xff] }
 0x89b   : > { %15877 = vmatprep.mubr.bf16.mxu1 %v12109_v12 }
 0x89c   : > { %v12180_v12 = vor.u32 %v12179_v13, %v12176_v53  ;;  %v23725_v13 = vld [vmem:[#allocation40_spill] sm:$0xff] }
 0x89e   : > { %v12181_v41 = vsel %vm23686_vm13, %v12171_v48, %v12180_v12  ;;  %v12190_v29 = vsel %vm23687_vm4, %v12180_v12, %v12189_v55  ;;  %v23727_v48 = vcombine.low %v23725_v13, %v23726_v39  ;;  %v23730_v12 = vcombine.low %v23728_v58, %v23729_v30  ;;  %vm23768_vm13 = vmmov %vm23763_vm0 }
 0x89f   : > { %v13158_v39 = vshll.u32 %v17539_v61, 16  ;;  %vm23769_vm4 = vmmov %vm23763_vm0 }
 0x8a2   : > { %15878 = vmatmul.mubr.bf16.gmra.mrb[200].mxu1 %v12118_v6  ;;  %v12199_v6 = vsel %vm23688_vm1, %v12189_v55, %v12198_v60  ;;  %v23739_v55 = vcombine.low %v23737_v46, %v23738_v50  ;;  %vm23770_vm1 = vmmov %vm23763_vm0 }
 0x8a3   : > { %15881 = vmatprep.mubr.bf16.mxu1 %v12127_v18  ;;  %v23693_v18 = vld [vmem:[#allocation22_spill] sm:$0xff] }
 0x8a4   : > { %v23694_v52 = vcombine.low %v23692_v19, %v23693_v18  ;;  %v23747_v19 = vld [vmem:[#allocation85_spill] sm:$0xff] }
 0x8aa   : > { %15882 = vmatmul.mubr.bf16.gmra.mrb[204].mxu1 %v12136_v42  ;;  %v23703_v42 = vcombine.low %v23701_v16, %v23702_v43 }
 0x8ab   : > { %15885 = vmatprep.mubr.bf16.mxu1 %v12145_v20  ;;  %v23708_v20 = vld [vmem:[#allocation69_spill] sm:$0xff] }
 0x8ac   : > { %v23709_v1 = vcombine.low %v23707_v26, %v23708_v20 }
 0x8b2   : > { %15886 = vmatmul.mubr.bf16.gmra.mrb[208].mxu1 %v12154_v28  ;;  %v23718_v28 = vcombine.low %v23716_v57, %v23717_v54 }
 0x8b3   : > { %15889 = vmatprep.mubr.bf16.mxu1 %v12163_v59  ;;  %v23723_v59 = vld [vmem:[#allocation37_spill] sm:$0xff] }
 0x8b4   : > { %v23724_v53 = vcombine.low %v23722_v44, %v23723_v59  ;;  %v17540_v59 = vld [vmem:[#allocation2 + $0x54] sm:$0xff]  }
 0x8b5   : > { %v13166_v30 = vshll.u32 %v17540_v59, 16 }
 0x8ba   : > { %15890 = vmatmul.mubr.bf16.gmra.mrb[212].mxu1 %v12172_v10  ;;  %v23733_v10 = vcombine.low %v23731_v49, %v23732_v37  ;;  %v17541_v49 = vld [vmem:[#allocation2 + $0x5c] sm:$0xff]  }
 0x8bb   : > { %15893 = vmatprep.mubr.bf16.mxu1 %v12181_v41  ;;  %v23736_v41 = vcombine.low %v23734_v22, %v23735_v33  ;;  %v13168_v22 = vrot.slane %v13166_v30, 1  ;;  %v17542_v33 = vld [vmem:[#allocation2 + $0x64] sm:$0xff]   ;;  %v13174_v50 = vshll.u32 %v17541_v49, 16 }
 0x8c2   : > { %15894 = vmatmul.mubr.bf16.gmra.mrb[216].mxu1 %v12190_v29  ;;  %v23741_v29 = vld [vmem:[#allocation28_spill] sm:$0xff] }
 0x8c3   : > { %15897 = vmatprep.mubr.bf16.mxu1 %v12199_v6 }
 0x8ca   : > { %15898 = vmatmul.mubr.bf16.gmra.mrb[220].mxu1 %v12198_v60  ;;  %v23740_v60 = vld [vmem:[#allocation45_spill] sm:$0xff] }
 0x8cb   : > { %15917 = vmatprep.mubr.bf16.mxu1 %v23691_v4  ;;  %v23742_v6 = vcombine.low %v23740_v60, %v23741_v29  ;;  %v23745_v4 = vcombine.low %v23743_v63, %v23744_v32  ;;  %v13182_v29 = vshll.u32 %v17542_v33, 16  ;;  %v17543_v63 = vld [vmem:[#allocation2 + $0x6c] sm:$0xff]   ;;  %v13170_v32 = vshrl.u32 %v17540_v59, 16 }
 0x8d2   : > { %15918 = vmatmul.mubr.bf16.vlgmr.msra.gmra.mrb[176].mxu1 %v23694_v52  ;;  %v23749_v52 = vld [vmem:[#allocation86_spill] sm:$0xff] }
 0x8d3   : > { %15921 = vmatprep.mubr.bf16.mxu1 %v23697_v35  ;;  %15966 = vmatpush3.bf16.msra.mxu1 %v22431_v56  ;;  %v23704_v56 = vld [vmem:[#allocation67_spill] sm:$0xff]  ;;  %v23751_v15 = vcombine.low %v23749_v52, %v23750_v34  ;;  %v17533_v35 = vld [vmem:[#allocation2 + $0x1c] sm:$0xff]   ;;  %v13190_v34 = vshll.u32 %v17543_v63, 16 }
 0x8d4   : > { %15967 = vmatprep.subr.bf16.mxu1 %v17507_v45  ;;  %v23706_v11 = vcombine.low %v23704_v56, %v23705_v36  ;;  %v13113_v21 = vshll.u32 %v17533_v35, 16  ;;  %v13111_v56 = vshrl.u32 %v17533_v35, 16 }
 0x8d7   : > { %15968 = vmatpush3.bf16.msra.mxu1 %v17507_v45  ;;  %v23746_v45 = vld [vmem:[#allocation84_spill] sm:$0xff] }
 0x8d8   : > { %15969 = vmatprep.subr.bf16.mxu1 %v17511_v47  ;;  %v23748_v18 = vcombine.low %v23746_v45, %v23747_v19  ;;  %v13184_v45 = vrot.slane %v13182_v29, 1  ;;  %v17544_v19 = vld [vmem:[#allocation2 + $0x74] sm:$0xff]  }
 0x8da   : > { %15922 = vmatmul.mubr.bf16.gmra.mrb[180].mxu1 %v23700_v0  ;;  %v23753_v0 = vld [vmem:[#allocation89_spill] sm:$0xff] }
 0x8db   : > { %15925 = vmatprep.mubr.bf16.mxu1 %v23703_v42  ;;  %15970 = vmatpush3.bf16.msra.mxu1 %v17511_v47  ;;  %v17534_v47 = vld [vmem:[#allocation2 + $0x24] sm:$0xff]   ;;  %v23754_v16 = vcombine.low %v23752_v9, %v23753_v0  ;;  %v13115_v42 = vrot.slane %v13113_v21, 1  ;;  %v17545_v21 = vld [vmem:[#allocation2 + $0x7c] sm:$0xff]   ;;  %v13186_v9 = vshrl.u32 %v17542_v33, 16  ;;  %v13194_v0 = vshrl.u32 %v17543_v63, 16 }
 0x8dc   : > { %15971 = vmatprep.subr.bf16.mxu1 %v17515_v62  ;;  %v13118_v43 = vshll.u32 %v17534_v47, 16  ;;  %v17554_v63 = vld [vmem:[#allocation2 + $0xc4] sm:$0xff]  }
 0x8dd   : > { %v13116_v26 = vor.u32 %v13115_v42, %v13111_v56  ;;  %v13188_v42 = vor.u32 %v13186_v9, %v13184_v45 }
 0x8de   : > { %v13120_v36 = vrot.slane %v13118_v43, 1  ;;  %v17546_v43 = vld [vmem:[#allocation2 + $0x84] sm:$0xff]  }
 0x8df   : > { %15972 = vmatpush3.bf16.msra.mxu1 %v17515_v62  ;;  %v14771_v62 = vcombine.low %v22442_v27, %v22444_v14 }
 0x8e0   : > { %15973 = vmatprep.subr.bf16.mxu1 %v17519_v3  ;;  %v13121_v27 = vsel %vm23755_vm3, %v13116_v26, %v13120_v36  ;;  %vm23771_vm3 = vmmov %vm23763_vm0 }
 0x8e2   : > { %15926 = vmatmul.mubr.bf16.gmra.mrb[184].mxu1 %v23706_v11  ;;  %v17536_v11 = vld [vmem:[#allocation2 + $0x34] sm:$0xff]  }
 0x8e3   : > { %15929 = vmatprep.mubr.bf16.mxu1 %v23709_v1  ;;  %15974 = vmatpush3.bf16.msra.mxu1 %v17519_v3  ;;  %v17535_v3 = vld [vmem:[#allocation2 + $0x2c] sm:$0xff]   ;;  %v13134_v14 = vshll.u32 %v17536_v11, 16  ;;  %v13138_v40 = vshrl.u32 %v17536_v11, 16  ;;  %v13214_v11 = vshll.u32 %v17546_v43, 16 }
 0x8e4   : > { %15975 = vmatprep.subr.bf16.mxu1 %v17523_v2  ;;  %v13126_v20 = vshll.u32 %v17535_v3, 16  ;;  %v13130_v8 = vshrl.u32 %v17535_v3, 16 }
 0x8e5   : > { %v13136_v25 = vrot.slane %v13134_v14, 1  ;;  %v13210_v14 = vshrl.u32 %v17545_v21, 16 }
 0x8e6   : > { %v13128_v1 = vrot.slane %v13126_v20, 1  ;;  %v17547_v20 = vld [vmem:[#allocation2 + $0x8c] sm:$0xff]  }
 0x8e7   : > { %15976 = vmatpush3.bf16.msra.mxu1 %v17523_v2  ;;  %v14772_v2 = vcombine.low %v22446_v31, %v22446_v31 }
 0x8e8   : > { %15977 = vmatprep.subr.bf16.mxu1 %v17527_v51  ;;  %v13132_v24 = vor.u32 %v13130_v8, %v13128_v1 }
 0x8ea   : > { %15930 = vmatmul.mubr.bf16.gmra.mrb[188].mxu1 %v23712_v5  ;;  %v17538_v5 = vld [vmem:[#allocation2 + $0x44] sm:$0xff]   ;;  %v13137_v57 = vsel %vm23757_vm5, %v13132_v24, %v13136_v25  ;;  %vm23773_vm5 = vmmov %vm23763_vm0 }
 0x8eb   : > { %15933 = vmatprep.mubr.bf16.mxu1 %v23715_v17  ;;  %15978 = vmatpush3.bf16.msra.mxu1 %v17527_v51  ;;  %v17537_v51 = vld [vmem:[#allocation2 + $0x3c] sm:$0xff]   ;;  %v13150_v54 = vshll.u32 %v17538_v5, 16  ;;  %v13154_v37 = vshrl.u32 %v17538_v5, 16 }
 0x8ec   : > { %15979 = vmatprep.subr.bf16.mxu1 %v17530_v7  ;;  %v13142_v17 = vshll.u32 %v17537_v51, 16 }
 0x8ed   : > { %v13152_v44 = vrot.slane %v13150_v54, 1  ;;  %v13226_v54 = vshrl.u32 %v17547_v20, 16 }
 0x8ef   : > { %15980 = vmatpush3.bf16.msra.mxu1 %v17530_v7  ;;  %v13122_v7 = vshrl.u32 %v17534_v47, 16  ;;  %v13198_v47 = vshll.u32 %v17544_v19, 16 }
 0x8f1   : > { %v13124_v23 = vor.u32 %v13122_v7, %v13120_v36 }
 0x8f2   : > { %15934 = vmatmul.mubr.bf16.gmra.mrb[192].mxu1 %v23718_v28  ;;  %v13144_v28 = vrot.slane %v13142_v17, 1 }
 0x8f3   : > { %15937 = vmatprep.mubr.bf16.mxu1 %v23721_v38  ;;  %v13129_v31 = vsel %vm23756_vm7, %v13124_v23, %v13128_v1  ;;  %v13146_v38 = vshrl.u32 %v17537_v51, 16  ;;  %v13216_v1 = vrot.slane %v13214_v11, 1  ;;  %v17548_v51 = vld [vmem:[#allocation2 + $0x94] sm:$0xff]   ;;  %vm23772_vm7 = vmmov %vm23763_vm0 }
 0x8f4   : > { %v13230_v24 = vshll.u32 %v17548_v51, 16 }
 0x8f5   : > { %v13148_v13 = vor.u32 %v13146_v38, %v13144_v28 }
 0x8f7   : > { %v13153_v58 = vsel %vm23759_vm12, %v13148_v13, %v13152_v44  ;;  %vm23775_vm12 = vmmov %vm23763_vm0 }
 0x8fa   : > { %15938 = vmatmul.mubr.bf16.gmra.mrb[196].mxu1 %v23724_v53  ;;  %v13140_v53 = vor.u32 %v13138_v40, %v13136_v25  ;;  %v13222_v25 = vshll.u32 %v17547_v20, 16 }
 0x8fb   : > { %15941 = vmatprep.mubr.bf16.mxu1 %v23727_v48 }
 0x8fc   : > { %v13145_v48 = vsel %vm23758_vm15, %v13140_v53, %v13144_v28  ;;  %v13224_v17 = vrot.slane %v13222_v25, 1  ;;  %v13232_v28 = vrot.slane %v13230_v24, 1  ;;  %vm23774_vm15 = vmmov %vm23763_vm0  ;;  %v22554_v25 = vld [vmem:[%s22695_s4] ss:$0 sm:$0xff] }
 0x8fe   : > { %v13228_v38 = vor.u32 %v13226_v54, %v13224_v17 }
 0x900   : > { %v13233_v53 = vsel %vm23769_vm4, %v13228_v38, %v13232_v28 }
 0x902   : > { %15942 = vmatmul.mubr.bf16.gmra.mrb[200].mxu1 %v23730_v12  ;;  %v13160_v12 = vrot.slane %v13158_v39, 1 }
 0x903   : > { %15945 = vmatprep.mubr.bf16.mxu1 %v23733_v10  ;;  %v13162_v10 = vshrl.u32 %v17539_v61, 16  ;;  %v17550_v61 = vld [vmem:[#allocation2 + $0xa4] sm:$0xff]  }
 0x904   : > { %v13246_v13 = vshll.u32 %v17550_v61, 16 }
 0x905   : > { %v13164_v46 = vor.u32 %v13162_v10, %v13160_v12 }
 0x907   : > { %v13169_v60 = vsel %vm23761_vm10, %v13164_v46, %v13168_v22  ;;  %vm23777_vm10 = vmmov %vm23763_vm0 }
 0x90a   : > { %15946 = vmatmul.mubr.bf16.gmra.mrb[204].mxu1 %v23736_v41  ;;  %v13156_v41 = vor.u32 %v13154_v37, %v13152_v44 }
 0x90b   : > { %15949 = vmatprep.mubr.bf16.mxu1 %v23739_v55 }
 0x90c   : > { %v13161_v55 = vsel %vm23760_vm14, %v13156_v41, %v13160_v12  ;;  %v13248_v12 = vrot.slane %v13246_v13, 1  ;;  %vm23776_vm14 = vmmov %vm23763_vm0 }
 0x912   : > { %15950 = vmatmul.mubr.bf16.gmra.mrb[208].mxu1 %v23742_v6  ;;  %v13176_v6 = vrot.slane %v13174_v50, 1 }
 0x913   : > { %15953 = vmatprep.mubr.bf16.mxu1 %v23745_v4  ;;  %v13178_v4 = vshrl.u32 %v17541_v49, 16  ;;  %v17552_v49 = vld [vmem:[#allocation2 + $0xb4] sm:$0xff]  }
 0x914   : > { %v13262_v46 = vshll.u32 %v17552_v49, 16 }
 0x915   : > { %v13180_v52 = vor.u32 %v13178_v4, %v13176_v6 }
 0x917   : > { %v13185_v35 = vsel %vm23763_vm0, %v13180_v52, %v13184_v45  ;;  %v13278_v52 = vshll.u32 %v17554_v63, 16 }
 0x91a   : > { %15954 = vmatmul.mubr.bf16.gmra.mrb[212].mxu1 %v23748_v18  ;;  %v13172_v18 = vor.u32 %v13170_v32, %v13168_v22 }
 0x91b   : > { %15957 = vmatprep.mubr.bf16.mxu1 %v23751_v15 }
 0x91c   : > { %v13177_v15 = vsel %vm23762_vm8, %v13172_v18, %v13176_v6  ;;  %v13264_v6 = vrot.slane %v13262_v46, 1 }
 0x922   : > { %15958 = vmatmul.mubr.bf16.gmra.mrb[216].mxu1 %v23754_v16  ;;  %v13200_v16 = vrot.slane %v13198_v47, 1  ;;  %v13266_v47 = vshrl.u32 %v17552_v49, 16 }
 0x923   : > { %15961 = vmatprep.mubr.bf16.mxu1 %v14771_v62  ;;  %v13192_v62 = vrot.slane %v13190_v34, 1  ;;  %v17555_v34 = vld [vmem:[#allocation2 + $0xcc] sm:$0xff]  }
 0x924   : > { %v13286_v9 = vshll.u32 %v17555_v34, 16 }
 0x925   : > { %v13196_v3 = vor.u32 %v13194_v0, %v13192_v62  ;;  %v13193_v56 = vsel %vm23764_vm6, %v13188_v42, %v13192_v62  ;;  %v13268_v0 = vor.u32 %v13266_v47, %v13264_v6 }
 0x927   : > { %v13201_v36 = vsel %vm23765_vm2, %v13196_v3, %v13200_v16 }
 0x92a   : > { %15962 = vmatmul.mubr.bf16.gmra.mrb[220].mxu1 %v14772_v2  ;;  %v13206_v2 = vshll.u32 %v17545_v21, 16  ;;  %v13280_v21 = vrot.slane %v13278_v52, 1 }
 0x92b   : > { %15981 = vmatprep.mubr.bf16.mxu1 %v13121_v27  ;;  %v13202_v27 = vshrl.u32 %v17544_v19, 16 }
 0x92c   : > { %v13208_v26 = vrot.slane %v13206_v2, 1 }
 0x92d   : > { %v13204_v7 = vor.u32 %v13202_v27, %v13200_v16 }
 0x92e   : > { %v13212_v8 = vor.u32 %v13210_v14, %v13208_v26 }
 0x92f   : > { %v13209_v5 = vsel %vm23766_vm11, %v13204_v7, %v13208_v26 }
 0x930   : > { %v13217_v23 = vsel %vm23767_vm9, %v13212_v8, %v13216_v1 }
 0x932   : > { %15982 = vmatmul.mubr.bf16.vlgmr.msra.gmra.mrb[176].mxu1 %v13129_v31  ;;  %v17549_v31 = vld [vmem:[#allocation2 + $0x9c] sm:$0xff]  }
 0x933   : > { %15985 = vmatprep.mubr.bf16.mxu1 %v13137_v57  ;;  %v13218_v57 = vshrl.u32 %v17546_v43, 16  ;;  %v13238_v44 = vshll.u32 %v17549_v31, 16  ;;  %v13242_v30 = vshrl.u32 %v17549_v31, 16  ;;  %v13290_v43 = vshrl.u32 %v17555_v34, 16 }
 0x935   : > { %v13220_v40 = vor.u32 %v13218_v57, %v13216_v1  ;;  %v13240_v39 = vrot.slane %v13238_v44, 1 }
 0x937   : > { %v13225_v59 = vsel %vm23768_vm13, %v13220_v40, %v13224_v17  ;;  %v13244_v10 = vor.u32 %v13242_v30, %v13240_v39  ;;  %v23779_v17 = vld [vmem:[#allocation71_spill] sm:$0xff]  ;;  %v23782_v30 = vld [vmem:[#allocation54_spill] sm:$0xff] }
 0x939   : > { %v13249_v41 = vsel %vm23771_vm3, %v13244_v10, %v13248_v12  ;;  %v23783_v10 = vld [vmem:[#allocation75_spill] sm:$0xff] }
 0x93a   : > { %15986 = vmatmul.mubr.bf16.gmra.mrb[180].mxu1 %v13145_v48  ;;  %v17551_v48 = vld [vmem:[#allocation2 + $0xac] sm:$0xff]  }
 0x93b   : > { %15989 = vmatprep.mubr.bf16.mxu1 %v13153_v58  ;;  %v13234_v58 = vshrl.u32 %v17548_v51, 16  ;;  %v13254_v22 = vshll.u32 %v17551_v48, 16  ;;  %v13258_v29 = vshrl.u32 %v17551_v48, 16 }
 0x93d   : > { %v13236_v37 = vor.u32 %v13234_v58, %v13232_v28  ;;  %v13256_v50 = vrot.slane %v13254_v22, 1  ;;  %v23780_v28 = vld [vmem:[#allocation47_spill] sm:$0xff] }
 0x93f   : > { %v13241_v33 = vsel %vm23770_vm1, %v13236_v37, %v13240_v39  ;;  %v13260_v4 = vor.u32 %v13258_v29, %v13256_v50 }
 0x941   : > { %v13265_v18 = vsel %vm23773_vm5, %v13260_v4, %v13264_v6  ;;  %v23784_v4 = vld [vmem:[#allocation49_spill] sm:$0xff] }
 0x942   : > { %15990 = vmatmul.mubr.bf16.gmra.mrb[184].mxu1 %v13161_v55  ;;  %v17553_v55 = vld [vmem:[#allocation2 + $0xbc] sm:$0xff]  }
 0x943   : > { %15993 = vmatprep.mubr.bf16.mxu1 %v13169_v60  ;;  %v13250_v60 = vshrl.u32 %v17550_v61, 16  ;;  %v13270_v45 = vshll.u32 %v17553_v55, 16  ;;  %v13274_v62 = vshrl.u32 %v17553_v55, 16 }
 0x945   : > { %v13252_v32 = vor.u32 %v13250_v60, %v13248_v12 }
 0x947   : > { %v13257_v19 = vsel %vm23772_vm7, %v13252_v32, %v13256_v50 }
 0x94a   : > { %15994 = vmatmul.mubr.bf16.gmra.mrb[188].mxu1 %v13177_v15  ;;  %v13272_v15 = vrot.slane %v13270_v45, 1 }
 0x94b   : > { %15997 = vmatprep.mubr.bf16.mxu1 %v13185_v35  ;;  %v17556_v35 = vld [vmem:[#allocation2 + $0xd4] sm:$0x1f]  }
 0x94c   : > { %v13276_v16 = vor.u32 %v13274_v62, %v13272_v15  ;;  %v13294_v42 = vshll.u32 %v17556_v35, 16  ;;  %v13273_v3 = vsel %vm23774_vm15, %v13268_v0, %v13272_v15  ;;  %v13298_v1 = vshrl.u32 %v17556_v35, 16  ;;  %v23785_v15 = vld [vmem:[#allocation77_spill] sm:$0xff] }
 0x94e   : > { %v13281_v2 = vsel %vm23775_vm12, %v13276_v16, %v13280_v21  ;;  %v13296_v26 = vrot.slane %v13294_v42, 1 }
 0x950   : > { %v13300_v51 = vor.u32 %v13298_v1, %v13296_v26 }
 0x952   : > { %15998 = vmatmul.mubr.bf16.gmra.mrb[192].mxu1 %v13193_v56  ;;  %v13288_v56 = vrot.slane %v13286_v9, 1 }
 0x953   : > { %16001 = vmatprep.mubr.bf16.mxu1 %v13201_v36  ;;  %v13282_v36 = vshrl.u32 %v17554_v63, 16 }
 0x954   : > { %v13292_v11 = vor.u32 %v13290_v43, %v13288_v56  ;;  %v23786_v43 = vld [vmem:[#allocation88_spill] sm:$0xff] }
 0x955   : > { %v13284_v20 = vor.u32 %v13282_v36, %v13280_v21 }
 0x956   : > { %v13297_v27 = vsel %vm23776_vm14, %v13292_v11, %v13296_v26  ;;  %v23788_v26 = vld [vmem:[#allocation51_spill] sm:$0xff] }
 0x957   : > { %v13289_v14 = vsel %vm23777_vm10, %v13284_v20, %v13288_v56 }
 0x95a   : > { %16002 = vmatmul.mubr.bf16.gmra.mrb[196].mxu1 %v13209_v5  ;;  %v23778_v5 = vld [vmem:[#allocation92_spill] sm:$0xff] }
 0x95b   : > { %16005 = vmatprep.mubr.bf16.mxu1 %v13217_v23 }
 0x962   : > { %16006 = vmatmul.mubr.bf16.gmra.mrb[200].mxu1 %v13225_v59 }
 0x963   : > { %16009 = vmatprep.mubr.bf16.mxu1 %v13233_v53  ;;  %v23781_v53 = vld [vmem:[#allocation74_spill] sm:$0xff] }
 0x96a   : > { %16010 = vmatmul.mubr.bf16.gmra.mrb[204].mxu1 %v13241_v33 }
 0x96b   : > { %16013 = vmatprep.mubr.bf16.mxu1 %v13249_v41 }
 0x972   : > { %16014 = vmatmul.mubr.bf16.gmra.mrb[208].mxu1 %v13257_v19 }
 0x973   : > { %16017 = vmatprep.mubr.bf16.mxu1 %v13265_v18 }
 0x97a   : > { %16018 = vmatmul.mubr.bf16.gmra.mrb[212].mxu1 %v13273_v3 }
 0x97b   : > { %16021 = vmatprep.mubr.bf16.mxu1 %v13281_v2  ;;  %v23787_v2 = vld [vmem:[#allocation78_spill] sm:$0xff] }
 0x982   : > { %16022 = vmatmul.mubr.bf16.gmra.mrb[216].mxu1 %v13289_v14 }
 0x983   : > { %16025 = vmatprep.mubr.bf16.mxu1 %v13297_v27 }
 0x98a   : > { %16026 = vmatmul.mubr.bf16.gmra.mrb[220].mxu1 %v13300_v51 }
 0xa05   : > { %v15983_v7 = vpop.f32.mrb[176].mxu1 }
 0xa06   : > { %v13407_v8 = vpop.f32.mrb[177].mxu1  ;;  %v23789_v7 = vld [vmem:[#allocation72_spill] sm:$0xff] }
 0xa07   : > { %v13644_v23 = vadd.f32 %v23778_v5, %v13407_v8  ;;  %v15984_v24 = vpop.f32.mrb[178].mxu1 }
 0xa08   : > { %v13647_v31 = vadd.f32 %v15984_v24, %v23779_v17  ;;  %v13410_v57 = vpop.f32.mrb[179].mxu1  ;;  %v23790_v17 = vld [vmem:[#allocation80_spill] sm:$0xff] }
 0xa09   : > { %v13698_v54 = vadd.f32 %v22554_v25, %v13644_v23  ;;  %v13645_v61 = vadd.f32 %v23780_v28, %v13410_v57  ;;  %v23791_v28 = vld [vmem:[#allocation70_spill] sm:$0xff] }
 0xa0a   : > { %v13701_v48 = vadd.f32 %v22554_v25, %v13647_v31 }
 0xa0b   : > { %v13699_v40 = vadd.f32 %v22554_v25, %v13645_v61  ;;  %v13745_v38 = vmax.f32 %v13698_v54, 0.0 }
 0xa0c   : > { %v13748_v50 = vmax.f32 %v13701_v48, 0.0 }
 0xa0d   : > { %v13746_v44 = vmax.f32 %v13699_v40, 0.0  ;;  %v15987_v59 = vpop.f32.mrb[180].mxu1 }
 0xa0e   : > { %v13650_v13 = vadd.f32 %v23781_v53, %v15987_v59  ;;  %v13423_v39 = vpop.f32.mrb[181].mxu1 }
 0xa0f   : > { %v15050_v58 = vpack.c.bf16 %v13746_v44, %v13745_v38  ;;  %v13648_v12 = vadd.f32 %v13423_v39, %v23782_v30  ;;  %v15988_v49 = vpop.f32.mrb[182].mxu1 }
 0xa10   : > { %v13704_v37 = vadd.f32 %v22554_v25, %v13650_v13  ;;  %v13651_v22 = vadd.f32 %v23783_v10, %v15988_v49  ;;  %v13426_v33 = vpop.f32.mrb[183].mxu1 }
 0xa11   : > { %15051 = vst [vmem:[%s22568_s30] sm:$0xff] %v15050_v58   ;;  %v13702_v41 = vadd.f32 %v22554_v25, %v13648_v12  ;;  %v23792_v12 = vld [vmem:[#allocation93_spill] sm:$0xff] }
 0xa12   : > { %v13705_v46 = vadd.f32 %v22554_v25, %v13651_v22  ;;  %v13751_v60 = vmax.f32 %v13704_v37, 0.0 }
 0xa13   : > { %v13749_v55 = vmax.f32 %v13702_v41, 0.0  ;;  %v23793_v41 = vld [vmem:[#allocation66_spill] sm:$0xff] }
 0xa14   : > { %v13752_v29 = vmax.f32 %v13705_v46, 0.0 }
 0xa15   : > { %v15055_v6 = vpack.c.bf16 %v13749_v55, %v13748_v50  ;;  %v15991_v63 = vpop.f32.mrb[184].mxu1 }
 0xa16   : > { %v15060_v32 = vpack.c.bf16 %v13752_v29, %v13751_v60  ;;  %v13654_v45 = vadd.f32 %v15991_v63, %v23784_v4  ;;  %v13439_v19 = vpop.f32.mrb[185].mxu1 }
 0xa17   : > { %15150 = vst [vmem:[%s22568_s30 + $0x8] sm:$0xff] %v15055_v6   ;;  %v15992_v18 = vpop.f32.mrb[186].mxu1  ;;  %v23795_v19 = vld [vmem:[#allocation60_spill] sm:$0xff] }
 0xa18   : > { %15151 = vst [vmem:[%s22568_s30 + $0x10] sm:$0xff] %v15060_v32   ;;  %v13442_v52 = vpop.f32.mrb[187].mxu1  ;;  %v13708_v34 = vadd.f32 %v22554_v25, %v13654_v45  ;;  %v23794_v32 = vld [vmem:[#allocation73_spill] sm:$0xff] }
 0xa19   : > { %v13653_v35 = vadd.f32 %v13442_v52, %v23785_v15  ;;  %v23796_v15 = vld [vmem:[#allocation53_spill] sm:$0xff] }
 0xa1a   : > { %v13755_v62 = vmax.f32 %v13708_v34, 0.0 }
 0xa1b   : > { %v13707_v47 = vadd.f32 %v22554_v25, %v13653_v35 }
 0xa1d   : > { %v13754_v21 = vmax.f32 %v13707_v47, 0.0  ;;  %v15995_v9 = vpop.f32.mrb[188].mxu1 }
 0xa1e   : > { %v13455_v0 = vpop.f32.mrb[189].mxu1 }
 0xa1f   : > { %v15065_v16 = vpack.c.bf16 %v13755_v62, %v13754_v21  ;;  %v13656_v42 = vadd.f32 %v23786_v43, %v13455_v0  ;;  %v15996_v3 = vpop.f32.mrb[190].mxu1  ;;  %v23797_v0 = vld [vmem:[#allocation56_spill] sm:$0xff] }
 0xa20   : > { %v13659_v56 = vadd.f32 %v15996_v3, %v23787_v2  ;;  %v13458_v36 = vpop.f32.mrb[191].mxu1  ;;  %v23798_v2 = vld [vmem:[#allocation63_spill] sm:$0xff] }
 0xa21   : > { %15152 = vst [vmem:[%s22568_s30 + $0x18] sm:$0xff] %v15065_v16   ;;  %v13710_v11 = vadd.f32 %v22554_v25, %v13656_v42  ;;  %v13657_v20 = vadd.f32 %v23788_v26, %v13458_v36  ;;  %v23799_v26 = vld [vmem:[#allocation55_spill] sm:$0xff] }
 0xa22   : > { %v13713_v23 = vadd.f32 %v22554_v25, %v13659_v56 }
 0xa23   : > { %v13711_v27 = vadd.f32 %v22554_v25, %v13657_v20  ;;  %v13757_v14 = vmax.f32 %v13710_v11, 0.0 }
 0xa24   : > { %v13760_v59 = vmax.f32 %v13713_v23, 0.0 }
 0xa25   : > { %v13758_v1 = vmax.f32 %v13711_v27, 0.0  ;;  %v15999_v51 = vpop.f32.mrb[192].mxu1 }
 0xa26   : > { %v13662_v8 = vadd.f32 %v23789_v7, %v15999_v51  ;;  %v13471_v5 = vpop.f32.mrb[193].mxu1 }
 0xa27   : > { %v15070_v24 = vpack.c.bf16 %v13758_v1, %v13757_v14  ;;  %v13660_v31 = vadd.f32 %v13471_v5, %v23790_v17  ;;  %v16000_v57 = vpop.f32.mrb[194].mxu1 }
 0xa28   : > { %v13716_v54 = vadd.f32 %v22554_v25, %v13662_v8  ;;  %v13663_v61 = vadd.f32 %v23791_v28, %v16000_v57  ;;  %v13474_v40 = vpop.f32.mrb[195].mxu1 }
 0xa29   : > { %15153 = vst [vmem:[%s22568_s30 + $0x20] sm:$0xff] %v15070_v24   ;;  %v13714_v38 = vadd.f32 %v22554_v25, %v13660_v31  ;;  %v23800_v31 = vld [vmem:[#allocation65_spill] sm:$0xff] }
 0xa2a   : > { %v13717_v44 = vadd.f32 %v22554_v25, %v13663_v61  ;;  %v13763_v13 = vmax.f32 %v13716_v54, 0.0 }
 0xa2b   : > { %v13761_v53 = vmax.f32 %v13714_v38, 0.0  ;;  %v23801_v38 = vld [vmem:[#allocation64_spill] sm:$0xff] }
 0xa2c   : > { %v13764_v39 = vmax.f32 %v13717_v44, 0.0 }
 0xa2d   : > { %v15075_v48 = vpack.c.bf16 %v13761_v53, %v13760_v59  ;;  %v16003_v58 = vpop.f32.mrb[196].mxu1 }
 0xa2e   : > { %v15080_v30 = vpack.c.bf16 %v13764_v39, %v13763_v13  ;;  %v13666_v49 = vadd.f32 %v16003_v58, %v23792_v12  ;;  %v13487_v37 = vpop.f32.mrb[197].mxu1 }
 0xa2f   : > { %15154 = vst [vmem:[%s22568_s30 + $0x28] sm:$0xff] %v15075_v48   ;;  %v16004_v10 = vpop.f32.mrb[198].mxu1  ;;  %v23803_v37 = vld [vmem:[#allocation15_spill] sm:$0xff] }
 0xa30   : > { %15155 = vst [vmem:[%s22568_s30 + $0x30] sm:$0xff] %v15080_v30   ;;  %v13490_v22 = vpop.f32.mrb[199].mxu1  ;;  %v13720_v33 = vadd.f32 %v22554_v25, %v13666_v49  ;;  %v23802_v30 = vld [vmem:[#allocation87_spill] sm:$0xff] }
 0xa31   : > { %v13665_v46 = vadd.f32 %v13490_v22, %v23793_v41  ;;  %v23804_v41 = vld [vmem:[#allocation14_spill] sm:$0xff] }
 0xa32   : > { %v13767_v55 = vmax.f32 %v13720_v33, 0.0 }
 0xa33   : > { %v13719_v50 = vadd.f32 %v22554_v25, %v13665_v46 }
 0xa35   : > { %v13766_v60 = vmax.f32 %v13719_v50, 0.0  ;;  %v16007_v29 = vpop.f32.mrb[200].mxu1 }
 0xa36   : > { %v13503_v6 = vpop.f32.mrb[201].mxu1 }
 0xa37   : > { %v15085_v63 = vpack.c.bf16 %v13767_v55, %v13766_v60  ;;  %v13668_v4 = vadd.f32 %v23794_v32, %v13503_v6  ;;  %v16008_v45 = vpop.f32.mrb[202].mxu1  ;;  %v23805_v6 = vld [vmem:[#allocation82_spill] sm:$0xff] }
 0xa38   : > { %v13671_v18 = vadd.f32 %v16008_v45, %v23795_v19  ;;  %v13506_v52 = vpop.f32.mrb[203].mxu1  ;;  %v23806_v19 = vld [vmem:[#allocation16_spill] sm:$0xff] }
 0xa39   : > { %15156 = vst [vmem:[%s22568_s30 + $0x38] sm:$0xff] %v15085_v63   ;;  %v13722_v34 = vadd.f32 %v22554_v25, %v13668_v4  ;;  %v13669_v35 = vadd.f32 %v23796_v15, %v13506_v52  ;;  %v23807_v15 = vld [vmem:[#allocation50_spill] sm:$0xff] }
 0xa3a   : > { %v13725_v42 = vadd.f32 %v22554_v25, %v13671_v18 }
 0xa3b   : > { %v13723_v47 = vadd.f32 %v22554_v25, %v13669_v35  ;;  %v13769_v62 = vmax.f32 %v13722_v34, 0.0 }
 0xa3c   : > { %v13772_v51 = vmax.f32 %v13725_v42, 0.0 }
 0xa3d   : > { %v13770_v21 = vmax.f32 %v13723_v47, 0.0  ;;  %v16011_v9 = vpop.f32.mrb[204].mxu1 }
 0xa3e   : > { %v13674_v16 = vadd.f32 %v23797_v0, %v16011_v9  ;;  %v13519_v43 = vpop.f32.mrb[205].mxu1 }
 0xa3f   : > { %v15090_v3 = vpack.c.bf16 %v13770_v21, %v13769_v62  ;;  %v13672_v56 = vadd.f32 %v13519_v43, %v23798_v2  ;;  %v16012_v36 = vpop.f32.mrb[206].mxu1 }
 0xa40   : > { %v13728_v11 = vadd.f32 %v22554_v25, %v13674_v16  ;;  %v13675_v20 = vadd.f32 %v23799_v26, %v16012_v36  ;;  %v13522_v27 = vpop.f32.mrb[207].mxu1 }
 0xa41   : > { %15157 = vst [vmem:[%s22568_s30 + $0x40] sm:$0xff] %v15090_v3   ;;  %v13726_v14 = vadd.f32 %v22554_v25, %v13672_v56  ;;  %v23808_v56 = vld [vmem:[#allocation57_spill] sm:$0xff] }
 0xa42   : > { %v13729_v1 = vadd.f32 %v22554_v25, %v13675_v20  ;;  %v13775_v8 = vmax.f32 %v13728_v11, 0.0 }
 0xa43   : > { %v13773_v7 = vmax.f32 %v13726_v14, 0.0  ;;  %v23809_v14 = vld [vmem:[#allocation58_spill] sm:$0xff] }
 0xa44   : > { %v13776_v5 = vmax.f32 %v13729_v1, 0.0 }
 0xa45   : > { %v15095_v23 = vpack.c.bf16 %v13773_v7, %v13772_v51  ;;  %v16015_v24 = vpop.f32.mrb[208].mxu1 }
 0xa46   : > { %v15100_v17 = vpack.c.bf16 %v13776_v5, %v13775_v8  ;;  %v13678_v57 = vadd.f32 %v16015_v24, %v23800_v31  ;;  %v13535_v54 = vpop.f32.mrb[209].mxu1 }
 0xa47   : > { %15158 = vst [vmem:[%s22568_s30 + $0x48] sm:$0xff] %v15095_v23   ;;  %v16016_v28 = vpop.f32.mrb[210].mxu1 }
 0xa48   : > { %15159 = vst [vmem:[%s22568_s30 + $0x50] sm:$0xff] %v15100_v17   ;;  %v13538_v61 = vpop.f32.mrb[211].mxu1  ;;  %v13732_v40 = vadd.f32 %v22554_v25, %v13678_v57 }
 0xa49   : > { %v13677_v44 = vadd.f32 %v13538_v61, %v23801_v38 }
 0xa4a   : > { %v13779_v53 = vmax.f32 %v13732_v40, 0.0 }
 0xa4b   : > { %v13731_v59 = vadd.f32 %v22554_v25, %v13677_v44 }
 0xa4d   : > { %v13778_v13 = vmax.f32 %v13731_v59, 0.0  ;;  %v16019_v39 = vpop.f32.mrb[212].mxu1 }
 0xa4e   : > { %v13551_v48 = vpop.f32.mrb[213].mxu1 }
 0xa4f   : > { %v15105_v58 = vpack.c.bf16 %v13779_v53, %v13778_v13  ;;  %v13680_v12 = vadd.f32 %v23802_v30, %v13551_v48  ;;  %v16020_v49 = vpop.f32.mrb[214].mxu1 }
 0xa50   : > { %v13683_v10 = vadd.f32 %v16020_v49, %v23803_v37  ;;  %v13554_v22 = vpop.f32.mrb[215].mxu1 }
 0xa51   : > { %15160 = vst [vmem:[%s22568_s30 + $0x58] sm:$0xff] %v15105_v58   ;;  %v13734_v33 = vadd.f32 %v22554_v25, %v13680_v12  ;;  %v13681_v46 = vadd.f32 %v23804_v41, %v13554_v22 }
 0xa52   : > { %v13737_v4 = vadd.f32 %v22554_v25, %v13683_v10 }
 0xa53   : > { %v13735_v50 = vadd.f32 %v22554_v25, %v13681_v46  ;;  %v13781_v55 = vmax.f32 %v13734_v33, 0.0 }
 0xa54   : > { %v13784_v9 = vmax.f32 %v13737_v4, 0.0 }
 0xa55   : > { %v13782_v60 = vmax.f32 %v13735_v50, 0.0  ;;  %v16023_v29 = vpop.f32.mrb[216].mxu1 }
 0xa56   : > { %v13686_v63 = vadd.f32 %v23805_v6, %v16023_v29  ;;  %v13567_v32 = vpop.f32.mrb[217].mxu1 }
 0xa57   : > { %v15110_v45 = vpack.c.bf16 %v13782_v60, %v13781_v55  ;;  %v13684_v18 = vadd.f32 %v13567_v32, %v23806_v19  ;;  %v16024_v52 = vpop.f32.mrb[218].mxu1 }
 0xa58   : > { %v13740_v34 = vadd.f32 %v22554_v25, %v13686_v63  ;;  %v13687_v35 = vadd.f32 %v23807_v15, %v16024_v52  ;;  %v13570_v47 = vpop.f32.mrb[219].mxu1 }
 0xa59   : > { %15161 = vst [vmem:[%s22568_s30 + $0x60] sm:$0xff] %v15110_v45   ;;  %v13738_v62 = vadd.f32 %v22554_v25, %v13684_v18 }
 0xa5a   : > { %v13741_v21 = vadd.f32 %v22554_v25, %v13687_v35  ;;  %v13787_v16 = vmax.f32 %v13740_v34, 0.0 }
 0xa5b   : > { %v13785_v0 = vmax.f32 %v13738_v62, 0.0 }
 0xa5c   : > { %v13788_v43 = vmax.f32 %v13741_v21, 0.0 }
 0xa5d   : > { %v15115_v42 = vpack.c.bf16 %v13785_v0, %v13784_v9  ;;  %v16027_v3 = vpop.f32.mrb[220].mxu1 }
 0xa5e   : > { %v15120_v2 = vpack.c.bf16 %v13788_v43, %v13787_v16  ;;  %v13690_v36 = vadd.f32 %v16027_v3, %v23808_v56  ;;  %v13583_v11 = vpop.f32.mrb[221].mxu1 }
 0xa5f   : > { %15162 = vst [vmem:[%s22568_s30 + $0x68] sm:$0xff] %v15115_v42   ;;  %v16028_v26 = vpop.f32.mrb[222].mxu1 }
 0xa60   : > { %15163 = vst [vmem:[%s22568_s30 + $0x70] sm:$0xff] %v15120_v2   ;;  %v13586_v20 = vpop.f32.mrb[223].mxu1  ;;  %v13744_v27 = vadd.f32 %v22554_v25, %v13690_v36 }
 0xa61   : > { %v13689_v1 = vadd.f32 %v13586_v20, %v23809_v14 }
 0xa62   : > { %v13791_v7 = vmax.f32 %v13744_v27, 0.0 }
 0xa63   : > { %v13743_v51 = vadd.f32 %v22554_v25, %v13689_v1 }
 0xa65   : > { %v13790_v8 = vmax.f32 %v13743_v51, 0.0 }
 0xa67   : > { %v15125_v5 = vpack.c.bf16 %v13791_v7, %v13790_v8 }
 0xa69   : > { %15164 = vst [vmem:[%s22568_s30 + $0x78] sm:$0xff] %v15125_v5  }
 0xa6a   : > { %17803 = shalt.err (!%p17800_p2)
}
 0xa6b   : > { %s17804_s13 = scalar_lea.hbm %s22644_s8, 2048  ;;  %s17808_s15 = scalar_lea.hbm %s22696_s5, 4096 }
 0xa6c   : > { %p17805_p13 = scmp.ne.s32.totalorder %s22644_s8, %s17804_s13  ;;  %p17809_p4 = scmp.lt.u32.totalorder %s22644_s8, %s22696_s5 }
 0xa6d   : > { %p17810_p7 = scmp.lt.u32.totalorder %s17808_s15, %s17804_s13  ;;  %p17812_p11 = scmp.lt.u32.totalorder %s17804_s13, %s22644_s8 }
 0xa6e   : > { %p17806_p6 = pnand %p17805_p13, %p23810_p0 }
 0xa6f   : > { %p17811_p8 = por %p17810_p7, %p17809_p4 }
 0xa70   : > { %p17807_p10 = pneg %p17806_p6 }
 0xa71   : > { %p17813_p1 = por %p17812_p11, %p17811_p8 }
 0xa73   : > { %p17814_p3 = pnand %p17813_p1, %p17807_p10 }
 0xa75   : > { %17817 = shalt.err (!%p17814_p3)
}
 0xa76   : > { %s17871_s11 = smov 64   ;;  %s17872_s7 = smov 4  }
 0xa77   : > { %16789 = dma.vmem_to_hbm [thread:$0]  (%p23810_p0), %s22646_s23, 2048, %s22644_s8, %s13969_s14, %s17871_s11, %s17871_s11, %s17872_s7  }
 0xa78 PF: > { %s13997_s6 = sand.u32 1, %s17848_s18   ;;  %p23811_p5 = scmp.ne.s32.totalorder %s22816_s25, 0 }
 0xa79   : > { %p23812_p9 = scmp.ge.s32.totalorder %s17860_s21, 2  ;;  %s13998_s24 = scalar_lea.sflag [#allocation5], %s13997_s6 }
 0xa7b   : > { %p16803_p12 = pnand %p23812_p9, %p23811_p5 }
 0xa7d   : > { %17843 = dma.done.wait (!%p16803_p12), %s13998_s24, 2048  }
 0xa7e   : > { %17845 = vsyncadd (!%p16803_p12), %s13998_s24, 4294965248  ;;  %p19_p2 = scmp.ge.s32.totalorder %s18016_s16, 4   ;;  %s23813_s18 = smov %s17852_s19 }
 0xa7f   : > { %s23814_s19 = smov %s17856_s20  ;;  %s23815_s20 = smov %s18025_s27 }
 0xa80   : > { %s23816_s21 = smov %s18016_s16  ;;  %21 = sbr.rel (!%p19_p2) target bundleno = 6 (0x6), region = 108 }
 0xa87   :  { %14003 = vsyncpa [#allocation4], 1 }
 0xa88   :  { %14005 = vsyncpa [#allocation4 + $0x1], 1 }
 0xa89   :  { %14006 = vsyncpa [#allocation7], 1 }
 0xa8a   :  { %14007 = vsyncpa [#allocation5], 1 }
 0xa8b   :  { %14009 = vsyncpa [#allocation5 + $0x1], 1 }

</bundles_post_ra>
